<compile_context>
chip_gen: v7x
topology: tpu7x:2x2x1
jax: 0.10.0
libtpu: 0.0.40
codegen_flags: <defaults>
</compile_context>

<pallas_src>
import jax
import jax.numpy as jnp
from jax.experimental import pallas as pl
from jax.experimental.pallas import tpu as pltpu


def fitfuel_kernel(x_ref, w1_ref, w2_ref, fc1w_ref, fc2w_ref, fc3w_ref,
                   bias_ref, out_ref):
    x = x_ref[...]                                   # (N, H, W, Cin) f32, NHWC
    N, H, W, Cin = x.shape
    C1 = w1_ref.shape[-1]                            # 32
    C2 = w2_ref.shape[-1]                            # 16
    H1, W1 = H - 2, W - 2
    H2, W2 = H1 - 2, W1 - 2
    Hp, Wp = H2 - 2, W2 - 2

    # Packed biases (one DMA): row 0=conv1, 1=conv2, 2=fc1, 3=fc2, 4=fc3(pad128)
    b1   = bias_ref[0:1, 0:C1]                       # (1, 32)
    b2   = bias_ref[1:2, 0:C2]                       # (1, 16)
    fc1b = bias_ref[2:3, 0:fc1w_ref.shape[-1]]       # (1, 32)
    fc2b = bias_ref[3:4, 0:fc2w_ref.shape[-1]]       # (1, 32)
    fc3b = bias_ref[4:5, :]                          # (1, 128), zero padded

    # ---- Conv2d(Cin -> 32, k=3, valid) + ReLU : im2col -> one matmul ----
    p1 = jnp.concatenate(
        [x[:, kh:kh + H1, kw:kw + W1, :] for kh in range(3) for kw in range(3)],
        axis=-1)                                     # (N, H1, W1, 9*Cin), (kh,kw,c)
    p1 = p1.reshape(N * H1 * W1, 9 * Cin)            # lane dim unchanged (safe)
    y1 = jnp.maximum(
        jnp.dot(p1, w1_ref[...], preferred_element_type=jnp.float32) + b1, 0.0)
    y1 = y1.reshape(N, H1, W1, C1)                   # C1=32 stays in lanes

    # ---- Conv2d(32 -> 16, k=3, valid) + ReLU : im2col -> one matmul ----
    p2 = jnp.concatenate(
        [y1[:, kh:kh + H2, kw:kw + W2, :] for kh in range(3) for kw in range(3)],
        axis=-1)                                     # (N, H2, W2, 288), (kh,kw,c)
    p2 = p2.reshape(N * H2 * W2, 9 * C1)
    y2 = jnp.maximum(
        jnp.dot(p2, w2_ref[...], preferred_element_type=jnp.float32) + b2, 0.0)
    y2 = y2.reshape(N, H2, W2, C2)

    # ---- MaxPool2d(k=3, s=1, valid), separable: horizontal then vertical ----
    hm = jnp.maximum(jnp.maximum(y2[:, :, 0:Wp, :], y2[:, :, 1:Wp + 1, :]),
                     y2[:, :, 2:Wp + 2, :])          # (N, H2, Wp, C2)
    mp = jnp.maximum(jnp.maximum(hm[:, 0:Hp, :, :], hm[:, 1:Hp + 1, :, :]),
                     hm[:, 2:Hp + 2, :, :])          # (N, Hp, Wp, C2)

    # ---- Flatten to a lane-dense (N, Hp*Wp*C2) operand in (h, w, c) order ----
    wcat = jnp.concatenate([mp[:, :, w, :] for w in range(Wp)],
                           axis=-1)                  # (N, Hp, Wp*C2) = (N, 8, 128)
    flat = jnp.concatenate([wcat[:, h, :] for h in range(Hp)],
                           axis=-1)                  # (N, 1024), order (h, w, c)

    # ---- Linear(1024 -> 32) + ReLU : single fused matmul ----
    z1 = jnp.maximum(
        jnp.dot(flat, fc1w_ref[...], preferred_element_type=jnp.float32) + fc1b,
        0.0)
    # ---- Linear(32 -> 32) + ReLU ----
    z2 = jnp.maximum(
        jnp.dot(z1, fc2w_ref[...], preferred_element_type=jnp.float32) + fc2b,
        0.0)
    # ---- Linear(32 -> n_classes), lane-padded to 128 for unmasked stores ----
    out_ref[...] = (jnp.dot(z2, fc3w_ref[...],
                            preferred_element_type=jnp.float32) + fc3b)


def fitfuel_forward(x_nchw, params, n_classes):
    """x_nchw: (N, 3, H, W) float32; params: kernel-layout parameter tuple."""
    x_nhwc = jnp.transpose(x_nchw, (0, 2, 3, 1))     # NCHW -> NHWC (layout glue)
    args = (x_nhwc,) + tuple(params)
    vmem = pl.BlockSpec(memory_space=pltpu.MemorySpace.VMEM)
    out_pad = pl.pallas_call(
        fitfuel_kernel,
        out_shape=jax.ShapeDtypeStruct((x_nchw.shape[0], 128), jnp.float32),
        in_specs=[vmem] * len(args),
        out_specs=vmem,
    )(*args)
    return out_pad[:, :n_classes]                    # drop the lane padding


def init_params(key, cin=3, H=14, W=14, n_classes=10):
    """Deterministic synthetic parameters in PyTorch layouts + kernel layouts."""
    H1, W1 = H - 2, W - 2
    H2, W2 = H1 - 2, W1 - 2
    Hp, Wp = H2 - 2, W2 - 2
    flat = 16 * Hp * Wp

    ks = jax.random.split(key, 10)

    def u(k, shape, s):
        return jax.random.uniform(k, shape, jnp.float32, -s, s)

    # PyTorch-native layouts
    w1_t = u(ks[0], (32, cin, 3, 3), 0.2)
    b1_t = u(ks[1], (32,), 0.2)
    w2_t = u(ks[2], (16, 32, 3, 3), 0.1)
    b2_t = u(ks[3], (16,), 0.1)
    fc1_t = u(ks[4], (32, flat), 0.03)
    fc1b_t = u(ks[5], (32,), 0.03)
    fc2_t = u(ks[6], (32, 32), 0.1)
    fc2b_t = u(ks[7], (32,), 0.1)
    fc3_t = u(ks[8], (n_classes, 32), 0.1)
    fc3b_t = u(ks[9], (n_classes,), 0.1)

    # Kernel layouts (im2col / fused-fc1 / lane-padded), matching kernel math:
    #   conv weights: (Cout, Cin, kh, kw) -> (kh, kw, Cin, Cout) -> (9*Cin, Cout)
    w1 = jnp.transpose(w1_t, (2, 3, 1, 0)).reshape(9 * cin, 32)
    w2 = jnp.transpose(w2_t, (2, 3, 1, 0)).reshape(9 * 32, 16)
    #   fc1: torch flatten order is (c, h, w); kernel flatten order is (h, w, c)
    fc1 = jnp.transpose(fc1_t.reshape(32, 16, Hp, Wp),
                        (2, 3, 1, 0)).reshape(flat, 32)
    fc2 = fc2_t.T                                               # (32, 32)
    fc3 = jnp.zeros((32, 128), jnp.float32).at[:, :n_classes].set(fc3_t.T)

    # Pack all biases into a single (8, 128) buffer (one DMA descriptor).
    biases = jnp.zeros((8, 128), jnp.float32)
    biases = biases.at[0, :32].set(b1_t)
    biases = biases.at[1, :16].set(b2_t)
    biases = biases.at[2, :32].set(fc1b_t)
    biases = biases.at[3, :32].set(fc2b_t)
    biases = biases.at[4, :n_classes].set(fc3b_t)

    kernel_params = (w1, w2, fc1, fc2, fc3, biases)
    torch_params = (w1_t, b1_t, w2_t, b2_t, fc1_t, fc1b_t,
                    fc2_t, fc2b_t, fc3_t, fc3b_t)
    return kernel_params, torch_params


def reference_forward(x_nchw, tparams):
    """Pure-JAX reference with PyTorch semantics (NCHW, NCHW flatten)."""
    w1, b1, w2, b2, fc1, fc1b, fc2, fc2b, fc3, fc3b = tparams
    y = jax.lax.conv_general_dilated(
        x_nchw, w1, (1, 1), 'VALID',
        dimension_numbers=('NCHW', 'OIHW', 'NCHW'))
    y = jnp.maximum(y + b1[None, :, None, None], 0.0)
    y = jax.lax.conv_general_dilated(
        y, w2, (1, 1), 'VALID',
        dimension_numbers=('NCHW', 'OIHW', 'NCHW'))
    y = jnp.maximum(y + b2[None, :, None, None], 0.0)
    y = jax.lax.reduce_window(y, -jnp.inf, jax.lax.max,
                              (1, 1, 3, 3), (1, 1, 1, 1), 'VALID')
    y = y.reshape(y.shape[0], -1)                 # torch.flatten(x, 1)
    y = jnp.maximum(y @ fc1.T + fc1b, 0.0)
    y = jnp.maximum(y @ fc2.T + fc2b, 0.0)
    return y @ fc3.T + fc3b


if __name__ == "__main__":
    key = jax.random.PRNGKey(0)
    kx, kp = jax.random.split(key)

    # Small input consistent with the module's op sequence (batch=2, 3x14x14).
    x = jax.random.normal(kx, (2, 3, 14, 14), jnp.float32)
    params, tparams = init_params(kp, cin=3, H=14, W=14, n_classes=10)

    out = fitfuel_forward(x, params, n_classes=10)
    out = jax.block_until_ready(out)

    ref = reference_forward(x, tparams)
    assert out.shape == (2, 10), out.shape
    assert jnp.allclose(out, ref, atol=1e-3, rtol=1e-3), \
        float(jnp.max(jnp.abs(out - ref)))

    print("KERNEL_OK")
</pallas_src>

<mosaic_0001>
module attributes {stable_mosaic.version = 11 : i64} {
  func.func @fitfuel_kernel(%arg0: memref<2x14x14x3xf32, #tpu.memory_space<vmem>>, %arg1: memref<27x32xf32, #tpu.memory_space<vmem>>, %arg2: memref<288x16xf32, #tpu.memory_space<vmem>>, %arg3: memref<1024x32xf32, #tpu.memory_space<vmem>>, %arg4: memref<32x32xf32, #tpu.memory_space<vmem>>, %arg5: memref<32x128xf32, #tpu.memory_space<vmem>>, %arg6: memref<8x128xf32, #tpu.memory_space<vmem>>, %arg7: memref<2x128xf32, #tpu.memory_space<vmem>>) attributes {dimension_semantics = [], scalar_prefetch = 0 : i64, scratch_operands = 0 : i64, tpu.core_type = #tpu.core_type<tc>} {
    %c0 = arith.constant 0 : index
    %c0_0 = arith.constant 0 : index
    %c0_1 = arith.constant 0 : index
    %c0_2 = arith.constant 0 : index
    %0 = vector.load %arg0[%c0, %c0_0, %c0_1, %c0_2] : memref<2x14x14x3xf32, #tpu.memory_space<vmem>>, vector<2x14x14x3xf32>
    %c0_3 = arith.constant 0 : index
    %c0_4 = arith.constant 0 : index
    %1 = vector.load %arg6[%c0_3, %c0_4] : memref<8x128xf32, #tpu.memory_space<vmem>>, vector<1x32xf32>
    %c1 = arith.constant 1 : index
    %c0_5 = arith.constant 0 : index
    %2 = vector.load %arg6[%c1, %c0_5] : memref<8x128xf32, #tpu.memory_space<vmem>>, vector<1x16xf32>
    %c2 = arith.constant 2 : index
    %c0_6 = arith.constant 0 : index
    %3 = vector.load %arg6[%c2, %c0_6] : memref<8x128xf32, #tpu.memory_space<vmem>>, vector<1x32xf32>
    %c3 = arith.constant 3 : index
    %c0_7 = arith.constant 0 : index
    %4 = vector.load %arg6[%c3, %c0_7] : memref<8x128xf32, #tpu.memory_space<vmem>>, vector<1x32xf32>
    %c4 = arith.constant 4 : index
    %c0_8 = arith.constant 0 : index
    %5 = vector.load %arg6[%c4, %c0_8] : memref<8x128xf32, #tpu.memory_space<vmem>>, vector<1x128xf32>
    %6 = vector.extract_strided_slice %0 {offsets = [0, 0, 0, 0], sizes = [2, 12, 12, 3], strides = [1, 1, 1, 1]} : vector<2x14x14x3xf32> to vector<2x12x12x3xf32>
    %7 = vector.extract_strided_slice %0 {offsets = [0, 0, 1, 0], sizes = [2, 12, 12, 3], strides = [1, 1, 1, 1]} : vector<2x14x14x3xf32> to vector<2x12x12x3xf32>
    %8 = vector.extract_strided_slice %0 {offsets = [0, 0, 2, 0], sizes = [2, 12, 12, 3], strides = [1, 1, 1, 1]} : vector<2x14x14x3xf32> to vector<2x12x12x3xf32>
    %9 = vector.extract_strided_slice %0 {offsets = [0, 1, 0, 0], sizes = [2, 12, 12, 3], strides = [1, 1, 1, 1]} : vector<2x14x14x3xf32> to vector<2x12x12x3xf32>
    %10 = vector.extract_strided_slice %0 {offsets = [0, 1, 1, 0], sizes = [2, 12, 12, 3], strides = [1, 1, 1, 1]} : vector<2x14x14x3xf32> to vector<2x12x12x3xf32>
    %11 = vector.extract_strided_slice %0 {offsets = [0, 1, 2, 0], sizes = [2, 12, 12, 3], strides = [1, 1, 1, 1]} : vector<2x14x14x3xf32> to vector<2x12x12x3xf32>
    %12 = vector.extract_strided_slice %0 {offsets = [0, 2, 0, 0], sizes = [2, 12, 12, 3], strides = [1, 1, 1, 1]} : vector<2x14x14x3xf32> to vector<2x12x12x3xf32>
    %13 = vector.extract_strided_slice %0 {offsets = [0, 2, 1, 0], sizes = [2, 12, 12, 3], strides = [1, 1, 1, 1]} : vector<2x14x14x3xf32> to vector<2x12x12x3xf32>
    %14 = vector.extract_strided_slice %0 {offsets = [0, 2, 2, 0], sizes = [2, 12, 12, 3], strides = [1, 1, 1, 1]} : vector<2x14x14x3xf32> to vector<2x12x12x3xf32>
    %15 = tpu.concatenate %6, %7, %8, %9, %10, %11, %12, %13, %14 in 3 : vector<2x12x12x3xf32>, vector<2x12x12x3xf32>, vector<2x12x12x3xf32>, vector<2x12x12x3xf32>, vector<2x12x12x3xf32>, vector<2x12x12x3xf32>, vector<2x12x12x3xf32>, vector<2x12x12x3xf32>, vector<2x12x12x3xf32> -> vector<2x12x12x27xf32>
    %16 = vector.shape_cast %15 : vector<2x12x12x27xf32> to vector<288x27xf32>
    %c0_9 = arith.constant 0 : index
    %c0_10 = arith.constant 0 : index
    %17 = vector.load %arg1[%c0_9, %c0_10] : memref<27x32xf32, #tpu.memory_space<vmem>>, vector<27x32xf32>
    %cst = arith.constant dense<0.000000e+00> : vector<288x32xf32>
    %18 = tpu.matmul %16, %17, %cst {dimension_numbers = #tpu.dot_dimension_numbers<[1], [0], [0], [1], [0, 0, 1, 1], [], []>} : vector<288x27xf32>, vector<27x32xf32>, vector<288x32xf32> -> vector<288x32xf32>
    %19 = vector.broadcast %1 : vector<1x32xf32> to vector<288x32xf32>
    %20 = arith.addf %18, %19 : vector<288x32xf32>
    %cst_11 = arith.constant 0.000000e+00 : f32
    %21 = vector.broadcast %cst_11 : f32 to vector<288x32xf32>
    %22 = arith.maximumf %20, %21 : vector<288x32xf32>
    %23 = vector.shape_cast %22 : vector<288x32xf32> to vector<2x12x12x32xf32>
    %24 = vector.extract_strided_slice %23 {offsets = [0, 0, 0, 0], sizes = [2, 10, 10, 32], strides = [1, 1, 1, 1]} : vector<2x12x12x32xf32> to vector<2x10x10x32xf32>
    %25 = vector.extract_strided_slice %23 {offsets = [0, 0, 1, 0], sizes = [2, 10, 10, 32], strides = [1, 1, 1, 1]} : vector<2x12x12x32xf32> to vector<2x10x10x32xf32>
    %26 = vector.extract_strided_slice %23 {offsets = [0, 0, 2, 0], sizes = [2, 10, 10, 32], strides = [1, 1, 1, 1]} : vector<2x12x12x32xf32> to vector<2x10x10x32xf32>
    %27 = vector.extract_strided_slice %23 {offsets = [0, 1, 0, 0], sizes = [2, 10, 10, 32], strides = [1, 1, 1, 1]} : vector<2x12x12x32xf32> to vector<2x10x10x32xf32>
    %28 = vector.extract_strided_slice %23 {offsets = [0, 1, 1, 0], sizes = [2, 10, 10, 32], strides = [1, 1, 1, 1]} : vector<2x12x12x32xf32> to vector<2x10x10x32xf32>
    %29 = vector.extract_strided_slice %23 {offsets = [0, 1, 2, 0], sizes = [2, 10, 10, 32], strides = [1, 1, 1, 1]} : vector<2x12x12x32xf32> to vector<2x10x10x32xf32>
    %30 = vector.extract_strided_slice %23 {offsets = [0, 2, 0, 0], sizes = [2, 10, 10, 32], strides = [1, 1, 1, 1]} : vector<2x12x12x32xf32> to vector<2x10x10x32xf32>
    %31 = vector.extract_strided_slice %23 {offsets = [0, 2, 1, 0], sizes = [2, 10, 10, 32], strides = [1, 1, 1, 1]} : vector<2x12x12x32xf32> to vector<2x10x10x32xf32>
    %32 = vector.extract_strided_slice %23 {offsets = [0, 2, 2, 0], sizes = [2, 10, 10, 32], strides = [1, 1, 1, 1]} : vector<2x12x12x32xf32> to vector<2x10x10x32xf32>
    %33 = tpu.concatenate %24, %25, %26, %27, %28, %29, %30, %31, %32 in 3 : vector<2x10x10x32xf32>, vector<2x10x10x32xf32>, vector<2x10x10x32xf32>, vector<2x10x10x32xf32>, vector<2x10x10x32xf32>, vector<2x10x10x32xf32>, vector<2x10x10x32xf32>, vector<2x10x10x32xf32>, vector<2x10x10x32xf32> -> vector<2x10x10x288xf32>
    %34 = vector.shape_cast %33 : vector<2x10x10x288xf32> to vector<200x288xf32>
    %c0_12 = arith.constant 0 : index
    %c0_13 = arith.constant 0 : index
    %35 = vector.load %arg2[%c0_12, %c0_13] : memref<288x16xf32, #tpu.memory_space<vmem>>, vector<288x16xf32>
    %cst_14 = arith.constant dense<0.000000e+00> : vector<200x16xf32>
    %36 = tpu.matmul %34, %35, %cst_14 {dimension_numbers = #tpu.dot_dimension_numbers<[1], [0], [0], [1], [0, 0, 1, 1], [], []>} : vector<200x288xf32>, vector<288x16xf32>, vector<200x16xf32> -> vector<200x16xf32>
    %37 = vector.broadcast %2 : vector<1x16xf32> to vector<200x16xf32>
    %38 = arith.addf %36, %37 : vector<200x16xf32>
    %cst_15 = arith.constant 0.000000e+00 : f32
    %39 = vector.broadcast %cst_15 : f32 to vector<200x16xf32>
    %40 = arith.maximumf %38, %39 : vector<200x16xf32>
    %41 = vector.shape_cast %40 : vector<200x16xf32> to vector<2x10x10x16xf32>
    %42 = vector.extract_strided_slice %41 {offsets = [0, 0, 0, 0], sizes = [2, 10, 8, 16], strides = [1, 1, 1, 1]} : vector<2x10x10x16xf32> to vector<2x10x8x16xf32>
    %43 = vector.extract_strided_slice %41 {offsets = [0, 0, 1, 0], sizes = [2, 10, 8, 16], strides = [1, 1, 1, 1]} : vector<2x10x10x16xf32> to vector<2x10x8x16xf32>
    %44 = arith.maximumf %42, %43 : vector<2x10x8x16xf32>
    %45 = vector.extract_strided_slice %41 {offsets = [0, 0, 2, 0], sizes = [2, 10, 8, 16], strides = [1, 1, 1, 1]} : vector<2x10x10x16xf32> to vector<2x10x8x16xf32>
    %46 = arith.maximumf %44, %45 : vector<2x10x8x16xf32>
    %47 = vector.extract_strided_slice %46 {offsets = [0, 0, 0, 0], sizes = [2, 8, 8, 16], strides = [1, 1, 1, 1]} : vector<2x10x8x16xf32> to vector<2x8x8x16xf32>
    %48 = vector.extract_strided_slice %46 {offsets = [0, 1, 0, 0], sizes = [2, 8, 8, 16], strides = [1, 1, 1, 1]} : vector<2x10x8x16xf32> to vector<2x8x8x16xf32>
    %49 = arith.maximumf %47, %48 : vector<2x8x8x16xf32>
    %50 = vector.extract_strided_slice %46 {offsets = [0, 2, 0, 0], sizes = [2, 8, 8, 16], strides = [1, 1, 1, 1]} : vector<2x10x8x16xf32> to vector<2x8x8x16xf32>
    %51 = arith.maximumf %49, %50 : vector<2x8x8x16xf32>
    %52 = vector.extract_strided_slice %51 {offsets = [0, 0, 0, 0], sizes = [2, 8, 1, 16], strides = [1, 1, 1, 1]} : vector<2x8x8x16xf32> to vector<2x8x1x16xf32>
    %53 = vector.shape_cast %52 : vector<2x8x1x16xf32> to vector<2x8x16xf32>
    %54 = vector.extract_strided_slice %51 {offsets = [0, 0, 1, 0], sizes = [2, 8, 1, 16], strides = [1, 1, 1, 1]} : vector<2x8x8x16xf32> to vector<2x8x1x16xf32>
    %55 = vector.shape_cast %54 : vector<2x8x1x16xf32> to vector<2x8x16xf32>
    %56 = vector.extract_strided_slice %51 {offsets = [0, 0, 2, 0], sizes = [2, 8, 1, 16], strides = [1, 1, 1, 1]} : vector<2x8x8x16xf32> to vector<2x8x1x16xf32>
    %57 = vector.shape_cast %56 : vector<2x8x1x16xf32> to vector<2x8x16xf32>
    %58 = vector.extract_strided_slice %51 {offsets = [0, 0, 3, 0], sizes = [2, 8, 1, 16], strides = [1, 1, 1, 1]} : vector<2x8x8x16xf32> to vector<2x8x1x16xf32>
    %59 = vector.shape_cast %58 : vector<2x8x1x16xf32> to vector<2x8x16xf32>
    %60 = vector.extract_strided_slice %51 {offsets = [0, 0, 4, 0], sizes = [2, 8, 1, 16], strides = [1, 1, 1, 1]} : vector<2x8x8x16xf32> to vector<2x8x1x16xf32>
    %61 = vector.shape_cast %60 : vector<2x8x1x16xf32> to vector<2x8x16xf32>
    %62 = vector.extract_strided_slice %51 {offsets = [0, 0, 5, 0], sizes = [2, 8, 1, 16], strides = [1, 1, 1, 1]} : vector<2x8x8x16xf32> to vector<2x8x1x16xf32>
    %63 = vector.shape_cast %62 : vector<2x8x1x16xf32> to vector<2x8x16xf32>
    %64 = vector.extract_strided_slice %51 {offsets = [0, 0, 6, 0], sizes = [2, 8, 1, 16], strides = [1, 1, 1, 1]} : vector<2x8x8x16xf32> to vector<2x8x1x16xf32>
    %65 = vector.shape_cast %64 : vector<2x8x1x16xf32> to vector<2x8x16xf32>
    %66 = vector.extract_strided_slice %51 {offsets = [0, 0, 7, 0], sizes = [2, 8, 1, 16], strides = [1, 1, 1, 1]} : vector<2x8x8x16xf32> to vector<2x8x1x16xf32>
    %67 = vector.shape_cast %66 : vector<2x8x1x16xf32> to vector<2x8x16xf32>
    %68 = tpu.concatenate %53, %55, %57, %59, %61, %63, %65, %67 in 2 : vector<2x8x16xf32>, vector<2x8x16xf32>, vector<2x8x16xf32>, vector<2x8x16xf32>, vector<2x8x16xf32>, vector<2x8x16xf32>, vector<2x8x16xf32>, vector<2x8x16xf32> -> vector<2x8x128xf32>
    %69 = vector.extract_strided_slice %68 {offsets = [0, 0, 0], sizes = [2, 1, 128], strides = [1, 1, 1]} : vector<2x8x128xf32> to vector<2x1x128xf32>
    %70 = vector.shape_cast %69 : vector<2x1x128xf32> to vector<2x128xf32>
    %71 = vector.extract_strided_slice %68 {offsets = [0, 1, 0], sizes = [2, 1, 128], strides = [1, 1, 1]} : vector<2x8x128xf32> to vector<2x1x128xf32>
    %72 = vector.shape_cast %71 : vector<2x1x128xf32> to vector<2x128xf32>
    %73 = vector.extract_strided_slice %68 {offsets = [0, 2, 0], sizes = [2, 1, 128], strides = [1, 1, 1]} : vector<2x8x128xf32> to vector<2x1x128xf32>
    %74 = vector.shape_cast %73 : vector<2x1x128xf32> to vector<2x128xf32>
    %75 = vector.extract_strided_slice %68 {offsets = [0, 3, 0], sizes = [2, 1, 128], strides = [1, 1, 1]} : vector<2x8x128xf32> to vector<2x1x128xf32>
    %76 = vector.shape_cast %75 : vector<2x1x128xf32> to vector<2x128xf32>
    %77 = vector.extract_strided_slice %68 {offsets = [0, 4, 0], sizes = [2, 1, 128], strides = [1, 1, 1]} : vector<2x8x128xf32> to vector<2x1x128xf32>
    %78 = vector.shape_cast %77 : vector<2x1x128xf32> to vector<2x128xf32>
    %79 = vector.extract_strided_slice %68 {offsets = [0, 5, 0], sizes = [2, 1, 128], strides = [1, 1, 1]} : vector<2x8x128xf32> to vector<2x1x128xf32>
    %80 = vector.shape_cast %79 : vector<2x1x128xf32> to vector<2x128xf32>
    %81 = vector.extract_strided_slice %68 {offsets = [0, 6, 0], sizes = [2, 1, 128], strides = [1, 1, 1]} : vector<2x8x128xf32> to vector<2x1x128xf32>
    %82 = vector.shape_cast %81 : vector<2x1x128xf32> to vector<2x128xf32>
    %83 = vector.extract_strided_slice %68 {offsets = [0, 7, 0], sizes = [2, 1, 128], strides = [1, 1, 1]} : vector<2x8x128xf32> to vector<2x1x128xf32>
    %84 = vector.shape_cast %83 : vector<2x1x128xf32> to vector<2x128xf32>
    %85 = tpu.concatenate %70, %72, %74, %76, %78, %80, %82, %84 in 1 : vector<2x128xf32>, vector<2x128xf32>, vector<2x128xf32>, vector<2x128xf32>, vector<2x128xf32>, vector<2x128xf32>, vector<2x128xf32>, vector<2x128xf32> -> vector<2x1024xf32>
    %c0_16 = arith.constant 0 : index
    %c0_17 = arith.constant 0 : index
    %86 = vector.load %arg3[%c0_16, %c0_17] : memref<1024x32xf32, #tpu.memory_space<vmem>>, vector<1024x32xf32>
    %cst_18 = arith.constant dense<0.000000e+00> : vector<2x32xf32>
    %87 = tpu.matmul %85, %86, %cst_18 {dimension_numbers = #tpu.dot_dimension_numbers<[1], [0], [0], [1], [0, 0, 1, 1], [], []>} : vector<2x1024xf32>, vector<1024x32xf32>, vector<2x32xf32> -> vector<2x32xf32>
    %88 = vector.broadcast %3 : vector<1x32xf32> to vector<2x32xf32>
    %89 = arith.addf %87, %88 : vector<2x32xf32>
    %cst_19 = arith.constant 0.000000e+00 : f32
    %90 = vector.broadcast %cst_19 : f32 to vector<2x32xf32>
    %91 = arith.maximumf %89, %90 : vector<2x32xf32>
    %c0_20 = arith.constant 0 : index
    %c0_21 = arith.constant 0 : index
    %92 = vector.load %arg4[%c0_20, %c0_21] : memref<32x32xf32, #tpu.memory_space<vmem>>, vector<32x32xf32>
    %cst_22 = arith.constant dense<0.000000e+00> : vector<2x32xf32>
    %93 = tpu.matmul %91, %92, %cst_22 {dimension_numbers = #tpu.dot_dimension_numbers<[1], [0], [0], [1], [0, 0, 1, 1], [], []>} : vector<2x32xf32>, vector<32x32xf32>, vector<2x32xf32> -> vector<2x32xf32>
    %94 = vector.broadcast %4 : vector<1x32xf32> to vector<2x32xf32>
    %95 = arith.addf %93, %94 : vector<2x32xf32>
    %cst_23 = arith.constant 0.000000e+00 : f32
    %96 = vector.broadcast %cst_23 : f32 to vector<2x32xf32>
    %97 = arith.maximumf %95, %96 : vector<2x32xf32>
    %c0_24 = arith.constant 0 : index
    %c0_25 = arith.constant 0 : index
    %98 = vector.load %arg5[%c0_24, %c0_25] : memref<32x128xf32, #tpu.memory_space<vmem>>, vector<32x128xf32>
    %cst_26 = arith.constant dense<0.000000e+00> : vector<2x128xf32>
    %99 = tpu.matmul %97, %98, %cst_26 {dimension_numbers = #tpu.dot_dimension_numbers<[1], [0], [0], [1], [0, 0, 1, 1], [], []>} : vector<2x32xf32>, vector<32x128xf32>, vector<2x128xf32> -> vector<2x128xf32>
    %100 = vector.broadcast %5 : vector<1x128xf32> to vector<2x128xf32>
    %101 = arith.addf %99, %100 : vector<2x128xf32>
    %c0_27 = arith.constant 0 : index
    %c0_28 = arith.constant 0 : index
    %102 = vector.load %arg7[%c0_27, %c0_28] : memref<2x128xf32, #tpu.memory_space<vmem>>, vector<2x128xf32>
    tpu.vector_store %arg7[%c0_27, %c0_28], %101 {strides = array<i32>} : memref<2x128xf32, #tpu.memory_space<vmem>>, vector<2x128xf32>,
    return
  }
}

</mosaic_0001>

<bundles_post_ra>
// kernel: tpu_custom_call.1
= control target key start
LH: loop header
LB: loop body
LE: loop exit
PB: predicated region body
PF: predicated region fallthrough
CT: control target
= control target key end

     0   :  { %vm136_vm0 = vcmask 1046528   ;;  %s9615_s30 = smov 9   ;;  %vm353_vm1 = vcmask 1045504   ;;  %s9616_s10 = smov 3   ;;  %s16162_s0 = inlined_call_operand.vmem [shape: f32[2,14,14,3], index: 0, kind: input, shape index: {}]   ;;  %s16163_s1 = inlined_call_operand.vmem [shape: f32[27,32], index: 1, kind: input, shape index: {}]   ;;  %s16164_s2 = inlined_call_operand.vmem [shape: f32[288,16], index: 2, kind: input, shape index: {}]   ;;  %s16165_s3 = inlined_call_operand.vmem [shape: f32[1024,32], index: 3, kind: input, shape index: {}]   ;;  %s16166_s4 = inlined_call_operand.vmem [shape: f32[32,32], index: 4, kind: input, shape index: {}]   ;;  %s16167_s5 = inlined_call_operand.vmem [shape: f32[32,128], index: 5, kind: input, shape index: {}]   ;;  %s16168_s6 = inlined_call_operand.vmem [shape: f32[8,128], index: 6, kind: input, shape index: {}]   ;;  %s16169_s7 = inlined_call_operand.hbm [shape: f32[2,128], index: 7, kind: output, shape index: {}]  }
   0x1   :  { %v9679_v0 = vld [vmem:[%s16162_s0 + $0x10] sm:$0xff]  ;;  %v9684_v1 = vld [vmem:[%s16162_s0] sm:$0xff]  ;;  %v9689_v2 = vld [vmem:[%s16162_s0 + $0x8] sm:$0x3f]  ;;  %s9617_s15 = smov 6  }
   0x2   :  { %574 = vrot.lane.b32.xlu1 %v9679_v0, %s9615_s30  ;;  %v137_v3 = vrot.slane %v9684_v1, 1  ;;  %v138_v4 = vrot.slane %v9689_v2, 1  ;;  %v354_v5 = vrot.slane %v9684_v1, 2  ;;  %v355_v6 = vrot.slane %v9689_v2, 2  ;;  %v9700_v7 = vld [vmem:[%s16162_s0 + $0x18] sm:$0x3f] }
   0x3   :  { %v140_v8 = vrot.slane %v9679_v0, 1  ;;  %v141_v10 = vrot.slane %v9700_v7, 1  ;;  %v357_v13 = vrot.slane %v9679_v0, 2  ;;  %v358_v14 = vrot.slane %v9700_v7, 2  ;;  %v9714_v15 = vld [vmem:[%s16162_s0 + $0x20] sm:$0xff] }
   0x4   :  { %v139_v9 = vsel %vm136_vm0, %v137_v3, %v138_v4  ;;  %v356_v11 = vsel %vm353_vm1, %v354_v5, %v355_v6  ;;  %v9719_v16 = vld [vmem:[%s16162_s0 + $0x28] sm:$0x3f] }
   0x5   :  { %209 = vrot.lane.b32.xlu0 %v139_v9, %s9616_s10  ;;  %v142_v12 = vsel %vm136_vm0, %v140_v8, %v141_v10 }
   0x6   :  { %211 = vrot.lane.b32.xlu1 %v138_v4, %s9616_s10 }
   0x9   :  { %426 = vrot.lane.b32.xlu0 %v356_v11, %s9617_s15 }
   0xa   :  { %12 = vsyncpa [#allocation3], 0  ;;  %s9618_s16 = smov 12   ;;  %v359_v17 = vsel %vm353_vm1, %v357_v13, %v358_v14  ;;  %v143_v18 = vrot.slane %v9714_v15, 1  ;;  %v144_v19 = vrot.slane %v9719_v16, 1  ;;  %s9619_s17 = smov 15  }
   0xb   :  { %724 = vrot.lane.b32.xlu1 %v142_v12, %s9618_s16  ;;  %v360_v21 = vrot.slane %v9714_v15, 2  ;;  %v361_v22 = vrot.slane %v9719_v16, 2  ;;  %s9620_s18 = smov 18   ;;  %s9621_s19 = smov 21   ;;  %v9748_v24 = vld [vmem:[%s16162_s0 + $0x30] sm:$0xff]  ;;  %v1930_v32 = vld [vmem:[%s16163_s1] sm:$0xff] }
   0xc   :  { %v145_v20 = vsel %vm136_vm0, %v143_v18, %v144_v19  ;;  %v9758_v25 = vld [vmem:[%s16162_s0 + $0x38] sm:$0x3f]  ;;  %v146_v26 = vrot.slane %v9748_v24, 1  ;;  %s9622_s24 = smov 24   ;;  %v363_v29 = vrot.slane %v9748_v24, 2  ;;  %v1931_v33 = vld [vmem:[%s16163_s1 + $0x8] sm:$0xff] }
   0xd   :  { %213 = vrot.lane.b32.xlu0 %v142_v12, %s9616_s10  ;;  %v362_v23 = vsel %vm353_vm1, %v360_v21, %v361_v22  ;;  %v147_v27 = vrot.slane %v9758_v25, 1  ;;  %v364_v30 = vrot.slane %v9758_v25, 2  ;;  %v9222_v34 = vpack.c.bf16 %v1931_v33, %v1930_v32  ;;  %v1932_v35 = vld [vmem:[%s16163_s1 + $0x10] sm:$0xff]  ;;  %v1933_v36 = vld [vmem:[%s16163_s1 + $0x18] sm:$0x7]  ;;  %v9796_v38 = vld [vmem:[%s16162_s0 + $0x40] sm:$0xff] }
   0xe   :  { %vm2047_vm2 = vcmask 1042432   ;;  %v9226_v37 = vpack.c.bf16 %v1933_v36, %v1932_v35  ;;  %vm9623_vm3 = vmmov 1   ;;  %v9806_v39 = vld [vmem:[%s16162_s0 + $0x48] sm:$0x3f]  ;;  %v149_v40 = vrot.slane %v9796_v38, 1  ;;  %v9847_v47 = vld [vmem:[%s16162_s0 + $0x50] sm:$0xff] }
   0xf   :  { %430 = vrot.lane.b32.xlu1 %v359_v17, %s9617_s15  ;;  %v148_v28 = vsel %vm136_vm0, %v146_v26, %v147_v27  ;;  %v365_v31 = vsel %vm353_vm1, %v363_v29, %v364_v30  ;;  %9223 = vmatprep.subr.bf16.mxu0 %v9222_v34  ;;  %vm9227_vm4 = vmpackc.low %vm2047_vm2, %vm9623_vm3  ;;  %v150_v41 = vrot.slane %v9806_v39, 1  ;;  %v366_v43 = vrot.slane %v9796_v38, 2  ;;  %v9840_v46 = vld [vmem:[%s16162_s0 + $0x58] sm:$0x3f]  ;;  %v9892_v3 = vld [vmem:[%s16162_s0 + $0x60] sm:$0xff]  ;;  %s9625_s25 = smov 32  }
  0x10   :  { %9225 = vmatpush3.bf16.msra.mxu0 %v9222_v34  ;;  %v9824_v44 = vrot.slane %v9806_v39, 2  ;;  %v152_v48 = vrot.slane %v9847_v47, 1  ;;  %v9851_v49 = vrot.slane %v9840_v46, 1  ;;  %v369_v55 = vrot.slane %v9847_v47, 2  ;;  %v9897_v4 = vld [vmem:[%s16162_s0 + $0x68] sm:$0x3f] }
  0x11   :  { %428 = vrot.lane.b32.xlu0 %v355_v6, %s9617_s15  ;;  %9228 = vmatprep.subr.msk.bf16.mxu0 %vm9227_vm4, %v9226_v37  ;;  %v151_v42 = vsel %vm136_vm0, %v149_v40, %v150_v41  ;;  %v9868_v56 = vrot.slane %v9840_v46, 2  ;;  %v155_v6 = vrot.slane %v9892_v3, 1  ;;  %v9905_v8 = vrot.slane %v9897_v4, 1  ;;  %v9964_v36 = vld [vmem:[%s16162_s0 + $0x70] sm:$0xff]  ;;  %s9626_s8 = smov 64   ;;  %s9627_s14 = smov 96  }
  0x12   :  { %v368_v45 = vsel %vm353_vm1, %v366_v43, %v9824_v44  ;;  %v154_v50 = vsel %vm136_vm0, %v152_v48, %v9851_v49  ;;  %v9925_v18 = vrot.slane %v9897_v4, 2  ;;  %vm1466_vm5 = vcmask 23552   ;;  %v9981_v48 = vld [vmem:[%s16162_s0 + $0x78] sm:$0x3f]  ;;  %s9631_s21 = smov 16  }
  0x13   :  { %217 = vrot.lane.b32.xlu1 %v145_v20, %s9616_s10  ;;  %v371_v59 = vsel %vm353_vm1, %v369_v55, %v9868_v56  ;;  %v157_v11 = vsel %vm136_vm0, %v155_v6, %v9905_v8  ;;  %vm1515_vm6 = vcmask 48128   ;;  %vm1564_vm7 = vcmask 72704  }
  0x14   :  { %9231 = vmatpush3.bf16.msk.msra.mxu0 %vm9227_vm4, %v9226_v37  ;;  %vm1613_vm8 = vcmask 97280   ;;  %vm1662_vm9 = vcmask 121856   ;;  %vm1711_vm10 = vcmask 146432   ;;  %vm1760_vm11 = vcmask 171008  }
  0x15   :  { %874 = vrot.lane.b32.xlu0 %v359_v17, %s9619_s17  ;;  %v372_v17 = vrot.slane %v9892_v3, 2  ;;  %vm1809_vm12 = vcmask 195584   ;;  %vm1974_vm13 = vcmask 220160   ;;  %vm3362_vm14 = vcmask 261120  }
  0x16   :  { %vm3403_vm15 = vcmask 523264   ;;  %vm3444_vm2 = vcmask 785408   ;;  %vm6676_vm3 = vcmask 1042434  }
  0x17   :  { %578 = vrot.lane.b32.xlu1 %v9714_v15, %s9615_s30  ;;  %v374_v21 = vsel %vm353_vm1, %v372_v17, %v9925_v18 }
  0x19   :  { %576 = vrot.lane.b32.xlu0 %v9700_v7, %s9615_s30 }
  0x1b   :  { %215 = vrot.lane.b32.xlu1 %v141_v10, %s9616_s10 }
  0x1d   :  { %1022 = vrot.lane.b32.xlu0 %v9714_v15, %s9620_s18 }
  0x1f   :  { %726 = vrot.lane.b32.xlu1 %v141_v10, %s9618_s16 }
  0x21   :  { %434 = vrot.lane.b32.xlu0 %v362_v23, %s9617_s15 }
  0x23   :  { %1172 = vrot.lane.b32.xlu1 %v145_v20, %s9621_s19 }
  0x25   :  { %728 = vrot.lane.b32.xlu0 %v145_v20, %s9618_s16 }
  0x27   :  { %582 = vrot.lane.b32.xlu1 %v9748_v24, %s9615_s30 }
  0x29   :  { %432 = vrot.lane.b32.xlu0 %v358_v14, %s9617_s15 }
  0x2b   :  { %878 = vrot.lane.b32.xlu1 %v362_v23, %s9619_s17 }
  0x2d   :  { %876 = vrot.lane.b32.xlu0 %v358_v14, %s9619_s17 }
  0x2f   :  { %580 = vrot.lane.b32.xlu1 %v9719_v16, %s9615_s30 }
  0x31   :  { %1322 = vrot.lane.b32.xlu0 %v362_v23, %s9622_s24 }
  0x33   :  { %1024 = vrot.lane.b32.xlu1 %v9719_v16, %s9620_s18 }
  0x35   :  { %732 = vrot.lane.b32.xlu0 %v148_v28, %s9618_s16 }
  0x37   :  { %221 = vrot.lane.b32.xlu1 %v148_v28, %s9616_s10 }
  0x39   :  { %1026 = vrot.lane.b32.xlu0 %v9748_v24, %s9620_s18 }
  0x3b   :  { %882 = vrot.lane.b32.xlu1 %v365_v31, %s9619_s17 }
  0x3d   :  { %730 = vrot.lane.b32.xlu0 %v144_v19, %s9618_s16 }
  0x3f   :  { %1176 = vrot.lane.b32.xlu1 %v148_v28, %s9621_s19 }
  0x41   :  { %1174 = vrot.lane.b32.xlu0 %v144_v19, %s9621_s19 }
  0x43   :  { %438 = vrot.lane.b32.xlu1 %v365_v31, %s9617_s15 }
  0x45   :  { %219 = vrot.lane.b32.xlu0 %v144_v19, %s9616_s10 }
  0x47   :  { %1030 = vrot.lane.b32.xlu1 %v9796_v38, %s9620_s18 }
  0x49   :  { %880 = vrot.lane.b32.xlu0 %v361_v22, %s9619_s17 }
  0x4b   :  { %1326 = vrot.lane.b32.xlu1 %v365_v31, %s9622_s24 }
  0x4d   :  { %1324 = vrot.lane.b32.xlu0 %v361_v22, %s9622_s24 }
  0x4f   :  { %436 = vrot.lane.b32.xlu1 %v361_v22, %s9617_s15 }
  0x51   :  { %223 = vrot.lane.b32.xlu0 %v147_v27, %s9616_s10 }
  0x53   :  { %1028 = vrot.lane.b32.xlu1 %v9758_v25, %s9620_s18 }
  0x55   :  { %586 = vrot.lane.b32.xlu0 %v9796_v38, %s9615_s30 }
  0x57   :  { %225 = vrot.lane.b32.xlu1 %v151_v42, %s9616_s10 }
  0x59   :  { %1180 = vrot.lane.b32.xlu0 %v151_v42, %s9621_s19 }
  0x5b   :  { %584 = vrot.lane.b32.xlu1 %v9758_v25, %s9615_s30 }
  0x5d   :  { %440 = vrot.lane.b32.xlu0 %v364_v30, %s9617_s15 }
  0x5f   :  { %1178 = vrot.lane.b32.xlu1 %v147_v27, %s9621_s19 }
  0x61   :  { %736 = vrot.lane.b32.xlu0 %v151_v42, %s9618_s16 }
  0x63   :  { %442 = vrot.lane.b32.xlu1 %v368_v45, %s9617_s15 }
  0x65   :  { %1330 = vrot.lane.b32.xlu0 %v368_v45, %s9622_s24 }
  0x67   :  { %734 = vrot.lane.b32.xlu1 %v147_v27, %s9618_s16 }
  0x69   :  { %588 = vrot.lane.b32.xlu0 %v9806_v39, %s9615_s30 }
  0x6b   :  { %1328 = vrot.lane.b32.xlu1 %v364_v30, %s9622_s24 }
  0x6d   :  { %886 = vrot.lane.b32.xlu0 %v368_v45, %s9619_s17 }
  0x6f   :  { %738 = vrot.lane.b32.xlu1 %v150_v41, %s9618_s16 }
  0x71   :  { %590 = vrot.lane.b32.xlu0 %v9847_v47, %s9615_s30 }
  0x73   :  { %1034 = vrot.lane.b32.xlu1 %v9847_v47, %s9620_s18 }
  0x74   :  { %v575_v51 = vpop.permute.xlu1 %574 }
  0x75   :  { %884 = vrot.lane.b32.xlu0 %v364_v30, %s9619_s17 }
  0x77   :  { %229 = vrot.lane.b32.xlu1 %v154_v50, %s9616_s10  ;;  %v210_v52 = vpop.permute.xlu0 %209 }
  0x78   :  { %v9861_v53 = vpop.permute.xlu1 %211  ;;  %v1467_v23 = vsel %vm1466_vm5, %v9684_v1, %v210_v52 }
  0x79   :  { %227 = vrot.lane.b32.xlu0 %v150_v41, %s9616_s10 }
  0x7b   :  { %888 = vrot.lane.b32.xlu1 %v9824_v44, %s9619_s17  ;;  %v427_v54 = vpop.permute.xlu0 %426 }
  0x7c   :  { %v1516_v26 = vsel %vm1515_vm6, %v1467_v23, %v427_v54 }
  0x7d   :  { %v725_v57 = vpop.permute.xlu1 %724  ;;  %740 = vrot.lane.b32.xlu0 %v154_v50, %s9618_s16  ;;  %v1565_v29 = vsel %vm1564_vm7, %v1516_v26, %v575_v51  ;;  %v9991_v51 = vrot.slane %v9981_v48, 1 }
  0x7e   :  { %v1614_v30 = vsel %vm1613_vm8, %v1565_v29, %v725_v57  ;;  %v375_v57 = vrot.slane %v9964_v36, 2 }
  0x7f   :  { %1184 = vrot.lane.b32.xlu1 %v154_v50, %s9621_s19  ;;  %v9872_v58 = vpop.permute.xlu0 %213  ;;  %v158_v50 = vrot.slane %v9964_v36, 1 }
  0x80   :  { %v1469_v6 = vsel %vm1466_vm5, %v9679_v0, %v9872_v58 }
  0x81   :  { %v9876_v60 = vpop.permute.xlu1 %430  ;;  %1032 = vrot.lane.b32.xlu0 %v9806_v39, %s9620_s18  ;;  %v160_v55 = vsel %vm136_vm0, %v158_v50, %v9991_v51  ;;  %v10074_v50 = vld [vmem:[%s16162_s0 + $0x88] sm:$0x3f] }
  0x83   :  { %446 = vrot.lane.b32.xlu1 %v371_v59, %s9617_s15  ;;  %v9881_v61 = vpop.permute.xlu0 %428 }
  0x85   :  { %v9883_v62 = vpop.permute.xlu1 %217  ;;  %444 = vrot.lane.b32.xlu0 %v9824_v44, %s9617_s15 }
  0x87   :  { %1036 = vrot.lane.b32.xlu1 %v9840_v46, %s9620_s18  ;;  %v875_v63 = vpop.permute.xlu0 %874 }
  0x88   :  { %v1663_v32 = vsel %vm1662_vm9, %v1614_v30, %v875_v63 }
  0x89   :  { %v9899_v5 = vpop.permute.xlu1 %578  ;;  %890 = vrot.lane.b32.xlu0 %v371_v59, %s9619_s17 }
  0x8b   :  { %1334 = vrot.lane.b32.xlu1 %v371_v59, %s9622_s24  ;;  %v9907_v9 = vpop.permute.xlu0 %576  ;;  %v10002_v59 = vrot.slane %v9981_v48, 2 }
  0x8d   :  { %v9909_v10 = vpop.permute.xlu1 %215  ;;  %1182 = vrot.lane.b32.xlu0 %v150_v41, %s9621_s19 }
  0x8f   :  { %592 = vrot.lane.b32.xlu1 %v9840_v46, %s9615_s30  ;;  %v1023_v12 = vpop.permute.xlu0 %1022 }
  0x90   :  { %v1712_v33 = vsel %vm1711_vm10, %v1663_v32, %v1023_v12  ;;  %v377_v12 = vsel %vm353_vm1, %v375_v57, %v10002_v59  ;;  %v1471_v57 = vsel %vm1466_vm5, %v9714_v15, %v9883_v62 }
  0x91   :  { %v9916_v13 = vpop.permute.xlu1 %726  ;;  %233 = vrot.lane.b32.xlu0 %v157_v11, %s9616_s10 }
  0x93   :  { %1038 = vrot.lane.b32.xlu1 %v9892_v3, %s9620_s18  ;;  %v9921_v14 = vpop.permute.xlu0 %434 }
  0x95   :  { %v1173_v19 = vpop.permute.xlu1 %1172  ;;  %594 = vrot.lane.b32.xlu0 %v9892_v3, %s9615_s30 }
  0x96   :  { %v1761_v34 = vsel %vm1760_vm11, %v1712_v33, %v1173_v19  ;;  %v1468_v19 = vsel %vm1466_vm5, %v9689_v2, %v9861_v53 }
  0x97   :  { %1332 = vrot.lane.b32.xlu1 %v9824_v44, %s9622_s24  ;;  %v9931_v20 = vpop.permute.xlu0 %728  ;;  %v1517_v23 = vsel %vm1515_vm6, %v1468_v19, %v9881_v61 }
  0x98   :  { %v1566_v58 = vsel %vm1564_vm7, %v1517_v23, %v9907_v9 }
  0x99   :  { %v9935_v22 = vpop.permute.xlu1 %582  ;;  %1186 = vrot.lane.b32.xlu0 %v9851_v49, %s9621_s19  ;;  %v1615_v2 = vsel %vm1613_vm8, %v1566_v58, %v9916_v13 }
  0x9b   :  { %450 = vrot.lane.b32.xlu1 %v374_v21, %s9617_s15  ;;  %v9943_v27 = vpop.permute.xlu0 %432 }
  0x9d   :  { %v9945_v28 = vpop.permute.xlu1 %878  ;;  %231 = vrot.lane.b32.xlu0 %v9851_v49, %s9616_s10 }
  0x9f   :  { %744 = vrot.lane.b32.xlu1 %v157_v11, %s9618_s16  ;;  %v877_v1 = vpop.permute.xlu0 %876 }
  0xa0   :  { %v1664_v61 = vsel %vm1662_vm9, %v1615_v2, %v877_v1 }
  0xa1   :  { %v9952_v31 = vpop.permute.xlu1 %580  ;;  %742 = vrot.lane.b32.xlu0 %v9851_v49, %s9618_s16 }
  0xa3   :  { %1336 = vrot.lane.b32.xlu1 %v9868_v56, %s9622_s24  ;;  %v1323_v35 = vpop.permute.xlu0 %1322 }
  0xa4   :  { %v1810_v37 = vsel %vm1809_vm12, %v1761_v34, %v1323_v35  ;;  %v10056_v35 = vld [vmem:[%s16162_s0 + $0x80] sm:$0xff] }
  0xa5   :  { %v1025_v40 = vpop.permute.xlu1 %1024  ;;  %v1906_v41 = vcombine.high %v1810_v37, %v1810_v37  ;;  %1188 = vrot.lane.b32.xlu0 %v157_v11, %s9621_s19 }
  0xa7   :  { %598 = vrot.lane.b32.xlu1 %v9964_v36, %s9615_s30  ;;  %v9970_v42 = vpop.permute.xlu0 %732  ;;  %v1938_v43 = vcombine.low %v1810_v37, %v1906_v41 }
  0xa9   :  { %v9972_v44 = vpop.permute.xlu1 %221  ;;  %448 = vrot.lane.b32.xlu0 %v9868_v56, %s9617_s15  ;;  %9063 = vmatprep.mubr.msk.f32.mxu0 %vm1974_vm13, %v1938_v43 }
  0xab   :  { %894 = vrot.lane.b32.xlu1 %v374_v21, %s9619_s17  ;;  %v1027_v45 = vpop.permute.xlu0 %1026 }
  0xad   :  { %v9983_v49 = vpop.permute.xlu1 %882  ;;  %892 = vrot.lane.b32.xlu0 %v9868_v56, %s9619_s17 }
  0xaf   :  { %596 = vrot.lane.b32.xlu1 %v9897_v4, %s9615_s30  ;;  %v9993_v52 = vpop.permute.xlu0 %730 }
  0xb1   :  { %v1177_v54 = vpop.permute.xlu1 %1176  ;;  %1338 = vrot.lane.b32.xlu0 %v374_v21, %s9622_s24  ;;  %v1518_v21 = vsel %vm1515_vm6, %v1469_v6, %v9876_v60  ;;  %v1520_v6 = vsel %vm1515_vm6, %v1471_v57, %v9921_v14  ;;  %v1470_v14 = vsel %vm1466_vm5, %v9700_v7, %v9909_v10 }
  0xb2   :  { %v1567_v0 = vsel %vm1564_vm7, %v1518_v21, %v9899_v5  ;;  %v1713_v5 = vsel %vm1711_vm10, %v1664_v61, %v1025_v40  ;;  %v1519_v23 = vsel %vm1515_vm6, %v1470_v14, %v9943_v27 }
  0xb3   :  { %1040 = vrot.lane.b32.xlu1 %v9897_v4, %s9620_s18  ;;  %v1175_v56 = vpop.permute.xlu0 %1174  ;;  %v1616_v53 = vsel %vm1613_vm8, %v1567_v0, %v9931_v20 }
  0xb4   :  { %v1665_v60 = vsel %vm1662_vm9, %v1616_v53, %v9945_v28  ;;  %v1762_v30 = vsel %vm1760_vm11, %v1713_v5, %v1175_v56 }
  0xb5   :  { %v10004_v63 = vpop.permute.xlu1 %438  ;;  %748 = vrot.lane.b32.xlu0 %v160_v55, %s9618_s16  ;;  %v1714_v9 = vsel %vm1711_vm10, %v1665_v60, %v1027_v45 }
  0xb6   :  { %v1763_v13 = vsel %vm1760_vm11, %v1714_v9, %v1177_v54  ;;  %v161_v54 = vrot.slane %v10056_v35, 1 }
  0xb7   :  { %237 = vrot.lane.b32.xlu1 %v160_v55, %s9616_s10  ;;  %v10011_v11 = vpop.permute.xlu0 %219 }
  0xb9   :  { %v1031_v17 = vpop.permute.xlu1 %1030  ;;  %1042 = vrot.lane.b32.xlu0 %v9964_v36, %s9620_s18 }
  0xbb   :  { %898 = vrot.lane.b32.xlu1 %v377_v12, %s9619_s17  ;;  %v881_v26 = vpop.permute.xlu0 %880 }
  0xbd   :  { %v1327_v29 = vpop.permute.xlu1 %1326  ;;  %746 = vrot.lane.b32.xlu0 %v9905_v8, %s9618_s16 }
  0xbe   :  { %v1812_v32 = vsel %vm1809_vm12, %v1763_v13, %v1327_v29  ;;  %v10133_v29 = vrot.slane %v10074_v50, 2 }
  0xbf   :  { %1192 = vrot.lane.b32.xlu1 %v160_v55, %s9621_s19  ;;  %v1325_v20 = vpop.permute.xlu0 %1324  ;;  %v10084_v55 = vrot.slane %v10074_v50, 1  ;;  %v1907_v60 = vcombine.high %v1812_v32, %v1812_v32 }
  0xc0   :  { %v1811_v28 = vsel %vm1809_vm12, %v1762_v30, %v1325_v20 }
  0xc1   :  { %v10045_v33 = vpop.permute.xlu1 %436  ;;  %v1939_v1 = vcombine.low %v1811_v28, %v1812_v32  ;;  %1190 = vrot.lane.b32.xlu0 %v9905_v8, %s9621_s19  ;;  %v163_v19 = vsel %vm136_vm0, %v161_v54, %v10084_v55 }
  0xc3   :  { %454 = vrot.lane.b32.xlu1 %v377_v12, %s9617_s15  ;;  %9064 = vmatmul.mubr.msk.f32.vlgmr.msra.gmra.mrb[0].mxu0 %vm1974_vm13, %v1939_v1  ;;  %v10051_v34 = vpop.permute.xlu0 %223 }
  0xc5   :  { %v1029_v37 = vpop.permute.xlu1 %1028  ;;  %235 = vrot.lane.b32.xlu0 %v9905_v8, %s9616_s10 }
  0xc7   :  { %1046 = vrot.lane.b32.xlu1 %v10056_v35, %s9620_s18  ;;  %v10062_v40 = vpop.permute.xlu0 %586 }
  0xc9   :  { %v10064_v41 = vpop.permute.xlu1 %225  ;;  %896 = vrot.lane.b32.xlu0 %v9925_v18, %s9619_s17 }
  0xcb   :  { %1342 = vrot.lane.b32.xlu1 %v377_v12, %s9622_s24  ;;  %v1181_v43 = vpop.permute.xlu0 %1180 }
  0xcd   :  { %v10069_v45 = vpop.permute.xlu1 %584  ;;  %1340 = vrot.lane.b32.xlu0 %v9925_v18, %s9622_s24 }
  0xcf   :  { %452 = vrot.lane.b32.xlu1 %v9925_v18, %s9617_s15  ;;  %v10080_v8 = vpop.permute.xlu0 %440  ;;  %v1569_v18 = vsel %vm1564_vm7, %v1520_v6, %v9935_v22 }
  0xd0   :  { %v1618_v15 = vsel %vm1613_vm8, %v1569_v18, %v9970_v42 }
  0xd1   :  { %v1179_v56 = vpop.permute.xlu1 %1178  ;;  %239 = vrot.lane.b32.xlu0 %v9991_v51, %s9616_s10  ;;  %v1667_v21 = vsel %vm1662_vm9, %v1618_v15, %v9983_v49  ;;  %v1568_v49 = vsel %vm1564_vm7, %v1519_v23, %v9952_v31  ;;  %v378_v31 = vrot.slane %v10056_v35, 2 }
  0xd2   :  { %v1716_v22 = vsel %vm1711_vm10, %v1667_v21, %v1031_v17  ;;  %v1617_v7 = vsel %vm1613_vm8, %v1568_v49, %v9993_v52 }
  0xd3   :  { %1044 = vrot.lane.b32.xlu1 %v9981_v48, %s9620_s18  ;;  %v10097_v12 = vpop.permute.xlu0 %736  ;;  %v1765_v42 = vsel %vm1760_vm11, %v1716_v22, %v1181_v43  ;;  %v1666_v10 = vsel %vm1662_vm9, %v1617_v7, %v881_v26  ;;  %v380_v30 = vsel %vm353_vm1, %v378_v31, %v10133_v29 }
  0xd4   :  { %v1715_v27 = vsel %vm1711_vm10, %v1666_v10, %v1029_v37 }
  0xd5   :  { %v10103_v62 = vpop.permute.xlu1 %442  ;;  %602 = vrot.lane.b32.xlu0 %v10056_v35, %s9615_s30  ;;  %v1764_v52 = vsel %vm1760_vm11, %v1715_v27, %v1179_v56  ;;  %v10167_v56 = vld [vmem:[%s16162_s0 + $0x98] sm:$0x3f]  ;;  %v1473_v27 = vsel %vm1466_vm5, %v9748_v24, %v9972_v44 }
  0xd6   :  { %v10181_v18 = vrot.slane %v10167_v56, 1  ;;  %v10204_v49 = vrot.slane %v10167_v56, 2  ;;  %v1522_v31 = vsel %vm1515_vm6, %v1473_v27, %v10004_v63 }
  0xd7   :  { %241 = vrot.lane.b32.xlu1 %v163_v19, %s9616_s10  ;;  %v1331_v0 = vpop.permute.xlu0 %1330 }
  0xd8   :  { %v1814_v58 = vsel %vm1809_vm12, %v1765_v42, %v1331_v0 }
  0xd9   :  { %v10120_v2 = vpop.permute.xlu1 %734  ;;  %1196 = vrot.lane.b32.xlu0 %v163_v19, %s9621_s19  ;;  %v1908_v17 = vcombine.high %v1814_v58, %v1814_v58 }
  0xdb   :  { %600 = vrot.lane.b32.xlu1 %v9981_v48, %s9615_s30  ;;  %v10129_v53 = vpop.permute.xlu0 %588  ;;  %v1941_v9 = vcombine.low %v1814_v58, %v1908_v17  ;;  %v1472_v17 = vsel %vm1466_vm5, %v9719_v16, %v10011_v11 }
  0xdd   :  { %v1329_v61 = vpop.permute.xlu1 %1328  ;;  %456 = vrot.lane.b32.xlu0 %v10002_v59, %s9617_s15 }
  0xde   :  { %v1813_v5 = vsel %vm1809_vm12, %v1764_v52, %v1329_v61  ;;  %v1571_v61 = vsel %vm1564_vm7, %v1522_v31, %v10062_v40 }
  0xdf   :  { %v1940_v26 = vcombine.low %v1907_v60, %v1813_v5  ;;  %1194 = vrot.lane.b32.xlu1 %v9991_v51, %s9621_s19  ;;  %v887_v13 = vpop.permute.xlu0 %886  ;;  %v1521_v60 = vsel %vm1515_vm6, %v1472_v17, %v10045_v33  ;;  %v1620_v16 = vsel %vm1613_vm8, %v1571_v61, %v10097_v12  ;;  %v10250_v12 = vld [vmem:[%s16162_s0 + $0xa0] sm:$0xff] }
  0xe0   :  { %v1570_v24 = vsel %vm1564_vm7, %v1521_v60, %v10069_v45  ;;  %v1669_v63 = vsel %vm1662_vm9, %v1620_v16, %v887_v13  ;;  %v384_v31 = vrot.slane %v10250_v12, 2 }
  0xe1   :  { %v10143_v20 = vpop.permute.xlu1 %738  ;;  %9066 = vmatprep.mubr.msk.f32.mxu0 %vm1974_vm13, %v1940_v26  ;;  %752 = vrot.lane.b32.xlu0 %v163_v19, %s9618_s16  ;;  %v1619_v11 = vsel %vm1613_vm8, %v1570_v24, %v10120_v2  ;;  %v10255_v2 = vld [vmem:[%s16162_s0 + $0xa8] sm:$0x3f] }
  0xe2   :  { %9067 = vmatmul.mubr.msk.f32.gmra.mrb[2].mxu0 %vm1974_vm13, %v1941_v9 }
  0xe3   :  { %458 = vrot.lane.b32.xlu1 %v380_v30, %s9617_s15  ;;  %v10149_v32 = vpop.permute.xlu0 %590 }
  0xe5   :  { %v1035_v28 = vpop.permute.xlu1 %1034  ;;  %1346 = vrot.lane.b32.xlu0 %v380_v30, %s9622_s24 }
  0xe6   :  { %v1718_v40 = vsel %vm1711_vm10, %v1669_v63, %v1035_v28 }
  0xe7   :  { %750 = vrot.lane.b32.xlu1 %v9991_v51, %s9618_s16  ;;  %v885_v1 = vpop.permute.xlu0 %884  ;;  %v10175_v51 = vld [vmem:[%s16162_s0 + $0x90] sm:$0xff] }
  0xe8   :  { %v164_v6 = vrot.slane %v10175_v51, 1  ;;  %v381_v0 = vrot.slane %v10175_v51, 2  ;;  %v1668_v33 = vsel %vm1662_vm9, %v1619_v11, %v885_v1 }
  0xe9   :  { %v10154_v37 = vpop.permute.xlu1 %229  ;;  %604 = vrot.lane.b32.xlu0 %v10074_v50, %s9615_s30 }
  0xea   :  { %v166_v21 = vsel %vm136_vm0, %v164_v6, %v10181_v18  ;;  %v383_v7 = vsel %vm353_vm1, %v381_v0, %v10204_v49  ;;  %v167_v6 = vrot.slane %v10250_v12, 1 }
  0xeb   :  { %1344 = vrot.lane.b32.xlu1 %v10002_v59, %s9622_s24  ;;  %v10160_v43 = vpop.permute.xlu0 %227 }
  0xed   :  { %v10162_v54 = vpop.permute.xlu1 %888  ;;  %902 = vrot.lane.b32.xlu0 %v380_v30, %s9619_s17 }
  0xef   :  { %754 = vrot.lane.b32.xlu1 %v10084_v55, %s9618_s16  ;;  %v10177_v57 = vpop.permute.xlu0 %740 }
  0xf1   :  { %v1185_v19 = vpop.permute.xlu1 %1184  ;;  %606 = vrot.lane.b32.xlu0 %v10175_v51, %s9615_s30 }
  0xf2   :  { %v1767_v26 = vsel %vm1760_vm11, %v1718_v40, %v1185_v19  ;;  %v1474_v19 = vsel %vm1466_vm5, %v9758_v25, %v10051_v34 }
  0xf3   :  { %1050 = vrot.lane.b32.xlu1 %v10175_v51, %s9620_s18  ;;  %v1033_v15 = vpop.permute.xlu0 %1032 }
  0xf4   :  { %v1717_v45 = vsel %vm1711_vm10, %v1668_v33, %v1033_v15  ;;  %v10265_v15 = vrot.slane %v10255_v2, 1 }
  0xf5   :  { %v10189_v14 = vpop.permute.xlu1 %446  ;;  %900 = vrot.lane.b32.xlu0 %v10002_v59, %s9619_s17 }
  0xf7   :  { %245 = vrot.lane.b32.xlu1 %v166_v21, %s9616_s10  ;;  %v10194_v22 = vpop.permute.xlu0 %444 }
  0xf9   :  { %v1037_v23 = vpop.permute.xlu1 %1036  ;;  %243 = vrot.lane.b32.xlu0 %v10084_v55, %s9616_s10 }
  0xfb   :  { %904 = vrot.lane.b32.xlu1 %v10133_v29, %s9619_s17  ;;  %v10200_v42 = vpop.permute.xlu0 %890 }
  0xfd   :  { %v1335_v58 = vpop.permute.xlu1 %1334  ;;  %756 = vrot.lane.b32.xlu0 %v166_v21, %s9618_s16 }
  0xfe   :  { %v1816_v30 = vsel %vm1809_vm12, %v1767_v26, %v1335_v58  ;;  %v169_v58 = vsel %vm136_vm0, %v167_v6, %v10265_v15 }
  0xff   :  { %1200 = vrot.lane.b32.xlu1 %v166_v21, %s9621_s19  ;;  %v1183_v59 = vpop.permute.xlu0 %1182  ;;  %v1909_v60 = vcombine.high %v1816_v30, %v1816_v30 }
 0x100   :  { %v1766_v9 = vsel %vm1760_vm11, %v1717_v45, %v1183_v59  ;;  %v1523_v59 = vsel %vm1515_vm6, %v1474_v19, %v10080_v8 }
 0x101   :  { %v10210_v10 = vpop.permute.xlu1 %592  ;;  %1048 = vrot.lane.b32.xlu0 %v10074_v50, %s9620_s18  ;;  %v1572_v27 = vsel %vm1564_vm7, %v1523_v59, %v10129_v53  ;;  %v10299_v53 = vrot.slane %v10255_v2, 2 }
 0x103   :  { %462 = vrot.lane.b32.xlu1 %v383_v7, %s9617_s15  ;;  %v10225_v52 = vpop.permute.xlu0 %233  ;;  %v386_v16 = vsel %vm353_vm1, %v384_v31, %v10299_v53 }
 0x105   :  { %v10231_v44 = vpop.permute.xlu1 %1038  ;;  %460 = vrot.lane.b32.xlu0 %v10133_v29, %s9617_s15 }
 0x107   :  { %1052 = vrot.lane.b32.xlu1 %v10167_v56, %s9620_s18  ;;  %v10245_v5 = vpop.permute.xlu0 %594 }
 0x109   :  { %v1333_v13 = vpop.permute.xlu1 %1332  ;;  %906 = vrot.lane.b32.xlu0 %v383_v7, %s9619_s17 }
 0x10a   :  { %v1815_v28 = vsel %vm1809_vm12, %v1766_v9, %v1333_v13 }
 0x10b   :  { %v1942_v1 = vcombine.low %v1815_v28, %v1816_v30  ;;  %1350 = vrot.lane.b32.xlu1 %v383_v7, %s9622_s24  ;;  %v1187_v21 = vpop.permute.xlu0 %1186 }
 0x10d   :  { %v10267_v0 = vpop.permute.xlu1 %450  ;;  %9069 = vmatprep.mubr.msk.f32.mxu0 %vm1974_vm13, %v1942_v1  ;;  %1198 = vrot.lane.b32.xlu0 %v10084_v55, %s9621_s19  ;;  %v1621_v55 = vsel %vm1613_vm8, %v1572_v27, %v10143_v20 }
 0x10e   :  { %v1670_v25 = vsel %vm1662_vm9, %v1621_v55, %v10162_v54 }
 0x10f   :  { %608 = vrot.lane.b32.xlu1 %v10167_v56, %s9615_s30  ;;  %v10281_v7 = vpop.permute.xlu0 %231  ;;  %v1719_v34 = vsel %vm1711_vm10, %v1670_v25, %v1037_v23 }
 0x110   :  { %v1768_v20 = vsel %vm1760_vm11, %v1719_v34, %v1187_v21  ;;  %v10360_v21 = vld [vmem:[%s16162_s0 + $0xb8] sm:$0x3f] }
 0x111   :  { %v10285_v17 = vpop.permute.xlu1 %744  ;;  %249 = vrot.lane.b32.xlu0 %v169_v58, %s9616_s10  ;;  %v10370_v59 = vrot.slane %v10360_v21, 1 }
 0x113   :  { %1054 = vrot.lane.b32.xlu1 %v10250_v12, %s9620_s18  ;;  %v10295_v8 = vpop.permute.xlu0 %742 }
 0x115   :  { %v1337_v61 = vpop.permute.xlu1 %1336  ;;  %610 = vrot.lane.b32.xlu0 %v10250_v12, %s9615_s30 }
 0x116   :  { %v1817_v24 = vsel %vm1809_vm12, %v1768_v20, %v1337_v61 }
 0x117   :  { %v1943_v54 = vcombine.low %v1909_v60, %v1817_v24  ;;  %1348 = vrot.lane.b32.xlu1 %v10133_v29, %s9622_s24  ;;  %v1189_v23 = vpop.permute.xlu0 %1188  ;;  %v1475_v29 = vsel %vm1466_vm5, %v9796_v38, %v10064_v41  ;;  %v10386_v60 = vrot.slane %v10360_v21, 2  ;;  %v1477_v24 = vsel %vm1466_vm5, %v9847_v47, %v10154_v37 }
 0x118   :  { %v1524_v40 = vsel %vm1515_vm6, %v1475_v29, %v10103_v62 }
 0x119   :  { %v10309_v11 = vpop.permute.xlu1 %598  ;;  %9070 = vmatmul.mubr.msk.f32.gmra.mrb[4].mxu0 %vm1974_vm13, %v1943_v54  ;;  %1202 = vrot.lane.b32.xlu0 %v10181_v18, %s9621_s19  ;;  %v1573_v45 = vsel %vm1564_vm7, %v1524_v40, %v10149_v32  ;;  %v1476_v54 = vsel %vm1466_vm5, %v9806_v39, %v10160_v43 }
 0x11a   :  { %v1622_v9 = vsel %vm1613_vm8, %v1573_v45, %v10177_v57  ;;  %v10343_v57 = vld [vmem:[%s16162_s0 + $0xb0] sm:$0xff] }
 0x11b   :  { %466 = vrot.lane.b32.xlu1 %v386_v16, %s9617_s15  ;;  %v10315_v63 = vpop.permute.xlu0 %448  ;;  %v1671_v38 = vsel %vm1662_vm9, %v1622_v9, %v10200_v42  ;;  %v387_v31 = vrot.slane %v10343_v57, 2 }
 0x11c   :  { %v1720_v41 = vsel %vm1711_vm10, %v1671_v38, %v10231_v44 }
 0x11d   :  { %v895_v33 = vpop.permute.xlu1 %894  ;;  %247 = vrot.lane.b32.xlu0 %v10181_v18, %s9616_s10  ;;  %v1769_v62 = vsel %vm1760_vm11, %v1720_v41, %v1189_v23  ;;  %v1526_v23 = vsel %vm1515_vm6, %v1477_v24, %v10189_v14  ;;  %v389_v29 = vsel %vm353_vm1, %v387_v31, %v10386_v60  ;;  %v10436_v41 = vld [vmem:[%s16162_s0 + $0xc8] sm:$0x3f] }
 0x11e   :  { %v1575_v39 = vsel %vm1564_vm7, %v1526_v23, %v10245_v5  ;;  %v10462_v24 = vrot.slane %v10436_v41, 2 }
 0x11f   :  { %760 = vrot.lane.b32.xlu1 %v169_v58, %s9618_s16  ;;  %v893_v26 = vpop.permute.xlu0 %892  ;;  %v1624_v43 = vsel %vm1613_vm8, %v1575_v39, %v10285_v17 }
 0x120   :  { %v1673_v40 = vsel %vm1662_vm9, %v1624_v43, %v895_v33 }
 0x121   :  { %v10329_v13 = vpop.permute.xlu1 %596  ;;  %758 = vrot.lane.b32.xlu0 %v10181_v18, %s9618_s16 }
 0x123   :  { %1352 = vrot.lane.b32.xlu1 %v10204_v49, %s9622_s24  ;;  %v1339_v32 = vpop.permute.xlu0 %1338 }
 0x124   :  { %v1818_v30 = vsel %vm1809_vm12, %v1769_v62, %v1339_v32  ;;  %v51_v32 = vld [vmem:[%s16162_s0 + $0xc0] sm:$0xff] }
 0x125   :  { %v1041_v42 = vpop.permute.xlu1 %1040  ;;  %v1910_v28 = vcombine.high %v1818_v30, %v1818_v30  ;;  %1204 = vrot.lane.b32.xlu0 %v169_v58, %s9621_s19  ;;  %v170_v58 = vrot.slane %v10343_v57, 1 }
 0x127   :  { %614 = vrot.lane.b32.xlu1 %v10343_v57, %s9615_s30  ;;  %v1944_v18 = vcombine.low %v1818_v30, %v1910_v28  ;;  %v10349_v44 = vpop.permute.xlu0 %748  ;;  %v172_v25 = vsel %vm136_vm0, %v170_v58, %v10370_v59  ;;  %v10449_v28 = vrot.slane %v10436_v41, 1 }
 0x129   :  { %v10351_v1 = vpop.permute.xlu1 %237  ;;  %464 = vrot.lane.b32.xlu0 %v10204_v49, %s9617_s15  ;;  %9072 = vmatprep.mubr.msk.f32.mxu0 %vm1974_vm13, %v1944_v18 }
 0x12b   :  { %910 = vrot.lane.b32.xlu1 %v386_v16, %s9619_s17  ;;  %v1043_v6 = vpop.permute.xlu0 %1042 }
 0x12c   :  { %v1722_v9 = vsel %vm1711_vm10, %v1673_v40, %v1043_v6 }
 0x12d   :  { %v10362_v19 = vpop.permute.xlu1 %898  ;;  %908 = vrot.lane.b32.xlu0 %v10204_v49, %s9619_s17 }
 0x12f   :  { %612 = vrot.lane.b32.xlu1 %v10255_v2, %s9615_s30  ;;  %v10372_v27 = vpop.permute.xlu0 %746 }
 0x131   :  { %v1193_v55 = vpop.permute.xlu1 %1192  ;;  %1354 = vrot.lane.b32.xlu0 %v386_v16, %s9622_s24  ;;  %v1525_v16 = vsel %vm1515_vm6, %v1476_v54, %v10194_v22 }
 0x132   :  { %v1574_v47 = vsel %vm1564_vm7, %v1525_v16, %v10210_v10  ;;  %v1771_v5 = vsel %vm1760_vm11, %v1722_v9, %v1193_v55 }
 0x133   :  { %1056 = vrot.lane.b32.xlu1 %v10255_v2, %s9620_s18  ;;  %v1191_v49 = vpop.permute.xlu0 %1190  ;;  %v1623_v14 = vsel %vm1613_vm8, %v1574_v47, %v10295_v8  ;;  %v1479_v47 = vsel %vm1466_vm5, %v9892_v3, %v10225_v52  ;;  %v1478_v52 = vsel %vm1466_vm5, %v9840_v46, %v10281_v7  ;;  %v10511_v46 = vld [vmem:[%s16162_s0 + $0xe8] sm:$0x3f] }
 0x134   :  { %v1672_v45 = vsel %vm1662_vm9, %v1623_v14, %v893_v26  ;;  %v1528_v39 = vsel %vm1515_vm6, %v1479_v47, %v10267_v0  ;;  %v1527_v0 = vsel %vm1515_vm6, %v1478_v52, %v10315_v63  ;;  %v10576_v52 = vld [vmem:[%s16162_s0 + $0xf0] sm:$0xff] }
 0x135   :  { %v10379_v34 = vpop.permute.xlu1 %454  ;;  %764 = vrot.lane.b32.xlu0 %v172_v25, %s9618_s16  ;;  %v1721_v10 = vsel %vm1711_vm10, %v1672_v45, %v1041_v42  ;;  %v718_v42 = vrot.slane %v51_v32, 1  ;;  %v1576_v7 = vsel %vm1564_vm7, %v1527_v0, %v10329_v13  ;;  %v174_v13 = vrot.slane %v10511_v46, 1  ;;  %v53_v0 = vld [vmem:[%s16162_s0 + $0xd0] sm:$0xff] }
 0x136   :  { %v1770_v17 = vsel %vm1760_vm11, %v1721_v10, %v1191_v49  ;;  %v868_v49 = vrot.slane %v51_v32, 2  ;;  %v1625_v63 = vsel %vm1613_vm8, %v1576_v7, %v10372_v27 }
 0x137   :  { %762 = vrot.lane.b32.xlu1 %v10265_v15, %s9618_s16  ;;  %v10388_v20 = vpop.permute.xlu0 %235  ;;  %v720_v58 = vsel %vm136_vm0, %v718_v42, %v10449_v28 }
 0x138   :  { %v870_v23 = vsel %vm353_vm1, %v868_v49, %v10462_v24 }
 0x139   :  { %v10390_v61 = vpop.permute.xlu1 %1046  ;;  %1058 = vrot.lane.b32.xlu0 %v10343_v57, %s9620_s18 }
 0x13b   :  { %1206 = vrot.lane.b32.xlu1 %v10265_v15, %s9621_s19  ;;  %v10412_v37 = vpop.permute.xlu0 %896 }
 0x13c   :  { %v1674_v40 = vsel %vm1662_vm9, %v1625_v63, %v10412_v37  ;;  %v10597_v63 = vld [vmem:[%s16162_s0 + $0xd8] sm:$0x3f] }
 0x13d   :  { %v1343_v22 = vpop.permute.xlu1 %1342  ;;  %914 = vrot.lane.b32.xlu0 %v389_v29, %s9619_s17 }
 0x13e   :  { %v10428_v8 = vsel %vm1809_vm12, %v1771_v5, %v1343_v22 }
 0x13f   :  { %912 = vrot.lane.b32.xlu1 %v10299_v53, %s9619_s17  ;;  %v1341_v38 = vpop.permute.xlu0 %1340  ;;  %v1911_v27 = vcombine.high %v10428_v8, %v10428_v8 }
 0x140   :  { %v1819_v33 = vsel %vm1809_vm12, %v1770_v17, %v1341_v38 }
 0x141   :  { %v10431_v26 = vpop.permute.xlu1 %452  ;;  %v1945_v62 = vcombine.low %v1819_v33, %v10428_v8  ;;  %1208 = vrot.lane.b32.xlu0 %v172_v25, %s9621_s19 }
 0x143   :  { %1356 = vrot.lane.b32.xlu1 %v10299_v53, %s9622_s24  ;;  %9073 = vmatmul.mubr.msk.f32.gmra.mrb[6].mxu0 %vm1974_vm13, %v1945_v62  ;;  %v10446_v30 = vpop.permute.xlu0 %239 }
 0x145   :  { %v1045_v18 = vpop.permute.xlu1 %1044  ;;  %1062 = vrot.lane.b32.xlu0 %v51_v32, %s9620_s18 }
 0x146   :  { %v1723_v10 = vsel %vm1711_vm10, %v1674_v40, %v1045_v18  ;;  %v1166_v40 = vrot.slane %v53_v0, 1 }
 0x147   :  { %253 = vrot.lane.b32.xlu1 %v172_v25, %s9616_s10  ;;  %v10453_v6 = vpop.permute.xlu0 %602 }
 0x149   :  { %v10457_v55 = vpop.permute.xlu1 %241  ;;  %1358 = vrot.lane.b32.xlu0 %v389_v29, %s9622_s24 }
 0x14b   :  { %1212 = vrot.lane.b32.xlu1 %v720_v58, %s9621_s19  ;;  %v1197_v31 = vpop.permute.xlu0 %1196 }
 0x14d   :  { %v10464_v54 = vpop.permute.xlu1 %600  ;;  %1060 = vrot.lane.b32.xlu0 %v10360_v21, %s9620_s18 }
 0x14f   :  { %470 = vrot.lane.b32.xlu1 %v389_v29, %s9617_s15  ;;  %v10469_v25 = vpop.permute.xlu0 %456  ;;  %v1577_v29 = vsel %vm1564_vm7, %v1528_v39, %v10309_v11 }
 0x150   :  { %v1626_v14 = vsel %vm1613_vm8, %v1577_v29, %v10349_v44 }
 0x151   :  { %v1195_v16 = vpop.permute.xlu1 %1194  ;;  %251 = vrot.lane.b32.xlu0 %v10265_v15, %s9616_s10  ;;  %v1675_v3 = vsel %vm1662_vm9, %v1626_v14, %v10362_v19  ;;  %v10506_v19 = vld [vmem:[%s16162_s0 + $0xe0] sm:$0xff] }
 0x152   :  { %v1724_v15 = vsel %vm1711_vm10, %v1675_v3, %v10390_v61  ;;  %v173_v45 = vrot.slane %v10506_v19, 1  ;;  %v1772_v17 = vsel %vm1760_vm11, %v1723_v10, %v1195_v16  ;;  %v390_v8 = vrot.slane %v10506_v19, 2  ;;  %v10567_v3 = vld [vmem:[%s16162_s0 + $0xf8] sm:$0x3f] }
 0x153   :  { %1362 = vrot.lane.b32.xlu1 %v870_v23, %s9622_s24  ;;  %v10483_v43 = vpop.permute.xlu0 %752  ;;  %v1773_v11 = vsel %vm1760_vm11, %v1724_v15, %v1197_v31  ;;  %v176_v15 = vrot.slane %v10576_v52, 1  ;;  %v1167_v10 = vrot.slane %v10597_v63, 1 }
 0x154   :  { %v175_v62 = vsel %vm136_vm0, %v173_v45, %v174_v13 }
 0x155   :  { %v10487_v22 = vpop.permute.xlu1 %458  ;;  %1210 = vrot.lane.b32.xlu0 %v10370_v59, %s9621_s19 }
 0x157   :  { %468 = vrot.lane.b32.xlu1 %v10299_v53, %s9617_s15  ;;  %v1347_v44 = vpop.permute.xlu0 %1346 }
 0x158   :  { %v1822_v53 = vsel %vm1809_vm12, %v1773_v11, %v1347_v44  ;;  %v10585_v11 = vrot.slane %v10567_v3, 1 }
 0x159   :  { %v10516_v61 = vpop.permute.xlu1 %750  ;;  %255 = vrot.lane.b32.xlu0 %v10370_v59, %s9616_s10  ;;  %v1912_v9 = vcombine.high %v1822_v53, %v1822_v53 }
 0x15a   :  { %v178_v7 = vsel %vm136_vm0, %v176_v15, %v10585_v11 }
 0x15b   :  { %1360 = vrot.lane.b32.xlu1 %v10386_v60, %s9622_s24  ;;  %v10529_v5 = vpop.permute.xlu0 %604  ;;  %v1947_v42 = vcombine.low %v1822_v53, %v1912_v9 }
 0x15d   :  { %v1345_v38 = vpop.permute.xlu1 %1344  ;;  %618 = vrot.lane.b32.xlu0 %v51_v32, %s9615_s30  ;;  %v391_v32 = vrot.slane %v10511_v46, 2 }
 0x15e   :  { %v1821_v37 = vsel %vm1809_vm12, %v1772_v17, %v1345_v38  ;;  %v10617_v38 = vrot.slane %v10567_v3, 2 }
 0x15f   :  { %v1946_v33 = vcombine.low %v1911_v27, %v1821_v37  ;;  %472 = vrot.lane.b32.xlu1 %v10386_v60, %s9617_s15  ;;  %v10539_v18 = vpop.permute.xlu0 %902  ;;  %v392_v47 = vsel %vm353_vm1, %v390_v8, %v391_v32  ;;  %v393_v27 = vrot.slane %v10576_v52, 2  ;;  %v1480_v8 = vsel %vm1466_vm5, %v9897_v4, %v10388_v20 }
 0x160   :  { %v1529_v15 = vsel %vm1515_vm6, %v1480_v8, %v10431_v26 }
 0x161   :  { %v10541_v49 = vpop.permute.xlu1 %754  ;;  %9075 = vmatprep.mubr.msk.f32.mxu0 %vm1974_vm13, %v1946_v33  ;;  %257 = vrot.lane.b32.xlu0 %v175_v62, %s9616_s10  ;;  %v395_v33 = vsel %vm353_vm1, %v393_v27, %v10617_v38 }
 0x162   :  { %9076 = vmatmul.mubr.msk.f32.gmra.mrb[8].mxu0 %vm1974_vm13, %v1947_v42  ;;  %v1481_v42 = vsel %vm1466_vm5, %v9964_v36, %v10351_v1  ;;  %v1578_v1 = vsel %vm1564_vm7, %v1529_v15, %v10464_v54 }
 0x163   :  { %768 = vrot.lane.b32.xlu1 %v720_v58, %s9618_s16  ;;  %v10549_v31 = vpop.permute.xlu0 %606 }
 0x165   :  { %v1051_v16 = vpop.permute.xlu1 %1050  ;;  %616 = vrot.lane.b32.xlu0 %v10360_v21, %s9615_s30 }
 0x167   :  { %620 = vrot.lane.b32.xlu1 %v10436_v41, %s9615_s30  ;;  %v901_v39 = vpop.permute.xlu0 %900 }
 0x169   :  { %v10556_v29 = vpop.permute.xlu1 %245  ;;  %474 = vrot.lane.b32.xlu0 %v392_v47, %s9617_s15  ;;  %v1530_v47 = vsel %vm1515_vm6, %v1481_v42, %v10379_v34  ;;  %v1627_v34 = vsel %vm1613_vm8, %v1578_v1, %v10516_v61  ;;  %v10667_v61 = vld [vmem:[%s16162_s0 + $0x100] sm:$0xff] }
 0x16a   :  { %v1579_v36 = vsel %vm1564_vm7, %v1530_v47, %v10453_v6  ;;  %v179_v8 = vrot.slane %v10667_v61, 1 }
 0x16b   :  { %918 = vrot.lane.b32.xlu1 %v870_v23, %s9619_s17  ;;  %v10560_v58 = vpop.permute.xlu0 %243  ;;  %v1628_v20 = vsel %vm1613_vm8, %v1579_v36, %v10483_v43 }
 0x16c   :  { %v1677_v26 = vsel %vm1662_vm9, %v1628_v20, %v10539_v18  ;;  %v10672_v18 = vld [vmem:[%s16162_s0 + $0x108] sm:$0x3f] }
 0x16d   :  { %v10562_v14 = vpop.permute.xlu1 %904  ;;  %766 = vrot.lane.b32.xlu0 %v10370_v59, %s9618_s16  ;;  %v1726_v6 = vsel %vm1711_vm10, %v1677_v26, %v1051_v16  ;;  %v10682_v47 = vrot.slane %v10672_v18, 1  ;;  %v10717_v20 = vrot.slane %v10672_v18, 2 }
 0x16f   :  { %770 = vrot.lane.b32.xlu1 %v10449_v28, %s9618_s16  ;;  %v10578_v23 = vpop.permute.xlu0 %756 }
 0x171   :  { %v1201_v59 = vpop.permute.xlu1 %1200  ;;  %622 = vrot.lane.b32.xlu0 %v10576_v52, %s9615_s30 }
 0x173   :  { %1066 = vrot.lane.b32.xlu1 %v53_v0, %s9620_s18  ;;  %v1049_v44 = vpop.permute.xlu0 %1048 }
 0x175   :  { %v10592_v53 = vpop.permute.xlu1 %462  ;;  %916 = vrot.lane.b32.xlu0 %v10386_v60, %s9619_s17  ;;  %v1168_v60 = vsel %vm136_vm0, %v1166_v40, %v1167_v10 }
 0x177   :  { %261 = vrot.lane.b32.xlu1 %v178_v7, %s9616_s10  ;;  %v10602_v45 = vpop.permute.xlu0 %460 }
 0x179   :  { %v10605_v9 = vpop.permute.xlu1 %1052  ;;  %259 = vrot.lane.b32.xlu0 %v174_v13, %s9616_s10 }
 0x17b   :  { %920 = vrot.lane.b32.xlu1 %v10462_v24, %s9619_s17  ;;  %v10611_v17 = vpop.permute.xlu0 %906 }
 0x17d   :  { %v1351_v37 = vpop.permute.xlu1 %1350  ;;  %772 = vrot.lane.b32.xlu0 %v178_v7, %s9618_s16  ;;  %v1316_v7 = vrot.slane %v53_v0, 2  ;;  %v1676_v0 = vsel %vm1662_vm9, %v1627_v34, %v901_v39 }
 0x17e   :  { %v1725_v54 = vsel %vm1711_vm10, %v1676_v0, %v1049_v44 }
 0x17f   :  { %1216 = vrot.lane.b32.xlu1 %v1168_v60, %s9621_s19  ;;  %v1199_v13 = vpop.permute.xlu0 %1198 }
 0x180   :  { %v1774_v16 = vsel %vm1760_vm11, %v1725_v54, %v1199_v13 }
 0x181   :  { %v10623_v62 = vpop.permute.xlu1 %608  ;;  %1064 = vrot.lane.b32.xlu0 %v10436_v41, %s9620_s18  ;;  %v1317_v41 = vrot.slane %v10597_v63, 2 }
 0x183   :  { %478 = vrot.lane.b32.xlu1 %v395_v33, %s9617_s15  ;;  %v10638_v40 = vpop.permute.xlu0 %249  ;;  %v1318_v43 = vsel %vm353_vm1, %v1316_v7, %v1317_v41 }
 0x185   :  { %v10645_v4 = vpop.permute.xlu1 %1054  ;;  %476 = vrot.lane.b32.xlu0 %v391_v32, %s9617_s15  ;;  %v1775_v32 = vsel %vm1760_vm11, %v1726_v6, %v1201_v59  ;;  %v1482_v59 = vsel %vm1466_vm5, %v9981_v48, %v10446_v30 }
 0x186   :  { %v1824_v44 = vsel %vm1809_vm12, %v1775_v32, %v1351_v37  ;;  %v181_v37 = vsel %vm136_vm0, %v179_v8, %v10682_v47  ;;  %v1531_v13 = vsel %vm1515_vm6, %v1482_v59, %v10469_v25 }
 0x187   :  { %1068 = vrot.lane.b32.xlu1 %v10597_v63, %s9620_s18  ;;  %v10659_v27 = vpop.permute.xlu0 %610  ;;  %v1580_v36 = vsel %vm1564_vm7, %v1531_v13, %v10529_v5  ;;  %v396_v5 = vrot.slane %v10667_v61, 2  ;;  %v1913_v34 = vcombine.high %v1824_v44, %v1824_v44  ;;  %v10782_v13 = vld [vmem:[%s16162_s0 + $0x118] sm:$0x3f] }
 0x189   :  { %v1349_v39 = vpop.permute.xlu1 %1348  ;;  %922 = vrot.lane.b32.xlu0 %v395_v33, %s9619_s17 }
 0x18a   :  { %v1823_v60 = vsel %vm1809_vm12, %v1774_v16, %v1349_v39  ;;  %v1483_v39 = vsel %vm1466_vm5, %v10056_v35, %v10457_v55 }
 0x18b   :  { %v1948_v42 = vcombine.low %v1823_v60, %v1824_v44  ;;  %1366 = vrot.lane.b32.xlu1 %v1318_v43, %s9622_s24  ;;  %v1203_v15 = vpop.permute.xlu0 %1202  ;;  %v398_v43 = vsel %vm353_vm1, %v396_v5, %v10717_v20  ;;  %v1532_v44 = vsel %vm1515_vm6, %v1483_v39, %v10487_v22 }
 0x18d   :  { %v10684_v7 = vpop.permute.xlu1 %466  ;;  %9078 = vmatprep.mubr.msk.f32.mxu0 %vm1974_vm13, %v1948_v42  ;;  %1214 = vrot.lane.b32.xlu0 %v10449_v28, %s9621_s19  ;;  %v1629_v28 = vsel %vm1613_vm8, %v1580_v36, %v10541_v49 }
 0x18e   :  { %v1678_v48 = vsel %vm1662_vm9, %v1629_v28, %v10562_v14  ;;  %v10790_v28 = vrot.slane %v10782_v13, 1 }
 0x18f   :  { %624 = vrot.lane.b32.xlu1 %v10567_v3, %s9615_s30  ;;  %v10698_v33 = vpop.permute.xlu0 %247  ;;  %v1727_v30 = vsel %vm1711_vm10, %v1678_v48, %v10605_v9 }
 0x190   :  { %v1776_v49 = vsel %vm1760_vm11, %v1727_v30, %v1203_v15 }
 0x191   :  { %v10702_v1 = vpop.permute.xlu1 %760  ;;  %265 = vrot.lane.b32.xlu0 %v181_v37, %s9616_s10 }
 0x193   :  { %1070 = vrot.lane.b32.xlu1 %v10667_v61, %s9620_s18  ;;  %v10713_v25 = vpop.permute.xlu0 %758 }
 0x195   :  { %v1353_v26 = vpop.permute.xlu1 %1352  ;;  %626 = vrot.lane.b32.xlu0 %v10667_v61, %s9615_s30 }
 0x196   :  { %v1825_v0 = vsel %vm1809_vm12, %v1776_v49, %v1353_v26  ;;  %v10725_v9 = vpop.f32.mrb[0].mxu0  ;;  %v10801_v49 = vrot.slane %v10782_v13, 2 }
 0x197   :  { %v1949_v14 = vcombine.low %v1913_v34, %v1825_v0  ;;  %1364 = vrot.lane.b32.xlu1 %v10462_v24, %s9622_s24  ;;  %v10727_v6 = vpop.f32.mrb[1].mxu0  ;;  %v1205_v54 = vpop.permute.xlu0 %1204 }
 0x198   :  { %16307 = vst [vmem:[#allocation5_spill] sm:$0xff] %v10727_v6  ;;  %v16325_v6 = vmov 0.0|0.0  }
 0x199   :  { %v10731_v32 = vpop.permute.xlu1 %614  ;;  %9079 = vmatmul.mubr.msk.f32.gmra.mrb[10].mxu0 %vm1974_vm13, %v1949_v14  ;;  %1218 = vrot.lane.b32.xlu0 %v1167_v10, %s9621_s19  ;;  %v1581_v10 = vsel %vm1564_vm7, %v1532_v44, %v10549_v31  ;;  %v1485_v14 = vsel %vm1466_vm5, %v10175_v51, %v10556_v29 }
 0x19a   :  { %v1630_v42 = vsel %vm1613_vm8, %v1581_v10, %v10578_v23  ;;  %v10767_v23 = vld [vmem:[%s16162_s0 + $0x110] sm:$0xff]  ;;  %v1534_v39 = vsel %vm1515_vm6, %v1485_v14, %v10592_v53 }
 0x19b   :  { %482 = vrot.lane.b32.xlu1 %v398_v43, %s9617_s15  ;;  %v10738_v16 = vpop.permute.xlu0 %464  ;;  %v1679_v35 = vsel %vm1662_vm9, %v1630_v42, %v10611_v17  ;;  %v182_v36 = vrot.slane %v10767_v23, 1  ;;  %v399_v34 = vrot.slane %v10767_v23, 2  ;;  %v1583_v51 = vsel %vm1564_vm7, %v1534_v39, %v10659_v27 }
 0x19c   :  { %v1728_v55 = vsel %vm1711_vm10, %v1679_v35, %v10645_v4 }
 0x19d   :  { %v911_v24 = vpop.permute.xlu1 %910  ;;  %263 = vrot.lane.b32.xlu0 %v10585_v11, %s9616_s10  ;;  %v1777_v22 = vsel %vm1760_vm11, %v1728_v55, %v1205_v54  ;;  %v184_v5 = vsel %vm136_vm0, %v182_v36, %v10790_v28  ;;  %v1484_v54 = vsel %vm1466_vm5, %v10074_v50, %v10560_v58  ;;  %v401_v50 = vsel %vm353_vm1, %v399_v34, %v10801_v49  ;;  %v10863_v36 = vld [vmem:[%s16162_s0 + $0x120] sm:$0xff] }
 0x19e   :  { %v1533_v44 = vsel %vm1515_vm6, %v1484_v54, %v10602_v45  ;;  %v1632_v58 = vsel %vm1613_vm8, %v1583_v51, %v10702_v1 }
 0x19f   :  { %776 = vrot.lane.b32.xlu1 %v181_v37, %s9618_s16  ;;  %v909_v60 = vpop.permute.xlu0 %908  ;;  %v1582_v10 = vsel %vm1564_vm7, %v1533_v44, %v10623_v62  ;;  %v1681_v45 = vsel %vm1662_vm9, %v1632_v58, %v911_v24 }
 0x1a0   :  { %v1631_v53 = vsel %vm1613_vm8, %v1582_v10, %v10713_v25 }
 0x1a1   :  { %v10752_v8 = vpop.permute.xlu1 %612  ;;  %774 = vrot.lane.b32.xlu0 %v10585_v11, %s9618_s16  ;;  %v1680_v35 = vsel %vm1662_vm9, %v1631_v53, %v909_v60 }
 0x1a3   :  { %1368 = vrot.lane.b32.xlu1 %v1317_v41, %s9622_s24  ;;  %v1355_v31 = vpop.permute.xlu0 %1354 }
 0x1a4   :  { %v1826_v17 = vsel %vm1809_vm12, %v1777_v22, %v1355_v31 }
 0x1a5   :  { %v1057_v15 = vpop.permute.xlu1 %1056  ;;  %v1914_v59 = vcombine.high %v1826_v17, %v1826_v17  ;;  %1220 = vrot.lane.b32.xlu0 %v181_v37, %s9621_s19 }
 0x1a6   :  { %v1729_v62 = vsel %vm1711_vm10, %v1680_v35, %v1057_v15 }
 0x1a7   :  { %630 = vrot.lane.b32.xlu1 %v10767_v23, %s9615_s30  ;;  %v1950_v11 = vcombine.low %v1826_v17, %v1914_v59  ;;  %v765_v63 = vpop.permute.xlu0 %764  ;;  %v1487_v59 = vsel %vm1466_vm5, %v10250_v12, %v10638_v40 }
 0x1a9   :  { %v10773_v41 = vpop.permute.xlu1 %762  ;;  %480 = vrot.lane.b32.xlu0 %v10617_v38, %s9617_s15  ;;  %9081 = vmatprep.mubr.msk.f32.mxu0 %vm1974_vm13, %v1950_v11  ;;  %v1536_v11 = vsel %vm1515_vm6, %v1487_v59, %v10684_v7  ;;  %v1486_v7 = vsel %vm1466_vm5, %v10167_v56, %v10698_v33 }
 0x1ab   :  { %926 = vrot.lane.b32.xlu1 %v398_v43, %s9619_s17  ;;  %v1059_v4 = vpop.permute.xlu0 %1058 }
 0x1ac   :  { %v1730_v27 = vsel %vm1711_vm10, %v1681_v45, %v1059_v4  ;;  %v1585_v4 = vsel %vm1564_vm7, %v1536_v11, %v10731_v32 }
 0x1ad   :  { %v1207_v37 = vpop.permute.xlu1 %1206  ;;  %924 = vrot.lane.b32.xlu0 %v10617_v38, %s9619_s17  ;;  %v1634_v12 = vsel %vm1613_vm8, %v1585_v4, %v765_v63 }
 0x1ae   :  { %v1778_v1 = vsel %vm1760_vm11, %v1729_v62, %v1207_v37 }
 0x1af   :  { %628 = vrot.lane.b32.xlu1 %v10672_v18, %s9615_s30  ;;  %v915_v48 = vpop.permute.xlu0 %914 }
 0x1b1   :  { %v10792_v30 = vpop.permute.xlu1 %912  ;;  %1370 = vrot.lane.b32.xlu0 %v398_v43, %s9622_s24 }
 0x1b3   :  { %1072 = vrot.lane.b32.xlu1 %v10672_v18, %s9620_s18  ;;  %v1209_v38 = vpop.permute.xlu0 %1208 }
 0x1b4   :  { %v1779_v55 = vsel %vm1760_vm11, %v1730_v27, %v1209_v38  ;;  %v1535_v38 = vsel %vm1515_vm6, %v1486_v7, %v10738_v16  ;;  %v402_v27 = vrot.slane %v10863_v36, 2 }
 0x1b5   :  { %v1357_v26 = vpop.permute.xlu1 %1356  ;;  %v10803_v0 = vpop.f32.mrb[2].mxu0  ;;  %780 = vrot.lane.b32.xlu0 %v184_v5, %s9618_s16 }
 0x1b6   :  { %16308 = vst [vmem:[#allocation6_spill] sm:$0xff] %v10803_v0  ;;  %v10811_v43 = vpop.f32.mrb[3].mxu0  ;;  %v1827_v22 = vsel %vm1809_vm12, %v1778_v1, %v1357_v26 }
 0x1b7   :  { %269 = vrot.lane.b32.xlu1 %v184_v5, %s9616_s10  ;;  %v1063_v29 = vpop.permute.xlu0 %1062 }
 0x1b9   :  { %v10829_v42 = vpop.permute.xlu1 %253  ;;  %1074 = vrot.lane.b32.xlu0 %v10767_v23, %s9620_s18 }
 0x1bb   :  { %930 = vrot.lane.b32.xlu1 %v401_v50, %s9619_s17  ;;  %v1359_v25 = vpop.permute.xlu0 %1358 }
 0x1bc   :  { %v1828_v24 = vsel %vm1809_vm12, %v1779_v55, %v1359_v25 }
 0x1bd   :  { %v1213_v31 = vpop.permute.xlu1 %1212  ;;  %v1951_v60 = vcombine.low %v1827_v22, %v1828_v24  ;;  %778 = vrot.lane.b32.xlu0 %v10682_v47, %s9618_s16 }
 0x1bf   :  { %1224 = vrot.lane.b32.xlu1 %v184_v5, %s9621_s19  ;;  %9082 = vmatmul.mubr.msk.f32.gmra.mrb[12].mxu0 %vm1974_vm13, %v1951_v60  ;;  %v1061_v17 = vpop.permute.xlu0 %1060  ;;  %v1683_v5 = vsel %vm1662_vm9, %v1634_v12, %v915_v48  ;;  %v1584_v48 = vsel %vm1564_vm7, %v1535_v38, %v10752_v8  ;;  %v1915_v8 = vcombine.high %v1828_v24, %v1828_v24  ;;  %v10962_v12 = vld [vmem:[%s16162_s0 + $0x130] sm:$0xff] }
 0x1c0   :  { %v1732_v32 = vsel %vm1711_vm10, %v1683_v5, %v1063_v29  ;;  %v1633_v56 = vsel %vm1613_vm8, %v1584_v48, %v10773_v41  ;;  %v10904_v29 = vld [vmem:[%s16162_s0 + $0x128] sm:$0x3f]  ;;  %v188_v7 = vrot.slane %v10962_v12, 1 }
 0x1c1   :  { %v10846_v15 = vpop.permute.xlu1 %470  ;;  %1222 = vrot.lane.b32.xlu0 %v10682_v47, %s9621_s19  ;;  %v1781_v63 = vsel %vm1760_vm11, %v1732_v32, %v1213_v31  ;;  %v1682_v33 = vsel %vm1662_vm9, %v1633_v56, %v10792_v30  ;;  %v10916_v58 = vrot.slane %v10904_v29, 1  ;;  %v10932_v1 = vrot.slane %v10904_v29, 2 }
 0x1c2   :  { %v1731_v16 = vsel %vm1711_vm10, %v1682_v33, %v1061_v17  ;;  %v405_v56 = vrot.slane %v10962_v12, 2 }
 0x1c3   :  { %486 = vrot.lane.b32.xlu1 %v401_v50, %s9617_s15  ;;  %v10858_v37 = vpop.permute.xlu0 %251  ;;  %v404_v22 = vsel %vm353_vm1, %v402_v27, %v10932_v1 }
 0x1c5   :  { %v1363_v40 = vpop.permute.xlu1 %1362  ;;  %267 = vrot.lane.b32.xlu0 %v10682_v47, %s9616_s10 }
 0x1c6   :  { %v1830_v47 = vsel %vm1809_vm12, %v1781_v63, %v1363_v40 }
 0x1c7   :  { %1078 = vrot.lane.b32.xlu1 %v10863_v36, %s9620_s18  ;;  %v1211_v34 = vpop.permute.xlu0 %1210  ;;  %v1916_v14 = vcombine.high %v1830_v47, %v1830_v47 }
 0x1c8   :  { %v1780_v39 = vsel %vm1760_vm11, %v1731_v16, %v1211_v34 }
 0x1c9   :  { %v10881_v26 = vpop.permute.xlu1 %468  ;;  %928 = vrot.lane.b32.xlu0 %v10717_v20, %s9619_s17  ;;  %v1953_v30 = vcombine.low %v1830_v47, %v1916_v14 }
 0x1cb   :  { %1374 = vrot.lane.b32.xlu1 %v401_v50, %s9622_s24  ;;  %v10891_v54 = vpop.permute.xlu0 %255 }
 0x1cd   :  { %v1361_v44 = vpop.permute.xlu1 %1360  ;;  %1372 = vrot.lane.b32.xlu0 %v10717_v20, %s9622_s24 }
 0x1ce   :  { %v1829_v10 = vsel %vm1809_vm12, %v1780_v39, %v1361_v44 }
 0x1cf   :  { %v1952_v41 = vcombine.low %v1915_v8, %v1829_v10  ;;  %484 = vrot.lane.b32.xlu1 %v10717_v20, %s9617_s15  ;;  %v10899_v51 = vpop.permute.xlu0 %618  ;;  %v185_v20 = vrot.slane %v10863_v36, 1 }
 0x1d1   :  { %v10906_v50 = vpop.permute.xlu1 %472  ;;  %9084 = vmatprep.mubr.msk.f32.mxu0 %vm1974_vm13, %v1952_v41  ;;  %271 = vrot.lane.b32.xlu0 %v10790_v28, %s9616_s10  ;;  %v187_v35 = vsel %vm136_vm0, %v185_v20, %v10916_v58 }
 0x1d2   :  { %9085 = vmatmul.mubr.msk.f32.gmra.mrb[14].mxu0 %vm1974_vm13, %v1953_v30  ;;  %v1489_v30 = vsel %vm1466_vm5, %v10343_v57, %v10829_v42 }
 0x1d3   :  { %1076 = vrot.lane.b32.xlu1 %v10782_v13, %s9620_s18  ;;  %v10918_v53 = vpop.permute.xlu0 %257  ;;  %v1538_v27 = vsel %vm1515_vm6, %v1489_v30, %v10846_v15 }
 0x1d4   :  { %v1587_v57 = vsel %vm1564_vm7, %v1538_v27, %v10899_v51 }
 0x1d5   :  { %v10920_v45 = vpop.permute.xlu1 %768  ;;  %634 = vrot.lane.b32.xlu0 %v10863_v36, %s9615_s30 }
 0x1d7   :  { %488 = vrot.lane.b32.xlu1 %v10801_v49, %s9617_s15  ;;  %v10928_v62 = vpop.permute.xlu0 %616 }
 0x1d9   :  { %v10934_v55 = vpop.permute.xlu1 %620  ;;  %1228 = vrot.lane.b32.xlu0 %v187_v35, %s9621_s19 }
 0x1db   :  { %784 = vrot.lane.b32.xlu1 %v187_v35, %s9618_s16  ;;  %v10938_v25 = vpop.permute.xlu0 %474 }
 0x1dd   :  { %v919_v24 = vpop.permute.xlu1 %918  ;;  %632 = vrot.lane.b32.xlu0 %v10782_v13, %s9615_s30 }
 0x1df   :  { %1378 = vrot.lane.b32.xlu1 %v404_v22, %s9622_s24  ;;  %v767_v31 = vpop.permute.xlu0 %766 }
 0x1e1   :  { %v10945_v60 = vpop.permute.xlu1 %770  ;;  %1226 = vrot.lane.b32.xlu0 %v10790_v28, %s9621_s19 }
 0x1e3   :  { %782 = vrot.lane.b32.xlu1 %v10790_v28, %s9618_s16  ;;  %v10951_v17 = vpop.permute.xlu0 %622  ;;  %v10967_v28 = vld [vmem:[%s16162_s0 + $0x138] sm:$0x3f] }
 0x1e4   :  { %v10978_v32 = vrot.slane %v10967_v28, 1  ;;  %v10997_v33 = vrot.slane %v10967_v28, 2 }
 0x1e5   :  { %v1067_v59 = vpop.permute.xlu1 %1066  ;;  %636 = vrot.lane.b32.xlu0 %v10904_v29, %s9615_s30 }
 0x1e6   :  { %v190_v34 = vsel %vm136_vm0, %v188_v7, %v10978_v32  ;;  %v11009_v8 = vsel %vm353_vm1, %v405_v56, %v10997_v33 }
 0x1e7   :  { %1376 = vrot.lane.b32.xlu1 %v10801_v49, %s9622_s24  ;;  %v917_v11 = vpop.permute.xlu0 %916 }
 0x1e9   :  { %v10957_v4 = vpop.permute.xlu1 %261  ;;  %934 = vrot.lane.b32.xlu0 %v404_v22, %s9619_s17 }
 0x1eb   :  { %932 = vrot.lane.b32.xlu1 %v10801_v49, %s9619_s17  ;;  %v10974_v5 = vpop.permute.xlu0 %259 }
 0x1ec   :  { %v10972_v40 = vpop.f32.mrb[4].mxu0 }
 0x1ed   :  { %16309 = vst [vmem:[#allocation7_spill] sm:$0xff] %v10972_v40  ;;  %v10980_v38 = vpop.permute.xlu1 %920  ;;  %v10982_v63 = vpop.f32.mrb[5].mxu0  ;;  %786 = vrot.lane.b32.xlu0 %v10916_v58, %s9618_s16 }
 0x1ee   :  { %16310 = vst [vmem:[#allocation8_spill] sm:$0xff] %v10982_v63 }
 0x1ef   :  { %936 = vrot.lane.b32.xlu1 %v10932_v1, %s9619_s17  ;;  %v10988_v49 = vpop.permute.xlu0 %772 }
 0x1f1   :  { %v1217_v48 = vpop.permute.xlu1 %1216  ;;  %1082 = vrot.lane.b32.xlu0 %v10962_v12, %s9620_s18 }
 0x1f3   :  { %1232 = vrot.lane.b32.xlu1 %v190_v34, %s9621_s19  ;;  %v1065_v47 = vpop.permute.xlu0 %1064 }
 0x1f5   :  { %v10999_v16 = vpop.permute.xlu1 %478  ;;  %1080 = vrot.lane.b32.xlu0 %v10904_v29, %s9620_s18 }
 0x1f7   :  { %1084 = vrot.lane.b32.xlu1 %v10967_v28, %s9620_s18  ;;  %v11005_v14 = vpop.permute.xlu0 %476 }
 0x1f9   :  { %v1069_v39 = vpop.permute.xlu1 %1068  ;;  %273 = vrot.lane.b32.xlu0 %v187_v35, %s9616_s10  ;;  %v1488_v35 = vsel %vm1466_vm5, %v10255_v2, %v10858_v37  ;;  %v1636_v2 = vsel %vm1613_vm8, %v1587_v57, %v10920_v45 }
 0x1fa   :  { %v1537_v7 = vsel %vm1515_vm6, %v1488_v35, %v10881_v26  ;;  %v1685_v15 = vsel %vm1662_vm9, %v1636_v2, %v919_v24  ;;  %v11061_v24 = vld [vmem:[%s16162_s0 + $0x140] sm:$0xff] }
 0x1fb   :  { %1382 = vrot.lane.b32.xlu1 %v11009_v8, %s9622_s24  ;;  %v11014_v44 = vpop.permute.xlu0 %922  ;;  %v1586_v42 = vsel %vm1564_vm7, %v1537_v7, %v10928_v62  ;;  %v1734_v51 = vsel %vm1711_vm10, %v1685_v15, %v1067_v59 }
 0x1fc   :  { %v1635_v37 = vsel %vm1613_vm8, %v1586_v42, %v767_v31  ;;  %v1783_v45 = vsel %vm1760_vm11, %v1734_v51, %v1217_v48 }
 0x1fd   :  { %v1367_v10 = vpop.permute.xlu1 %1366  ;;  %1230 = vrot.lane.b32.xlu0 %v10916_v58, %s9621_s19  ;;  %v1684_v26 = vsel %vm1662_vm9, %v1635_v37, %v917_v11 }
 0x1fe   :  { %v1733_v62 = vsel %vm1711_vm10, %v1684_v26, %v1065_v47  ;;  %v1832_v59 = vsel %vm1809_vm12, %v1783_v45, %v1367_v10  ;;  %v1490_v10 = vsel %vm1466_vm5, %v10360_v21, %v10891_v54 }
 0x1ff   :  { %1234 = vrot.lane.b32.xlu1 %v10978_v32, %s9621_s19  ;;  %v1215_v41 = vpop.permute.xlu0 %1214  ;;  %v1539_v57 = vsel %vm1515_vm6, %v1490_v10, %v10906_v50  ;;  %v1917_v26 = vcombine.high %v1832_v59, %v1832_v59 }
 0x200   :  { %v1782_v31 = vsel %vm1760_vm11, %v1733_v62, %v1215_v41  ;;  %v191_v41 = vrot.slane %v11061_v24, 1  ;;  %v1588_v37 = vsel %vm1564_vm7, %v1539_v57, %v10934_v55 }
 0x201   :  { %v11023_v20 = vpop.permute.xlu1 %624  ;;  %490 = vrot.lane.b32.xlu0 %v404_v22, %s9617_s15 }
 0x203   :  { %638 = vrot.lane.b32.xlu1 %v10962_v12, %s9615_s30  ;;  %v11035_v56 = vpop.permute.xlu0 %265 }
 0x205   :  { %v11041_v22 = vpop.permute.xlu1 %1070  ;;  %1380 = vrot.lane.b32.xlu0 %v10932_v1, %s9622_s24 }
 0x207   :  { %275 = vrot.lane.b32.xlu1 %v10916_v58, %s9616_s10  ;;  %v11054_v30 = vpop.permute.xlu0 %626  ;;  %v11066_v58 = vld [vmem:[%s16162_s0 + $0x148] sm:$0x3f] }
 0x208   :  { %v11075_v27 = vrot.slane %v11066_v58, 1 }
 0x209   :  { %v1365_v35 = vpop.permute.xlu1 %1364  ;;  %1384 = vrot.lane.b32.xlu0 %v10997_v33, %s9622_s24 }
 0x20a   :  { %v1831_v11 = vsel %vm1809_vm12, %v1782_v31, %v1365_v35  ;;  %v193_v2 = vsel %vm136_vm0, %v191_v41, %v11075_v27  ;;  %v11125_v31 = vrot.slane %v11066_v58, 2 }
 0x20b   :  { %v1954_v48 = vcombine.low %v1831_v11, %v1832_v59  ;;  %788 = vrot.lane.b32.xlu1 %v190_v34, %s9618_s16  ;;  %v1219_v47 = vpop.permute.xlu0 %1218  ;;  %v1491_v11 = vsel %vm1466_vm5, %v10506_v19, %v10918_v53 }
 0x20d   :  { %v11077_v7 = vpop.permute.xlu1 %482  ;;  %9087 = vmatprep.mubr.msk.f32.mxu0 %vm1974_vm13, %v1954_v48  ;;  %277 = vrot.lane.b32.xlu0 %v190_v34, %s9616_s10  ;;  %v1637_v34 = vsel %vm1613_vm8, %v1588_v37, %v10945_v60  ;;  %v1540_v48 = vsel %vm1515_vm6, %v1491_v11, %v10938_v25 }
 0x20e   :  { %v1686_v21 = vsel %vm1662_vm9, %v1637_v34, %v10980_v38  ;;  %v1589_v41 = vsel %vm1564_vm7, %v1540_v48, %v10951_v17  ;;  %v11158_v17 = vld [vmem:[%s16162_s0 + $0x150] sm:$0xff] }
 0x20f   :  { %494 = vrot.lane.b32.xlu1 %v11009_v8, %s9617_s15  ;;  %v11088_v42 = vpop.permute.xlu0 %263  ;;  %v1735_v54 = vsel %vm1711_vm10, %v1686_v21, %v1069_v39  ;;  %v1638_v57 = vsel %vm1613_vm8, %v1589_v41, %v10988_v49 }
 0x210   :  { %v1784_v55 = vsel %vm1760_vm11, %v1735_v54, %v1219_v47  ;;  %v1687_v53 = vsel %vm1662_vm9, %v1638_v57, %v11014_v44 }
 0x211   :  { %v11094_v15 = vpop.permute.xlu1 %776  ;;  %492 = vrot.lane.b32.xlu0 %v10932_v1, %s9617_s15  ;;  %v1736_v25 = vsel %vm1711_vm10, %v1687_v53, %v11041_v22 }
 0x213   :  { %281 = vrot.lane.b32.xlu1 %v193_v2, %s9616_s10  ;;  %v11104_v50 = vpop.permute.xlu0 %774 }
 0x215   :  { %v1369_v51 = vpop.permute.xlu1 %1368  ;;  %938 = vrot.lane.b32.xlu0 %v11009_v8, %s9619_s17  ;;  %v408_v8 = vrot.slane %v11061_v24, 2 }
 0x216   :  { %v1833_v62 = vsel %vm1809_vm12, %v1784_v55, %v1369_v51  ;;  %v11112_v1 = vpop.f32.mrb[6].mxu0  ;;  %v194_v51 = vrot.slane %v11158_v17, 1 }
 0x217   :  { %v1955_v60 = vcombine.low %v1917_v26, %v1833_v62  ;;  %642 = vrot.lane.b32.xlu1 %v11061_v24, %s9615_s30  ;;  %16311 = vst [vmem:[#allocation9_spill] sm:$0xff] %v11112_v1  ;;  %v11114_v38 = vpop.f32.mrb[7].mxu0  ;;  %v1221_v39 = vpop.permute.xlu0 %1220  ;;  %v410_v47 = vsel %vm353_vm1, %v408_v8, %v11125_v31 }
 0x218   :  { %16312 = vst [vmem:[#allocation10_spill] sm:$0xff] %v11114_v38  ;;  %v9583_v38 = vld [vmem:[%s16162_s0 + $0x168] sm:$0x3f] }
 0x219   :  { %v11116_v45 = vpop.permute.xlu1 %630  ;;  %9088 = vmatmul.mubr.msk.f32.gmra.mrb[16].mxu0 %vm1974_vm13, %v1955_v60  ;;  %640 = vrot.lane.b32.xlu0 %v10967_v28, %s9615_s30 }
 0x21b   :  { %279 = vrot.lane.b32.xlu1 %v10978_v32, %s9616_s10  ;;  %v11127_v35 = vpop.permute.xlu0 %480 }
 0x21d   :  { %v11129_v59 = vpop.permute.xlu1 %926  ;;  %1086 = vrot.lane.b32.xlu0 %v11061_v24, %s9620_s18 }
 0x21f   :  { %790 = vrot.lane.b32.xlu1 %v10978_v32, %s9618_s16  ;;  %v925_v10 = vpop.permute.xlu0 %924  ;;  %v1785_v32 = vsel %vm1760_vm11, %v1736_v25, %v1221_v39 }
 0x221   :  { %v11146_v19 = vpop.permute.xlu1 %628  ;;  %498 = vrot.lane.b32.xlu0 %v410_v47, %s9617_s15 }
 0x223   :  { %1236 = vrot.lane.b32.xlu1 %v193_v2, %s9621_s19  ;;  %v1371_v37 = vpop.permute.xlu0 %1370 }
 0x224   :  { %v1834_v49 = vsel %vm1809_vm12, %v1785_v32, %v1371_v37  ;;  %v1493_v32 = vsel %vm1466_vm5, %v10576_v52, %v10957_v4  ;;  %v1492_v37 = vsel %vm1466_vm5, %v10511_v46, %v10974_v5 }
 0x225   :  { %v1073_v34 = vpop.permute.xlu1 %1072  ;;  %v1918_v21 = vcombine.high %v1834_v49, %v1834_v49  ;;  %792 = vrot.lane.b32.xlu0 %v193_v2, %s9618_s16  ;;  %v11175_v2 = vld [vmem:[%s16162_s0 + $0x158] sm:$0x3f] }
 0x226   :  { %v11185_v62 = vrot.slane %v11175_v2, 1  ;;  %v11205_v57 = vrot.slane %v11175_v2, 2 }
 0x227   :  { %646 = vrot.lane.b32.xlu1 %v11158_v17, %s9615_s30  ;;  %v1956_v44 = vcombine.low %v1834_v49, %v1918_v21  ;;  %v11164_v22 = vpop.permute.xlu0 %780  ;;  %v1542_v49 = vsel %vm1515_vm6, %v1493_v32, %v10999_v16  ;;  %v1541_v21 = vsel %vm1515_vm6, %v1492_v37, %v11005_v14 }
 0x228   :  { %v196_v8 = vsel %vm136_vm0, %v194_v51, %v11185_v62  ;;  %v1590_v52 = vsel %vm1564_vm7, %v1541_v21, %v11023_v20  ;;  %v1591_v46 = vsel %vm1564_vm7, %v1542_v49, %v11054_v30 }
 0x229   :  { %v11166_v54 = vpop.permute.xlu1 %269  ;;  %496 = vrot.lane.b32.xlu0 %v10997_v33, %s9617_s15  ;;  %9090 = vmatprep.mubr.msk.f32.mxu0 %vm1974_vm13, %v1956_v44  ;;  %v1640_v5 = vsel %vm1613_vm8, %v1591_v46, %v11094_v15  ;;  %v1639_v16 = vsel %vm1613_vm8, %v1590_v52, %v11104_v50 }
 0x22a   :  { %v1689_v51 = vsel %vm1662_vm9, %v1640_v5, %v11129_v59 }
 0x22b   :  { %942 = vrot.lane.b32.xlu1 %v410_v47, %s9619_s17  ;;  %v1075_v26 = vpop.permute.xlu0 %1074 }
 0x22c   :  { %v1738_v30 = vsel %vm1711_vm10, %v1689_v51, %v1075_v26 }
 0x22d   :  { %v11177_v55 = vpop.permute.xlu1 %930  ;;  %940 = vrot.lane.b32.xlu0 %v10997_v33, %s9619_s17 }
 0x22f   :  { %644 = vrot.lane.b32.xlu1 %v11066_v58, %s9615_s30  ;;  %v11187_v60 = vpop.permute.xlu0 %778 }
 0x231   :  { %v1225_v39 = vpop.permute.xlu1 %1224  ;;  %1386 = vrot.lane.b32.xlu0 %v410_v47, %s9622_s24  ;;  %v411_v47 = vrot.slane %v11158_v17, 2 }
 0x232   :  { %v1787_v15 = vsel %vm1760_vm11, %v1738_v30, %v1225_v39  ;;  %v11262_v39 = vld [vmem:[%s16162_s0 + $0x168] sm:$0x3f]  ;;  %v1495_v30 = vsel %vm1466_vm5, %v10667_v61, %v11035_v56 }
 0x233   :  { %1088 = vrot.lane.b32.xlu1 %v11066_v58, %s9620_s18  ;;  %v1223_v33 = vpop.permute.xlu0 %1222  ;;  %v11225_v44 = vsel %vm353_vm1, %v411_v47, %v11205_v57  ;;  %v1688_v47 = vsel %vm1662_vm9, %v1639_v16, %v925_v10  ;;  %v11268_v52 = vrot.slane %v11262_v39, 1  ;;  %v11283_v51 = vrot.slane %v11262_v39, 2 }
 0x234   :  { %v1737_v20 = vsel %vm1711_vm10, %v1688_v47, %v1073_v34  ;;  %v71_v34 = vld [vmem:[%s16162_s0 + $0x160] sm:$0xff] }
 0x235   :  { %v11194_v11 = vpop.permute.xlu1 %486  ;;  %v11196_v48 = vpop.f32.mrb[8].mxu0  ;;  %796 = vrot.lane.b32.xlu0 %v196_v8, %s9618_s16  ;;  %v1786_v50 = vsel %vm1760_vm11, %v1737_v20, %v1223_v33  ;;  %v197_v21 = vrot.slane %v71_v34, 1 }
 0x236   :  { %v11198_v41 = vpop.f32.mrb[9].mxu0 }
 0x237   :  { %16313 = vst [vmem:[#allocation11_spill] sm:$0xff] %v11198_v41  ;;  %794 = vrot.lane.b32.xlu1 %v11075_v27, %s9618_s16  ;;  %v11207_v53 = vpop.permute.xlu0 %267  ;;  %v11280_v16 = vsel %vm136_vm0, %v197_v21, %v11268_v52 }
 0x239   :  { %v1079_v25 = vpop.permute.xlu1 %1078  ;;  %1090 = vrot.lane.b32.xlu0 %v11158_v17, %s9620_s18 }
 0x23b   :  { %1238 = vrot.lane.b32.xlu1 %v11075_v27, %s9621_s19  ;;  %v929_v4 = vpop.permute.xlu0 %928 }
 0x23d   :  { %v1375_v14 = vpop.permute.xlu1 %1374  ;;  %946 = vrot.lane.b32.xlu0 %v11225_v44, %s9619_s17 }
 0x23e   :  { %v1836_v37 = vsel %vm1809_vm12, %v1787_v15, %v1375_v14  ;;  %v414_v14 = vrot.slane %v71_v34, 2  ;;  %v1544_v15 = vsel %vm1515_vm6, %v1495_v30, %v11077_v7  ;;  %v1494_v7 = vsel %vm1466_vm5, %v10567_v3, %v11088_v42 }
 0x23f   :  { %944 = vrot.lane.b32.xlu1 %v11125_v31, %s9619_s17  ;;  %v1373_v32 = vpop.permute.xlu0 %1372 }
 0x240   :  { %v1835_v59 = vsel %vm1809_vm12, %v1786_v50, %v1373_v32  ;;  %v11297_v50 = vsel %vm353_vm1, %v414_v14, %v11283_v51  ;;  %v1593_v32 = vsel %vm1564_vm7, %v1544_v15, %v11116_v45  ;;  %v1543_v45 = vsel %vm1515_vm6, %v1494_v7, %v11127_v35  ;;  %v11353_v7 = vld [vmem:[%s16162_s0 + $0x170] sm:$0xff] }
 0x241   :  { %v11248_v10 = vpop.permute.xlu1 %484  ;;  %v1957_v49 = vcombine.low %v1835_v59, %v1836_v37  ;;  %1240 = vrot.lane.b32.xlu0 %v196_v8, %s9621_s19  ;;  %v1642_v61 = vsel %vm1613_vm8, %v1593_v32, %v11164_v22 }
 0x243   :  { %1388 = vrot.lane.b32.xlu1 %v11125_v31, %s9622_s24  ;;  %9091 = vmatmul.mubr.msk.f32.gmra.mrb[18].mxu0 %vm1974_vm13, %v1957_v49  ;;  %v11257_v26 = vpop.permute.xlu0 %271  ;;  %v1691_v49 = vsel %vm1662_vm9, %v1642_v61, %v11177_v55  ;;  %v1592_v55 = vsel %vm1564_vm7, %v1543_v45, %v11146_v19  ;;  %v1919_v19 = vcombine.high %v1836_v37, %v1836_v37 }
 0x244   :  { %v1641_v3 = vsel %vm1613_vm8, %v1592_v55, %v11187_v60 }
 0x245   :  { %v1077_v33 = vpop.permute.xlu1 %1076  ;;  %1094 = vrot.lane.b32.xlu0 %v71_v34, %s9620_s18 }
 0x247   :  { %1092 = vrot.lane.b32.xlu1 %v11175_v2, %s9620_s18  ;;  %v11270_v46 = vpop.permute.xlu0 %634 }
 0x249   :  { %v11272_v5 = vpop.permute.xlu1 %488  ;;  %1390 = vrot.lane.b32.xlu0 %v11225_v44, %s9622_s24 }
 0x24b   :  { %1242 = vrot.lane.b32.xlu1 %v11185_v62, %s9621_s19  ;;  %v1229_v47 = vpop.permute.xlu0 %1228 }
 0x24d   :  { %v11285_v20 = vpop.permute.xlu1 %784  ;;  %1244 = vrot.lane.b32.xlu0 %v11280_v16, %s9621_s19 }
 0x24f   :  { %285 = vrot.lane.b32.xlu1 %v196_v8, %s9616_s10  ;;  %v11301_v59 = vpop.permute.xlu0 %632  ;;  %v1740_v8 = vsel %vm1711_vm10, %v1691_v49, %v1079_v25 }
 0x250   :  { %v1789_v22 = vsel %vm1760_vm11, %v1740_v8, %v1229_v47  ;;  %v11358_v8 = vld [vmem:[%s16162_s0 + $0x178] sm:$0x3f] }
 0x251   :  { %v1379_v56 = vpop.permute.xlu1 %1378  ;;  %1394 = vrot.lane.b32.xlu0 %v11297_v50, %s9622_s24  ;;  %v11370_v55 = vrot.slane %v11358_v8, 1 }
 0x252   :  { %v1838_v14 = vsel %vm1809_vm12, %v1789_v22, %v1379_v56 }
 0x253   :  { %283 = vrot.lane.b32.xlu1 %v11075_v27, %s9616_s10  ;;  %v1227_v21 = vpop.permute.xlu0 %1226  ;;  %v1690_v27 = vsel %vm1662_vm9, %v1641_v3, %v929_v4  ;;  %v1920_v35 = vcombine.high %v1838_v14, %v1838_v14 }
 0x254   :  { %v1739_v42 = vsel %vm1711_vm10, %v1690_v27, %v1077_v33 }
 0x255   :  { %v11321_v30 = vpop.permute.xlu1 %782  ;;  %1392 = vrot.lane.b32.xlu0 %v11205_v57, %s9622_s24  ;;  %v1788_v47 = vsel %vm1760_vm11, %v1739_v42, %v1227_v21  ;;  %v1959_v4 = vcombine.low %v1838_v14, %v1920_v35  ;;  %v200_v21 = vrot.slane %v11353_v7, 1 }
 0x257   :  { %287 = vrot.lane.b32.xlu1 %v11185_v62, %s9616_s10  ;;  %v637_v25 = vpop.permute.xlu0 %636  ;;  %v11383_v27 = vsel %vm136_vm0, %v200_v21, %v11370_v55 }
 0x259   :  { %v1377_v15 = vpop.permute.xlu1 %1376  ;;  %502 = vrot.lane.b32.xlu0 %v11225_v44, %s9617_s15 }
 0x25a   :  { %v1837_v32 = vsel %vm1809_vm12, %v1788_v47, %v1377_v15 }
 0x25b   :  { %v1958_v60 = vcombine.low %v1919_v19, %v1837_v32  ;;  %650 = vrot.lane.b32.xlu1 %v71_v34, %s9615_s30  ;;  %v935_v61 = vpop.permute.xlu0 %934  ;;  %v1496_v19 = vsel %vm1466_vm5, %v10672_v18, %v11207_v53  ;;  %v1498_v18 = vsel %vm1466_vm5, %v10782_v13, %v11257_v26 }
 0x25d   :  { %v933_v56 = vpop.permute.xlu1 %932  ;;  %9093 = vmatprep.mubr.msk.f32.mxu0 %vm1974_vm13, %v1958_v60  ;;  %500 = vrot.lane.b32.xlu0 %v11125_v31, %s9617_s15 }
 0x25e   :  { %9094 = vmatmul.mubr.msk.f32.gmra.mrb[20].mxu0 %vm1974_vm13, %v1959_v4 }
 0x25f   :  { %648 = vrot.lane.b32.xlu1 %v11175_v2, %s9615_s30  ;;  %v787_v37 = vpop.permute.xlu0 %786 }
 0x261   :  { %v937_v33 = vpop.permute.xlu1 %936  ;;  %504 = vrot.lane.b32.xlu0 %v11205_v57, %s9617_s15 }
 0x263   :  { %652 = vrot.lane.b32.xlu1 %v11262_v39, %s9615_s30  ;;  %v1083_v44 = vpop.permute.xlu0 %1082 }
 0x265   :  { %v1233_v34 = vpop.permute.xlu1 %1232  ;;  %800 = vrot.lane.b32.xlu0 %v11280_v16, %s9618_s16 }
 0x267   :  { %950 = vrot.lane.b32.xlu1 %v11297_v50, %s9619_s17  ;;  %v1081_v31 = vpop.permute.xlu0 %1080 }
 0x269   :  { %v1085_v49 = vpop.permute.xlu1 %1084  ;;  %798 = vrot.lane.b32.xlu0 %v11185_v62, %s9618_s16  ;;  %v1497_v62 = vsel %vm1466_vm5, %v10767_v23, %v11166_v54  ;;  %v1545_v23 = vsel %vm1515_vm6, %v1496_v19, %v11248_v10  ;;  %v11410_v10 = vrot.slane %v11358_v8, 2 }
 0x26a   :  { %v1546_v42 = vsel %vm1515_vm6, %v1497_v62, %v11194_v11  ;;  %v417_v11 = vrot.slane %v11353_v7, 2  ;;  %v1594_v53 = vsel %vm1564_vm7, %v1545_v23, %v11301_v59 }
 0x26b   :  { %948 = vrot.lane.b32.xlu1 %v11205_v57, %s9619_s17  ;;  %v11366_v22 = vpop.permute.xlu0 %273  ;;  %v1595_v47 = vsel %vm1564_vm7, %v1546_v42, %v11270_v46  ;;  %v1643_v32 = vsel %vm1613_vm8, %v1594_v53, %v11321_v30 }
 0x26c   :  { %v11364_v45 = vpop.f32.mrb[10].mxu0  ;;  %v1644_v54 = vsel %vm1613_vm8, %v1595_v47, %v11285_v20  ;;  %v1547_v20 = vsel %vm1515_vm6, %v1498_v18, %v11272_v5  ;;  %v1692_v26 = vsel %vm1662_vm9, %v1643_v32, %v933_v56 }
 0x26d   :  { %v1383_v14 = vpop.permute.xlu1 %1382  ;;  %v11372_v3 = vpop.f32.mrb[11].mxu0  ;;  %802 = vrot.lane.b32.xlu0 %v11268_v52, %s9618_s16  ;;  %v1693_v46 = vsel %vm1662_vm9, %v1644_v54, %v935_v61  ;;  %v1596_v13 = vsel %vm1564_vm7, %v1547_v20, %v637_v25  ;;  %v1741_v61 = vsel %vm1711_vm10, %v1692_v26, %v1081_v31  ;;  %v419_v25 = vsel %vm353_vm1, %v417_v11, %v11410_v10 }
 0x26e   :  { %v1742_v60 = vsel %vm1711_vm10, %v1693_v46, %v1083_v44  ;;  %v1645_v59 = vsel %vm1613_vm8, %v1596_v13, %v787_v37 }
 0x26f   :  { %952 = vrot.lane.b32.xlu1 %v11283_v51, %s9619_s17  ;;  %v1231_v57 = vpop.permute.xlu0 %1230  ;;  %v1791_v5 = vsel %vm1760_vm11, %v1742_v60, %v1233_v34  ;;  %v1694_v37 = vsel %vm1662_vm9, %v1645_v59, %v937_v33 }
 0x270   :  { %v1790_v30 = vsel %vm1760_vm11, %v1741_v61, %v1231_v57  ;;  %v1840_v56 = vsel %vm1809_vm12, %v1791_v5, %v1383_v14  ;;  %v1743_v34 = vsel %vm1711_vm10, %v1694_v37, %v1085_v49 }
 0x271   :  { %v1235_v35 = vpop.permute.xlu1 %1234  ;;  %1098 = vrot.lane.b32.xlu0 %v11353_v7, %s9620_s18  ;;  %v1921_v62 = vcombine.high %v1840_v56, %v1840_v56 }
 0x272   :  { %v1792_v57 = vsel %vm1760_vm11, %v1743_v34, %v1235_v35 }
 0x273   :  { %1248 = vrot.lane.b32.xlu1 %v11383_v27, %s9621_s19  ;;  %v11407_v15 = vpop.permute.xlu0 %490 }
 0x275   :  { %v11417_v4 = vpop.permute.xlu1 %638  ;;  %1096 = vrot.lane.b32.xlu0 %v11262_v39, %s9620_s18 }
 0x277   :  { %1100 = vrot.lane.b32.xlu1 %v11358_v8, %s9620_s18  ;;  %v1381_v44 = vpop.permute.xlu0 %1380 }
 0x278   :  { %v1839_v21 = vsel %vm1809_vm12, %v1790_v30, %v1381_v44  ;;  %v1499_v30 = vsel %vm1466_vm5, %v10863_v36, %v11366_v22 }
 0x279   :  { %v11433_v39 = vpop.permute.xlu1 %275  ;;  %v1960_v31 = vcombine.low %v1839_v21, %v1840_v56  ;;  %289 = vrot.lane.b32.xlu0 %v11280_v16, %s9616_s10 }
 0x27b   :  { %1398 = vrot.lane.b32.xlu1 %v419_v25, %s9622_s24  ;;  %9096 = vmatprep.mubr.msk.f32.mxu0 %vm1974_vm13, %v1960_v31  ;;  %v1385_v14 = vpop.permute.xlu0 %1384 }
 0x27c   :  { %v1841_v42 = vsel %vm1809_vm12, %v1792_v57, %v1385_v14 }
 0x27d   :  { %v789_v19 = vpop.permute.xlu1 %788  ;;  %v1961_v47 = vcombine.low %v1921_v62, %v1841_v42  ;;  %1246 = vrot.lane.b32.xlu0 %v11268_v52, %s9621_s19 }
 0x27f   :  { %1250 = vrot.lane.b32.xlu1 %v11370_v55, %s9621_s19  ;;  %9097 = vmatmul.mubr.msk.f32.gmra.mrb[22].mxu0 %vm1974_vm13, %v1961_v47  ;;  %v11448_v16 = vpop.permute.xlu0 %277 }
 0x281   :  { %v11450_v33 = vpop.permute.xlu1 %494  ;;  %506 = vrot.lane.b32.xlu0 %v11297_v50, %s9617_s15  ;;  %v11469_v50 = vld [vmem:[%s16162_s0 + $0x180] sm:$0xff] }
 0x282   :  { %v203_v11 = vrot.slane %v11469_v50, 1 }
 0x283   :  { %654 = vrot.lane.b32.xlu1 %v11353_v7, %s9615_s30  ;;  %v11456_v49 = vpop.permute.xlu0 %492  ;;  %v11474_v7 = vld [vmem:[%s16162_s0 + $0x188] sm:$0x3f] }
 0x284   :  { %v11484_v18 = vrot.slane %v11474_v7, 1  ;;  %v11517_v5 = vrot.slane %v11474_v7, 2 }
 0x285   :  { %v11458_v35 = vpop.permute.xlu1 %281  ;;  %1396 = vrot.lane.b32.xlu0 %v11283_v51, %s9622_s24 }
 0x286   :  { %v205_v20 = vsel %vm136_vm0, %v203_v11, %v11484_v18 }
 0x287   :  { %291 = vrot.lane.b32.xlu1 %v11268_v52, %s9616_s10  ;;  %v939_v23 = vpop.permute.xlu0 %938 }
 0x289   :  { %v11464_v54 = vpop.permute.xlu1 %642  ;;  %1400 = vrot.lane.b32.xlu0 %v11410_v10, %s9622_s24 }
 0x28b   :  { %804 = vrot.lane.b32.xlu1 %v11383_v27, %s9618_s16  ;;  %v11480_v52 = vpop.permute.xlu0 %640 }
 0x28d   :  { %v11486_v53 = vpop.permute.xlu1 %279  ;;  %293 = vrot.lane.b32.xlu0 %v11383_v27, %s9616_s10 }
 0x28f   :  { %510 = vrot.lane.b32.xlu1 %v419_v25, %s9617_s15  ;;  %v1087_v46 = vpop.permute.xlu0 %1086 }
 0x291   :  { %v11493_v32 = vpop.permute.xlu1 %790  ;;  %508 = vrot.lane.b32.xlu0 %v11283_v51, %s9617_s15  ;;  %v420_v51 = vrot.slane %v11469_v50, 2 }
 0x292   :  { %v11498_v60 = vpop.f32.mrb[12].mxu0 }
 0x293   :  { %297 = vrot.lane.b32.xlu1 %v205_v20, %s9616_s10  ;;  %v11500_v13 = vpop.f32.mrb[13].mxu0  ;;  %v11502_v26 = vpop.permute.xlu0 %498 }
 0x295   :  { %v1237_v27 = vpop.permute.xlu1 %1236  ;;  %954 = vrot.lane.b32.xlu0 %v419_v25, %s9619_s17  ;;  %v1548_v25 = vsel %vm1515_vm6, %v1499_v30, %v11407_v15 }
 0x296   :  { %v1597_v21 = vsel %vm1564_vm7, %v1548_v25, %v11417_v4  ;;  %v77_v4 = vld [vmem:[%s16162_s0 + $0x190] sm:$0xff] }
 0x297   :  { %658 = vrot.lane.b32.xlu1 %v11469_v50, %s9615_s30  ;;  %v11507_v59 = vpop.permute.xlu0 %792  ;;  %v1646_v36 = vsel %vm1613_vm8, %v1597_v21, %v789_v19 }
 0x298   :  { %v1695_v15 = vsel %vm1662_vm9, %v1646_v36, %v939_v23 }
 0x299   :  { %v11509_v61 = vpop.permute.xlu1 %646  ;;  %656 = vrot.lane.b32.xlu0 %v11358_v8, %s9615_s30  ;;  %v422_v8 = vsel %vm353_vm1, %v420_v51, %v11517_v5  ;;  %v1744_v31 = vsel %vm1711_vm10, %v1695_v15, %v1087_v46  ;;  %v206_v51 = vrot.slane %v77_v4, 1 }
 0x29b   :  { %295 = vrot.lane.b32.xlu1 %v11370_v55, %s9616_s10  ;;  %v11522_v44 = vpop.permute.xlu0 %496 }
 0x29d   :  { %v943_v56 = vpop.permute.xlu1 %942  ;;  %1102 = vrot.lane.b32.xlu0 %v11469_v50, %s9620_s18 }
 0x29f   :  { %806 = vrot.lane.b32.xlu1 %v11370_v55, %s9618_s16  ;;  %v941_v37 = vpop.permute.xlu0 %940  ;;  %v1793_v55 = vsel %vm1760_vm11, %v1744_v31, %v1237_v27  ;;  %v11561_v27 = vld [vmem:[%s16162_s0 + $0x198] sm:$0x3f] }
 0x2a0   :  { %v11568_v30 = vrot.slane %v11561_v27, 1 }
 0x2a1   :  { %v11535_v22 = vpop.permute.xlu1 %644  ;;  %514 = vrot.lane.b32.xlu0 %v422_v8, %s9617_s15 }
 0x2a2   :  { %v11575_v36 = vsel %vm136_vm0, %v206_v51, %v11568_v30 }
 0x2a3   :  { %1252 = vrot.lane.b32.xlu1 %v205_v20, %s9621_s19  ;;  %v1387_v34 = vpop.permute.xlu0 %1386 }
 0x2a4   :  { %v1842_v62 = vsel %vm1809_vm12, %v1793_v55, %v1387_v34  ;;  %v1500_v55 = vsel %vm1466_vm5, %v10904_v29, %v11433_v39  ;;  %v423_v34 = vrot.slane %v77_v4, 2 }
 0x2a5   :  { %v1089_v57 = vpop.permute.xlu1 %1088  ;;  %v11546_v14 = vpop.f32.mrb[14].mxu0  ;;  %v1922_v42 = vcombine.high %v1842_v62, %v1842_v62  ;;  %808 = vrot.lane.b32.xlu0 %v205_v20, %s9618_s16 }
 0x2a6   :  { %v11548_v19 = vpop.f32.mrb[15].mxu0 }
 0x2a7   :  { %662 = vrot.lane.b32.xlu1 %v77_v4, %s9615_s30  ;;  %v1962_v47 = vcombine.low %v1842_v62, %v1922_v42  ;;  %v797_v23 = vpop.permute.xlu0 %796 }
 0x2a9   :  { %v11552_v11 = vpop.permute.xlu1 %794  ;;  %512 = vrot.lane.b32.xlu0 %v11410_v10, %s9617_s15  ;;  %9099 = vmatprep.mubr.msk.f32.mxu0 %vm1974_vm13, %v1962_v47 }
 0x2ab   :  { %958 = vrot.lane.b32.xlu1 %v422_v8, %s9619_s17  ;;  %v1091_v46 = vpop.permute.xlu0 %1090 }
 0x2ad   :  { %v1239_v20 = vpop.permute.xlu1 %1238  ;;  %956 = vrot.lane.b32.xlu0 %v11410_v10, %s9619_s17  ;;  %v1501_v10 = vsel %vm1466_vm5, %v10962_v12, %v11448_v16  ;;  %v11592_v12 = vrot.slane %v11561_v27, 2 }
 0x2af   :  { %660 = vrot.lane.b32.xlu1 %v11474_v7, %s9615_s30  ;;  %v947_v25 = vpop.permute.xlu0 %946 }
 0x2b1   :  { %v945_v21 = vpop.permute.xlu1 %944  ;;  %1402 = vrot.lane.b32.xlu0 %v422_v8, %s9622_s24  ;;  %v1549_v8 = vsel %vm1515_vm6, %v1500_v55, %v11456_v49 }
 0x2b2   :  { %v1598_v29 = vsel %vm1564_vm7, %v1549_v8, %v11480_v52  ;;  %v11611_v52 = vsel %vm353_vm1, %v423_v34, %v11592_v12  ;;  %v11652_v8 = vld [vmem:[%s16162_s0 + $0x1a8] sm:$0x3f] }
 0x2b3   :  { %1104 = vrot.lane.b32.xlu1 %v11474_v7, %s9620_s18  ;;  %v1241_v15 = vpop.permute.xlu0 %1240  ;;  %v1550_v7 = vsel %vm1515_vm6, %v1501_v10, %v11450_v33  ;;  %v1647_v33 = vsel %vm1613_vm8, %v1598_v29, %v11493_v32 }
 0x2b4   :  { %v1599_v16 = vsel %vm1564_vm7, %v1550_v7, %v11464_v54  ;;  %v1696_v47 = vsel %vm1662_vm9, %v1647_v33, %v941_v37 }
 0x2b5   :  { %v1389_v31 = vpop.permute.xlu1 %1388  ;;  %812 = vrot.lane.b32.xlu0 %v11575_v36, %s9618_s16  ;;  %v1648_v49 = vsel %vm1613_vm8, %v1599_v16, %v11507_v59  ;;  %v1745_v51 = vsel %vm1711_vm10, %v1696_v47, %v1089_v57  ;;  %v1503_v57 = vsel %vm1466_vm5, %v11061_v24, %v11458_v35  ;;  %v1502_v24 = vsel %vm1466_vm5, %v10967_v28, %v11486_v53 }
 0x2b6   :  { %v1697_v42 = vsel %vm1662_vm9, %v1648_v49, %v943_v56  ;;  %v1794_v32 = vsel %vm1760_vm11, %v1745_v51, %v1239_v20  ;;  %v1552_v55 = vsel %vm1515_vm6, %v1503_v57, %v11502_v26  ;;  %v1551_v26 = vsel %vm1515_vm6, %v1502_v24, %v11522_v44 }
 0x2b7   :  { %810 = vrot.lane.b32.xlu1 %v11484_v18, %s9618_s16  ;;  %v1095_v39 = vpop.permute.xlu0 %1094  ;;  %v1746_v54 = vsel %vm1711_vm10, %v1697_v42, %v1091_v46  ;;  %v1843_v37 = vsel %vm1809_vm12, %v1794_v32, %v1389_v31  ;;  %v1601_v20 = vsel %vm1564_vm7, %v1552_v55, %v11509_v61  ;;  %v1600_v28 = vsel %vm1564_vm7, %v1551_v26, %v11535_v22 }
 0x2b8   :  { %v1795_v59 = vsel %vm1760_vm11, %v1746_v54, %v1241_v15  ;;  %v1650_v31 = vsel %vm1613_vm8, %v1601_v20, %v797_v23  ;;  %v79_v23 = vld [vmem:[%s16162_s0 + $0x1a0] sm:$0xff]  ;;  %v1649_v44 = vsel %vm1613_vm8, %v1600_v28, %v11552_v11  ;;  %v11665_v49 = vrot.slane %v11652_v8, 1 }
 0x2b9   :  { %v1093_v62 = vpop.permute.xlu1 %1092  ;;  %1106 = vrot.lane.b32.xlu0 %v77_v4, %s9620_s18  ;;  %v1699_v35 = vsel %vm1662_vm9, %v1650_v31, %v947_v25  ;;  %v1698_v29 = vsel %vm1662_vm9, %v1649_v44, %v945_v21  ;;  %v721_v33 = vrot.slane %v79_v23, 1  ;;  %v871_v32 = vrot.slane %v79_v23, 2 }
 0x2ba   :  { %v1748_v61 = vsel %vm1711_vm10, %v1699_v35, %v1095_v39  ;;  %v1747_v22 = vsel %vm1711_vm10, %v1698_v29, %v1093_v62  ;;  %v16176_v26 = vmov 0.0|0.0   ;;  %v11760_v29 = vld [vmem:[%s16162_s0 + $0x1b8] sm:$0x3f] }
 0x2bb   :  { %1254 = vrot.lane.b32.xlu1 %v11484_v18, %s9621_s19  ;;  %v1391_v56 = vpop.permute.xlu0 %1390  ;;  %9426 = vmatprep.subr.bf16.mxu1 %v16176_v26 }
 0x2bc   :  { %v1844_v4 = vsel %vm1809_vm12, %v1795_v59, %v1391_v56  ;;  %v723_v59 = vsel %vm136_vm0, %v721_v33, %v11665_v49  ;;  %v11678_v56 = vrot.slane %v11652_v8, 2  ;;  %9232 = vmatprep.subr.bf16.mxu0 %v16176_v26 }
 0x2bd   :  { %v1243_v10 = vpop.permute.xlu1 %1242  ;;  %v1963_v46 = vcombine.low %v1843_v37, %v1844_v4  ;;  %962 = vrot.lane.b32.xlu0 %v11611_v52, %s9619_s17  ;;  %v1923_v42 = vcombine.high %v1844_v4, %v1844_v4 }
 0x2be   :  { %v1796_v11 = vsel %vm1760_vm11, %v1747_v22, %v1243_v10  ;;  %v873_v10 = vsel %vm353_vm1, %v871_v32, %v11678_v56 }
 0x2bf   :  { %960 = vrot.lane.b32.xlu1 %v11517_v5, %s9619_s17  ;;  %9100 = vmatmul.mubr.msk.f32.gmra.mrb[24].mxu0 %vm1974_vm13, %v1963_v46  ;;  %v1245_v15 = vpop.permute.xlu0 %1244 }
 0x2c0   :  { %v1797_v53 = vsel %vm1760_vm11, %v1748_v61, %v1245_v15 }
 0x2c1   :  { %v11630_v7 = vpop.permute.xlu1 %285  ;;  %1256 = vrot.lane.b32.xlu0 %v11575_v36, %s9621_s19 }
 0x2c2   :  { %v1505_v33 = vsel %vm1466_vm5, %v11158_v17, %v11630_v7 }
 0x2c3   :  { %1404 = vrot.lane.b32.xlu1 %v11517_v5, %s9622_s24  ;;  %v1395_v25 = vpop.permute.xlu0 %1394 }
 0x2c4   :  { %v1846_v34 = vsel %vm1809_vm12, %v1797_v53, %v1395_v25  ;;  %v4707_v53 = vld [vmem:[%s16164_s2 + $0x10] sm:$0xff]  ;;  %v4708_v25 = vld [vmem:[%s16164_s2 + $0x18] sm:$0xff] }
 0x2c5   :  { %v11657_v16 = vpop.permute.xlu1 %283  ;;  %1110 = vrot.lane.b32.xlu0 %v79_v23, %s9620_s18  ;;  %v1924_v39 = vcombine.high %v1846_v34, %v1846_v34  ;;  %v9236_v22 = vpack.c.bf16 %v4708_v25, %v4707_v53 }
 0x2c7   :  { %1108 = vrot.lane.b32.xlu1 %v11561_v27, %s9620_s18  ;;  %v1393_v47 = vpop.permute.xlu0 %1392  ;;  %v1965_v62 = vcombine.low %v1846_v34, %v1924_v39  ;;  %v11755_v34 = vld [vmem:[%s16162_s0 + $0x1b0] sm:$0xff]  ;;  %v11768_v39 = vld [vmem:[%s16168_s6] ss:$0 sm:$0xff] }
 0x2c8   :  { %v1845_v51 = vsel %vm1809_vm12, %v1796_v11, %v1393_v47  ;;  %v1169_v47 = vrot.slane %v11755_v34, 1  ;;  %v2168_v17 = vadd.f32 %v11768_v39, %v11372_v3 }
 0x2c9   :  { %v11669_v54 = vpop.permute.xlu1 %287  ;;  %v1964_v21 = vcombine.low %v1923_v42, %v1845_v51  ;;  %1406 = vrot.lane.b32.xlu0 %v11611_v52, %s9622_s24  ;;  %v4709_v51 = vld [vmem:[%s16164_s2 + $0x20] sm:$0xff] }
 0x2ca   :  { %v11819_v53 = vmax.f32 %v2168_v17, 0.0 }
 0x2cb   :  { %1258 = vrot.lane.b32.xlu1 %v11568_v30, %s9621_s19  ;;  %9102 = vmatprep.mubr.msk.f32.mxu0 %vm1974_vm13, %v1964_v21  ;;  %v503_v37 = vpop.permute.xlu0 %502 }
 0x2cc   :  { %9103 = vmatmul.mubr.msk.f32.gmra.mrb[26].mxu0 %vm1974_vm13, %v1965_v62  ;;  %v1554_v7 = vsel %vm1515_vm6, %v1505_v33, %v503_v37  ;;  %v2173_v37 = vadd.f32 %v11364_v45, %v11768_v39  ;;  %v4712_v45 = vld [vmem:[%s16164_s2 + $0x38] sm:$0xff]  ;;  %16314 = vst [vmem:[#allocation12_spill] sm:$0xff] %v11819_v53  ;;  %v2378_v17 = vcombine.high %v11819_v53, %v11819_v53 }
 0x2cd   :  { %v11681_v4 = vpop.permute.xlu1 %650  ;;  %1260 = vrot.lane.b32.xlu0 %v723_v59, %s9621_s19 }
 0x2cf   :  { %301 = vrot.lane.b32.xlu1 %v11575_v36, %s9616_s10  ;;  %v11689_v57 = vpop.permute.xlu0 %500 }
 0x2d1   :  { %v11691_v46 = vpop.permute.xlu1 %648  ;;  %1410 = vrot.lane.b32.xlu0 %v873_v10, %s9622_s24 }
 0x2d3   :  { %299 = vrot.lane.b32.xlu1 %v11484_v18, %s9616_s10  ;;  %v11696_v55 = vpop.permute.xlu0 %504 }
 0x2d5   :  { %v11698_v20 = vpop.permute.xlu1 %652  ;;  %1408 = vrot.lane.b32.xlu0 %v11592_v12, %s9622_s24 }
 0x2d7   :  { %303 = vrot.lane.b32.xlu1 %v11568_v30, %s9616_s10  ;;  %v11704_v36 = vpop.permute.xlu0 %800 }
 0x2d9   :  { %v11706_v15 = vpop.permute.xlu1 %950  ;;  %518 = vrot.lane.b32.xlu0 %v11611_v52, %s9617_s15 }
 0x2db   :  { %666 = vrot.lane.b32.xlu1 %v79_v23, %s9615_s30  ;;  %v11711_v18 = vpop.permute.xlu0 %798 }
 0x2dd   :  { %v11713_v31 = vpop.permute.xlu1 %948  ;;  %516 = vrot.lane.b32.xlu0 %v11517_v5, %s9617_s15  ;;  %v4705_v5 = vld [vmem:[%s16164_s2] sm:$0xff] }
 0x2df   :  { %664 = vrot.lane.b32.xlu1 %v11561_v27, %s9615_s30  ;;  %v11719_v24 = vpop.permute.xlu0 %802  ;;  %v4706_v27 = vld [vmem:[%s16164_s2 + $0x8] sm:$0xff] }
 0x2e0   :  { %v9233_v23 = vpack.c.bf16 %v4706_v27, %v4705_v5 }
 0x2e1   :  { %v11721_v35 = vpop.permute.xlu1 %952  ;;  %520 = vrot.lane.b32.xlu0 %v11592_v12, %s9617_s15 }
 0x2e2   :  { %9442 = vmatpush1.bf16.msra.mxu1 %v9233_v23  ;;  %9234 = vmatpush1.bf16.msra.mxu0 %v9233_v23 }
 0x2e3   :  { %668 = vrot.lane.b32.xlu1 %v11652_v8, %s9615_s30  ;;  %v11727_v52 = vpop.permute.xlu0 %1098  ;;  %9427 = vmatprep.subr.bf16.mxu1 %v16176_v26 }
 0x2e4   :  { %9235 = vmatprep.subr.bf16.mxu0 %v16176_v26 }
 0x2e5   :  { %v11737_v61 = vpop.permute.xlu1 %1248  ;;  %816 = vrot.lane.b32.xlu0 %v723_v59, %s9618_s16  ;;  %v1504_v59 = vsel %vm1466_vm5, %v11066_v58, %v11657_v16  ;;  %v1603_v58 = vsel %vm1564_vm7, %v1554_v7, %v11681_v4  ;;  %v2178_v4 = vadd.f32 %v11768_v39, %v11500_v13 }
 0x2e6   :  { %9443 = vmatpush1.bf16.msra.mxu1 %v9236_v22  ;;  %9237 = vmatpush1.bf16.msra.mxu0 %v9236_v22  ;;  %v1553_v3 = vsel %vm1515_vm6, %v1504_v59, %v11689_v57  ;;  %v4711_v57 = vld [vmem:[%s16164_s2 + $0x30] sm:$0xff]  ;;  %v1652_v25 = vsel %vm1613_vm8, %v1603_v58, %v11704_v36 }
 0x2e7   :  { %966 = vrot.lane.b32.xlu1 %v873_v10, %s9619_s17  ;;  %v11741_v28 = vpop.permute.xlu0 %1096  ;;  %9428 = vmatprep.subr.bf16.mxu1 %v16176_v26  ;;  %v9242_v33 = vpack.c.bf16 %v4712_v45, %v4711_v57  ;;  %v2308_v59 = vmax.f32 %v2178_v4, 0.0 }
 0x2e8   :  { %9238 = vmatprep.subr.bf16.mxu0 %v16176_v26 }
 0x2e9   :  { %v11750_v44 = vpop.permute.xlu1 %1100  ;;  %814 = vrot.lane.b32.xlu0 %v11568_v30, %s9618_s16  ;;  %v1170_v30 = vrot.slane %v11760_v29, 1  ;;  %v2380_v57 = vcombine.high %v2308_v59, %v2308_v59 }
 0x2eb   :  { %964 = vrot.lane.b32.xlu1 %v11592_v12, %s9619_s17  ;;  %v11775_v11 = vpop.permute.xlu0 %289  ;;  %v4710_v12 = vld [vmem:[%s16164_s2 + $0x28] sm:$0xff]  ;;  %v1171_v23 = vsel %vm136_vm0, %v1169_v47, %v1170_v30  ;;  %v1602_v47 = vsel %vm1564_vm7, %v1553_v3, %v11691_v46 }
 0x2ec   :  { %v9089_v42 = vpop.f32.mrb[16].mxu0  ;;  %v9239_v32 = vpack.c.bf16 %v4710_v12, %v4709_v51  ;;  %v1651_v12 = vsel %vm1613_vm8, %v1602_v47, %v11711_v18  ;;  %v4714_v18 = vld [vmem:[%s16164_s2 + $0x48] sm:$0xff] }
 0x2ed   :  { %v11789_v21 = vpop.permute.xlu1 %1398  ;;  %v2197_v62 = vpop.f32.mrb[17].mxu0  ;;  %v2203_v10 = vadd.f32 %v9089_v42, %v11768_v39  ;;  %818 = vrot.lane.b32.xlu0 %v11665_v49, %s9618_s16  ;;  %v1506_v42 = vsel %vm1466_vm5, %v11175_v2, %v11669_v54  ;;  %v1701_v2 = vsel %vm1662_vm9, %v1652_v25, %v11706_v15 }
 0x2ee   :  { %v2198_v5 = vadd.f32 %v11768_v39, %v2197_v62  ;;  %9444 = vmatpush1.bf16.msra.mxu1 %v9239_v32  ;;  %9240 = vmatpush1.bf16.msra.mxu0 %v9239_v32  ;;  %v1555_v36 = vsel %vm1515_vm6, %v1506_v42, %v11696_v55  ;;  %v4713_v55 = vld [vmem:[%s16164_s2 + $0x40] sm:$0xff]  ;;  %v1750_v15 = vsel %vm1711_vm10, %v1701_v2, %v11727_v52  ;;  %v2307_v32 = vmax.f32 %v2173_v37, 0.0 }
 0x2ef   :  { %968 = vrot.lane.b32.xlu1 %v11678_v56, %s9619_s17  ;;  %v1247_v27 = vpop.permute.xlu0 %1246  ;;  %9429 = vmatprep.subr.bf16.mxu1 %v16176_v26  ;;  %v11831_v51 = vmax.f32 %v2203_v10, 0.0  ;;  %v9245_v62 = vpack.c.bf16 %v4714_v18, %v4713_v55  ;;  %v1604_v10 = vsel %vm1564_vm7, %v1555_v36, %v11698_v20  ;;  %v1319_v37 = vrot.slane %v11755_v34, 2 }
 0x2f0   :  { %v11807_v16 = vmax.f32 %v2198_v5, 0.0  ;;  %9241 = vmatprep.subr.bf16.mxu0 %v16176_v26  ;;  %v1700_v5 = vsel %vm1662_vm9, %v1651_v12, %v11713_v31  ;;  %v1653_v52 = vsel %vm1613_vm8, %v1604_v10, %v11719_v24  ;;  %v1320_v20 = vrot.slane %v11760_v29, 2  ;;  %v4715_v24 = vld [vmem:[%s16164_s2 + $0x50] sm:$0xff] }
 0x2f1   :  { %v1251_v22 = vpop.permute.xlu1 %1250  ;;  %1114 = vrot.lane.b32.xlu0 %v11755_v34, %s9620_s18  ;;  %v1749_v3 = vsel %vm1711_vm10, %v1700_v5, %v11741_v28  ;;  %v1799_v31 = vsel %vm1760_vm11, %v1750_v15, %v11737_v61  ;;  %v4716_v28 = vld [vmem:[%s16164_s2 + $0x58] sm:$0xff]  ;;  %v11892_v61 = vcombine.low %v2378_v17, %v2307_v32  ;;  %v1702_v45 = vsel %vm1662_vm9, %v1653_v52, %v11721_v35  ;;  %v4719_v15 = vld [vmem:[%s16164_s2 + $0x70] sm:$0xff] }
 0x2f2   :  { %v2384_v13 = vcombine.high %v11807_v16, %v11807_v16  ;;  %9445 = vmatpush1.bf16.msra.mxu1 %v9242_v33  ;;  %9243 = vmatpush1.bf16.msra.mxu0 %v9242_v33  ;;  %v11899_v25 = vcombine.high %v2307_v32, %v2307_v32  ;;  %v1321_v33 = vsel %vm353_vm1, %v1319_v37, %v1320_v20 }
 0x2f3   :  { %1264 = vrot.lane.b32.xlu1 %v1171_v23, %s9621_s19  ;;  %v11844_v54 = vpop.permute.xlu0 %506  ;;  %9430 = vmatprep.subr.bf16.mxu1 %v16176_v26  ;;  %v2183_v35 = vadd.f32 %v11498_v60, %v11768_v39  ;;  %v2475_v2 = vrot.slane %v11892_v61, 1  ;;  %v2163_v52 = vadd.f32 %v11196_v48, %v11768_v39  ;;  %v4722_v48 = vld [vmem:[%s16164_s2 + $0x88] sm:$0xff] }
 0x2f4   :  { %v11847_v46 = vcombine.low %v2384_v13, %v11831_v51  ;;  %9244 = vmatprep.subr.bf16.mxu0 %v16176_v26  ;;  %16315 = vst [vmem:[#allocation13_spill] sm:$0xff] %v11899_v25  ;;  %v11933_v17 = vrot.slane %v11899_v25, 1 }
 0x2f5   :  { %v11860_v7 = vpop.permute.xlu1 %654  ;;  %1112 = vrot.lane.b32.xlu0 %v11652_v8, %s9620_s18  ;;  %v1798_v8 = vsel %vm1760_vm11, %v1749_v3, %v1247_v27  ;;  %v9248_v27 = vpack.c.bf16 %v4716_v28, %v4715_v24  ;;  %v11927_v55 = vmax.f32 %v2183_v35, 0.0  ;;  %v2655_v28 = vrot.slane %v11892_v61, 2 }
 0x2f6   :  { %9446 = vmatpush1.bf16.msra.mxu1 %v9245_v62  ;;  %9246 = vmatpush1.bf16.msra.mxu0 %v9245_v62  ;;  %16316 = vst [vmem:[#allocation14_spill] sm:$0xff] %v11933_v17  ;;  %v4720_v62 = vld [vmem:[%s16164_s2 + $0x78] sm:$0xff]  ;;  %v11948_v10 = vsel %vm136_vm0, %v2475_v2, %v11933_v17 }
 0x2f7   :  { %1262 = vrot.lane.b32.xlu1 %v11665_v49, %s9621_s19  ;;  %v1397_v58 = vpop.permute.xlu0 %1396  ;;  %9431 = vmatprep.subr.bf16.mxu1 %v16176_v26  ;;  %v1848_v49 = vsel %vm1809_vm12, %v1799_v31, %v11789_v21  ;;  %v1751_v21 = vsel %vm1711_vm10, %v1702_v45, %v11750_v44  ;;  %v4717_v44 = vld [vmem:[%s16164_s2 + $0x60] sm:$0xff]  ;;  %v11962_v37 = vrot.slane %v11927_v55, 2  ;;  %v2188_v31 = vadd.f32 %v11768_v39, %v11548_v19 }
 0x2f8   :  { %v1847_v34 = vsel %vm1809_vm12, %v1798_v8, %v1397_v58  ;;  %9247 = vmatprep.subr.bf16.mxu0 %v16176_v26  ;;  %v1925_v42 = vcombine.high %v1848_v49, %v1848_v49  ;;  %v1800_v47 = vsel %vm1760_vm11, %v1751_v21, %v1251_v22  ;;  %v11921_v22 = vcombine.low %v2308_v59, %v2380_v57  ;;  %v4724_v57 = vld [vmem:[%s16164_s2 + $0x98] sm:$0xff] }
 0x2f9   :  { %v11890_v23 = vpop.permute.xlu1 %291  ;;  %v1966_v4 = vcombine.low %v1847_v34, %v1848_v49  ;;  %1116 = vrot.lane.b32.xlu0 %v11760_v29, %s9620_s18  ;;  %v4718_v29 = vld [vmem:[%s16164_s2 + $0x68] sm:$0xff]  ;;  %v9254_v59 = vpack.c.bf16 %v4720_v62, %v4719_v15  ;;  %16318 = vst [vmem:[#allocation16_spill] sm:$0xff] %v11962_v37  ;;  %v2305_v49 = vmax.f32 %v2163_v52, 0.0  ;;  %v11988_v34 = vrot.slane %v11899_v25, 2  ;;  %v4727_v62 = vld [vmem:[%s16164_s2 + $0xb0] sm:$0xff]  ;;  %s9635_s18 = smov [#allocation2]  }
 0x2fa   :  { %9447 = vmatpush1.bf16.msra.mxu1 %v9248_v27  ;;  %v9251_v60 = vpack.c.bf16 %v4718_v29, %v4717_v44  ;;  %9249 = vmatpush1.bf16.msra.mxu0 %v9248_v27  ;;  %v2658_v5 = vrot.slane %v11921_v22, 2  ;;  %v4723_v27 = vld [vmem:[%s16164_s2 + $0x90] sm:$0xff]  ;;  %v2310_v45 = vmax.f32 %v2188_v31, 0.0  ;;  %v4725_v44 = vld [vmem:[%s16164_s2 + $0xa0] sm:$0xff]  ;;  %v4726_v29 = vld [vmem:[%s16164_s2 + $0xa8] sm:$0xff] }
 0x2fb   :  { %1266 = vrot.lane.b32.xlu1 %v1170_v30, %s9621_s19  ;;  %9105 = vmatprep.mubr.msk.f32.mxu0 %vm1974_vm13, %v1966_v4  ;;  %v1401_v13 = vpop.permute.xlu0 %1400  ;;  %16320 = vst [vmem:[#allocation18_spill] sm:$0xff] %v11988_v34  ;;  %v9260_v21 = vpack.c.bf16 %v4724_v57, %v4723_v27  ;;  %v2377_v35 = vcombine.high %v2305_v49, %v2305_v49 }
 0x2fc   :  { %9432 = vmatprep.subr.bf16.mxu1 %v16176_v26  ;;  %v1849_v30 = vsel %vm1809_vm12, %v1800_v47, %v1401_v13  ;;  %9250 = vmatprep.subr.bf16.mxu0 %v16176_v26  ;;  %v11979_v24 = vsel %vm353_vm1, %v2658_v5, %v11962_v37  ;;  %v12013_v13 = vrot.slane %v11819_v53, 2 }
 0x2fd   :  { %v11919_v36 = vpop.permute.xlu1 %804  ;;  %v1967_v12 = vcombine.low %v1925_v42, %v1849_v30  ;;  %1414 = vrot.lane.b32.xlu0 %v1321_v33, %s9622_s24  ;;  %16319 = vst [vmem:[#allocation17_spill] sm:$0xff] %v11979_v24  ;;  %v12003_v33 = vsel %vm353_vm1, %v2655_v28, %v11988_v34  ;;  %v2381_v42 = vcombine.high %v11927_v55, %v11927_v55  ;;  %v4730_v28 = vld [vmem:[%s16164_s2 + $0xc8] sm:$0xff] }
 0x2fe   :  { %9448 = vmatpush1.bf16.msra.mxu1 %v9251_v60  ;;  %9252 = vmatpush1.bf16.msra.mxu0 %v9251_v60  ;;  %16321 = vst [vmem:[#allocation19_spill] sm:$0xff] %v12003_v33  ;;  %16322 = vst [vmem:[#allocation20_spill] sm:$0xff] %v12013_v13  ;;  %v12029_v2 = vcombine.low %v2305_v49, %v2377_v35 }
 0x2ff   :  { %1416 = vrot.lane.b32.xlu1 %v1320_v20, %s9622_s24  ;;  %9106 = vmatmul.mubr.msk.f32.gmra.mrb[28].mxu0 %vm1974_vm13, %v1967_v12  ;;  %v11930_v18 = vpop.permute.xlu0 %293  ;;  %v4721_v20 = vld [vmem:[%s16164_s2 + $0x80] sm:$0xff]  ;;  %v12022_v30 = vcombine.low %v2381_v42, %v2310_v45  ;;  %v9263_v12 = vpack.c.bf16 %v4726_v29, %v4725_v44  ;;  %v4731_v29 = vld [vmem:[%s16164_s2 + $0xd0] sm:$0xff] }
 0x300   :  { %9433 = vmatprep.subr.bf16.mxu1 %v16176_v26  ;;  %9253 = vmatprep.subr.bf16.mxu0 %v16176_v26  ;;  %v9257_v58 = vpack.c.bf16 %v4722_v48, %v4721_v20  ;;  %v12044_v20 = vcombine.high %v2310_v45, %v2310_v45  ;;  %v2472_v48 = vrot.slane %v12029_v2, 1 }
 0x301   :  { %v11942_v32 = vpop.permute.xlu1 %510  ;;  %1412 = vrot.lane.b32.xlu0 %v11678_v56, %s9622_s24  ;;  %v11959_v56 = vrot.slane %v11819_v53, 1  ;;  %v2481_v45 = vrot.slane %v12022_v30, 1  ;;  %v2661_v41 = vrot.slane %v12022_v30, 2  ;;  %s9634_s24 = smov 112  }
 0x302   :  { %9449 = vmatpush1.bf16.msra.mxu1 %v9254_v59  ;;  %9255 = vmatpush1.bf16.msra.mxu0 %v9254_v59  ;;  %v4728_v59 = vld [vmem:[%s16164_s2 + $0xb8] sm:$0xff]  ;;  %v12201_v1 = vrot.slane %v12044_v20, 2 }
 0x303   :  { %2542 = vrot.lane.b32.xlu1 %v11948_v10, %s9625_s25  ;;  %v11956_v3 = vpop.permute.xlu0 %508  ;;  %16317 = vst [vmem:[#allocation15_spill] sm:$0xff] %v11959_v56  ;;  %9434 = vmatprep.subr.bf16.mxu1 %v16176_v26  ;;  %v9266_v52 = vpack.c.bf16 %v4728_v59, %v4727_v62  ;;  %v12063_v27 = vsel %vm136_vm0, %v2472_v48, %v11959_v56  ;;  %v9581_v48 = vld [vmem:[%s16162_s0 + $0x160] sm:$0xff] }
 0x304   :  { %9256 = vmatprep.subr.bf16.mxu0 %v16176_v26  ;;  %16323 = vst [vmem:[#allocation21_spill] sm:$0xff] %v12063_v27 }
 0x305   :  { %v11973_v8 = vpop.permute.xlu1 %297  ;;  %2540 = vrot.lane.b32.xlu0 %v11959_v56, %s9625_s25 }
 0x306   :  { %9450 = vmatpush1.bf16.msra.mxu1 %v9257_v58  ;;  %9258 = vmatpush1.bf16.msra.mxu0 %v9257_v58  ;;  %v4729_v58 = vld [vmem:[%s16164_s2 + $0xc0] sm:$0xff] }
 0x307   :  { %3016 = vrot.lane.b32.xlu1 %v11979_v24, %s9625_s25  ;;  %v11985_v19 = vpop.permute.xlu0 %954  ;;  %9435 = vmatprep.subr.bf16.mxu1 %v16176_v26  ;;  %v9269_v57 = vpack.c.bf16 %v4730_v28, %v4729_v58  ;;  %v1507_v58 = vsel %vm1466_vm5, %v9581_v48, %v11775_v11  ;;  %v2652_v48 = vrot.slane %v12029_v2, 2 }
 0x308   :  { %9259 = vmatprep.subr.bf16.mxu0 %v16176_v26 }
 0x309   :  { %v11997_v4 = vpop.permute.xlu1 %658  ;;  %3014 = vrot.lane.b32.xlu0 %v11988_v34, %s9625_s25 }
 0x30a   :  { %9451 = vmatpush1.bf16.msra.mxu1 %v9260_v21  ;;  %9261 = vmatpush1.bf16.msra.mxu0 %v9260_v21  ;;  %v12069_v21 = vrot.slane %v12044_v20, 1 }
 0x30b   :  { %2722 = vrot.lane.b32.xlu1 %v12003_v33, %s9626_s8  ;;  %v12010_v47 = vpop.permute.xlu0 %656  ;;  %9436 = vmatprep.subr.bf16.mxu1 %v16176_v26 }
 0x30c   :  { %9262 = vmatprep.subr.bf16.mxu0 %v16176_v26 }
 0x30d   :  { %v12024_v60 = vpop.permute.xlu1 %295  ;;  %2720 = vrot.lane.b32.xlu0 %v12013_v13, %s9626_s8 }
 0x30e   :  { %9452 = vmatpush1.bf16.msra.mxu1 %v9263_v12  ;;  %9264 = vmatpush1.bf16.msra.mxu0 %v9263_v12  ;;  %v4732_v12 = vld [vmem:[%s16164_s2 + $0xd8] sm:$0xff] }
 0x30f   :  { %3138 = vrot.lane.b32.xlu1 %v12022_v30, %s9626_s8  ;;  %v12033_v15 = vpop.permute.xlu0 %1102  ;;  %9437 = vmatprep.subr.bf16.mxu1 %v16176_v26  ;;  %v9272_v59 = vpack.c.bf16 %v4732_v12, %v4731_v29  ;;  %v4734_v29 = vld [vmem:[%s16164_s2 + $0xe8] sm:$0xff]  ;;  %v1556_v12 = vsel %vm1515_vm6, %v1507_v58, %v11844_v54  ;;  %v4735_v54 = vld [vmem:[%s16164_s2 + $0xf0] sm:$0xff] }
 0x310   :  { %9265 = vmatprep.subr.bf16.mxu0 %v16176_v26  ;;  %v1605_v56 = vsel %vm1564_vm7, %v1556_v12, %v11860_v7  ;;  %v12142_v7 = vsel %vm353_vm1, %v2652_v48, %v12013_v13 }
 0x311   :  { %v12042_v5 = vpop.permute.xlu1 %806  ;;  %3136 = vrot.lane.b32.xlu0 %v11927_v55, %s9626_s8  ;;  %v1654_v58 = vsel %vm1613_vm8, %v1605_v56, %v11919_v36  ;;  %16324 = vst [vmem:[#allocation22_spill] sm:$0xff] %v12142_v7  ;;  %v2193_v56 = vadd.f32 %v11546_v14, %v11768_v39 }
 0x312   :  { %9453 = vmatpush1.bf16.msra.mxu1 %v9266_v52  ;;  %9267 = vmatpush1.bf16.msra.mxu0 %v9266_v52  ;;  %v12093_v52 = vsel %vm136_vm0, %v2481_v45, %v12069_v21  ;;  %v4733_v45 = vld [vmem:[%s16164_s2 + $0xe0] sm:$0xff]  ;;  %v1703_v12 = vsel %vm1662_vm9, %v1654_v58, %v11985_v19 }
 0x313   :  { %2842 = vrot.lane.b32.xlu1 %v11899_v25, %s9627_s14  ;;  %v12052_v31 = vpop.permute.xlu0 %514  ;;  %9438 = vmatprep.subr.bf16.mxu1 %v16176_v26  ;;  %v9275_v11 = vpack.c.bf16 %v4734_v29, %v4733_v45  ;;  %v1752_v36 = vsel %vm1711_vm10, %v1703_v12, %v12033_v15  ;;  %v2311_v14 = vmax.f32 %v2193_v56, 0.0 }
 0x314   :  { %9268 = vmatprep.subr.bf16.mxu0 %v16176_v26 }
 0x315   :  { %v1253_v49 = vpop.permute.xlu1 %1252  ;;  %2538 = vrot.lane.b32.xlu0 %v12063_v27, %s9625_s25 }
 0x316   :  { %v12074_v35 = vpop.f32.mrb[18].mxu0  ;;  %9454 = vmatpush1.bf16.msra.mxu1 %v9269_v57  ;;  %9270 = vmatpush1.bf16.msra.mxu0 %v9269_v57  ;;  %v12106_v57 = vrot.slane %v11927_v55, 1 }
 0x317   :  { %3012 = vrot.lane.b32.xlu1 %v12003_v33, %s9625_s25  ;;  %v12076_v42 = vpop.f32.mrb[19].mxu0  ;;  %v12078_v44 = vpop.permute.xlu0 %808  ;;  %9439 = vmatprep.subr.bf16.mxu1 %v16176_v26 }
 0x318   :  { %9271 = vmatprep.subr.bf16.mxu0 %v16176_v26 }
 0x319   :  { %v12087_v62 = vpop.permute.xlu1 %662  ;;  %2844 = vrot.lane.b32.xlu0 %v11921_v22, %s9627_s14 }
 0x31a   :  { %9455 = vmatpush1.bf16.msra.mxu1 %v9272_v59  ;;  %9273 = vmatpush1.bf16.msra.mxu0 %v9272_v59  ;;  %v4736_v59 = vld [vmem:[%s16164_s2 + $0xf8] sm:$0xff] }
 0x31b   :  { %3264 = vrot.lane.b32.xlu1 %v12093_v52, %s9627_s14  ;;  %v12103_v28 = vpop.permute.xlu0 %512  ;;  %9440 = vmatprep.subr.bf16.mxu1 %v16176_v26  ;;  %v9278_v29 = vpack.c.bf16 %v4736_v59, %v4735_v54 }
 0x31c   :  { %9274 = vmatprep.subr.bf16.mxu0 %v16176_v26 }
 0x31d   :  { %v12117_v33 = vpop.permute.xlu1 %958  ;;  %3262 = vrot.lane.b32.xlu0 %v12106_v57, %s9627_s14 }
 0x31e   :  { %9456 = vmatpush1.bf16.msra.mxu1 %v9275_v11  ;;  %9276 = vmatpush1.bf16.msra.mxu0 %v9275_v11  ;;  %v1801_v11 = vsel %vm1760_vm11, %v1752_v36, %v1253_v49 }
 0x31f   :  { %3134 = vrot.lane.b32.xlu1 %v11921_v22, %s9626_s8  ;;  %v12127_v27 = vpop.permute.xlu0 %956  ;;  %9441 = vmatprep.subr.bf16.mxu1 %v16176_v26  ;;  %v2478_v26 = vrot.slane %v11921_v22, 1 }
 0x320   :  { %9277 = vmatprep.subr.bf16.mxu0 %v16325_v6 }
 0x321   :  { %v12138_v45 = vpop.permute.xlu1 %660  ;;  %2718 = vrot.lane.b32.xlu0 %v12142_v7, %s9626_s8  ;;  %v12163_v15 = vsel %vm136_vm0, %v2478_v26, %v12106_v57 }
 0x322   :  { %9457 = vmatpush1.bf16.msra.mxu1 %v9278_v29  ;;  %9279 = vmatpush1.bf16.msra.mxu0 %v9278_v29  ;;  %v2383_v29 = vcombine.high %v2311_v14, %v2311_v14 }
 0x323   :  { %2840 = vrot.lane.b32.xlu1 %v11892_v61, %s9627_s14  ;;  %v1403_v19 = vpop.permute.xlu0 %1402  ;;  %9280 = vmatprep.subr.bf16.mxu1 %v16325_v6  ;;  %v1508_v6 = vsel %vm1466_vm5, %v9583_v38, %v11890_v23 }
 0x324   :  { %v1850_v48 = vsel %vm1809_vm12, %v1801_v11, %v1403_v19  ;;  %v12178_v56 = vcombine.low %v2311_v14, %v2383_v29  ;;  %v9582_v14 = vld [vmem:[%s16162_s0 + $0x170] sm:$0xff]  ;;  %v1557_v40 = vsel %vm1515_vm6, %v1508_v6, %v11956_v3  ;;  %v12230_v6 = vsel %vm353_vm1, %v2661_v41, %v12201_v1 }
 0x325   :  { %v1105_v54 = vpop.permute.xlu1 %1104  ;;  %v1926_v59 = vcombine.high %v1850_v48, %v1850_v48  ;;  %2544 = vrot.lane.b32.xlu0 %v11933_v17, %s9625_s25  ;;  %v1509_v29 = vsel %vm1466_vm5, %v9582_v14, %v11930_v18  ;;  %v1606_v38 = vsel %vm1564_vm7, %v1557_v40, %v12010_v47 }
 0x326   :  { %v2982_v13 = vrot.slane %v12178_v56, 2  ;;  %v1558_v14 = vsel %vm1515_vm6, %v1509_v29, %v11942_v32 }
 0x327   :  { %3260 = vrot.lane.b32.xlu1 %v12163_v15, %s9627_s14  ;;  %v1968_v49 = vcombine.low %v1850_v48, %v1926_v59  ;;  %v813_v58 = vpop.permute.xlu0 %812  ;;  %v1607_v63 = vsel %vm1564_vm7, %v1558_v14, %v11997_v4 }
 0x328   :  { %v1656_v0 = vsel %vm1613_vm8, %v1607_v63, %v12078_v44  ;;  %v1511_v44 = vsel %vm1466_vm5, %v11469_v50, %v11973_v8  ;;  %v9584_v50 = vld [vmem:[%s16162_s0 + $0x178] sm:$0x3f] }
 0x329   :  { %v12167_v12 = vpop.permute.xlu1 %810  ;;  %3018 = vrot.lane.b32.xlu0 %v11962_v37, %s9625_s25  ;;  %9108 = vmatprep.mubr.msk.f32.mxu0 %vm1974_vm13, %v1968_v49  ;;  %v12189_v49 = vrot.slane %v11807_v16, 2  ;;  %v1705_v3 = vsel %vm1662_vm9, %v1656_v0, %v12117_v33  ;;  %v1510_v8 = vsel %vm1466_vm5, %v9584_v50, %v12024_v60 }
 0x32b   :  { %3140 = vrot.lane.b32.xlu1 %v12044_v20, %s9626_s8  ;;  %v1107_v36 = vpop.permute.xlu0 %1106  ;;  %16326 = vst [vmem:[#allocation23_spill] sm:$0xff] %v12189_v49  ;;  %v12212_v18 = vsel %vm353_vm1, %v2982_v13, %v12189_v49  ;;  %v1655_v13 = vsel %vm1613_vm8, %v1606_v38, %v12042_v5 }
 0x32c   :  { %16327 = vst [vmem:[#allocation24_spill] sm:$0xff] %v12212_v18  ;;  %v1704_v4 = vsel %vm1662_vm9, %v1655_v13, %v12127_v27  ;;  %v1754_v47 = vsel %vm1711_vm10, %v1705_v3, %v1107_v36  ;;  %v1560_v36 = vsel %vm1515_vm6, %v1511_v44, %v12052_v31 }
 0x32d   :  { %v1255_v26 = vpop.permute.xlu1 %1254  ;;  %2724 = vrot.lane.b32.xlu0 %v11988_v34, %s9626_s8  ;;  %v1753_v40 = vsel %vm1711_vm10, %v1704_v4, %v1105_v54 }
 0x32e   :  { %v1802_v63 = vsel %vm1760_vm11, %v1753_v40, %v1255_v26 }
 0x32f   :  { %3266 = vrot.lane.b32.xlu1 %v12069_v21, %s9627_s14  ;;  %v963_v11 = vpop.permute.xlu0 %962 }
 0x331   :  { %v12180_v19 = vpop.permute.xlu1 %960  ;;  %v12182_v48 = vpop.f32.mrb[20].mxu0  ;;  %2846 = vrot.lane.b32.xlu0 %v11927_v55, %s9627_s14 }
 0x332   :  { %v12184_v59 = vpop.f32.mrb[21].mxu0 }
 0x333   :  { %2550 = vrot.lane.b32.xlu1 %v12093_v52, %s9625_s25  ;;  %v1257_v34 = vpop.permute.xlu0 %1256 }
 0x334   :  { %v1803_v41 = vsel %vm1760_vm11, %v1754_v47, %v1257_v34  ;;  %v1609_v34 = vsel %vm1564_vm7, %v1560_v36, %v12087_v62  ;;  %v1559_v62 = vsel %vm1515_vm6, %v1510_v8, %v12103_v28 }
 0x335   :  { %v1405_v7 = vpop.permute.xlu1 %1404  ;;  %2546 = vrot.lane.b32.xlu0 %v12163_v15, %s9625_s25  ;;  %v1658_v26 = vsel %vm1613_vm8, %v1609_v34, %v813_v58  ;;  %v12276_v58 = vcombine.high %v11831_v51, %v11831_v51  ;;  %v1608_v60 = vsel %vm1564_vm7, %v1559_v62, %v12138_v45  ;;  %v3230_v51 = vrot.slane %v11847_v46, 1 }
 0x336   :  { %v1851_v0 = vsel %vm1809_vm12, %v1802_v63, %v1405_v7  ;;  %v1707_v31 = vsel %vm1662_vm9, %v1658_v26, %v963_v11  ;;  %v1657_v13 = vsel %vm1613_vm8, %v1608_v60, %v12167_v12 }
 0x337   :  { %3024 = vrot.lane.b32.xlu1 %v12212_v18, %s9625_s25  ;;  %v1111_v23 = vpop.permute.xlu0 %1110  ;;  %v3231_v12 = vrot.slane %v12276_v58, 1 }
 0x338   :  { %v1756_v14 = vsel %vm1711_vm10, %v1707_v31, %v1111_v23  ;;  %v1706_v23 = vsel %vm1662_vm9, %v1657_v13, %v12180_v19  ;;  %v2223_v13 = vadd.f32 %v12182_v48, %v11768_v39 }
 0x339   :  { %v1109_v32 = vpop.permute.xlu1 %1108  ;;  %3020 = vrot.lane.b32.xlu0 %v12230_v6, %s9625_s25 }
 0x33a   :  { %v1755_v45 = vsel %vm1711_vm10, %v1706_v23, %v1109_v32  ;;  %v3232_v32 = vsel %vm136_vm0, %v3230_v51, %v3231_v12 }
 0x33b   :  { %2730 = vrot.lane.b32.xlu1 %v12230_v6, %s9626_s8  ;;  %v1407_v5 = vpop.permute.xlu0 %1406 }
 0x33c   :  { %v1852_v33 = vsel %vm1809_vm12, %v1803_v41, %v1407_v5  ;;  %v12300_v5 = vrot.slane %v11807_v16, 1 }
 0x33d   :  { %v1259_v27 = vpop.permute.xlu1 %1258  ;;  %v1969_v54 = vcombine.low %v1851_v0, %v1852_v33  ;;  %2726 = vrot.lane.b32.xlu0 %v11979_v24, %s9626_s8  ;;  %v1927_v40 = vcombine.high %v1852_v33, %v1852_v33  ;;  %v2936_v33 = vrot.slane %v12178_v56, 1 }
 0x33e   :  { %v1804_v47 = vsel %vm1760_vm11, %v1755_v45, %v1259_v27 }
 0x33f   :  { %3146 = vrot.lane.b32.xlu1 %v11847_v46, %s9626_s8  ;;  %9109 = vmatmul.mubr.msk.f32.gmra.mrb[30].mxu0 %vm1974_vm13, %v1969_v54  ;;  %v1261_v7 = vpop.permute.xlu0 %1260  ;;  %v2208_v54 = vadd.f32 %v11768_v39, %v12076_v42  ;;  %v12315_v34 = vsel %vm136_vm0, %v2936_v33, %v12300_v5  ;;  %v2213_v42 = vadd.f32 %v12074_v35, %v11768_v39 }
 0x340   :  { %v1805_v11 = vsel %vm1760_vm11, %v1756_v14, %v1261_v7  ;;  %v2218_v14 = vadd.f32 %v11768_v39, %v12184_v59 }
 0x341   :  { %v12259_v29 = vpop.permute.xlu1 %301  ;;  %3142 = vrot.lane.b32.xlu0 %v12178_v56, %s9626_s8  ;;  %v2314_v7 = vmax.f32 %v2208_v54, 0.0 }
 0x343   :  { %2848 = vrot.lane.b32.xlu1 %v12022_v30, %s9627_s14  ;;  %v1411_v38 = vpop.permute.xlu0 %1410  ;;  %v2386_v62 = vcombine.high %v2314_v7, %v2314_v7 }
 0x344   :  { %v1854_v28 = vsel %vm1809_vm12, %v1805_v11, %v1411_v38  ;;  %v12335_v11 = vmax.f32 %v2213_v42, 0.0 }
 0x345   :  { %v12284_v3 = vpop.permute.xlu1 %299  ;;  %2548 = vrot.lane.b32.xlu0 %v12106_v57, %s9625_s25  ;;  %v1928_v4 = vcombine.high %v1854_v28, %v1854_v28  ;;  %v12339_v38 = vcombine.low %v2314_v7, %v2386_v62  ;;  %v9585_v7 = vld [vmem:[%s16162_s0 + $0x190] sm:$0xff] }
 0x346   :  { %v2387_v59 = vcombine.high %v12335_v11, %v12335_v11  ;;  %v1513_v42 = vsel %vm1466_vm5, %v9585_v7, %v12259_v29 }
 0x347   :  { %3022 = vrot.lane.b32.xlu1 %v12201_v1, %s9625_s25  ;;  %v1409_v63 = vpop.permute.xlu0 %1408  ;;  %v1971_v44 = vcombine.low %v1854_v28, %v1928_v4  ;;  %v2316_v28 = vmax.f32 %v2218_v14, 0.0  ;;  %v2484_v45 = vrot.slane %v12339_v38, 1  ;;  %v2317_v4 = vmax.f32 %v2223_v13, 0.0  ;;  %v9586_v13 = vld [vmem:[%s16162_s0 + $0x198] sm:$0x3f] }
 0x348   :  { %v1853_v41 = vsel %vm1809_vm12, %v1804_v47, %v1409_v63  ;;  %v2485_v63 = vrot.slane %v12335_v11, 1 }
 0x349   :  { %v12297_v19 = vpop.permute.xlu1 %303  ;;  %v1970_v0 = vcombine.low %v1927_v40, %v1853_v41  ;;  %2852 = vrot.lane.b32.xlu0 %v12178_v56, %s9627_s14  ;;  %v12350_v40 = vcombine.high %v2316_v28, %v2316_v28  ;;  %v12352_v47 = vcombine.low %v2387_v59, %v2316_v28 }
 0x34a   :  { %v1514_v28 = vsel %vm1466_vm5, %v9586_v13, %v12297_v19 }
 0x34b   :  { %3272 = vrot.lane.b32.xlu1 %v3232_v32, %s9627_s14  ;;  %9111 = vmatprep.mubr.msk.f32.mxu0 %vm1974_vm13, %v1970_v0  ;;  %v519_v27 = vpop.permute.xlu0 %518  ;;  %v2389_v0 = vcombine.high %v2317_v4, %v2317_v4  ;;  %v2667_v33 = vrot.slane %v12352_v47, 2  ;;  %v12362_v54 = vrot.slane %v12350_v40, 2  ;;  %v12391_v19 = vrot.slane %v12350_v40, 1 }
 0x34c   :  { %9112 = vmatmul.mubr.msk.f32.gmra.mrb[32].mxu0 %vm1974_vm13, %v1971_v44  ;;  %v2486_v44 = vsel %vm136_vm0, %v2484_v45, %v2485_v63  ;;  %v1562_v59 = vsel %vm1515_vm6, %v1513_v42, %v519_v27  ;;  %v2665_v27 = vrot.slane %v12335_v11, 2 }
 0x34d   :  { %v12310_v36 = vpop.permute.xlu1 %666  ;;  %3268 = vrot.lane.b32.xlu0 %v12315_v34, %s9627_s14  ;;  %v12372_v14 = vcombine.low %v2317_v4, %v2389_v0  ;;  %v2669_v29 = vsel %vm353_vm1, %v2667_v33, %v12362_v54 }
 0x34e   :  { %v1611_v33 = vsel %vm1564_vm7, %v1562_v59, %v12310_v36 }
 0x34f   :  { %3144 = vrot.lane.b32.xlu1 %v11807_v16, %s9626_s8  ;;  %v517_v56 = vpop.permute.xlu0 %516 }
 0x351   :  { %v12321_v26 = vpop.permute.xlu1 %664  ;;  %2728 = vrot.lane.b32.xlu0 %v11962_v37, %s9626_s8 }
 0x352   :  { %v12329_v50 = vpop.f32.mrb[22].mxu0 }
 0x353   :  { %3270 = vrot.lane.b32.xlu1 %v12300_v5, %s9627_s14  ;;  %v2227_v8 = vpop.f32.mrb[23].mxu0  ;;  %v521_v31 = vpop.permute.xlu0 %520 }
 0x354   :  { %v2228_v0 = vadd.f32 %v11768_v39, %v2227_v8  ;;  %v1563_v7 = vsel %vm1515_vm6, %v1514_v28, %v521_v31 }
 0x355   :  { %v669_v60 = vpop.permute.xlu1 %668  ;;  %2850 = vrot.lane.b32.xlu0 %v12044_v20, %s9627_s14 }
 0x356   :  { %v1612_v36 = vsel %vm1564_vm7, %v1563_v7, %v669_v60 }
 0x357   :  { %3026 = vrot.lane.b32.xlu1 %v12189_v49, %s9625_s25  ;;  %v817_v35 = vpop.permute.xlu0 %816  ;;  %v12402_v49 = vmax.f32 %v2228_v0, 0.0 }
 0x358   :  { %v1660_v42 = vsel %vm1613_vm8, %v1611_v33, %v817_v35 }
 0x359   :  { %v967_v23 = vpop.permute.xlu1 %966  ;;  %2552 = vrot.lane.b32.xlu0 %v12069_v21, %s9625_s25  ;;  %v12420_v60 = vrot.slane %v12402_v49, 1  ;;  %v12432_v7 = vrot.slane %v12402_v49, 2 }
 0x35a   :  { %v1709_v31 = vsel %vm1662_vm9, %v1660_v42, %v967_v23 }
 0x35b   :  { %3148 = vrot.lane.b32.xlu1 %v12276_v58, %s9626_s8  ;;  %v815_v51 = vpop.permute.xlu0 %814  ;;  %16328 = vst [vmem:[#allocation25_spill] sm:$0xff] %v12432_v7 }
 0x35d   :  { %v965_v48 = vpop.permute.xlu1 %964  ;;  %2732 = vrot.lane.b32.xlu0 %v12201_v1, %s9626_s8 }
 0x35f   :  { %2854 = vrot.lane.b32.xlu1 %v11807_v16, %s9627_s14  ;;  %v819_v41 = vpop.permute.xlu0 %818  ;;  %v2664_v16 = vrot.slane %v12339_v38, 2 }
 0x360   :  { %v1661_v35 = vsel %vm1613_vm8, %v1612_v36, %v819_v41 }
 0x361   :  { %v969_v32 = vpop.permute.xlu1 %968  ;;  %2554 = vrot.lane.b32.xlu0 %v2486_v44, %s9625_s25  ;;  %v2487_v44 = vrot.slane %v12352_v47, 1 }
 0x362   :  { %v1710_v0 = vsel %vm1662_vm9, %v1661_v35, %v969_v32  ;;  %v2233_v32 = vadd.f32 %v12329_v50, %v11768_v39  ;;  %v2390_v39 = vcombine.high %v12402_v49, %v12402_v49 }
 0x363   :  { %3274 = vrot.lane.b32.xlu1 %v3231_v12, %s9627_s14  ;;  %v1115_v62 = vpop.permute.xlu0 %1114  ;;  %v9587_v12 = vld [vmem:[%s16162_s0 + $0x188] sm:$0x3f]  ;;  %v12407_v18 = vsel %vm136_vm0, %v2487_v44, %v12391_v19 }
 0x364   :  { %v1512_v4 = vsel %vm1466_vm5, %v9587_v12, %v12284_v3  ;;  %v2666_v12 = vsel %vm353_vm1, %v2664_v16, %v2665_v27  ;;  %v1758_v59 = vsel %vm1711_vm10, %v1709_v31, %v1115_v62  ;;  %v2490_v62 = vrot.slane %v12372_v14, 1 }
 0x365   :  { %v1265_v45 = vpop.permute.xlu1 %1264  ;;  %3028 = vrot.lane.b32.xlu0 %v2669_v29, %s9625_s25  ;;  %v1561_v8 = vsel %vm1515_vm6, %v1512_v4, %v517_v56  ;;  %vm6678_vm5 = vcmask 1044484  }
 0x366   :  { %v1610_v56 = vsel %vm1564_vm7, %v1561_v8, %v12321_v26  ;;  %v1807_v23 = vsel %vm1760_vm11, %v1758_v59, %v1265_v45  ;;  %vm6680_vm7 = vcmask 1046534  }
 0x367   :  { %3150 = vrot.lane.b32.xlu1 %v12372_v14, %s9626_s8  ;;  %v1113_v3 = vpop.permute.xlu0 %1112  ;;  %v1659_v28 = vsel %vm1613_vm8, %v1610_v56, %v815_v51 }
 0x368   :  { %v1708_v26 = vsel %vm1662_vm9, %v1659_v28, %v965_v48  ;;  %v12438_v48 = vsel %vm136_vm0, %v2490_v62, %v12420_v60  ;;  %vm7390_vm9 = vcmask 1041409  }
 0x369   :  { %v1263_v13 = vpop.permute.xlu1 %1262  ;;  %2734 = vrot.lane.b32.xlu0 %v2666_v12, %s9626_s8  ;;  %v1757_v44 = vsel %vm1711_vm10, %v1708_v26, %v1113_v3  ;;  %v2670_v3 = vrot.slane %v12372_v14, 2 }
 0x36a   :  { %v1806_v42 = vsel %vm1760_vm11, %v1757_v44, %v1263_v13 }
 0x36b   :  { %2558 = vrot.lane.b32.xlu1 %v12407_v18, %s9625_s25  ;;  %v1117_v16 = vpop.permute.xlu0 %1116  ;;  %v12451_v35 = vsel %vm353_vm1, %v2670_v3, %v12432_v7 }
 0x36c   :  { %v1759_v41 = vsel %vm1711_vm10, %v1710_v0, %v1117_v16  ;;  %16329 = vst [vmem:[#allocation26_spill] sm:$0xff] %v12451_v35  ;;  %v2319_v16 = vmax.f32 %v2233_v32, 0.0  ;;  %vm7393_vm10 = vcmask 1043459  }
 0x36d   :  { %v1267_v4 = vpop.permute.xlu1 %1266  ;;  %2556 = vrot.lane.b32.xlu0 %v2485_v63, %s9625_s25 }
 0x36e   :  { %v1808_v45 = vsel %vm1760_vm11, %v1759_v41, %v1267_v4  ;;  %v12460_v4 = vcombine.low %v2390_v39, %v2319_v16  ;;  %v12465_v0 = vcombine.high %v2319_v16, %v2319_v16  ;;  %v4044_v16 = vcombine.high %v12230_v6, %v12230_v6 }
 0x36f   :  { %3030 = vrot.lane.b32.xlu1 %v12362_v54, %s9625_s25  ;;  %v1415_v51 = vpop.permute.xlu0 %1414  ;;  %vm7396_vm11 = vcmask 1045509  }
 0x370   :  { %v1856_v63 = vsel %vm1809_vm12, %v1807_v23, %v1415_v51  ;;  %v12473_v51 = vrot.slane %v12465_v0, 1 }
 0x371   :  { %v1417_v33 = vpop.permute.xlu1 %1416  ;;  %2856 = vrot.lane.b32.xlu0 %v12352_v47, %s9627_s14  ;;  %v1929_v8 = vcombine.high %v1856_v63, %v1856_v63 }
 0x372   :  { %v1857_v12 = vsel %vm1809_vm12, %v1808_v45, %v1417_v33  ;;  %v9628_v33 = vmov 1983009808   ;;  %v3691_v45 = vlaneseq }
 0x373   :  { %3276 = vrot.lane.b32.xlu1 %v12438_v48, %s9627_s14  ;;  %v1413_v36 = vpop.permute.xlu0 %1412  ;;  %v1973_v28 = vcombine.low %v1929_v8, %v1857_v12  ;;  %v3689_v32 = vunpack.c.l.s4 %v9628_v33 }
 0x374   :  { %v1855_v56 = vsel %vm1809_vm12, %v1806_v42, %v1413_v36  ;;  %v12489_v12 = vshrl.u32 %v3691_v45, 7  ;;  %vm7399_vm12 = vcmask 1047559  }
 0x375   :  { %v2543_v31 = vpop.permute.xlu1 %2542  ;;  %v1972_v50 = vcombine.low %v1855_v56, %v1856_v63  ;;  %3032 = vrot.lane.b32.xlu0 %v12451_v35, %s9625_s25  ;;  %v3690_v42 = vunpack.c.0.s8 %v3689_v32 }
 0x376   :  { %16330 = vst [vmem:[#allocation27_spill] sm:$0xff] %v12489_v12  ;;  %v3377_v36 = vsel %vm3362_vm14, %v11892_v61, %v2543_v31 }
 0x377   :  { %2738 = vrot.lane.b32.xlu1 %v2669_v29, %s9626_s8  ;;  %9114 = vmatprep.mubr.msk.f32.mxu0 %vm1974_vm13, %v1972_v50  ;;  %v2541_v13 = vpop.permute.xlu0 %2540  ;;  %v2493_v29 = vrot.slane %v12460_v4, 1  ;;  %v12506_v32 = vsub.s32 %v3690_v42, %v12489_v12 }
 0x378   :  { %9115 = vmatmul.mubr.msk.f32.gmra.mrb[34].mxu0 %vm1974_vm13, %v1973_v28  ;;  %vm8046_vm13 = vcmask 130048  }
 0x379   :  { %v3017_v59 = vpop.permute.xlu1 %3016  ;;  %2736 = vrot.lane.b32.xlu0 %v2665_v27, %s9626_s8  ;;  %v12479_v62 = vsel %vm136_vm0, %v2493_v29, %v12473_v51 }
 0x37a   :  { %v3499_v56 = vsel %vm3362_vm14, %v12163_v15, %v3017_v59 }
 0x37b   :  { %3154 = vrot.lane.b32.xlu1 %v12460_v4, %s9626_s8  ;;  %v3015_v26 = vpop.permute.xlu0 %3014 }
 0x37c   :  { %v3498_v15 = vsel %vm3362_vm14, %v11933_v17, %v3015_v26 }
 0x37d   :  { %v2723_v23 = vpop.permute.xlu1 %2722  ;;  %3152 = vrot.lane.b32.xlu0 %v12402_v49, %s9626_s8 }
 0x37e   :  { %v3418_v39 = vsel %vm3403_vm15, %v3377_v36, %v2723_v23  ;;  %v3376_v23 = vsel %vm3362_vm14, %v11819_v53, %v2541_v13  ;;  %v12516_v36 = vrot.slane %v4044_v16, %v12506_v32 }
 0x37f   :  { %2860 = vrot.lane.b32.xlu1 %v12372_v14, %s9627_s14  ;;  %v2721_v41 = vpop.permute.xlu0 %2720 }
 0x381   :  { %v3139_v27 = vpop.permute.xlu1 %3138  ;;  %2858 = vrot.lane.b32.xlu0 %v12350_v40, %s9627_s14 }
 0x382   :  { %v3539_v28 = vsel %vm3403_vm15, %v3499_v56, %v3139_v27 }
 0x383   :  { %3280 = vrot.lane.b32.xlu1 %v12479_v62, %s9627_s14  ;;  %v3137_v44 = vpop.permute.xlu0 %3136 }
 0x384   :  { %v3538_v27 = vsel %vm3403_vm15, %v3498_v15, %v3137_v44 }
 0x385   :  { %v2843_v63 = vpop.permute.xlu1 %2842  ;;  %3278 = vrot.lane.b32.xlu0 %v12420_v60, %s9627_s14 }
 0x387   :  { %3034 = vrot.lane.b32.xlu1 %v12432_v7, %s9625_s25  ;;  %v2539_v8 = vpop.permute.xlu0 %2538 }
 0x389   :  { %v3013_v3 = vpop.permute.xlu1 %3012  ;;  %2560 = vrot.lane.b32.xlu0 %v12391_v19, %s9625_s25 }
 0x38b   :  { %3156 = vrot.lane.b32.xlu1 %v12465_v0, %s9626_s8  ;;  %v2845_v50 = vpop.permute.xlu0 %2844 }
 0x38c   :  { %v3459_v29 = vsel %vm3444_vm2, %v3418_v39, %v2845_v50 }
 0x38d   :  { %v3265_v33 = vpop.permute.xlu1 %3264  ;;  %2740 = vrot.lane.b32.xlu0 %v12362_v54, %s9626_s8  ;;  %v3417_v54 = vsel %vm3403_vm15, %v3376_v23, %v2721_v41 }
 0x38e   :  { %v3579_v31 = vsel %vm3444_vm2, %v3539_v28, %v3265_v33  ;;  %v3458_v39 = vsel %vm3444_vm2, %v3417_v54, %v2843_v63  ;;  %v2673_v28 = vrot.slane %v12460_v4, 2  ;;  %v12534_v63 = vld [vmem:[%s16168_s6] ss:$0 sm:$0xff] }
 0x38f   :  { %v4043_v59 = vcombine.high %v3459_v29, %v3579_v31  ;;  %3282 = vrot.lane.b32.xlu1 %v12473_v51, %s9627_s14  ;;  %v3263_v45 = vpop.permute.xlu0 %3262  ;;  %v4042_v33 = vcombine.low %v3459_v29, %v3579_v31 }
 0x390   :  { %v3578_v26 = vsel %vm3444_vm2, %v3538_v27, %v3263_v45  ;;  %v3375_v27 = vsel %vm3362_vm14, %v12029_v2, %v2539_v8  ;;  %v12543_v45 = vrot.slane %v12465_v0, 2 }
 0x391   :  { %v12520_v42 = vrot.slane %v4043_v59, %v12506_v32  ;;  %v3135_v56 = vpop.permute.xlu1 %3134  ;;  %2862 = vrot.lane.b32.xlu0 %v12402_v49, %s9627_s14  ;;  %v4026_v44 = vcombine.low %v3458_v39, %v3578_v26  ;;  %v3497_v26 = vsel %vm3362_vm14, %v11948_v10, %v3013_v3  ;;  %v4051_v8 = vrot.slane %v4042_v33, %v12506_v32 }
 0x392   :  { %v9101_v50 = vpop.f32.mrb[24].mxu0 }
 0x393   :  { %2566 = vrot.lane.b32.xlu1 %v12479_v62, %s9625_s25  ;;  %v2237_v41 = vpop.f32.mrb[25].mxu0  ;;  %v2719_v16 = vpop.permute.xlu0 %2718  ;;  %v2243_v15 = vadd.f32 %v12534_v63, %v9101_v50  ;;  %v4033_v29 = vrot.slane %v4026_v44, %v12506_v32  ;;  %v12551_v50 = vsel %vm353_vm1, %v2673_v28, %v12543_v45 }
 0x394   :  { %v2238_v59 = vadd.f32 %v12534_v63, %v2237_v41  ;;  %v3416_v54 = vsel %vm3403_vm15, %v3375_v27, %v2719_v16  ;;  %v3537_v41 = vsel %vm3403_vm15, %v3497_v26, %v3135_v56 }
 0x395   :  { %v2841_v23 = vpop.permute.xlu1 %2840  ;;  %2562 = vrot.lane.b32.xlu0 %v12438_v48, %s9625_s25  ;;  %v12555_v13 = vmax.f32 %v2243_v15, 0.0  ;;  %v8744_v33 = vcombine.low %v4033_v29, %v4051_v8 }
 0x396   :  { %v2320_v31 = vmax.f32 %v2238_v59, 0.0  ;;  %v12558_v44 = vsel %vm3444_vm2, %v3416_v54, %v2841_v23 }
 0x397   :  { %v2545_v39 = vpop.permute.xlu0 %2544  ;;  %16331 = vst [vmem:[#allocation28_spill] sm:$0xff] %v12558_v44  ;;  %v12573_v27 = vrot.slane %v12555_v13, 2  ;;  %v5049_v29 = vrot.slane %v8744_v33, %v12506_v32 }
 0x398   :  { %v2392_v12 = vcombine.high %v2320_v31, %v2320_v31 }
 0x399   :  { %v3261_v37 = vpop.permute.xlu1 %3260  ;;  %3036 = vrot.lane.b32.xlu0 %v12551_v50, %s9625_s25  ;;  %16333 = vst [vmem:[#allocation30_spill] sm:$0xff] %v12573_v27 }
 0x39a   :  { %v12561_v16 = vsel %vm3444_vm2, %v3537_v41, %v3261_v37  ;;  %v12565_v3 = vcombine.low %v2320_v31, %v2392_v12  ;;  %v12590_v41 = vrot.slane %v12230_v6, %v12506_v32 }
 0x39b   :  { %16332 = vst [vmem:[#allocation29_spill] sm:$0xff] %v12561_v16  ;;  %v3992_v56 = vcombine.high %v12558_v44, %v12561_v16  ;;  %v3019_v15 = vpop.permute.xlu0 %3018  ;;  %v3378_v16 = vsel %vm3362_vm14, %v11899_v25, %v2545_v39 }
 0x39c   :  { %v2676_v23 = vrot.slane %v12565_v3, 2  ;;  %16335 = vst [vmem:[#allocation32_spill] sm:$0xff] %v12590_v41  ;;  %v4074_v33 = vcombine.high %v4051_v8, %v12590_v41 }
 0x39d   :  { %v3141_v59 = vpop.permute.xlu1 %3140  ;;  %v4007_v37 = vrot.slane %v3992_v56, %v12506_v32  ;;  %2742 = vrot.lane.b32.xlu0 %v12451_v35, %s9626_s8  ;;  %v3500_v56 = vsel %vm3362_vm14, %v12106_v57, %v3019_v15  ;;  %v2393_v15 = vcombine.high %v12555_v13, %v12555_v13 }
 0x39e   :  { %v12580_v12 = vsel %vm353_vm1, %v2676_v23, %v12573_v27  ;;  %v3540_v6 = vsel %vm3403_vm15, %v3500_v56, %v3141_v59  ;;  %v4091_v59 = vrot.slane %v12201_v1, %v12506_v32  ;;  %v2496_v56 = vrot.slane %v12565_v3, 1 }
 0x39f   :  { %16334 = vst [vmem:[#allocation31_spill] sm:$0xff] %v12580_v12  ;;  %v5035_v31 = vrot.slane %v4007_v37, %v12506_v32  ;;  %3040 = vrot.lane.b32.xlu1 %v12580_v12, %s9625_s25  ;;  %v12586_v54 = vpop.f32.mrb[26].mxu0  ;;  %v2725_v26 = vpop.permute.xlu0 %2724 }
 0x3a0   :  { %v2247_v23 = vpop.f32.mrb[27].mxu0  ;;  %v3419_v44 = vsel %vm3403_vm15, %v3378_v16, %v2725_v26  ;;  %v4076_v16 = vcombine.high %v12520_v42, %v12516_v36 }
 0x3a1   :  { %v3267_v28 = vpop.permute.xlu1 %3266  ;;  %v5058_v35 = vcombine.high %v5035_v31, %v5049_v29  ;;  %v5057_v24 = vcombine.low %v5035_v31, %v5049_v29  ;;  %v2248_v37 = vadd.f32 %v12534_v63, %v2247_v23  ;;  %3158 = vrot.lane.b32.xlu0 %v12565_v3, %s9626_s8 }
 0x3a2   :  { %v3580_v29 = vsel %vm3444_vm2, %v3540_v6, %v3267_v28 }
 0x3a3   :  { %5824 = vmatprep.mubr.f32.mxu1 %v5058_v35  ;;  %v2322_v57 = vmax.f32 %v2248_v37, 0.0  ;;  %2746 = vrot.lane.b32.xlu1 %v12551_v50, %s9626_s8  ;;  %v2847_v31 = vpop.permute.xlu0 %2846 }
 0x3a4   :  { %5825 = vmatmul.mubr.f32.vlgmr.msra.gmra.mrb[0].mxu1 %v5057_v24  ;;  %v3460_v8 = vsel %vm3444_vm2, %v3419_v44, %v2847_v31  ;;  %v8746_v44 = vcombine.low %v4074_v33, %v12520_v42 }
 0x3a5   :  { %v2551_v23 = vpop.permute.xlu1 %2550  ;;  %v12608_v39 = vcombine.low %v2393_v15, %v2322_v57  ;;  %v4077_v35 = vcombine.low %v3460_v8, %v3580_v29  ;;  %2564 = vrot.lane.b32.xlu0 %v12420_v60, %s9625_s25  ;;  %v16336_v15 = vcombine.low %v12520_v42, %v12516_v36  ;;  %v12627_v31 = vcombine.high %v2322_v57, %v2322_v57 }
 0x3a6   :  { %v12630_v29 = vrot.slane %v12555_v13, 1 }
 0x3a7   :  { %v4084_v24 = vrot.slane %v4077_v35, %v12506_v32  ;;  %3162 = vrot.lane.b32.xlu1 %v12608_v39, %s9626_s8  ;;  %v2547_v28 = vpop.permute.xlu0 %2546  ;;  %v8747_v1 = vcombine.high %v12590_v41, %v16336_v15  ;;  %v5070_v35 = vrot.slane %v8746_v44, %v12506_v32 }
 0x3a8   :  { %v12639_v42 = vsel %vm136_vm0, %v2496_v56, %v12630_v29 }
 0x3a9   :  { %v3025_v26 = vpop.permute.xlu1 %3024  ;;  %v4092_v37 = vcombine.low %v4084_v24, %v4091_v59  ;;  %v8748_v6 = vcombine.low %v4076_v16, %v4084_v24  ;;  %2868 = vrot.lane.b32.xlu0 %v12565_v3, %s9627_s14  ;;  %v5077_v15 = vrot.slane %v8747_v1, %v12506_v32  ;;  %v3356_v1 = vrot.slane %v11847_v46, 2 }
 0x3aa   :  { %v3381_v46 = vsel %vm3362_vm14, %v12022_v30, %v2551_v23  ;;  %v3379_v30 = vsel %vm3362_vm14, %v11921_v22, %v2547_v28 }
 0x3ab   :  { %v8749_v33 = vcombine.high %v12516_v36, %v4092_v37  ;;  %2864 = vrot.lane.b32.xlu1 %v12460_v4, %s9627_s14  ;;  %v3021_v8 = vpop.permute.xlu0 %3020  ;;  %v5084_v16 = vrot.slane %v8748_v6, %v12506_v32  ;;  %v2499_v36 = vrot.slane %v12608_v39, 1  ;;  %v12645_v37 = vrot.slane %v12627_v31, 1 }
 0x3ad   :  { %v2731_v59 = vpop.permute.xlu1 %2730  ;;  %3284 = vrot.lane.b32.xlu0 %v12639_v42, %s9627_s14  ;;  %v5093_v57 = vcombine.high %v5070_v35, %v5084_v16  ;;  %v5092_v24 = vcombine.low %v5070_v35, %v5084_v16  ;;  %v5091_v44 = vrot.slane %v8749_v33, %v12506_v32  ;;  %v12657_v35 = vsel %vm136_vm0, %v2499_v36, %v12645_v37 }
 0x3af   :  { %3038 = vrot.lane.b32.xlu1 %v12543_v45, %s9625_s25  ;;  %5829 = vmatprep.mubr.f32.mxu1 %v5093_v57  ;;  %v2727_v56 = vpop.permute.xlu0 %2726  ;;  %v12651_v41 = vcombine.low %v5077_v15, %v5091_v44  ;;  %v16200_v57 = vrot.slane %v12276_v58, 2 }
 0x3b0   :  { %5830 = vmatmul.mubr.f32.gmra.mrb[2].mxu1 %v5092_v24 }
 0x3b1   :  { %v3147_v6 = vpop.permute.xlu1 %3146  ;;  %16337 = vst [vmem:[#allocation33_spill] sm:$0xff] %v12651_v41  ;;  %2744 = vrot.lane.b32.xlu0 %v12432_v7, %s9626_s8  ;;  %v3358_v36 = vsel %vm353_vm1, %v3356_v1, %v16200_v57  ;;  %v3503_v7 = vsel %vm3362_vm14, %v12315_v34, %v3025_v26  ;;  %v3422_v41 = vsel %vm3403_vm15, %v3381_v46, %v2731_v59  ;;  %v2679_v59 = vrot.slane %v12608_v39, 2 }
 0x3b2   :  { %v4146_v44 = vcombine.high %v3358_v36, %v3358_v36  ;;  %v3543_v25 = vsel %vm3403_vm15, %v3503_v7, %v3147_v6  ;;  %v3501_v34 = vsel %vm3362_vm14, %v12093_v52, %v3021_v8  ;;  %v3420_v7 = vsel %vm3403_vm15, %v3379_v30, %v2727_v56 }
 0x3b3   :  { %3288 = vrot.lane.b32.xlu1 %v12657_v35, %s9627_s14  ;;  %v3143_v33 = vpop.permute.xlu0 %3142  ;;  %v12702_v6 = vrot.slane %v12627_v31, 2 }
 0x3b4   :  { %v12689_v23 = vrot.slane %v4146_v44, %v12506_v32 }
 0x3b5   :  { %v2849_v16 = vpop.permute.xlu1 %2848  ;;  %2866 = vrot.lane.b32.xlu0 %v12465_v0, %s9627_s14 }
 0x3b6   :  { %16338 = vst [vmem:[#allocation34_spill] sm:$0xff] %v12689_v23  ;;  %v3461_v22 = vsel %vm3444_vm2, %v3420_v7, %v2849_v16 }
 0x3b7   :  { %3160 = vrot.lane.b32.xlu1 %v12555_v13, %s9626_s8  ;;  %v2549_v24 = vpop.permute.xlu0 %2548 }
 0x3b9   :  { %v3023_v15 = vpop.permute.xlu1 %3022  ;;  %2568 = vrot.lane.b32.xlu0 %v12473_v51, %s9625_s25 }
 0x3ba   :  { %v3502_v7 = vsel %vm3362_vm14, %v12069_v21, %v3023_v15 }
 0x3bb   :  { %3286 = vrot.lane.b32.xlu1 %v12630_v29, %s9627_s14  ;;  %v2853_v17 = vpop.permute.xlu0 %2852 }
 0x3bc   :  { %v3463_v1 = vsel %vm3444_vm2, %v3422_v41, %v2853_v17  ;;  %v3541_v17 = vsel %vm3403_vm15, %v3501_v34, %v3143_v33  ;;  %v12720_v34 = vsel %vm353_vm1, %v2679_v59, %v12702_v6 }
 0x3bd   :  { %v3273_v57 = vpop.permute.xlu1 %3272  ;;  %2748 = vrot.lane.b32.xlu0 %v12543_v45, %s9626_s8 }
 0x3be   :  { %v3583_v53 = vsel %vm3444_vm2, %v3543_v25, %v3273_v57 }
 0x3bf   :  { %v4145_v26 = vcombine.high %v3463_v1, %v3583_v53  ;;  %v4144_v41 = vcombine.low %v3463_v1, %v3583_v53  ;;  %3042 = vrot.lane.b32.xlu1 %v12573_v27, %s9625_s25  ;;  %v3269_v25 = vpop.permute.xlu0 %3268  ;;  %v2253_v53 = vadd.f32 %v12534_v63, %v12586_v54  ;;  %v12716_v54 = vrot.slane %v3358_v36, %v12506_v32 }
 0x3c0   :  { %v3581_v52 = vsel %vm3444_vm2, %v3541_v17, %v3269_v25  ;;  %v3380_v36 = vsel %vm3362_vm14, %v11927_v55, %v2549_v24 }
 0x3c1   :  { %v12698_v28 = vrot.slane %v4145_v26, %v12506_v32  ;;  %v3145_v8 = vpop.permute.xlu1 %3144  ;;  %v4093_v56 = vcombine.low %v3461_v22, %v3581_v52  ;;  %v4094_v33 = vcombine.high %v3461_v22, %v3581_v52  ;;  %2570 = vrot.lane.b32.xlu0 %v12639_v42, %s9625_s25  ;;  %v4153_v57 = vrot.slane %v4144_v41, %v12506_v32 }
 0x3c2   :  { %16340 = vst [vmem:[#allocation36_spill] sm:$0xff] %v12716_v54  ;;  %v2323_v26 = vmax.f32 %v2253_v53, 0.0  ;;  %v3542_v25 = vsel %vm3403_vm15, %v3502_v7, %v3145_v8 }
 0x3c3   :  { %16339 = vst [vmem:[#allocation35_spill] sm:$0xff] %v12698_v28  ;;  %v4102_v46 = vrot.slane %v4093_v56, %v12506_v32  ;;  %v4109_v44 = vrot.slane %v4094_v33, %v12506_v32  ;;  %3164 = vrot.lane.b32.xlu1 %v12627_v31, %s9626_s8  ;;  %v2729_v1 = vpop.permute.xlu0 %2728  ;;  %v4176_v22 = vcombine.high %v4153_v57, %v12716_v54 }
 0x3c4   :  { %v3421_v59 = vsel %vm3403_vm15, %v3380_v36, %v2729_v1 }
 0x3c5   :  { %v3271_v30 = vpop.permute.xlu1 %3270  ;;  %3044 = vrot.lane.b32.xlu0 %v12720_v34, %s9625_s25  ;;  %v5105_v17 = vrot.slane %v4102_v46, %v12506_v32  ;;  %v5119_v41 = vrot.slane %v4109_v44, %v12506_v32  ;;  %v2395_v46 = vcombine.high %v2323_v26, %v2323_v26  ;;  %v8752_v8 = vcombine.low %v4176_v22, %v12698_v28 }
 0x3c6   :  { %v3582_v53 = vsel %vm3444_vm2, %v3542_v25, %v3271_v30 }
 0x3c7   :  { %2870 = vrot.lane.b32.xlu1 %v12555_v13, %s9627_s14  ;;  %v2851_v21 = vpop.permute.xlu0 %2850  ;;  %v5128_v15 = vcombine.high %v5105_v17, %v5119_v41  ;;  %v5127_v52 = vcombine.low %v5105_v17, %v5119_v41  ;;  %v12743_v30 = vcombine.low %v2323_v26, %v2395_v46  ;;  %v5154_v36 = vrot.slane %v8752_v8, %v12506_v32 }
 0x3c8   :  { %v3462_v56 = vsel %vm3444_vm2, %v3421_v59, %v2851_v21 }
 0x3c9   :  { %v3027_v33 = vpop.permute.xlu1 %3026  ;;  %v4128_v44 = vcombine.low %v3462_v56, %v3582_v53  ;;  %2750 = vrot.lane.b32.xlu0 %v12580_v12, %s9626_s8  ;;  %5834 = vmatprep.mubr.f32.mxu1 %v5128_v15 }
 0x3ca   :  { %5835 = vmatmul.mubr.f32.gmra.mrb[4].mxu1 %v5127_v52  ;;  %v3504_v15 = vsel %vm3362_vm14, %v12300_v5, %v3027_v33  ;;  %v16341_v5 = vrot.slane %v12276_v58, 2 }
 0x3cb   :  { %v4135_v55 = vrot.slane %v4128_v44, %v12506_v32  ;;  %3290 = vrot.lane.b32.xlu1 %v12645_v37, %s9627_s14  ;;  %v2553_v24 = vpop.permute.xlu0 %2552 }
 0x3cc   :  { %v3382_v59 = vsel %vm3362_vm14, %v12044_v20, %v2553_v24  ;;  %v4193_v33 = vrot.slane %v16341_v5, %v12506_v32 }
 0x3cd   :  { %v3149_v1 = vpop.permute.xlu1 %3148  ;;  %v8750_v7 = vcombine.low %v4135_v55, %v4153_v57  ;;  %2572 = vrot.lane.b32.xlu0 %v12630_v29, %s9625_s25 }
 0x3ce   :  { %v3544_v56 = vsel %vm3403_vm15, %v3504_v15, %v3149_v1  ;;  %v2502_v1 = vrot.slane %v12743_v30, 1 }
 0x3cf   :  { %3166 = vrot.lane.b32.xlu1 %v12743_v30, %s9626_s8  ;;  %v2733_v17 = vpop.permute.xlu0 %2732  ;;  %v5140_v41 = vrot.slane %v8750_v7, %v12506_v32 }
 0x3d0   :  { %v3423_v22 = vsel %vm3403_vm15, %v3382_v59, %v2733_v17 }
 0x3d1   :  { %v2855_v25 = vpop.permute.xlu1 %2854  ;;  %2872 = vrot.lane.b32.xlu0 %v12608_v39, %s9627_s14  ;;  %v5163_v26 = vcombine.high %v5140_v41, %v5154_v36  ;;  %v5162_v57 = vcombine.low %v5140_v41, %v5154_v36 }
 0x3d2   :  { %v9107_v21 = vpop.f32.mrb[28].mxu0  ;;  %v3464_v44 = vsel %vm3444_vm2, %v3423_v22, %v2855_v25  ;;  %v2682_v25 = vrot.slane %v12743_v30, 2 }
 0x3d3   :  { %2574 = vrot.lane.b32.xlu1 %v12657_v35, %s9625_s25  ;;  %v2257_v52 = vpop.f32.mrb[29].mxu0  ;;  %5839 = vmatprep.mubr.f32.mxu1 %v5163_v26  ;;  %v2555_v53 = vpop.permute.xlu0 %2554  ;;  %v2263_v22 = vadd.f32 %v12534_v63, %v9107_v21 }
 0x3d4   :  { %v2258_v20 = vadd.f32 %v12534_v63, %v2257_v52  ;;  %5840 = vmatmul.mubr.f32.gmra.mrb[6].mxu1 %v5162_v57  ;;  %v3383_v5 = vsel %vm3362_vm14, %v12339_v38, %v2555_v53 }
 0x3d5   :  { %v3275_v46 = vpop.permute.xlu1 %3274 }
 0x3d6   :  { %v3584_v55 = vsel %vm3444_vm2, %v3544_v56, %v3275_v46  ;;  %v12764_v24 = vmax.f32 %v2258_v20, 0.0  ;;  %v2325_v46 = vmax.f32 %v2263_v22, 0.0 }
 0x3d7   :  { %v4179_v8 = vcombine.low %v3464_v44, %v3584_v55  ;;  %3046 = vrot.lane.b32.xlu1 %v12702_v6, %s9625_s25  ;;  %v3029_v7 = vpop.permute.xlu0 %3028 }
 0x3d8   :  { %v12774_v36 = vrot.slane %v12764_v24, 1  ;;  %v12778_v59 = vrot.slane %v12764_v24, 2  ;;  %v2396_v20 = vcombine.high %v12764_v24, %v12764_v24  ;;  %v3505_v55 = vsel %vm3362_vm14, %v12407_v18, %v3029_v7 }
 0x3d9   :  { %v4186_v17 = vrot.slane %v4179_v8, %v12506_v32  ;;  %v3151_v41 = vpop.permute.xlu1 %3150 }
 0x3da   :  { %16342 = vst [vmem:[#allocation37_spill] sm:$0xff] %v12778_v59  ;;  %v12782_v58 = vsel %vm136_vm0, %v2502_v1, %v12774_v36  ;;  %v12786_v57 = vsel %vm353_vm1, %v2682_v25, %v12778_v59  ;;  %v12804_v8 = vcombine.low %v2396_v20, %v2325_v46  ;;  %v12813_v25 = vcombine.high %v2325_v46, %v2325_v46 }
 0x3db   :  { %v4194_v26 = vcombine.low %v4186_v17, %v4193_v33  ;;  %16343 = vst [vmem:[#allocation38_spill] sm:$0xff] %v12786_v57  ;;  %3292 = vrot.lane.b32.xlu1 %v12782_v58, %s9627_s14  ;;  %3048 = vrot.lane.b32.xlu0 %v12786_v57, %s9625_s25  ;;  %v2735_v15 = vpop.permute.xlu0 %2734  ;;  %v3545_v18 = vsel %vm3403_vm15, %v3505_v55, %v3151_v41 }
 0x3dc   :  { %v3424_v33 = vsel %vm3403_vm15, %v3383_v5, %v2735_v15  ;;  %v2505_v20 = vrot.slane %v12804_v8, 1  ;;  %v12827_v41 = vrot.slane %v12813_v25, 1 }
 0x3dd   :  { %v12794_v52 = vcombine.high %v12689_v23, %v4194_v26  ;;  %v2559_v56 = vpop.permute.xlu1 %2558  ;;  %v4178_v26 = vcombine.high %v12698_v28, %v12689_v23 }
 0x3de   :  { %v12831_v55 = vsel %vm136_vm0, %v2505_v20, %v12827_v41  ;;  %v3385_v20 = vsel %vm3362_vm14, %v12352_v47, %v2559_v56 }
 0x3df   :  { %16344 = vst [vmem:[#allocation39_spill] sm:$0xff] %v12794_v52  ;;  %2754 = vrot.lane.b32.xlu1 %v12720_v34, %s9626_s8  ;;  %2752 = vrot.lane.b32.xlu0 %v12573_v27, %s9626_s8  ;;  %v2557_v21 = vpop.permute.xlu0 %2556  ;;  %v8754_v53 = vcombine.low %v4178_v26, %v4186_v17 }
 0x3e1   :  { %v3031_v44 = vpop.permute.xlu1 %3030  ;;  %v5175_v17 = vrot.slane %v8754_v53, %v12506_v32 }
 0x3e3   :  { %3170 = vrot.lane.b32.xlu1 %v12804_v8, %s9626_s8  ;;  %3168 = vrot.lane.b32.xlu0 %v12764_v24, %s9626_s8  ;;  %v2857_v1 = vpop.permute.xlu0 %2856 }
 0x3e4   :  { %v3465_v7 = vsel %vm3444_vm2, %v3424_v33, %v2857_v1 }
 0x3e5   :  { %v3277_v22 = vpop.permute.xlu1 %3276 }
 0x3e6   :  { %v3585_v38 = vsel %vm3444_vm2, %v3545_v18, %v3277_v22 }
 0x3e7   :  { %v4195_v15 = vcombine.low %v3465_v7, %v3585_v38  ;;  %2876 = vrot.lane.b32.xlu1 %v12743_v30, %s9627_s14  ;;  %2874 = vrot.lane.b32.xlu0 %v12627_v31, %s9627_s14  ;;  %v3033_v46 = vpop.permute.xlu0 %3032  ;;  %v4196_v12 = vcombine.high %v3465_v7, %v3585_v38 }
 0x3e9   :  { %v4204_v5 = vrot.slane %v4195_v15, %v12506_v32  ;;  %v2739_v16 = vpop.permute.xlu1 %2738 }
 0x3eb   :  { %v5189_v33 = vrot.slane %v4204_v5, %v12506_v32  ;;  %3296 = vrot.lane.b32.xlu1 %v12831_v55, %s9627_s14  ;;  %3294 = vrot.lane.b32.xlu0 %v12774_v36, %s9627_s14  ;;  %v2737_v1 = vpop.permute.xlu0 %2736  ;;  %v3507_v5 = vsel %vm3362_vm14, %v12438_v48, %v3033_v46  ;;  %v3384_v48 = vsel %vm3362_vm14, %v12335_v11, %v2557_v21 }
 0x3ec   :  { %v3506_v46 = vsel %vm3362_vm14, %v12391_v19, %v3031_v44  ;;  %v3425_v54 = vsel %vm3403_vm15, %v3384_v48, %v2737_v1  ;;  %v2685_v1 = vrot.slane %v12804_v8, 2 }
 0x3ed   :  { %v3155_v26 = vpop.permute.xlu1 %3154  ;;  %v5198_v18 = vcombine.high %v5175_v17, %v5189_v33  ;;  %v5197_v22 = vcombine.low %v5175_v17, %v5189_v33  ;;  %v4248_v33 = vcombine.high %v12551_v50, %v12551_v50 }
 0x3ef   :  { %5844 = vmatprep.mubr.f32.mxu1 %v5198_v18  ;;  %3050 = vrot.lane.b32.xlu1 %v12778_v59, %s9625_s25  ;;  %v3153_v53 = vpop.permute.xlu0 %3152  ;;  %v3426_v18 = vsel %vm3403_vm15, %v3385_v20, %v2739_v16 }
 0x3f0   :  { %2576 = vrot.lane.b32.xlu0 %v12645_v37, %s9625_s25  ;;  %5845 = vmatmul.mubr.f32.gmra.mrb[8].mxu1 %v5197_v22  ;;  %v3547_v22 = vsel %vm3403_vm15, %v3507_v5, %v3155_v26  ;;  %v3546_v23 = vsel %vm3403_vm15, %v3506_v46, %v3153_v53  ;;  %v4276_v26 = vrot.slane %v4248_v33, %v12506_v32 }
 0x3f1   :  { %v2861_v15 = vpop.permute.xlu1 %2860  ;;  %v4211_v53 = vrot.slane %v4196_v12, %v12506_v32 }
 0x3f2   :  { %v3467_v47 = vsel %vm3444_vm2, %v3426_v18, %v2861_v15 }
 0x3f3   :  { %3172 = vrot.lane.b32.xlu1 %v12813_v25, %s9626_s8  ;;  %v2859_v17 = vpop.permute.xlu0 %2858  ;;  %v5210_v33 = vrot.slane %v4211_v53, %v12506_v32 }
 0x3f4   :  { %2756 = vrot.lane.b32.xlu0 %v12702_v6, %s9626_s8  ;;  %v3466_v11 = vsel %vm3444_vm2, %v3425_v54, %v2859_v17 }
 0x3f5   :  { %v3281_v27 = vpop.permute.xlu1 %3280 }
 0x3f6   :  { %v3587_v56 = vsel %vm3444_vm2, %v3547_v22, %v3281_v27  ;;  %v12892_v22 = vrot.slane %v12551_v50, %v12506_v32 }
 0x3f7   :  { %v4247_v52 = vcombine.high %v3467_v47, %v3587_v56  ;;  %v4246_v16 = vcombine.low %v3467_v47, %v3587_v56  ;;  %3298 = vrot.lane.b32.xlu1 %v12827_v41, %s9627_s14  ;;  %v3279_v27 = vpop.permute.xlu0 %3278 }
 0x3f8   :  { %2878 = vrot.lane.b32.xlu0 %v12764_v24, %s9627_s14  ;;  %v3586_v21 = vsel %vm3444_vm2, %v3546_v23, %v3279_v27  ;;  %v12880_v23 = vrot.slane %v12813_v25, 2  ;;  %16345 = vst [vmem:[#allocation40_spill] sm:$0xff] %v12892_v22 }
 0x3f9   :  { %v4262_v19 = vrot.slane %v4247_v52, %v12506_v32  ;;  %v3035_v44 = vpop.permute.xlu1 %3034  ;;  %v4230_v7 = vcombine.low %v3466_v11, %v3586_v21  ;;  %v4255_v15 = vrot.slane %v4246_v16, %v12506_v32 }
 0x3fa   :  { %v12884_v17 = vsel %vm353_vm1, %v2685_v1, %v12880_v23  ;;  %v3508_v46 = vsel %vm3362_vm14, %v12420_v60, %v3035_v44 }
 0x3fb   :  { %v4279_v38 = vcombine.low %v4262_v19, %v4276_v26  ;;  %v4237_v20 = vrot.slane %v4230_v7, %v12506_v32  ;;  %2582 = vrot.lane.b32.xlu1 %v12831_v55, %s9625_s25  ;;  %v2561_v54 = vpop.permute.xlu0 %2560  ;;  %v4278_v27 = vcombine.high %v4255_v15, %v12892_v22  ;;  %v4280_v44 = vcombine.high %v4262_v19, %v4276_v26 }
 0x3fc   :  { %2578 = vrot.lane.b32.xlu0 %v12782_v58, %s9625_s25  ;;  %v3386_v16 = vsel %vm3362_vm14, %v12350_v40, %v2561_v54  ;;  %v4295_v40 = vrot.slane %v12543_v45, %v12506_v32 }
 0x3fd   :  { %v3157_v52 = vpop.permute.xlu1 %3156  ;;  %v8756_v5 = vcombine.low %v4237_v20, %v4255_v15  ;;  %v8758_v20 = vcombine.low %v4278_v27, %v4262_v19  ;;  %v8759_v54 = vcombine.high %v12892_v22, %v4279_v38 }
 0x3fe   :  { %v3548_v11 = vsel %vm3403_vm15, %v3508_v46, %v3157_v52 }
 0x3ff   :  { %v2741_v12 = vpop.permute.xlu0 %2740  ;;  %v5224_v18 = vrot.slane %v8756_v5, %v12506_v32 }
 0x400   :  { %3052 = vrot.lane.b32.xlu0 %v12884_v17, %s9625_s25  ;;  %v3427_v21 = vsel %vm3403_vm15, %v3386_v16, %v2741_v12  ;;  %v5252_v16 = vrot.slane %v8759_v54, %v12506_v32 }
 0x401   :  { %v3283_v47 = vpop.permute.xlu1 %3282  ;;  %v5233_v56 = vcombine.high %v5210_v33, %v5224_v18  ;;  %v5232_v48 = vcombine.low %v5210_v33, %v5224_v18  ;;  %v5245_v18 = vrot.slane %v8758_v20, %v12506_v32 }
 0x402   :  { %v3588_v7 = vsel %vm3444_vm2, %v3548_v11, %v3283_v47 }
 0x403   :  { %5849 = vmatprep.mubr.f32.mxu1 %v5233_v56  ;;  %v2863_v50 = vpop.permute.xlu0 %2862 }
 0x404   :  { %2758 = vrot.lane.b32.xlu0 %v12786_v57, %s9626_s8  ;;  %v3468_v1 = vsel %vm3444_vm2, %v3427_v21, %v2863_v50  ;;  %5850 = vmatmul.mubr.f32.gmra.mrb[10].mxu1 %v5232_v48 }
 0x405   :  { %v4281_v60 = vcombine.low %v3468_v1, %v3588_v7  ;;  %v2567_v56 = vpop.permute.xlu1 %2566 }
 0x407   :  { %v4288_v53 = vrot.slane %v4281_v60, %v12506_v32  ;;  %v2563_v15 = vpop.permute.xlu0 %2562 }
 0x409   :  { %v4296_v52 = vcombine.low %v4288_v53, %v4295_v40  ;;  %v8760_v5 = vcombine.low %v4280_v44, %v4288_v53 }
 0x40b   :  { %v8761_v12 = vcombine.high %v4276_v26, %v4296_v52  ;;  %v3037_v33 = vpop.permute.xlu0 %3036  ;;  %v5259_v47 = vrot.slane %v8760_v5, %v12506_v32 }
 0x40d   :  { %v5268_v48 = vcombine.high %v5245_v18, %v5259_v47  ;;  %v5267_v46 = vcombine.low %v5245_v18, %v5259_v47  ;;  %v5266_v45 = vrot.slane %v8761_v12, %v12506_v32  ;;  %v3387_v47 = vsel %vm3362_vm14, %v12372_v14, %v2563_v15 }
 0x40f   :  { %5854 = vmatprep.mubr.f32.mxu1 %v5268_v48  ;;  %v2743_v11 = vpop.permute.xlu0 %2742  ;;  %v12913_v19 = vcombine.low %v5252_v16, %v5266_v45  ;;  %v3509_v48 = vsel %vm3362_vm14, %v12479_v62, %v3037_v33 }
 0x410   :  { %5855 = vmatmul.mubr.f32.gmra.mrb[12].mxu1 %v5267_v46  ;;  %v3428_v16 = vsel %vm3403_vm15, %v3387_v47, %v2743_v11 }
 0x411   :  { %16346 = vst [vmem:[#allocation41_spill] sm:$0xff] %v12913_v19  ;;  %v3041_v38 = vpop.permute.xlu1 %3040 }
 0x412   :  { %v9110_v27 = vpop.f32.mrb[30].mxu0 }
 0x413   :  { %v2267_v26 = vpop.f32.mrb[31].mxu0  ;;  %v3159_v21 = vpop.permute.xlu0 %3158  ;;  %v2273_v50 = vadd.f32 %v12534_v63, %v9110_v27 }
 0x414   :  { %v2268_v7 = vadd.f32 %v12534_v63, %v2267_v26  ;;  %v3549_v45 = vsel %vm3403_vm15, %v3509_v48, %v3159_v21  ;;  %v3389_v21 = vsel %vm3362_vm14, %v12460_v4, %v2567_v56  ;;  %v3511_v4 = vsel %vm3362_vm14, %v12639_v42, %v3041_v38 }
 0x415   :  { %v2747_v1 = vpop.permute.xlu1 %2746  ;;  %v12919_v40 = vmax.f32 %v2273_v50, 0.0 }
 0x416   :  { %v2326_v60 = vmax.f32 %v2268_v7, 0.0  ;;  %v3430_v56 = vsel %vm3403_vm15, %v3389_v21, %v2747_v1 }
 0x417   :  { %v12917_v44 = vpop.permute.xlu0 %2564  ;;  %v12927_v12 = vrot.slane %v12919_v40, 2  ;;  %v2399_v47 = vcombine.high %v12919_v40, %v12919_v40 }
 0x418   :  { %v2398_v53 = vcombine.high %v2326_v60, %v2326_v60 }
 0x419   :  { %v3163_v20 = vpop.permute.xlu1 %3162 }
 0x41a   :  { %v12921_v54 = vcombine.low %v2326_v60, %v2398_v53 }
 0x41b   :  { %v2869_v52 = vpop.permute.xlu0 %2868 }
 0x41c   :  { %3174 = vrot.lane.b32.xlu0 %v12921_v54, %s9626_s8  ;;  %v2688_v5 = vrot.slane %v12921_v54, 2  ;;  %v2508_v60 = vrot.slane %v12921_v54, 1 }
 0x41d   :  { %v2865_v18 = vpop.permute.xlu1 %2864 }
 0x41e   :  { %v12935_v46 = vsel %vm353_vm1, %v2688_v5, %v12927_v12  ;;  %v3469_v50 = vsel %vm3444_vm2, %v3428_v16, %v2865_v18  ;;  %v4350_v16 = vcombine.high %v12720_v34, %v12720_v34 }
 0x41f   :  { %16347 = vst [vmem:[#allocation42_spill] sm:$0xff] %v12935_v46  ;;  %3056 = vrot.lane.b32.xlu1 %v12935_v46, %s9625_s25  ;;  %v12941_v27 = vpop.f32.mrb[32].mxu0  ;;  %v3285_v26 = vpop.permute.xlu0 %3284 }
 0x420   :  { %v3589_v14 = vsel %vm3444_vm2, %v3549_v45, %v3285_v26  ;;  %v2277_v15 = vpop.f32.mrb[33].mxu0  ;;  %2580 = vrot.lane.b32.xlu0 %v12774_v36, %s9625_s25  ;;  %v12965_v45 = vrot.slane %v12919_v40, 1  ;;  %v3551_v26 = vsel %vm3403_vm15, %v3511_v4, %v3163_v20 }
 0x421   :  { %v4297_v62 = vcombine.low %v3469_v50, %v3589_v14  ;;  %v4298_v33 = vcombine.high %v3469_v50, %v3589_v14  ;;  %v2278_v11 = vadd.f32 %v12534_v63, %v2277_v15  ;;  %v3039_v7 = vpop.permute.xlu1 %3038 }
 0x422   :  { %v12976_v38 = vsel %vm136_vm0, %v2508_v60, %v12965_v45 }
 0x423   :  { %v4306_v53 = vrot.slane %v4297_v62, %v12506_v32  ;;  %v4313_v5 = vrot.slane %v4298_v33, %v12506_v32  ;;  %v2328_v18 = vmax.f32 %v2278_v11, 0.0  ;;  %2762 = vrot.lane.b32.xlu1 %v12884_v17, %s9626_s8  ;;  %v2745_v48 = vpop.permute.xlu0 %2744  ;;  %v3471_v33 = vsel %vm3444_vm2, %v3430_v56, %v2869_v52 }
 0x424   :  { %2884 = vrot.lane.b32.xlu0 %v12921_v54, %s9627_s14  ;;  %v12993_v56 = vrot.slane %v12720_v34, %v12506_v32 }
 0x425   :  { %v12968_v50 = vcombine.low %v2399_v47, %v2328_v18  ;;  %v3289_v14 = vpop.permute.xlu1 %3288  ;;  %v5280_v15 = vrot.slane %v4306_v53, %v12506_v32  ;;  %v5294_v62 = vrot.slane %v4313_v5, %v12506_v32  ;;  %v12983_v53 = vrot.slane %v4350_v16, %v12506_v32 }
 0x426   :  { %v3591_v42 = vsel %vm3444_vm2, %v3551_v26, %v3289_v14  ;;  %v12989_v4 = vcombine.high %v2328_v18, %v2328_v18  ;;  %16350 = vst [vmem:[#allocation45_spill] sm:$0xff] %v12993_v56  ;;  %v3388_v14 = vsel %vm3362_vm14, %v12402_v49, %v12917_v44  ;;  %v3510_v18 = vsel %vm3362_vm14, %v12473_v51, %v3039_v7 }
 0x427   :  { %v4348_v1 = vcombine.low %v3471_v33, %v3591_v42  ;;  %v4349_v11 = vcombine.high %v3471_v33, %v3591_v42  ;;  %3178 = vrot.lane.b32.xlu1 %v12968_v50, %s9626_s8  ;;  %v2867_v20 = vpop.permute.xlu0 %2866  ;;  %v5303_v21 = vcombine.high %v5280_v15, %v5294_v62  ;;  %v5302_v47 = vcombine.low %v5280_v15, %v5294_v62 }
 0x428   :  { %3300 = vrot.lane.b32.xlu0 %v12976_v38, %s9627_s14  ;;  %16348 = vst [vmem:[#allocation43_spill] sm:$0xff] %v12983_v53  ;;  %v3429_v34 = vsel %vm3403_vm15, %v3388_v14, %v2745_v48  ;;  %v13013_v49 = vrot.slane %v12989_v4, 1 }
 0x429   :  { %v4357_v52 = vrot.slane %v4348_v1, %v12506_v32  ;;  %v12987_v5 = vrot.slane %v4349_v11, %v12506_v32  ;;  %v3161_v60 = vpop.permute.xlu1 %3160  ;;  %5859 = vmatprep.mubr.f32.mxu1 %v5303_v21  ;;  %v3470_v42 = vsel %vm3444_vm2, %v3429_v34, %v2867_v20  ;;  %v2511_v11 = vrot.slane %v12968_v50, 1 }
 0x42a   :  { %5860 = vmatmul.mubr.f32.gmra.mrb[14].mxu1 %v5302_v47  ;;  %v3550_v62 = vsel %vm3403_vm15, %v3510_v18, %v3161_v60 }
 0x42b   :  { %16349 = vst [vmem:[#allocation44_spill] sm:$0xff] %v12987_v5  ;;  %2880 = vrot.lane.b32.xlu1 %v12804_v8, %s9627_s14  ;;  %v2569_v16 = vpop.permute.xlu0 %2568  ;;  %v4380_v15 = vcombine.high %v4357_v52, %v12993_v56  ;;  %v13023_v21 = vsel %vm136_vm0, %v2511_v11, %v13013_v49 }
 0x42c   :  { %2760 = vrot.lane.b32.xlu0 %v12778_v59, %s9626_s8  ;;  %v3390_v11 = vsel %vm3362_vm14, %v12465_v0, %v2569_v16  ;;  %v4397_v16 = vrot.slane %v12702_v6, %v12506_v32 }
 0x42d   :  { %v3287_v33 = vpop.permute.xlu1 %3286  ;;  %v8764_v20 = vcombine.low %v4380_v15, %v12987_v5 }
 0x42e   :  { %v3590_v1 = vsel %vm3444_vm2, %v3550_v62, %v3287_v33 }
 0x42f   :  { %v4332_v51 = vcombine.low %v3470_v42, %v3590_v1  ;;  %3054 = vrot.lane.b32.xlu1 %v12880_v23, %s9625_s25  ;;  %v2749_v44 = vpop.permute.xlu0 %2748  ;;  %v5329_v34 = vrot.slane %v8764_v20, %v12506_v32  ;;  %v2691_v42 = vrot.slane %v12968_v50, 2  ;;  %v13039_v1 = vrot.slane %v12989_v4, 2 }
 0x430   :  { %2882 = vrot.lane.b32.xlu0 %v12813_v25, %s9627_s14 }
 0x431   :  { %v4339_v7 = vrot.slane %v4332_v51, %v12506_v32  ;;  %v3043_v48 = vpop.permute.xlu1 %3042  ;;  %v13055_v0 = vsel %vm353_vm1, %v2691_v42, %v13039_v1 }
 0x432   :  { %v3512_v51 = vsel %vm3362_vm14, %v12630_v29, %v3043_v48  ;;  %v2283_v29 = vadd.f32 %v12534_v63, %v12941_v27 }
 0x433   :  { %v8762_v47 = vcombine.low %v4339_v7, %v4357_v52  ;;  %3304 = vrot.lane.b32.xlu1 %v13023_v21, %s9627_s14  ;;  %v2571_v60 = vpop.permute.xlu0 %2570  ;;  %v3431_v7 = vsel %vm3403_vm15, %v3390_v11, %v2749_v44 }
 0x434   :  { %2584 = vrot.lane.b32.xlu0 %v12827_v41, %s9625_s25  ;;  %v2329_v42 = vmax.f32 %v2283_v29, 0.0 }
 0x435   :  { %v3165_v14 = vpop.permute.xlu1 %3164  ;;  %v5315_v18 = vrot.slane %v8762_v47, %v12506_v32 }
 0x436   :  { %v3552_v20 = vsel %vm3403_vm15, %v3512_v51, %v3165_v14  ;;  %v4422_v14 = vrot.slane %v12786_v57, %v12506_v32 }
 0x437   :  { %3176 = vrot.lane.b32.xlu1 %v12919_v40, %s9626_s8  ;;  %v3045_v15 = vpop.permute.xlu0 %3044  ;;  %v5338_v62 = vcombine.high %v5315_v18, %v5329_v34  ;;  %v5337_v33 = vcombine.low %v5315_v18, %v5329_v34 }
 0x438   :  { %2764 = vrot.lane.b32.xlu0 %v12880_v23, %s9626_s8 }
 0x439   :  { %v2871_v52 = vpop.permute.xlu1 %2870  ;;  %5864 = vmatprep.mubr.f32.mxu1 %v5338_v62 }
 0x43a   :  { %5865 = vmatmul.mubr.f32.gmra.mrb[16].mxu1 %v5337_v33  ;;  %v3472_v34 = vsel %vm3444_vm2, %v3431_v7, %v2871_v52  ;;  %v13081_v7 = vrot.slane %v4422_v14, %v12506_v32  ;;  %v3513_v14 = vsel %vm3362_vm14, %v12657_v35, %v3045_v15 }
 0x43b   :  { %3302 = vrot.lane.b32.xlu1 %v12965_v45, %s9627_s14  ;;  %v2751_v47 = vpop.permute.xlu0 %2750 }
 0x43c   :  { %2586 = vrot.lane.b32.xlu0 %v12976_v38, %s9625_s25  ;;  %16352 = vst [vmem:[#allocation47_spill] sm:$0xff] %v13081_v7 }
 0x43d   :  { %v3291_v18 = vpop.permute.xlu1 %3290 }
 0x43e   :  { %v3592_v62 = vsel %vm3444_vm2, %v3552_v20, %v3291_v18  ;;  %v2401_v20 = vcombine.high %v2329_v42, %v2329_v42 }
 0x43f   :  { %v4383_v33 = vcombine.low %v3472_v34, %v3592_v62  ;;  %3058 = vrot.lane.b32.xlu1 %v12927_v12, %s9625_s25  ;;  %v13066_v11 = vpop.permute.xlu0 %2572 }
 0x440   :  { %3060 = vrot.lane.b32.xlu0 %v13055_v0, %s9625_s25  ;;  %v13089_v29 = vcombine.low %v2329_v42, %v2401_v20 }
 0x441   :  { %v4390_v44 = vrot.slane %v4383_v33, %v12506_v32  ;;  %v3167_v48 = vpop.permute.xlu1 %3166 }
 0x442   :  { %v3553_v26 = vsel %vm3403_vm15, %v3513_v14, %v3167_v48 }
 0x443   :  { %v4398_v52 = vcombine.low %v4390_v44, %v4397_v16  ;;  %3180 = vrot.lane.b32.xlu1 %v12989_v4, %s9626_s8  ;;  %v2873_v18 = vpop.permute.xlu0 %2872  ;;  %v3391_v16 = vsel %vm3362_vm14, %v12565_v3, %v2571_v60 }
 0x444   :  { %2766 = vrot.lane.b32.xlu0 %v12935_v46, %s9626_s8  ;;  %v3432_v62 = vsel %vm3403_vm15, %v3391_v16, %v2751_v47 }
 0x445   :  { %v8767_v27 = vcombine.high %v12983_v53, %v4398_v52  ;;  %v13073_v51 = vpop.permute.xlu1 %2574  ;;  %v4382_v52 = vcombine.high %v12987_v5, %v12983_v53  ;;  %v13104_v60 = vsel %vm3444_vm2, %v3432_v62, %v2873_v18  ;;  %v2985_v18 = vrot.slane %v13089_v29, 2 }
 0x446   :  { %v3393_v56 = vsel %vm3362_vm14, %v12608_v39, %v13073_v51 }
 0x447   :  { %2886 = vrot.lane.b32.xlu1 %v12919_v40, %s9627_s14  ;;  %v13078_v6 = vrot.slane %v8767_v27, %v12506_v32  ;;  %v8766_v15 = vcombine.low %v4382_v52, %v4390_v44 }
 0x448   :  { %2588 = vrot.lane.b32.xlu0 %v12965_v45, %s9625_s25 }
 0x449   :  { %16351 = vst [vmem:[#allocation46_spill] sm:$0xff] %v13078_v6  ;;  %v3047_v34 = vpop.permute.xlu1 %3046  ;;  %v5350_v44 = vrot.slane %v8766_v15, %v12506_v32 }
 0x44b   :  { %3306 = vrot.lane.b32.xlu1 %v13013_v49, %s9627_s14  ;;  %v9116_v33 = vpop.f32.mrb[34].mxu0 }
 0x44c   :  { %v2287_v27 = vpop.f32.mrb[35].mxu0  ;;  %2888 = vrot.lane.b32.xlu0 %v12968_v50, %s9627_s14  ;;  %v2293_v42 = vadd.f32 %v12534_v63, %v9116_v33 }
 0x44d   :  { %v2288_v20 = vadd.f32 %v12534_v63, %v2287_v27  ;;  %v3293_v7 = vpop.permute.xlu1 %3292  ;;  %v3049_v3 = vpop.permute.xlu0 %3048 }
 0x44e   :  { %v13107_v35 = vsel %vm3444_vm2, %v3553_v26, %v3293_v7  ;;  %v2331_v48 = vmax.f32 %v2293_v42, 0.0  ;;  %v3515_v53 = vsel %vm3362_vm14, %v12782_v58, %v3049_v3 }
 0x44f   :  { %v13109_v6 = vmax.f32 %v2288_v20, 0.0  ;;  %v4399_v47 = vcombine.low %v13104_v60, %v13107_v35  ;;  %3182 = vrot.lane.b32.xlu1 %v13089_v29, %s9626_s8  ;;  %v4400_v57 = vcombine.high %v13104_v60, %v13107_v35 }
 0x450   :  { %v13132_v52 = vcombine.high %v2331_v48, %v2331_v48 }
 0x451   :  { %v4408_v63 = vrot.slane %v4399_v47, %v12506_v32  ;;  %v2755_v33 = vpop.permute.xlu1 %2754  ;;  %v2753_v16 = vpop.permute.xlu0 %2752  ;;  %v13118_v62 = vrot.slane %v13109_v6, 2  ;;  %v2402_v14 = vcombine.high %v13109_v6, %v13109_v6  ;;  %v13135_v46 = vrot.slane %v13109_v6, 1 }
 0x452   :  { %16353 = vst [vmem:[#allocation48_spill] sm:$0xff] %v13132_v52  ;;  %v3434_v51 = vsel %vm3403_vm15, %v3393_v56, %v2755_v33 }
 0x453   :  { %2590 = vrot.lane.b32.xlu1 %v13023_v21, %s9625_s25  ;;  %v13124_v26 = vsel %vm353_vm1, %v2985_v18, %v13118_v62  ;;  %v5364_v7 = vrot.slane %v4408_v63, %v12506_v32  ;;  %16354 = vst [vmem:[#allocation49_spill] sm:$0xff] %v13135_v46  ;;  %v3109_v15 = vcombine.low %v2402_v14, %v2331_v48 }
 0x454   :  { %3064 = vrot.lane.b32.xlu0 %v13124_v26, %s9625_s25  ;;  %v4452_v63 = vcombine.high %v12884_v17, %v12884_v17  ;;  %v4605_v18 = vcombine.high %v13124_v26, %v13124_v26  ;;  %v3392_v14 = vsel %vm3362_vm14, %v12555_v13, %v13066_v11  ;;  %v16355_v13 = vrot.slane %v13132_v52, 1 }
 0x455   :  { %v3171_v27 = vpop.permute.xlu1 %3170  ;;  %v3169_v42 = vpop.permute.xlu0 %3168  ;;  %v5373_v20 = vcombine.high %v5350_v44, %v5364_v7  ;;  %v5372_v47 = vcombine.low %v5350_v44, %v5364_v7  ;;  %v2939_v44 = vrot.slane %v13089_v29, 1  ;;  %v3233_v48 = vrot.slane %v3109_v15, 1 }
 0x456   :  { %v4652_v58 = vrot.slane %v13118_v62, %v12506_v32  ;;  %v3433_v60 = vsel %vm3403_vm15, %v3392_v14, %v2753_v16  ;;  %v3555_v35 = vsel %vm3403_vm15, %v3515_v53, %v3171_v27  ;;  %v13204_v53 = vrot.slane %v4452_v63, %v12506_v32 }
 0x457   :  { %3062 = vrot.lane.b32.xlu1 %v13039_v1, %s9625_s25  ;;  %5869 = vmatprep.mubr.f32.mxu1 %v5373_v20  ;;  %v3359_v20 = vrot.slane %v3109_v15, 2  ;;  %v13158_v7 = vsel %vm136_vm0, %v2939_v44, %v13135_v46  ;;  %v13169_v39 = vsel %vm136_vm0, %v3233_v48, %v16355_v13 }
 0x458   :  { %2768 = vrot.lane.b32.xlu0 %v12927_v12, %s9626_s8  ;;  %5870 = vmatmul.mubr.f32.gmra.mrb[18].mxu1 %v5372_v47  ;;  %v3514_v47 = vsel %vm3362_vm14, %v12645_v37, %v3047_v34  ;;  %v16356_v37 = vrot.slane %v13132_v52, 2  ;;  %v4633_v34 = vrot.slane %v4605_v18, %v12506_v32 }
 0x459   :  { %v2877_v59 = vpop.permute.xlu1 %2876  ;;  %v2875_v19 = vpop.permute.xlu0 %2874  ;;  %v3554_v44 = vsel %vm3403_vm15, %v3514_v47, %v3169_v42  ;;  %v4415_v42 = vrot.slane %v4400_v57, %v12506_v32 }
 0x45a   :  { %v13174_v11 = vsel %vm353_vm1, %v3359_v20, %v16356_v37  ;;  %v3475_v56 = vsel %vm3444_vm2, %v3434_v51, %v2877_v59  ;;  %v3474_v20 = vsel %vm3444_vm2, %v3433_v60, %v2875_v19  ;;  %v13199_v59 = vld [vmem:[%s16168_s6] ss:$0 sm:$0xff]  ;;  %v5567_v16 = vrot.slane %v4633_v34, %v12506_v32 }
 0x45b   :  { %3308 = vrot.lane.b32.xlu1 %v13158_v7, %s9627_s14  ;;  %v13184_v3 = vrot.slane %v13174_v11, %v12506_v32  ;;  %v2123_v19 = vadd.f32 %v13199_v59, %v10725_v9  ;;  %v2128_v63 = vadd.f32 %v13199_v59, %v10811_v43  ;;  %v13228_v43 = vrot.slane %v12884_v17, %v12506_v32 }
 0x45c   :  { %3184 = vrot.lane.b32.xlu0 %v13109_v6, %s9626_s8 }
 0x45d   :  { %16357 = vst [vmem:[#allocation50_spill] sm:$0xff] %v13184_v3  ;;  %v3297_v33 = vpop.permute.xlu1 %3296  ;;  %v3295_v18 = vpop.permute.xlu0 %3294  ;;  %v8781_v37 = vcombine.low %v4652_v58, %v13184_v3  ;;  %16359 = vst [vmem:[#allocation52_spill] sm:$0xff] %v13228_v43 }
 0x45e   :  { %v3595_v48 = vsel %vm3444_vm2, %v3555_v35, %v3297_v33  ;;  %v3594_v13 = vsel %vm3444_vm2, %v3554_v44, %v3295_v18  ;;  %v13220_v44 = vmax.f32 %v2123_v19, 0.0  ;;  %v16360_v18 = vld [vmem:[#allocation6_spill] sm:$0xff] }
 0x45f   :  { %v4450_v5 = vcombine.low %v3475_v56, %v3595_v48  ;;  %v4451_v22 = vcombine.high %v3475_v56, %v3595_v48  ;;  %v4434_v28 = vcombine.low %v3474_v20, %v3594_v13  ;;  %2770 = vrot.lane.b32.xlu1 %v13055_v0, %s9626_s8  ;;  %v5581_v27 = vrot.slane %v8781_v37, %v12506_v32 }
 0x460   :  { %2890 = vrot.lane.b32.xlu0 %v12989_v4, %s9627_s14  ;;  %v2298_v56 = vmax.f32 %v2128_v63, 0.0  ;;  %v2133_v20 = vadd.f32 %v13199_v59, %v16360_v18  ;;  %v2369_v48 = vcombine.high %v13220_v44, %v13220_v44  ;;  %v4499_v63 = vrot.slane %v12880_v23, %v12506_v32 }
 0x461   :  { %v4459_v14 = vrot.slane %v4450_v5, %v12506_v32  ;;  %v4466_v47 = vrot.slane %v4451_v22, %v12506_v32  ;;  %v4441_v51 = vrot.slane %v4434_v28, %v12506_v32  ;;  %v3051_v58 = vpop.permute.xlu1 %3050  ;;  %v13216_v60 = vcombine.low %v5567_v16, %v5581_v27 }
 0x462   :  { %v2577_v9 = vpop.permute.xlu0 %2576  ;;  %v5385_v28 = vrot.slane %v4415_v42, %v12506_v32  ;;  %v3516_v13 = vsel %vm3362_vm14, %v12774_v36, %v3051_v58  ;;  %v13245_v42 = vcombine.high %v2298_v56, %v2298_v56 }
 0x463   :  { %16358 = vst [vmem:[#allocation51_spill] sm:$0xff] %v13216_v60  ;;  %v4483_v35 = vcombine.low %v4466_v47, %v13204_v53  ;;  %v8768_v34 = vcombine.low %v4441_v51, %v4459_v14  ;;  %3186 = vrot.lane.b32.xlu1 %v3109_v15, %s9626_s8  ;;  %v3394_v37 = vsel %vm3362_vm14, %v12627_v31, %v2577_v9 }
 0x464   :  { %3310 = vrot.lane.b32.xlu0 %v13135_v46, %s9627_s14  ;;  %v4482_v17 = vcombine.high %v4459_v14, %v13228_v43  ;;  %v13247_v51 = vcombine.low %v2369_v48, %v2298_v56  ;;  %v2299_v14 = vmax.f32 %v2133_v20, 0.0  ;;  %v4484_v9 = vcombine.high %v4466_v47, %v13204_v53 }
 0x465   :  { %v3173_v57 = vpop.permute.xlu1 %3172  ;;  %v5399_v5 = vrot.slane %v8768_v34, %v12506_v32  ;;  %v13263_v56 = vrot.slane %v13245_v42, 1 }
 0x466   :  { %v2757_v22 = vpop.permute.xlu0 %2756  ;;  %v2371_v18 = vcombine.high %v2299_v14, %v2299_v14  ;;  %v2637_v48 = vrot.slane %v13247_v51, 2 }
 0x467   :  { %2892 = vrot.lane.b32.xlu1 %v13089_v29, %s9627_s14  ;;  %v5408_v15 = vcombine.high %v5385_v28, %v5399_v5  ;;  %v5407_v33 = vcombine.low %v5385_v28, %v5399_v5  ;;  %v3556_v29 = vsel %vm3403_vm15, %v3516_v13, %v3173_v57  ;;  %v3435_v19 = vsel %vm3403_vm15, %v3394_v37, %v2757_v22  ;;  %v16361_v22 = vld [vmem:[#allocation8_spill] sm:$0xff] }
 0x468   :  { %2592 = vrot.lane.b32.xlu0 %v13013_v49, %s9625_s25  ;;  %v8770_v57 = vcombine.low %v4482_v17, %v4466_v47  ;;  %v2138_v28 = vadd.f32 %v13199_v59, %v16361_v22  ;;  %v2457_v5 = vrot.slane %v13247_v51, 1  ;;  %16362 = vst [vmem:[#allocation6_spill] sm:$0xff] %v13263_v56 }
 0x469   :  { %v3299_v16 = vpop.permute.xlu1 %3298  ;;  %5874 = vmatprep.mubr.f32.mxu1 %v5408_v15 }
 0x46a   :  { %v2879_v27 = vpop.permute.xlu0 %2878  ;;  %v3596_v36 = vsel %vm3444_vm2, %v3556_v29, %v3299_v16  ;;  %5875 = vmatmul.mubr.f32.gmra.mrb[20].mxu1 %v5407_v33  ;;  %v5420_v47 = vrot.slane %v8770_v57, %v12506_v32  ;;  %v13280_v13 = vmax.f32 %v2138_v28, 0.0 }
 0x46b   :  { %v3476_v31 = vsel %vm3444_vm2, %v3435_v19, %v2879_v27  ;;  %3312 = vrot.lane.b32.xlu1 %v13169_v39, %s9627_s14  ;;  %v8771_v39 = vcombine.high %v13228_v43, %v4483_v35  ;;  %v4737_v35 = vld [vmem:[%s16164_s2 + $0x100] sm:$0xff]  ;;  %v13293_v27 = vcombine.low %v2299_v14, %v2371_v18 }
 0x46c   :  { %v4485_v58 = vcombine.low %v3476_v31, %v3596_v36  ;;  %2772 = vrot.lane.b32.xlu0 %v13039_v1, %s9626_s8  ;;  %v16364_v36 = vld [vmem:[#allocation7_spill] sm:$0xff]  ;;  %v2372_v14 = vcombine.high %v13280_v13, %v13280_v13 }
 0x46d   :  { %v5427_v19 = vrot.slane %v8771_v39, %v12506_v32  ;;  %v2143_v31 = vadd.f32 %v13199_v59, %v16364_v36  ;;  %v2640_v28 = vrot.slane %v13293_v27, 2  ;;  %v4740_v39 = vld [vmem:[%s16164_s2 + $0x118] sm:$0xff] }
 0x46e   :  { %v4492_v34 = vrot.slane %v4485_v58, %v12506_v32  ;;  %v16365_v58 = vmov 0.0|0.0  }
 0x46f   :  { %3066 = vrot.lane.b32.xlu1 %v13118_v62, %s9625_s25  ;;  %v4738_v62 = vld [vmem:[%s16164_s2 + $0x108] sm:$0xff]  ;;  %v2301_v22 = vmax.f32 %v2143_v31, 0.0 }
 0x470   :  { %v4500_v15 = vcombine.low %v4492_v34, %v4499_v63  ;;  %v8772_v33 = vcombine.low %v4484_v9, %v4492_v34  ;;  %2894 = vrot.lane.b32.xlu0 %v13109_v6, %s9627_s14  ;;  %v13284_v6 = vsel %vm136_vm0, %v2457_v5, %v13263_v56  ;;  %v9281_v37 = vpack.c.bf16 %v4738_v62, %v4737_v35  ;;  %v4739_v5 = vld [vmem:[%s16164_s2 + $0x110] sm:$0xff]  ;;  %s8679_s2 = sshll.u32 %s9635_s18, 4  ;;  %s8680_s2 = int_to_ptr.vmem [resolvable:$true] %s8679_s2 }
 0x471   :  { %16363 = vst [vmem:[#allocation8_spill] sm:$0xff] %v13284_v6  ;;  %v13303_v63 = vrot.slane %v13280_v13, 2  ;;  %v16367_v34 = vrot.slane %v13132_v52, 1  ;;  %v13327_v18 = vcombine.low %v2372_v14, %v2301_v22  ;;  %p9596_p1 = scmp.lt.s32.totalorder %s8680_s2, %s8680_s2 }
 0x472   :  { %v8773_v23 = vcombine.high %v13204_v53, %v4500_v15  ;;  %v5434_v20 = vrot.slane %v8772_v33, %v12506_v32  ;;  %v13287_v53 = vrot.slane %v13245_v42, 2  ;;  %9282 = vmatpush3.bf16.msra.mxu1 %v9281_v37  ;;  %v9284_v15 = vpack.c.bf16 %v4740_v39, %v4739_v5  ;;  %v16374_v39 = vld [vmem:[#allocation11_spill] sm:$0xff] }
 0x473   :  { %3188 = vrot.lane.b32.xlu1 %v13132_v52, %s9626_s8  ;;  %9283 = vmatprep.subr.bf16.mxu1 %v16365_v58  ;;  %v13325_v33 = vsel %vm353_vm1, %v2640_v28, %v13303_v63  ;;  %v2463_v35 = vrot.slane %v13327_v18, 1  ;;  %v2583_v28 = vpop.permute.xlu1 %2582 }
 0x474   :  { %v5443_v17 = vcombine.high %v5420_v47, %v5434_v20  ;;  %v5442_v29 = vcombine.low %v5420_v47, %v5434_v20  ;;  %v5441_v16 = vrot.slane %v8773_v23, %v12506_v32  ;;  %2518 = vrot.lane.b32.xlu0 %v13284_v6, %s9625_s25  ;;  %v13312_v57 = vsel %vm353_vm1, %v2637_v48, %v13287_v53  ;;  %v16368_v23 = vld [vmem:[#allocation10_spill] sm:$0xff]  ;;  %v2579_v48 = vpop.permute.xlu0 %2578 }
 0x475   :  { %v2148_v47 = vadd.f32 %v13199_v59, %v16368_v23  ;;  %v13333_v20 = vcombine.high %v2301_v22, %v2301_v22 }
 0x476   :  { %5879 = vmatprep.mubr.f32.mxu1 %v5443_v17  ;;  %v13300_v9 = vcombine.low %v5427_v19, %v5441_v16  ;;  %9285 = vmatpush3.bf16.msra.mxu1 %v9284_v15  ;;  %v16372_v16 = vld [vmem:[#allocation9_spill] sm:$0xff]  ;;  %v2158_v15 = vadd.f32 %v13199_v59, %v16374_v39 }
 0x477   :  { %5880 = vmatmul.mubr.f32.gmra.mrb[22].mxu1 %v5442_v29  ;;  %3314 = vrot.lane.b32.xlu1 %v16367_v34, %s9627_s14  ;;  %16369 = vst [vmem:[#allocation10_spill] sm:$0xff] %v13333_v20  ;;  %v2302_v62 = vmax.f32 %v2148_v47, 0.0  ;;  %v13343_v37 = vrot.slane %v13333_v20, 1  ;;  %v2153_v36 = vadd.f32 %v13199_v59, %v16372_v16 }
 0x478   :  { %16366 = vst [vmem:[#allocation7_spill] sm:$0xff] %v13300_v9  ;;  %2698 = vrot.lane.b32.xlu0 %v13312_v57, %s9626_s8  ;;  %v3053_v19 = vpop.permute.xlu0 %3052  ;;  %v2304_v16 = vmax.f32 %v2158_v15, 0.0 }
 0x479   :  { %16370 = vst [vmem:[#allocation53_spill] sm:$0xff] %v13343_v37  ;;  %v13347_v17 = vsel %vm136_vm0, %v2463_v35, %v13343_v37  ;;  %v2374_v29 = vcombine.high %v2302_v62, %v2302_v62  ;;  %v13361_v14 = vmax.f32 %v2153_v36, 0.0  ;;  %v2643_v35 = vrot.slane %v13327_v18, 2 }
 0x47a   :  { %16371 = vst [vmem:[#allocation54_spill] sm:$0xff] %v13347_v17  ;;  %v13399_v15 = vcombine.high %v2304_v16, %v2304_v16 }
 0x47b   :  { %2992 = vrot.lane.b32.xlu1 %v13325_v33, %s9625_s25  ;;  %v13355_v31 = vcombine.low %v2302_v62, %v2374_v29  ;;  %v13369_v5 = vrot.slane %v13361_v14, 2  ;;  %v13383_v29 = vrot.slane %v13333_v20, 2 }
 0x47c   :  { %2820 = vrot.lane.b32.xlu0 %v13293_v27, %s9627_s14  ;;  %v2759_v34 = vpop.permute.xlu0 %2758 }
 0x47d   :  { %v2646_v22 = vrot.slane %v13355_v31, 2  ;;  %16373 = vst [vmem:[#allocation9_spill] sm:$0xff] %v13369_v5  ;;  %v13391_v39 = vsel %vm353_vm1, %v2643_v35, %v13383_v29 }
 0x47f   :  { %3114 = vrot.lane.b32.xlu1 %v13327_v18, %s9626_s8  ;;  %v13377_v47 = vsel %vm353_vm1, %v2646_v22, %v13369_v5  ;;  %v2375_v22 = vcombine.high %v13361_v14, %v13361_v14 }
 0x480   :  { %2520 = vrot.lane.b32.xlu0 %v13263_v56, %s9625_s25  ;;  %16375 = vst [vmem:[#allocation11_spill] sm:$0xff] %v13377_v47 }
 0x481   :  { %v13397_v60 = vcombine.low %v2375_v22, %v2304_v16  ;;  %v3395_v16 = vsel %vm3362_vm14, %v12743_v30, %v2579_v48  ;;  %v3517_v22 = vsel %vm3362_vm14, %v12831_v55, %v3053_v19  ;;  %v13435_v19 = vrot.slane %v13399_v15, 2 }
 0x482   :  { %v3436_v56 = vsel %vm3403_vm15, %v3395_v16, %v2759_v34 }
 0x483   :  { %3240 = vrot.lane.b32.xlu1 %v13347_v17, %s9627_s14 }
 0x484   :  { %2700 = vrot.lane.b32.xlu0 %v13287_v53, %s9626_s8 }
 0x487   :  { %2994 = vrot.lane.b32.xlu1 %v13303_v63, %s9625_s25 }
 0x488   :  { %2822 = vrot.lane.b32.xlu0 %v13280_v13, %s9627_s14 }
 0x48b   :  { %3116 = vrot.lane.b32.xlu1 %v13333_v20, %s9626_s8 }
 0x48c   :  { %2526 = vrot.lane.b32.xlu0 %v13347_v17, %s9625_s25  ;;  %v13409_v17 = vrot.slane %v13399_v15, 1 }
 0x48e   :  { %v3175_v23 = vpop.permute.xlu0 %3174 }
 0x48f   :  { %3242 = vrot.lane.b32.xlu1 %v13343_v37, %s9627_s14  ;;  %v3557_v6 = vsel %vm3403_vm15, %v3517_v22, %v3175_v23 }
 0x490   :  { %3000 = vrot.lane.b32.xlu0 %v13377_v47, %s9625_s25 }
 0x491   :  { %v3057_v62 = vpop.permute.xlu1 %3056 }
 0x492   :  { %v13385_v36 = vpop.permute.xlu0 %2580 }
 0x493   :  { %2528 = vrot.lane.b32.xlu1 %v13343_v37, %s9625_s25  ;;  %v2469_v37 = vrot.slane %v13397_v60, 1 }
 0x494   :  { %2706 = vrot.lane.b32.xlu0 %v13391_v39, %s9626_s8 }
 0x495   :  { %v2763_v58 = vpop.permute.xlu1 %2762  ;;  %v13425_v30 = vsel %vm136_vm0, %v2469_v37, %v13409_v17 }
 0x496   :  { %v2885_v9 = vpop.permute.xlu0 %2884 }
 0x497   :  { %3002 = vrot.lane.b32.xlu1 %v13369_v5, %s9625_s25 }
 0x498   :  { %3122 = vrot.lane.b32.xlu0 %v13397_v60, %s9626_s8 }
 0x499   :  { %v3179_v35 = vpop.permute.xlu1 %3178 }
 0x49a   :  { %v3301_v43 = vpop.permute.xlu0 %3300 }
 0x49b   :  { %2708 = vrot.lane.b32.xlu1 %v13383_v29, %s9626_s8  ;;  %v3597_v47 = vsel %vm3444_vm2, %v3557_v6, %v3301_v43 }
 0x49c   :  { %2828 = vrot.lane.b32.xlu0 %v13355_v31, %s9627_s14 }
 0x49d   :  { %v2881_v5 = vpop.permute.xlu1 %2880 }
 0x49e   :  { %v3477_v52 = vsel %vm3444_vm2, %v3436_v56, %v2881_v5  ;;  %v2761_v3 = vpop.permute.xlu0 %2760  ;;  %v3397_v56 = vsel %vm3362_vm14, %v12804_v8, %v2583_v28  ;;  %v4554_v8 = vcombine.high %v13055_v0, %v13055_v0 }
 0x49f   :  { %v4501_v20 = vcombine.low %v3477_v52, %v3597_v47  ;;  %v4502_v46 = vcombine.high %v3477_v52, %v3597_v47  ;;  %3124 = vrot.lane.b32.xlu1 %v13399_v15, %s9626_s8  ;;  %v2649_v52 = vrot.slane %v13397_v60, 2  ;;  %v3438_v37 = vsel %vm3403_vm15, %v3397_v56, %v2763_v58  ;;  %v16376_v47 = vld [vmem:[#allocation5_spill] sm:$0xff] }
 0x4a0   :  { %3248 = vrot.lane.b32.xlu0 %v13425_v30, %s9627_s14  ;;  %v2118_v16 = vadd.f32 %v13199_v59, %v16376_v47  ;;  %v3479_v22 = vsel %vm3444_vm2, %v3438_v37, %v2885_v9  ;;  %v13464_v59 = vrot.slane %v4554_v8, %v12506_v32  ;;  %v3396_v8 = vsel %vm3362_vm14, %v12764_v24, %v13385_v36 }
 0x4a1   :  { %v4510_v55 = vrot.slane %v4501_v20, %v12506_v32  ;;  %v4517_v48 = vrot.slane %v4502_v46, %v12506_v32  ;;  %v3055_v43 = vpop.permute.xlu1 %3054  ;;  %v3519_v46 = vsel %vm3362_vm14, %v12976_v38, %v3057_v62  ;;  %v13455_v38 = vsel %vm353_vm1, %v2649_v52, %v13435_v19 }
 0x4a2   :  { %v2883_v6 = vpop.permute.xlu0 %2882  ;;  %v3559_v28 = vsel %vm3403_vm15, %v3519_v46, %v3179_v35  ;;  %v4575_v62 = vrot.slane %v13055_v0, %v12506_v32  ;;  %v4550_v0 = vrot.slane %v12927_v12, %v12506_v32  ;;  %v3437_v12 = vsel %vm3403_vm15, %v3396_v8, %v2761_v3 }
 0x4a3   :  { %2830 = vrot.lane.b32.xlu1 %v13361_v14, %s9627_s14  ;;  %v5455_v34 = vrot.slane %v4510_v55, %v12506_v32  ;;  %v5469_v20 = vrot.slane %v4517_v48, %v12506_v32 }
 0x4a4   :  { %2534 = vrot.lane.b32.xlu0 %v13425_v30, %s9625_s25 }
 0x4a5   :  { %v3305_v5 = vpop.permute.xlu1 %3304  ;;  %v5478_v58 = vcombine.high %v5455_v34, %v5469_v20  ;;  %v5477_v23 = vcombine.low %v5455_v34, %v5469_v20  ;;  %v2296_v20 = vmax.f32 %v2118_v16, 0.0 }
 0x4a6   :  { %v3599_v55 = vsel %vm3444_vm2, %v3559_v28, %v3305_v5  ;;  %v2585_v48 = vpop.permute.xlu0 %2584  ;;  %v16377_v28 = vld [vmem:[#allocation22_spill] sm:$0xff]  ;;  %v8775_v5 = vcombine.low %v4550_v0, %v4575_v62 }
 0x4a7   :  { %v4552_v56 = vcombine.low %v3479_v22, %v3599_v55  ;;  %v4553_v35 = vcombine.high %v3479_v22, %v3599_v55  ;;  %3250 = vrot.lane.b32.xlu1 %v13409_v17, %s9627_s14  ;;  %5884 = vmatprep.mubr.f32.mxu1 %v5478_v58  ;;  %v3518_v58 = vsel %vm3362_vm14, %v12827_v41, %v3055_v43 }
 0x4a8   :  { %2714 = vrot.lane.b32.xlu0 %v13455_v38, %s9626_s8  ;;  %5885 = vmatmul.mubr.f32.gmra.mrb[24].mxu1 %v5477_v23  ;;  %v3478_v55 = vsel %vm3444_vm2, %v3437_v12, %v2883_v6  ;;  %v2368_v24 = vcombine.high %v2296_v20, %v2296_v20  ;;  %v5497_v41 = vrot.slane %v8775_v5, %v12506_v32 }
 0x4a9   :  { %v4561_v9 = vrot.slane %v4552_v56, %v12506_v32  ;;  %v13468_v52 = vrot.slane %v4553_v35, %v12506_v32  ;;  %v3177_v37 = vpop.permute.xlu1 %3176 }
 0x4aa   :  { %v2765_v34 = vpop.permute.xlu0 %2764  ;;  %v3558_v16 = vsel %vm3403_vm15, %v3518_v58, %v3177_v37 }
 0x4ab   :  { %v4585_v46 = vcombine.low %v13468_v52, %v13464_v59  ;;  %3008 = vrot.lane.b32.xlu1 %v16377_v28, %s9625_s25  ;;  %v4584_v23 = vcombine.high %v4561_v9, %v4575_v62 }
 0x4ac   :  { %2836 = vrot.lane.b32.xlu0 %v12029_v2, %s9627_s14 }
 0x4ad   :  { %v8777_v47 = vcombine.high %v4575_v62, %v4585_v46  ;;  %v3303_v22 = vpop.permute.xlu1 %3302  ;;  %v8776_v6 = vcombine.low %v4584_v23, %v13468_v52  ;;  %v13499_v46 = vcombine.low %v2296_v20, %v2368_v24 }
 0x4ae   :  { %v3598_v56 = vsel %vm3444_vm2, %v3558_v16, %v3303_v22  ;;  %v13487_v35 = vpop.permute.xlu0 %2586  ;;  %v2455_v22 = vrot.slane %v13220_v44, 1 }
 0x4af   :  { %v4536_v36 = vcombine.low %v3478_v55, %v3598_v56  ;;  %3130 = vrot.lane.b32.xlu1 %v11892_v61, %s9626_s8  ;;  %v5511_v3 = vrot.slane %v8777_v47, %v12506_v32  ;;  %v5504_v58 = vrot.slane %v8776_v6, %v12506_v32  ;;  %v2454_v23 = vrot.slane %v13499_v46, 1  ;;  %v16378_v47 = vld [vmem:[#allocation20_spill] sm:$0xff]  ;;  %v16380_v56 = vld [vmem:[#allocation13_spill] sm:$0xff] }
 0x4b0   :  { %2536 = vrot.lane.b32.xlu0 %v13409_v17, %s9625_s25  ;;  %v2634_v55 = vrot.slane %v13499_v46, 2 }
 0x4b1   :  { %v4543_v43 = vrot.slane %v4536_v36, %v12506_v32  ;;  %v3059_v62 = vpop.permute.xlu1 %3058  ;;  %v13497_v37 = vcombine.low %v5497_v41, %v5511_v3  ;;  %v2456_v24 = vsel %vm136_vm0, %v2454_v23, %v2455_v22  ;;  %v3398_v36 = vsel %vm3362_vm14, %v12813_v25, %v2585_v48  ;;  %v16381_v25 = vld [vmem:[#allocation14_spill] sm:$0xff] }
 0x4b2   :  { %v3061_v0 = vpop.permute.xlu0 %3060  ;;  %v3520_v41 = vsel %vm3362_vm14, %v12965_v45, %v3059_v62  ;;  %v4601_v48 = vrot.slane %v13039_v1, %v12506_v32 }
 0x4b3   :  { %v8774_v8 = vcombine.low %v4543_v43, %v4561_v9  ;;  %3256 = vrot.lane.b32.xlu1 %v11948_v10, %s9627_s14  ;;  %v16379_v9 = vld [vmem:[#allocation12_spill] sm:$0xff]  ;;  %v3439_v43 = vsel %vm3403_vm15, %v3398_v36, %v2765_v34 }
 0x4b4   :  { %2716 = vrot.lane.b32.xlu0 %v13435_v19, %s9626_s8 }
 0x4b5   :  { %v3181_v61 = vpop.permute.xlu1 %3180  ;;  %v5490_v5 = vrot.slane %v8774_v8, %v12506_v32 }
 0x4b6   :  { %v2767_v12 = vpop.permute.xlu0 %2766  ;;  %v3560_v6 = vsel %vm3403_vm15, %v3520_v41, %v3181_v61  ;;  %v13555_v41 = vrot.slane %v13280_v13, 1 }
 0x4b7   :  { %3010 = vrot.lane.b32.xlu1 %v16378_v47, %s9625_s25  ;;  %v5513_v20 = vcombine.high %v5490_v5, %v5504_v58  ;;  %v5512_v16 = vcombine.low %v5490_v5, %v5504_v58  ;;  %v2635_v5 = vrot.slane %v13220_v44, 2 }
 0x4b8   :  { %2838 = vrot.lane.b32.xlu0 %v16379_v9, %s9627_s14 }
 0x4b9   :  { %v2887_v10 = vpop.permute.xlu1 %2886  ;;  %5889 = vmatprep.mubr.f32.mxu1 %v5513_v20  ;;  %v2636_v45 = vsel %vm353_vm1, %v2634_v55, %v2635_v5  ;;  %vm6675_vm1 = vcmask 1040384  }
 0x4ba   :  { %5890 = vmatmul.mubr.f32.gmra.mrb[26].mxu1 %v5512_v16  ;;  %v13521_v3 = vpop.permute.xlu0 %2588  ;;  %v3480_v58 = vsel %vm3444_vm2, %v3439_v43, %v2887_v10  ;;  %v4626_v16 = vrot.slane %v13124_v26, %v12506_v32  ;;  %v3399_v43 = vsel %vm3362_vm14, %v12921_v54, %v13487_v35  ;;  %vm6677_vm4 = vmor %vm6675_vm1, %vm6676_vm3  ;;  %vm8051_vm1 = vcmask 392192  }
 0x4bb   :  { %3132 = vrot.lane.b32.xlu1 %v16380_v56, %s9626_s8  ;;  %vm6679_vm6 = vmor %vm6677_vm4, %vm6678_vm5  ;;  %vm8061_vm4 = vcmask 916480  }
 0x4bc   :  { %2514 = vrot.lane.b32.xlu0 %v2456_v24, %s9625_s25  ;;  %v13543_v36 = vrot.slane %v4626_v16, %v12506_v32  ;;  %vm14122_vm8 = vmor %vm6679_vm6, %vm6680_vm7 }
 0x4bd   :  { %v3307_v8 = vpop.permute.xlu1 %3306 }
 0x4be   :  { %v3600_v23 = vsel %vm3444_vm2, %v3560_v6, %v3307_v8  ;;  %v2889_v61 = vpop.permute.xlu0 %2888  ;;  %v3521_v6 = vsel %vm3362_vm14, %v13023_v21, %v3061_v0  ;;  %v3440_v8 = vsel %vm3403_vm15, %v3399_v43, %v2767_v12 }
 0x4bf   :  { %v4587_v20 = vcombine.low %v3480_v58, %v3600_v23  ;;  %3258 = vrot.lane.b32.xlu1 %v16381_v25, %s9627_s14  ;;  %v4586_v58 = vcombine.high %v13468_v52, %v13464_v59  ;;  %v3481_v25 = vsel %vm3444_vm2, %v3440_v8, %v2889_v61 }
 0x4c0   :  { %2694 = vrot.lane.b32.xlu0 %v2636_v45, %s9626_s8 }
 0x4c1   :  { %v4594_v34 = vrot.slane %v4587_v20, %v12506_v32  ;;  %v3183_v62 = vpop.permute.xlu1 %3182 }
 0x4c2   :  { %v3561_v23 = vsel %vm3403_vm15, %v3521_v6, %v3183_v62  ;;  %v3400_v6 = vsel %vm3362_vm14, %v12919_v40, %v13521_v3  ;;  %v4656_v40 = vcombine.high %v13174_v11, %v13174_v11 }
 0x4c3   :  { %v4602_v10 = vcombine.low %v4594_v34, %v4601_v48  ;;  %2988 = vrot.lane.b32.xlu1 %v13312_v57, %s9625_s25  ;;  %v8778_v35 = vcombine.low %v4586_v58, %v4594_v34 }
 0x4c4   :  { %2516 = vrot.lane.b32.xlu0 %v2455_v22, %s9625_s25 }
 0x4c5   :  { %v8779_v55 = vcombine.high %v13464_v59, %v4602_v10  ;;  %v2591_v56 = vpop.permute.xlu1 %2590 }
 0x4c6   :  { %v3065_v24 = vpop.permute.xlu0 %3064 }
 0x4c7   :  { %3110 = vrot.lane.b32.xlu1 %v13293_v27, %s9626_s8  ;;  %v13548_v1 = vrot.slane %v8779_v55, %v12506_v32 }
 0x4c8   :  { %2990 = vrot.lane.b32.xlu0 %v13287_v53, %s9625_s25  ;;  %v2460_v53 = vrot.slane %v13293_v27, 1 }
 0x4c9   :  { %v3063_v26 = vpop.permute.xlu1 %3062  ;;  %v5549_v57 = vcombine.low %v13548_v1, %v13543_v36 }
 0x4ca   :  { %v2769_v22 = vpop.permute.xlu0 %2768  ;;  %v13574_v21 = vsel %vm136_vm0, %v2460_v53, %v13555_v41  ;;  %v3522_v10 = vsel %vm3362_vm14, %v13013_v49, %v3063_v26  ;;  %v3401_v49 = vsel %vm3362_vm14, %v12968_v50, %v2591_v56  ;;  %v3523_v26 = vsel %vm3362_vm14, %v13158_v7, %v3065_v24 }
 0x4cb   :  { %2816 = vrot.lane.b32.xlu1 %v13247_v51, %s9627_s14  ;;  %v3441_v58 = vsel %vm3403_vm15, %v3400_v6, %v2769_v22 }
 0x4cc   :  { %2696 = vrot.lane.b32.xlu0 %v2635_v5, %s9626_s8  ;;  %v5525_v5 = vrot.slane %v8778_v35, %v12506_v32 }
 0x4cd   :  { %v3309_v20 = vpop.permute.xlu1 %3308 }
 0x4ce   :  { %v3601_v45 = vsel %vm3444_vm2, %v3561_v23, %v3309_v20  ;;  %v3185_v54 = vpop.permute.xlu0 %3184 }
 0x4cf   :  { %v4603_v0 = vcombine.low %v3481_v25, %v3601_v45  ;;  %3236 = vrot.lane.b32.xlu1 %v13574_v21, %s9627_s14  ;;  %v3562_v55 = vsel %vm3403_vm15, %v3522_v10, %v3185_v54  ;;  %v4604_v3 = vcombine.high %v3481_v25, %v3601_v45 }
 0x4d0   :  { %2818 = vrot.lane.b32.xlu0 %v13245_v42, %s9627_s14 }
 0x4d1   :  { %v4612_v59 = vrot.slane %v4603_v0, %v12506_v32  ;;  %v2771_v52 = vpop.permute.xlu1 %2770  ;;  %v4619_v11 = vrot.slane %v4604_v3, %v12506_v32  ;;  %v16384_v3 = vld [vmem:[#allocation50_spill] sm:$0xff] }
 0x4d2   :  { %v2891_v12 = vpop.permute.xlu0 %2890  ;;  %v3442_v22 = vsel %vm3403_vm15, %v3401_v49, %v2771_v52 }
 0x4d3   :  { %3112 = vrot.lane.b32.xlu1 %v13280_v13, %s9626_s8  ;;  %v5539_v48 = vrot.slane %v4612_v59, %v12506_v32  ;;  %v3482_v23 = vsel %vm3444_vm2, %v3441_v58, %v2891_v12  ;;  %v4684_v59 = vrot.slane %v4656_v40, %v12506_v32  ;;  %v5560_v10 = vrot.slane %v4619_v11, %v12506_v32  ;;  %v16383_v40 = vld [vmem:[#allocation10_spill] sm:$0xff] }
 0x4d4   :  { %2522 = vrot.lane.b32.xlu0 %v13574_v21, %s9625_s25 }
 0x4d5   :  { %v3187_v34 = vpop.permute.xlu1 %3186  ;;  %v5548_v62 = vcombine.high %v5525_v5, %v5539_v48  ;;  %v5547_v61 = vcombine.low %v5525_v5, %v5539_v48  ;;  %v2466_v48 = vrot.slane %v13355_v31, 1 }
 0x4d6   :  { %v3311_v16 = vpop.permute.xlu0 %3310  ;;  %v3563_v20 = vsel %vm3403_vm15, %v3523_v26, %v3187_v34  ;;  %v16382_v26 = vld [vmem:[#allocation49_spill] sm:$0xff] }
 0x4d7   :  { %3238 = vrot.lane.b32.xlu1 %v13555_v41, %s9627_s14  ;;  %5894 = vmatprep.mubr.f32.mxu1 %v5548_v62  ;;  %v3602_v53 = vsel %vm3444_vm2, %v3562_v55, %v3311_v16 }
 0x4d8   :  { %2702 = vrot.lane.b32.xlu0 %v13325_v33, %s9626_s8  ;;  %5895 = vmatmul.mubr.f32.gmra.mrb[28].mxu1 %v5547_v61  ;;  %v4638_v54 = vcombine.low %v3482_v23, %v3602_v53  ;;  %v13629_v61 = vrot.slane %v13361_v14, 1 }
 0x4d9   :  { %v2893_v43 = vpop.permute.xlu1 %2892 }
 0x4da   :  { %v2593_v8 = vpop.permute.xlu0 %2592  ;;  %v3483_v50 = vsel %vm3444_vm2, %v3442_v22, %v2893_v43  ;;  %v4645_v25 = vrot.slane %v4638_v54, %v12506_v32  ;;  %v13635_v6 = vsel %vm136_vm0, %v2466_v48, %v13629_v61  ;;  %vm9629_vm0 = vmmov 0  }
 0x4db   :  { %2996 = vrot.lane.b32.xlu1 %v13391_v39, %s9625_s25  ;;  %v3402_v49 = vsel %vm3362_vm14, %v12989_v4, %v2593_v8 }
 0x4dc   :  { %2524 = vrot.lane.b32.xlu0 %v13555_v41, %s9625_s25 }
 0x4dd   :  { %v3313_v35 = vpop.permute.xlu1 %3312 }
 0x4de   :  { %v3603_v56 = vsel %vm3444_vm2, %v3563_v20, %v3313_v35  ;;  %v2773_v7 = vpop.permute.xlu0 %2772 }
 0x4df   :  { %v4654_v24 = vcombine.low %v3483_v50, %v3603_v56  ;;  %v4655_v0 = vcombine.high %v3483_v50, %v3603_v56  ;;  %3118 = vrot.lane.b32.xlu1 %v13355_v31, %s9626_s8  ;;  %v3443_v20 = vsel %vm3403_vm15, %v3402_v49, %v2773_v7  ;;  %v3687_v50 = vcombine.high %v13325_v33, %v13325_v33  ;;  %v16385_v7 = vld [vmem:[#allocation48_spill] sm:$0xff] }
 0x4e0   :  { %2998 = vrot.lane.b32.xlu0 %v13383_v29, %s9625_s25 }
 0x4e1   :  { %v4663_v45 = vrot.slane %v4654_v24, %v12506_v32  ;;  %v4670_v52 = vrot.slane %v4655_v0, %v12506_v32  ;;  %v3067_v12 = vpop.permute.xlu1 %3066  ;;  %v16386_v0 = vrot.slane %v16385_v7, 2  ;;  %v3715_v48 = vrot.slane %v3687_v50, %v12506_v32 }
 0x4e2   :  { %v2895_v5 = vpop.permute.xlu0 %2894  ;;  %v3524_v23 = vsel %vm3362_vm14, %v16382_v26, %v3067_v12 }
 0x4e3   :  { %v4687_v34 = vcombine.low %v4670_v52, %v4684_v59  ;;  %v8780_v62 = vcombine.low %v4645_v25, %v4663_v45  ;;  %2824 = vrot.lane.b32.xlu1 %v13327_v18, %s9627_s14  ;;  %v4686_v22 = vcombine.high %v4663_v45, %v16384_v3  ;;  %v3484_v56 = vsel %vm3444_vm2, %v3443_v20, %v2895_v5 }
 0x4e4   :  { %2704 = vrot.lane.b32.xlu0 %v13303_v63, %s9626_s8  ;;  %v4703_v11 = vrot.slane %v16386_v0, %v12506_v32  ;;  %v4688_v25 = vcombine.high %v4670_v52, %v4684_v59 }
 0x4e5   :  { %v3189_v16 = vpop.permute.xlu1 %3188  ;;  %v5574_v55 = vrot.slane %v8780_v62, %v12506_v32  ;;  %v8782_v5 = vcombine.low %v4686_v22, %v4670_v52  ;;  %v3708_v52 = vrot.slane %v13325_v33, %v12506_v32  ;;  %v4776_v22 = vrot.slane %v3715_v48, %v12506_v32 }
 0x4e6   :  { %v2519_v43 = vpop.permute.xlu0 %2518  ;;  %v3564_v54 = vsel %vm3403_vm15, %v3524_v23, %v3189_v16  ;;  %v8783_v16 = vcombine.high %v16384_v3, %v4687_v34  ;;  %v3738_v33 = vcombine.high %v13391_v39, %v13391_v39 }
 0x4e7   :  { %3244 = vrot.lane.b32.xlu1 %v13635_v6, %s9627_s14  ;;  %v5583_v53 = vcombine.high %v5560_v10, %v5574_v55  ;;  %v5582_v58 = vcombine.low %v5560_v10, %v5574_v55  ;;  %v5595_v26 = vrot.slane %v8782_v5, %v12506_v32  ;;  %v4762_v0 = vrot.slane %v3708_v52, %v12506_v32 }
 0x4e8   :  { %2826 = vrot.lane.b32.xlu0 %v16383_v40, %s9627_s14  ;;  %v3766_v5 = vrot.slane %v3738_v33, %v12506_v32 }
 0x4e9   :  { %v3315_v35 = vpop.permute.xlu1 %3314  ;;  %5899 = vmatprep.mubr.f32.mxu1 %v5583_v53  ;;  %v16387_v53 = vld [vmem:[#allocation11_spill] sm:$0xff] }
 0x4ea   :  { %v3604_v4 = vsel %vm3444_vm2, %v3564_v54, %v3315_v35  ;;  %5900 = vmatmul.mubr.f32.gmra.mrb[30].mxu1 %v5582_v58  ;;  %v2699_v8 = vpop.permute.xlu0 %2698  ;;  %v5602_v54 = vrot.slane %v8783_v16, %v12506_v32  ;;  %v3365_v35 = vsel %vm3362_vm14, %v13247_v51, %v2519_v43 }
 0x4eb   :  { %v4689_v24 = vcombine.low %v3484_v56, %v3604_v4  ;;  %3120 = vrot.lane.b32.xlu1 %v13361_v14, %s9626_s8  ;;  %v3406_v56 = vsel %vm3403_vm15, %v3365_v35, %v2699_v8  ;;  %v16236_v8 = vmov 0.0  }
 0x4ec   :  { %2530 = vrot.lane.b32.xlu0 %v13635_v6, %s9625_s25 }
 0x4ed   :  { %v4696_v45 = vrot.slane %v4689_v24, %v12506_v32  ;;  %v2993_v12 = vpop.permute.xlu1 %2992 }
 0x4ee   :  { %v2821_v62 = vpop.permute.xlu0 %2820  ;;  %v3487_v50 = vsel %vm3362_vm14, %v13574_v21, %v2993_v12  ;;  %v4779_v12 = vcombine.low %v4762_v0, %v4776_v22 }
 0x4ef   :  { %v4704_v10 = vcombine.low %v4696_v45, %v4703_v11  ;;  %v8784_v55 = vcombine.low %v4688_v25, %v4696_v45  ;;  %3246 = vrot.lane.b32.xlu1 %v13629_v61, %s9627_s14  ;;  %v3447_v51 = vsel %vm3444_vm2, %v3406_v56, %v2821_v62  ;;  %v3759_v11 = vrot.slane %v13391_v39, %v12506_v32 }
 0x4f0   :  { %2710 = vrot.lane.b32.xlu0 %v16387_v53, %s9626_s8 }
 0x4f1   :  { %v8785_v58 = vcombine.high %v4684_v59, %v4704_v10  ;;  %v3115_v49 = vpop.permute.xlu1 %3114  ;;  %v5609_v23 = vrot.slane %v8784_v55, %v12506_v32 }
 0x4f2   :  { %v2521_v34 = vpop.permute.xlu0 %2520  ;;  %v3527_v4 = vsel %vm3403_vm15, %v3487_v50, %v3115_v49 }
 0x4f3   :  { %3004 = vrot.lane.b32.xlu1 %v13455_v38, %s9625_s25  ;;  %v5618_v3 = vcombine.high %v5595_v26, %v5609_v23  ;;  %v5617_v20 = vcombine.low %v5595_v26, %v5609_v23  ;;  %v5616_v59 = vrot.slane %v8785_v58, %v12506_v32  ;;  %v16388_v26 = vld [vmem:[#allocation9_spill] sm:$0xff] }
 0x4f4   :  { %2532 = vrot.lane.b32.xlu0 %v13629_v61, %s9625_s25 }
 0x4f5   :  { %v3241_v24 = vpop.permute.xlu1 %3240  ;;  %5904 = vmatprep.mubr.f32.mxu1 %v5618_v3  ;;  %v13685_v7 = vcombine.low %v5602_v54, %v5616_v59  ;;  %v16389_v3 = vld [vmem:[#allocation21_spill] sm:$0xff]  ;;  %v3366_v59 = vsel %vm3362_vm14, %v13245_v42, %v2521_v34  ;;  %v3861_v42 = vrot.slane %v13455_v38, %v12506_v32 }
 0x4f6   :  { %v3567_v21 = vsel %vm3444_vm2, %v3527_v4, %v3241_v24  ;;  %5905 = vmatmul.mubr.f32.gmra.mrb[32].mxu1 %v5617_v20  ;;  %v2701_v43 = vpop.permute.xlu0 %2700 }
 0x4f7   :  { %v3736_v25 = vcombine.low %v3447_v51, %v3567_v21  ;;  %v3737_v45 = vcombine.high %v3447_v51, %v3567_v21  ;;  %3126 = vrot.lane.b32.xlu1 %v12029_v2, %s9626_s8  ;;  %9125 = vmatprep.mubr.msk.f32.mxu1 %vm9629_vm0, %v16236_v8  ;;  %v3734_v2 = vrot.slane %v13303_v63, %v12506_v32 }
 0x4f8   :  { %3006 = vrot.lane.b32.xlu0 %v13435_v19, %s9625_s25  ;;  %v3407_v50 = vsel %vm3403_vm15, %v3366_v59, %v2701_v43 }
 0x4f9   :  { %v13700_v48 = vrot.slane %v3736_v25, %v12506_v32  ;;  %v3752_v39 = vrot.slane %v3737_v45, %v12506_v32  ;;  %v2995_v62 = vpop.permute.xlu1 %2994  ;;  %v8727_v49 = vcombine.low %v3734_v2, %v3759_v11  ;;  %v3836_v25 = vrot.slane %v16388_v26, %v12506_v32 }
 0x4fa   :  { %9126 = vmatmul.mubr.msk.f32.vlgmr.msra.gmra.mrb[34].mxu1 %vm3362_vm14, %v4779_v12  ;;  %v2823_v16 = vpop.permute.xlu0 %2822  ;;  %v3488_v35 = vsel %vm3362_vm14, %v13555_v41, %v2995_v62  ;;  %v3785_v41 = vrot.slane %v13383_v29, %v12506_v32  ;;  %v3810_v45 = vrot.slane %v16387_v53, %v12506_v32  ;;  %v16390_v62 = vld [vmem:[#allocation15_spill] sm:$0xff] }
 0x4fb   :  { %v3768_v10 = vcombine.high %v13700_v48, %v3759_v11  ;;  %v3769_v55 = vcombine.low %v3752_v39, %v3766_v5  ;;  %2832 = vrot.lane.b32.xlu1 %v13397_v60, %s9627_s14  ;;  %v3770_v58 = vcombine.high %v3752_v39, %v3766_v5  ;;  %9128 = vmatprep.mubr.msk.f32.mxu1 %vm9629_vm0, %v16236_v8 }
 0x4fc   :  { %2712 = vrot.lane.b32.xlu0 %v16388_v26, %s9626_s8  ;;  %v4797_v20 = vrot.slane %v8727_v49, %v12506_v32  ;;  %v3448_v24 = vsel %vm3444_vm2, %v3407_v50, %v2823_v16  ;;  %v8733_v16 = vcombine.low %v3836_v25, %v3861_v42  ;;  %v4846_v26 = vrot.slane %v3810_v45, %v12506_v32 }
 0x4fd   :  { %v8729_v23 = vcombine.high %v3759_v11, %v3769_v55  ;;  %v3117_v52 = vpop.permute.xlu1 %3116  ;;  %v13713_v63 = vcombine.low %v3768_v10, %v3752_v39  ;;  %v3840_v50 = vcombine.high %v13455_v38, %v13455_v38 }
 0x4fe   :  { %v2527_v22 = vpop.permute.xlu0 %2526  ;;  %v3528_v33 = vsel %vm3403_vm15, %v3488_v35, %v3117_v52 }
 0x4ff   :  { %3252 = vrot.lane.b32.xlu1 %v16389_v3, %s9627_s14  ;;  %v4811_v54 = vrot.slane %v8729_v23, %v12506_v32 }
 0x500   :  { %2834 = vrot.lane.b32.xlu0 %v13399_v15, %s9627_s14 }
 0x501   :  { %v3243_v56 = vpop.permute.xlu1 %3242  ;;  %v4814_v4 = vcombine.low %v4797_v20, %v4811_v54 }
 0x502   :  { %v3568_v0 = vsel %vm3444_vm2, %v3528_v33, %v3243_v56  ;;  %v3001_v51 = vpop.permute.xlu0 %3000 }
 0x503   :  { %v3771_v21 = vcombine.low %v3448_v24, %v3568_v0  ;;  %3128 = vrot.lane.b32.xlu1 %v16379_v9, %s9626_s8  ;;  %9129 = vmatmul.mubr.msk.f32.gmra.mrb[36].mxu1 %vm3362_vm14, %v4814_v4  ;;  %v3789_v9 = vcombine.high %v16387_v53, %v16387_v53  ;;  %v4881_v53 = vrot.slane %v8733_v16, %v12506_v32 }
 0x504   :  { %9131 = vmatprep.mubr.msk.f32.mxu1 %vm9629_vm0, %v16236_v8  ;;  %v3491_v54 = vsel %vm3362_vm14, %v13635_v6, %v3001_v51  ;;  %v3868_v51 = vrot.slane %v3840_v50, %v12506_v32 }
 0x505   :  { %v3778_v34 = vrot.slane %v3771_v21, %v12506_v32  ;;  %v2529_v43 = vpop.permute.xlu1 %2528  ;;  %v3817_v55 = vrot.slane %v3789_v9, %v12506_v32 }
 0x506   :  { %v2707_v11 = vpop.permute.xlu0 %2706 }
 0x507   :  { %v3786_v12 = vcombine.low %v3778_v34, %v3785_v41  ;;  %v13745_v39 = vcombine.low %v3770_v58, %v3778_v34  ;;  %3254 = vrot.lane.b32.xlu1 %v16390_v62, %s9627_s14  ;;  %v4867_v58 = vrot.slane %v3817_v55, %v12506_v32  ;;  %v3370_v34 = vsel %vm3362_vm14, %v16383_v40, %v2529_v43 }
 0x508   :  { %v3891_v40 = vcombine.high %v16377_v28, %v16377_v28 }
 0x509   :  { %v8731_v29 = vcombine.high %v3766_v5, %v3786_v12  ;;  %v3003_v2 = vpop.permute.xlu1 %3002  ;;  %v3369_v5 = vsel %vm3362_vm14, %v13327_v18, %v2527_v22  ;;  %v4884_v35 = vcombine.low %v4867_v58, %v4881_v53 }
 0x50a   :  { %v3123_v10 = vpop.permute.xlu0 %3122  ;;  %v3410_v33 = vsel %vm3403_vm15, %v3369_v5, %v2707_v11  ;;  %v3492_v11 = vsel %vm3362_vm14, %v13629_v61, %v3003_v2  ;;  %v3887_v61 = vrot.slane %v13435_v19, %v12506_v32  ;;  %v3919_v5 = vrot.slane %v3891_v40, %v12506_v32 }
 0x50b   :  { %v4832_v49 = vrot.slane %v8731_v29, %v12506_v32  ;;  %v3531_v56 = vsel %vm3403_vm15, %v3491_v54, %v3123_v10  ;;  %v3912_v19 = vrot.slane %v16377_v28, %v12506_v32 }
 0x50d   :  { %v2709_v23 = vpop.permute.xlu1 %2708  ;;  %v4849_v52 = vcombine.low %v4832_v49, %v4846_v26 }
 0x50e   :  { %v2829_v20 = vpop.permute.xlu0 %2828  ;;  %v3411_v45 = vsel %vm3403_vm15, %v3370_v34, %v2709_v23 }
 0x50f   :  { %9132 = vmatmul.mubr.msk.f32.gmra.mrb[38].mxu1 %vm3362_vm14, %v4849_v52  ;;  %v3451_v24 = vsel %vm3444_vm2, %v3410_v33, %v2829_v20 }
 0x510   :  { %9134 = vmatprep.mubr.msk.f32.mxu1 %vm9629_vm0, %v16236_v8 }
 0x511   :  { %v3125_v59 = vpop.permute.xlu1 %3124 }
 0x512   :  { %v3249_v4 = vpop.permute.xlu0 %3248  ;;  %v3532_v12 = vsel %vm3403_vm15, %v3492_v11, %v3125_v59  ;;  %v4951_v11 = vrot.slane %v3919_v5, %v12506_v32 }
 0x513   :  { %v3571_v0 = vsel %vm3444_vm2, %v3531_v56, %v3249_v4  ;;  %9135 = vmatmul.mubr.msk.f32.gmra.mrb[40].mxu1 %vm3362_vm14, %v4884_v35 }
 0x514   :  { %v3838_v18 = vcombine.low %v3451_v24, %v3571_v0  ;;  %v3839_v22 = vcombine.high %v3451_v24, %v3571_v0  ;;  %9137 = vmatprep.mubr.msk.f32.mxu1 %vm9629_vm0, %v16236_v8  ;;  %v16391_v0 = vld [vmem:[#allocation19_spill] sm:$0xff] }
 0x515   :  { %v2831_v6 = vpop.permute.xlu1 %2830 }
 0x516   :  { %v13772_v38 = vrot.slane %v3838_v18, %v12506_v32  ;;  %v3854_v21 = vrot.slane %v3839_v22, %v12506_v32  ;;  %v2535_v41 = vpop.permute.xlu0 %2534  ;;  %v3452_v16 = vsel %vm3444_vm2, %v3411_v45, %v2831_v6  ;;  %v3942_v18 = vcombine.high %v16391_v0, %v16391_v0 }
 0x517   :  { %v3373_v22 = vsel %vm3362_vm14, %v13397_v60, %v2535_v41 }
 0x518   :  { %v3870_v25 = vcombine.high %v13772_v38, %v3861_v42  ;;  %v3872_v9 = vcombine.high %v3854_v21, %v3868_v51  ;;  %v3871_v26 = vcombine.low %v3854_v21, %v3868_v51 }
 0x519   :  { %v3251_v29 = vpop.permute.xlu1 %3250 }
 0x51a   :  { %v3572_v10 = vsel %vm3444_vm2, %v3532_v12, %v3251_v29  ;;  %v2715_v55 = vpop.permute.xlu0 %2714  ;;  %v8734_v49 = vcombine.low %v3870_v25, %v3854_v21  ;;  %v8735_v53 = vcombine.high %v3861_v42, %v3871_v26  ;;  %v3963_v12 = vrot.slane %v16391_v0, %v12506_v32 }
 0x51b   :  { %v3873_v52 = vcombine.low %v3452_v16, %v3572_v10  ;;  %v3414_v6 = vsel %vm3403_vm15, %v3373_v22, %v2715_v55  ;;  %v3938_v29 = vrot.slane %v16378_v47, %v12506_v32  ;;  %v3970_v16 = vrot.slane %v3942_v18, %v12506_v32 }
 0x51c   :  { %v13791_v35 = vrot.slane %v8734_v49, %v12506_v32  ;;  %v4902_v56 = vrot.slane %v8735_v53, %v12506_v32 }
 0x51d   :  { %v3880_v43 = vrot.slane %v3873_v52, %v12506_v32  ;;  %v3009_v2 = vpop.permute.xlu1 %3008 }
 0x51e   :  { %v2837_v23 = vpop.permute.xlu0 %2836  ;;  %v3495_v28 = vsel %vm3362_vm14, %v16389_v3, %v3009_v2  ;;  %v4937_v3 = vrot.slane %v3912_v19, %v12506_v32  ;;  %v8739_v2 = vcombine.low %v3938_v29, %v3963_v12  ;;  %v16397_v29 = vld [vmem:[#allocation16_spill] sm:$0xff] }
 0x51f   :  { %v3888_v20 = vcombine.low %v3880_v43, %v3887_v61  ;;  %v8736_v58 = vcombine.low %v3872_v9, %v3880_v43  ;;  %v3455_v25 = vsel %vm3444_vm2, %v3414_v6, %v2837_v23 }
 0x520   :  { %v4954_v26 = vcombine.low %v4937_v3, %v4951_v11 }
 0x521   :  { %v8737_v54 = vcombine.high %v3868_v51, %v3888_v20  ;;  %v3131_v59 = vpop.permute.xlu1 %3130  ;;  %v13794_v50 = vrot.slane %v8736_v58, %v12506_v32  ;;  %v4972_v58 = vrot.slane %v8739_v2, %v12506_v32 }
 0x522   :  { %v2537_v33 = vpop.permute.xlu0 %2536  ;;  %v3535_v51 = vsel %vm3403_vm15, %v3495_v28, %v3131_v59 }
 0x523   :  { %v4916_v42 = vrot.slane %v8737_v54, %v12506_v32  ;;  %v4918_v4 = vcombine.high %v13791_v35, %v13794_v50  ;;  %v4917_v24 = vcombine.low %v13791_v35, %v13794_v50  ;;  %v3374_v54 = vsel %vm3362_vm14, %v13399_v15, %v2537_v33  ;;  %v16392_v15 = vld [vmem:[#allocation28_spill] sm:$0xff] }
 0x525   :  { %v3257_v21 = vpop.permute.xlu1 %3256  ;;  %v4919_v34 = vcombine.low %v4902_v56, %v4916_v42 }
 0x526   :  { %v3575_v9 = vsel %vm3444_vm2, %v3535_v51, %v3257_v21  ;;  %v2717_v45 = vpop.permute.xlu0 %2716  ;;  %v16395_v21 = vld [vmem:[#allocation18_spill] sm:$0xff] }
 0x527   :  { %v3940_v60 = vcombine.low %v3455_v25, %v3575_v9  ;;  %v3941_v41 = vcombine.high %v3455_v25, %v3575_v9  ;;  %9138 = vmatmul.mubr.msk.f32.gmra.mrb[42].mxu1 %vm3362_vm14, %v4919_v34  ;;  %v3415_v19 = vsel %vm3403_vm15, %v3374_v54, %v2717_v45  ;;  %v3989_v34 = vrot.slane %v16395_v21, %v12506_v32  ;;  %v16396_v9 = vld [vmem:[#allocation17_spill] sm:$0xff]  ;;  %v16399_v54 = vld [vmem:[#allocation24_spill] sm:$0xff] }
 0x528   :  { %9140 = vmatprep.mubr.msk.f32.mxu1 %vm9629_vm0, %v16236_v8  ;;  %v3993_v45 = vcombine.high %v16396_v9, %v16396_v9 }
 0x529   :  { %v13825_v10 = vrot.slane %v3940_v60, %v12506_v32  ;;  %v3956_v55 = vrot.slane %v3941_v41, %v12506_v32  ;;  %v3011_v49 = vpop.permute.xlu1 %3010  ;;  %v4014_v60 = vrot.slane %v16396_v9, %v12506_v32 }
 0x52a   :  { %v2839_v52 = vpop.permute.xlu0 %2838  ;;  %v3496_v59 = vsel %vm3362_vm14, %v16390_v62, %v3011_v49  ;;  %v16393_v62 = vld [vmem:[#allocation29_spill] sm:$0xff] }
 0x52b   :  { %v3972_v40 = vcombine.high %v13825_v10, %v3963_v12  ;;  %v3973_v61 = vcombine.low %v3956_v55, %v3970_v16  ;;  %9141 = vmatmul.mubr.msk.f32.gmra.mrb[44].mxu1 %vm3362_vm14, %v4954_v26  ;;  %v3974_v43 = vcombine.high %v3956_v55, %v3970_v16  ;;  %v3456_v18 = vsel %vm3444_vm2, %v3415_v19, %v2839_v52  ;;  %v16398_v52 = vld [vmem:[#allocation32_spill] sm:$0xff] }
 0x52c   :  { %9143 = vmatprep.mubr.msk.f32.mxu1 %vm9629_vm0, %v16236_v8  ;;  %v16394_v33 = vcombine.low %v16392_v15, %v16393_v62  ;;  %v16400_v15 = vld [vmem:[#allocation8_spill] sm:$0xff] }
 0x52d   :  { %v8741_v47 = vcombine.high %v3963_v12, %v3973_v61  ;;  %v3133_v23 = vpop.permute.xlu1 %3132  ;;  %v13832_v53 = vcombine.low %v3972_v40, %v3956_v55  ;;  %v4040_v55 = vrot.slane %v16397_v29, %v12506_v32 }
 0x52e   :  { %v2515_v20 = vpop.permute.xlu0 %2514  ;;  %v3536_v56 = vsel %vm3403_vm15, %v3496_v59, %v3133_v23  ;;  %v4000_v51 = vrot.slane %v16394_v33, %v12506_v32  ;;  %v4095_v59 = vcombine.high %v16399_v54, %v16399_v54 }
 0x52f   :  { %v4986_v5 = vrot.slane %v8741_v47, %v12506_v32  ;;  %v8745_v40 = vcombine.low %v4040_v55, %v16398_v52  ;;  %v4021_v47 = vrot.slane %v3993_v45, %v12506_v32  ;;  %v16405_v55 = vld [vmem:[#allocation36_spill] sm:$0xff]  ;;  %v4979_v36 = vrot.slane %v13832_v53, %v12506_v32 }
 0x530   :  { %v13865_v2 = vrot.slane %v4000_v51, %v12506_v32 }
 0x531   :  { %v3259_v42 = vpop.permute.xlu1 %3258  ;;  %v4989_v0 = vcombine.low %v4972_v58, %v4986_v5 }
 0x532   :  { %v3576_v22 = vsel %vm3444_vm2, %v3536_v56, %v3259_v42  ;;  %v2695_v28 = vpop.permute.xlu0 %2694  ;;  %v5056_v42 = vrot.slane %v8745_v40, %v12506_v32 }
 0x533   :  { %v3975_v6 = vcombine.low %v3456_v18, %v3576_v22  ;;  %9144 = vmatmul.mubr.msk.f32.gmra.mrb[46].mxu1 %vm3362_vm14, %v4989_v0  ;;  %v5042_v18 = vrot.slane %v4021_v47, %v12506_v32  ;;  %v4123_v22 = vrot.slane %v4095_v59, %v12506_v32  ;;  %v16406_v59 = vld [vmem:[#allocation33_spill] sm:$0xff] }
 0x534   :  { %9146 = vmatprep.mubr.msk.f32.mxu1 %vm9629_vm0, %v16236_v8 }
 0x535   :  { %v3982_v11 = vrot.slane %v3975_v6, %v12506_v32  ;;  %v2989_v25 = vpop.permute.xlu1 %2988  ;;  %v3363_v6 = vsel %vm3362_vm14, %v13499_v46, %v2515_v20 }
 0x536   :  { %v2517_v12 = vpop.permute.xlu0 %2516  ;;  %v3485_v62 = vsel %vm3362_vm14, %v16400_v15, %v2989_v25  ;;  %v3404_v33 = vsel %vm3403_vm15, %v3363_v6, %v2695_v28  ;;  %v16401_v25 = vld [vmem:[#allocation23_spill] sm:$0xff] }
 0x537   :  { %v3990_v41 = vcombine.low %v3982_v11, %v3989_v34  ;;  %v8742_v3 = vcombine.low %v3974_v43, %v3982_v11  ;;  %v5021_v43 = vrot.slane %v4014_v60, %v12506_v32  ;;  %v5059_v34 = vcombine.low %v5042_v18, %v5056_v42  ;;  %v16402_v28 = vld [vmem:[#allocation35_spill] sm:$0xff]  ;;  %v16407_v18 = vld [vmem:[#allocation6_spill] sm:$0xff] }
 0x538   :  { %v4116_v11 = vrot.slane %v16399_v54, %v12506_v32  ;;  %v3364_v42 = vsel %vm3362_vm14, %v13220_v44, %v2517_v12 }
 0x539   :  { %v8743_v49 = vcombine.high %v3970_v16, %v3990_v41  ;;  %v3111_v26 = vpop.permute.xlu1 %3110  ;;  %v13862_v61 = vrot.slane %v8742_v3, %v12506_v32  ;;  %v4142_v41 = vrot.slane %v16401_v25, %v12506_v32  ;;  %v16403_v3 = vld [vmem:[#allocation34_spill] sm:$0xff] }
 0x53a   :  { %v2991_v23 = vpop.permute.xlu0 %2990  ;;  %v3525_v51 = vsel %vm3403_vm15, %v3485_v62, %v3111_v26  ;;  %v16404_v29 = vcombine.low %v16402_v28, %v16403_v3  ;;  %v5126_v26 = vrot.slane %v4123_v22, %v12506_v32 }
 0x53b   :  { %v5007_v58 = vrot.slane %v8743_v49, %v12506_v32  ;;  %v5023_v5 = vcombine.high %v13862_v61, %v13865_v2  ;;  %v5022_v16 = vcombine.low %v13862_v61, %v13865_v2  ;;  %v8751_v54 = vcombine.low %v4142_v41, %v16405_v55 }
 0x53c   :  { %v8753_v49 = vcombine.high %v16405_v55, %v16404_v29  ;;  %v3486_v22 = vsel %vm3362_vm14, %v16407_v18, %v2991_v23  ;;  %v16411_v55 = vld [vmem:[#allocation39_spill] sm:$0xff]  ;;  %v4804_v18 = vrot.slane %v13713_v63, %v12506_v32 }
 0x53d   :  { %v2817_v19 = vpop.permute.xlu1 %2816  ;;  %v5024_v56 = vcombine.low %v5007_v58, %v5021_v43  ;;  %v5112_v58 = vrot.slane %v4116_v11, %v12506_v32  ;;  %v5147_v23 = vrot.slane %v8751_v54, %v12506_v32  ;;  %v16412_v54 = vld [vmem:[#allocation31_spill] sm:$0xff] }
 0x53e   :  { %v2697_v0 = vpop.permute.xlu0 %2696  ;;  %v3445_v9 = vsel %vm3444_vm2, %v3404_v33, %v2817_v19  ;;  %v5161_v15 = vrot.slane %v8753_v49, %v12506_v32  ;;  %v5182_v49 = vrot.slane %v16411_v55, %v12506_v32  ;;  %v4320_v63 = vrot.slane %v16412_v54, %v12506_v32 }
 0x53f   :  { %9147 = vmatmul.mubr.msk.f32.gmra.mrb[48].mxu1 %vm3362_vm14, %v5024_v56  ;;  %v5129_v6 = vcombine.low %v5112_v58, %v5126_v26  ;;  %v3405_v62 = vsel %vm3403_vm15, %v3364_v42, %v2697_v0 }
 0x540   :  { %9149 = vmatprep.mubr.msk.f32.mxu1 %vm9629_vm0, %v16236_v8  ;;  %v5164_v29 = vcombine.low %v5147_v23, %v5161_v15  ;;  %v16416_v23 = vld [vmem:[#allocation45_spill] sm:$0xff] }
 0x541   :  { %v3237_v21 = vpop.permute.xlu1 %3236 }
 0x542   :  { %v3565_v45 = vsel %vm3444_vm2, %v3525_v51, %v3237_v21  ;;  %v2819_v46 = vpop.permute.xlu0 %2818 }
 0x543   :  { %v3685_v20 = vcombine.low %v3445_v9, %v3565_v45  ;;  %v3686_v60 = vcombine.high %v3445_v9, %v3565_v45  ;;  %9150 = vmatmul.mubr.msk.f32.gmra.mrb[0].mxu1 %vm3362_vm14, %v5059_v34  ;;  %v3446_v11 = vsel %vm3444_vm2, %v3405_v62, %v2819_v46  ;;  %v16408_v9 = vld [vmem:[#allocation25_spill] sm:$0xff]  ;;  %v16410_v46 = vld [vmem:[#allocation40_spill] sm:$0xff] }
 0x544   :  { %9152 = vmatprep.mubr.msk.f32.mxu1 %vm9629_vm0, %v16236_v8  ;;  %v4244_v45 = vrot.slane %v16408_v9, %v12506_v32 }
 0x545   :  { %v3694_v52 = vrot.slane %v3685_v20, %v12506_v32  ;;  %v3701_v40 = vrot.slane %v3686_v60, %v12506_v32  ;;  %v3113_v47 = vpop.permute.xlu1 %3112  ;;  %v16409_v20 = vld [vmem:[#allocation26_spill] sm:$0xff] }
 0x546   :  { %v2523_v43 = vpop.permute.xlu0 %2522  ;;  %v3526_v33 = vsel %vm3403_vm15, %v3486_v22, %v3113_v47  ;;  %v4197_v60 = vcombine.high %v16409_v20, %v16409_v20  ;;  %v4218_v0 = vrot.slane %v16409_v20, %v12506_v32  ;;  %v8757_v41 = vcombine.low %v4244_v45, %v16410_v46  ;;  %v16417_v20 = vld [vmem:[#allocation54_spill] sm:$0xff] }
 0x547   :  { %9153 = vmatmul.mubr.msk.f32.gmra.mrb[2].mxu1 %vm3362_vm14, %v16406_v59  ;;  %v4755_v19 = vrot.slane %v3694_v52, %v12506_v32  ;;  %v4769_v56 = vrot.slane %v3701_v40, %v12506_v32  ;;  %v4299_v59 = vcombine.high %v16412_v54, %v16412_v54  ;;  %v3367_v45 = vsel %vm3362_vm14, %v13293_v27, %v2523_v43 }
 0x548   :  { %9155 = vmatprep.mubr.msk.f32.mxu1 %vm9629_vm0, %v16236_v8  ;;  %v4225_v52 = vrot.slane %v4197_v60, %v12506_v32  ;;  %v5196_v47 = vrot.slane %v4218_v0, %v12506_v32  ;;  %v5231_v58 = vrot.slane %v8757_v41, %v12506_v32  ;;  %v16418_v0 = vld [vmem:[#allocation30_spill] sm:$0xff] }
 0x549   :  { %v3239_v51 = vpop.permute.xlu1 %3238  ;;  %v4777_v21 = vcombine.low %v4755_v19, %v4769_v56  ;;  %v4778_v34 = vcombine.high %v4755_v19, %v4769_v56  ;;  %v4327_v62 = vrot.slane %v4299_v59, %v12506_v32 }
 0x54a   :  { %v3566_v44 = vsel %vm3444_vm2, %v3526_v33, %v3239_v51  ;;  %v2703_v12 = vpop.permute.xlu0 %2702  ;;  %v5199_v56 = vcombine.low %v5182_v49, %v5196_v47  ;;  %v5217_v15 = vrot.slane %v4225_v52, %v12506_v32  ;;  %v16419_v52 = vld [vmem:[#allocation41_spill] sm:$0xff] }
 0x54b   :  { %v3720_v25 = vcombine.low %v3446_v11, %v3566_v44  ;;  %5784 = vmatprep.mubr.f32.mxu0 %v4778_v34  ;;  %9156 = vmatmul.mubr.msk.f32.gmra.mrb[4].mxu1 %vm3362_vm14, %v5129_v6  ;;  %v16413_v34 = vld [vmem:[#allocation44_spill] sm:$0xff]  ;;  %v16414_v11 = vld [vmem:[#allocation43_spill] sm:$0xff]  ;;  %v3408_v46 = vsel %vm3403_vm15, %v3367_v45, %v2703_v12 }
 0x54c   :  { %5785 = vmatmul.mubr.f32.vlgmr.msra.gmra.mrb[36].mxu0 %v4777_v21  ;;  %9158 = vmatprep.mubr.msk.f32.mxu1 %vm9629_vm0, %v16236_v8  ;;  %v5234_v51 = vcombine.low %v5217_v15, %v5231_v58  ;;  %v16415_v44 = vcombine.low %v16413_v34, %v16414_v11  ;;  %v4825_v15 = vrot.slane %v13745_v39, %v12506_v32  ;;  %v16423_v11 = vld [vmem:[#allocation52_spill] sm:$0xff] }
 0x54d   :  { %v3727_v28 = vrot.slane %v3720_v25, %v12506_v32  ;;  %v2997_v3 = vpop.permute.xlu1 %2996  ;;  %v4346_v25 = vrot.slane %v16418_v0, %v12506_v32  ;;  %v16424_v0 = vld [vmem:[#allocation42_spill] sm:$0xff] }
 0x54e   :  { %v2525_v26 = vpop.permute.xlu0 %2524  ;;  %v8765_v9 = vcombine.high %v16416_v23, %v16415_v44  ;;  %v3489_v60 = vsel %vm3362_vm14, %v16417_v20, %v2997_v3 }
 0x54f   :  { %v8726_v40 = vcombine.low %v3727_v28, %v13700_v48  ;;  %9159 = vmatmul.mubr.msk.f32.gmra.mrb[6].mxu1 %vm3362_vm14, %v5164_v29  ;;  %v5301_v29 = vrot.slane %v4327_v62, %v12506_v32  ;;  %v8763_v3 = vcombine.low %v4346_v25, %v16416_v23  ;;  %v4503_v25 = vcombine.high %v16424_v0, %v16424_v0 }
 0x550   :  { %9161 = vmatprep.mubr.msk.f32.mxu1 %vm9629_vm0, %v16236_v8  ;;  %v5336_v12 = vrot.slane %v8765_v9, %v12506_v32 }
 0x551   :  { %v3119_v19 = vpop.permute.xlu1 %3118  ;;  %v4790_v42 = vrot.slane %v8726_v40, %v12506_v32  ;;  %v5287_v40 = vrot.slane %v4320_v63, %v12506_v32 }
 0x552   :  { %v2999_v48 = vpop.permute.xlu0 %2998  ;;  %v3529_v41 = vsel %vm3403_vm15, %v3489_v60, %v3119_v19  ;;  %v5322_v19 = vrot.slane %v8763_v3, %v12506_v32  ;;  %v16426_v3 = vld [vmem:[#allocation47_spill] sm:$0xff] }
 0x553   :  { %9162 = vmatmul.mubr.msk.f32.gmra.mrb[8].mxu1 %vm3362_vm14, %v5199_v56  ;;  %v4813_v22 = vcombine.high %v4790_v42, %v4804_v18  ;;  %v4812_v6 = vcombine.low %v4790_v42, %v4804_v18  ;;  %v5304_v54 = vcombine.low %v5287_v40, %v5301_v29  ;;  %v16420_v56 = vld [vmem:[#allocation37_spill] sm:$0xff]  ;;  %v16421_v18 = vld [vmem:[#allocation38_spill] sm:$0xff]  ;;  %v4531_v40 = vrot.slane %v4503_v25, %v12506_v32 }
 0x554   :  { %9164 = vmatprep.mubr.msk.f32.mxu1 %vm9629_vm0, %v16236_v8  ;;  %v4448_v42 = vrot.slane %v16420_v56, %v12506_v32  ;;  %v5339_v34 = vcombine.low %v5322_v19, %v5336_v12 }
 0x555   :  { %v2825_v33 = vpop.permute.xlu1 %2824  ;;  %5789 = vmatprep.mubr.f32.mxu0 %v4813_v22  ;;  %v4401_v22 = vcombine.high %v16421_v18, %v16421_v18 }
 0x556   :  { %5790 = vmatmul.mubr.f32.gmra.mrb[38].mxu0 %v4812_v6  ;;  %v2705_v21 = vpop.permute.xlu0 %2704  ;;  %v3449_v55 = vsel %vm3444_vm2, %v3408_v46, %v2825_v33  ;;  %v3368_v6 = vsel %vm3362_vm14, %v13280_v13, %v2525_v26  ;;  %v16422_v33 = vld [vmem:[#allocation53_spill] sm:$0xff]  ;;  %v8769_v44 = vcombine.low %v4448_v42, %v16423_v11 }
 0x557   :  { %9165 = vmatmul.mubr.msk.f32.gmra.mrb[10].mxu1 %vm3362_vm14, %v5234_v51  ;;  %v3490_v51 = vsel %vm3362_vm14, %v16422_v33, %v2999_v48  ;;  %v3409_v63 = vsel %vm3403_vm15, %v3368_v6, %v2705_v21  ;;  %v4429_v48 = vrot.slane %v4401_v22, %v12506_v32  ;;  %v5476_v22 = vrot.slane %v4531_v40, %v12506_v32  ;;  %v16428_v6 = vld [vmem:[#allocation7_spill] sm:$0xff] }
 0x558   :  { %9167 = vmatprep.mubr.msk.f32.mxu1 %vm9629_vm0, %v16236_v8  ;;  %v5406_v29 = vrot.slane %v8769_v44, %v12506_v32 }
 0x559   :  { %v3245_v28 = vpop.permute.xlu1 %3244 }
 0x55a   :  { %v3569_v27 = vsel %vm3444_vm2, %v3529_v41, %v3245_v28  ;;  %v2827_v43 = vpop.permute.xlu0 %2826 }
 0x55b   :  { %v3787_v49 = vcombine.low %v3449_v55, %v3569_v27  ;;  %9168 = vmatmul.mubr.msk.f32.gmra.mrb[12].mxu1 %vm3362_vm14, %v16419_v52  ;;  %v3788_v23 = vcombine.high %v3449_v55, %v3569_v27  ;;  %v3450_v39 = vsel %vm3444_vm2, %v3409_v63, %v2827_v43  ;;  %v16425_v43 = vld [vmem:[#allocation46_spill] sm:$0xff]  ;;  %v5392_v52 = vrot.slane %v4429_v48, %v12506_v32 }
 0x55c   :  { %9170 = vmatprep.mubr.msk.f32.mxu1 %vm9629_vm0, %v16236_v8 }
 0x55d   :  { %v3796_v47 = vrot.slane %v3787_v49, %v12506_v32  ;;  %v3121_v58 = vpop.permute.xlu1 %3120  ;;  %v3803_v46 = vrot.slane %v3788_v23, %v12506_v32  ;;  %v16427_v49 = vcombine.low %v16425_v43, %v16426_v3 }
 0x55e   :  { %v2531_v59 = vpop.permute.xlu0 %2530  ;;  %v3530_v13 = vsel %vm3403_vm15, %v3490_v51, %v3121_v58 }
 0x55f   :  { %9171 = vmatmul.mubr.msk.f32.gmra.mrb[14].mxu1 %vm3362_vm14, %v5304_v54  ;;  %v4839_v62 = vrot.slane %v3796_v47, %v12506_v32  ;;  %v5409_v47 = vcombine.low %v5392_v52, %v5406_v29  ;;  %v4860_v58 = vrot.slane %v3803_v46, %v12506_v32  ;;  %v16429_v46 = vld [vmem:[#allocation51_spill] sm:$0xff] }
 0x560   :  { %9173 = vmatprep.mubr.msk.f32.mxu1 %vm9629_vm0, %v16236_v8 }
 0x561   :  { %v3247_v26 = vpop.permute.xlu1 %3246  ;;  %v4848_v9 = vcombine.high %v4825_v15, %v4839_v62  ;;  %v4847_v45 = vcombine.low %v4825_v15, %v4839_v62  ;;  %v3371_v62 = vsel %vm3362_vm14, %v13355_v31, %v2531_v59 }
 0x562   :  { %v3570_v20 = vsel %vm3444_vm2, %v3530_v13, %v3247_v26  ;;  %v2711_v60 = vpop.permute.xlu0 %2710 }
 0x563   :  { %v3822_v21 = vcombine.low %v3450_v39, %v3570_v20  ;;  %5794 = vmatprep.mubr.f32.mxu0 %v4848_v9  ;;  %9174 = vmatmul.mubr.msk.f32.gmra.mrb[16].mxu1 %vm3362_vm14, %v5339_v34  ;;  %v3412_v51 = vsel %vm3403_vm15, %v3371_v62, %v2711_v60 }
 0x564   :  { %5795 = vmatmul.mubr.f32.gmra.mrb[40].mxu0 %v4847_v45  ;;  %9176 = vmatprep.mubr.msk.f32.mxu1 %vm9629_vm0, %v16236_v8 }
 0x565   :  { %v3829_v41 = vrot.slane %v3822_v21, %v12506_v32  ;;  %v3005_v28 = vpop.permute.xlu1 %3004 }
 0x566   :  { %v2533_v55 = vpop.permute.xlu0 %2532  ;;  %v3493_v33 = vsel %vm3362_vm14, %v13425_v30, %v3005_v28 }
 0x567   :  { %v8732_v27 = vcombine.low %v3829_v41, %v13772_v38  ;;  %9177 = vmatmul.mubr.msk.f32.gmra.mrb[18].mxu1 %vm3362_vm14, %v16427_v49  ;;  %v4524_v38 = vrot.slane %v16424_v0, %v12506_v32  ;;  %v3372_v50 = vsel %vm3362_vm14, %v13361_v14, %v2533_v55 }
 0x568   :  { %9179 = vmatprep.mubr.msk.f32.mxu1 %vm9629_vm0, %v16236_v8 }
 0x569   :  { %v3127_v12 = vpop.permute.xlu1 %3126  ;;  %v4874_v54 = vrot.slane %v8732_v27, %v12506_v32  ;;  %v5462_v15 = vrot.slane %v4524_v38, %v12506_v32 }
 0x56a   :  { %v3007_v19 = vpop.permute.xlu0 %3006  ;;  %v3533_v63 = vsel %vm3403_vm15, %v3493_v33, %v3127_v12  ;;  %v14104_v12 = vld [vmem:[%s16168_s6 + $0x1] ss:$0 sm:$0xff] }
 0x56b   :  { %9180 = vmatmul.mubr.msk.f32.gmra.mrb[20].mxu1 %vm3362_vm14, %v5409_v47  ;;  %v4883_v56 = vcombine.high %v4860_v58, %v4874_v54  ;;  %v4882_v42 = vcombine.low %v4860_v58, %v4874_v54  ;;  %v5479_v11 = vcombine.low %v5462_v15, %v5476_v22 }
 0x56c   :  { %9182 = vmatprep.mubr.msk.f32.mxu1 %vm9629_vm0, %v16236_v8 }
 0x56d   :  { %v2833_v18 = vpop.permute.xlu1 %2832  ;;  %5799 = vmatprep.mubr.f32.mxu0 %v4883_v56 }
 0x56e   :  { %5800 = vmatmul.mubr.f32.gmra.mrb[42].mxu0 %v4882_v42  ;;  %v2713_v34 = vpop.permute.xlu0 %2712  ;;  %v3453_v44 = vsel %vm3444_vm2, %v3412_v51, %v2833_v18 }
 0x56f   :  { %5804 = vmatprep.mubr.f32.mxu0 %v4918_v4  ;;  %9183 = vmatmul.mubr.msk.f32.gmra.mrb[22].mxu1 %vm3362_vm14, %v16428_v6  ;;  %v3413_v39 = vsel %vm3403_vm15, %v3372_v50, %v2713_v34 }
 0x570   :  { %9185 = vmatprep.mubr.msk.f32.mxu1 %vm9629_vm0, %v16236_v8 }
 0x571   :  { %v3253_v4 = vpop.permute.xlu1 %3252 }
 0x572   :  { %v3573_v23 = vsel %vm3444_vm2, %v3533_v63, %v3253_v4  ;;  %5805 = vmatmul.mubr.f32.gmra.mrb[44].mxu0 %v4917_v24  ;;  %v2835_v9 = vpop.permute.xlu0 %2834  ;;  %v3494_v24 = vsel %vm3362_vm14, %v13409_v17, %v3007_v19 }
 0x573   :  { %v3889_v31 = vcombine.low %v3453_v44, %v3573_v23  ;;  %v3890_v30 = vcombine.high %v3453_v44, %v3573_v23  ;;  %9186 = vmatmul.mubr.msk.f32.gmra.mrb[24].mxu1 %vm3362_vm14, %v5479_v11  ;;  %v3454_v21 = vsel %vm3444_vm2, %v3413_v39, %v2835_v9 }
 0x574   :  { %9188 = vmatprep.mubr.msk.f32.mxu1 %vm9629_vm0, %v16236_v8 }
 0x575   :  { %v3898_v59 = vrot.slane %v3889_v31, %v12506_v32  ;;  %v3905_v13 = vrot.slane %v3890_v30, %v12506_v32  ;;  %v3129_v26 = vpop.permute.xlu1 %3128 }
 0x576   :  { %v3534_v20 = vsel %vm3403_vm15, %v3494_v24, %v3129_v26 }
 0x577   :  { %9189 = vmatmul.mubr.msk.f32.gmra.mrb[26].mxu1 %vm3362_vm14, %v13497_v37  ;;  %v4930_v45 = vrot.slane %v3898_v59, %v12506_v32  ;;  %v4944_v35 = vrot.slane %v3905_v13, %v12506_v32 }
 0x578   :  { %9191 = vmatprep.mubr.msk.f32.mxu1 %vm9629_vm0, %v16236_v8 }
 0x579   :  { %v3255_v60 = vpop.permute.xlu1 %3254  ;;  %v4953_v48 = vcombine.high %v4930_v45, %v4944_v35  ;;  %v4952_v37 = vcombine.low %v4930_v45, %v4944_v35 }
 0x57a   :  { %v3574_v0 = vsel %vm3444_vm2, %v3534_v20, %v3255_v60 }
 0x57b   :  { %v3924_v25 = vcombine.low %v3454_v21, %v3574_v0  ;;  %5809 = vmatprep.mubr.f32.mxu0 %v4953_v48  ;;  %9192 = vmatmul.mubr.msk.f32.gmra.mrb[28].mxu1 %vm3362_vm14, %v5549_v57 }
 0x57c   :  { %5810 = vmatmul.mubr.f32.gmra.mrb[46].mxu0 %v4952_v37  ;;  %9194 = vmatprep.mubr.msk.f32.mxu1 %vm9629_vm0, %v16236_v8 }
 0x57d   :  { %v3931_v17 = vrot.slane %v3924_v25, %v12506_v32 }
 0x57f   :  { %v8738_v14 = vcombine.low %v3931_v17, %v13825_v10  ;;  %9195 = vmatmul.mubr.msk.f32.gmra.mrb[30].mxu1 %vm3362_vm14, %v16429_v46 }
 0x580   :  { %9197 = vmatprep.mubr.msk.f32.mxu1 %vm9629_vm0, %v16236_v8 }
 0x581   :  { %v4965_v41 = vrot.slane %v8738_v14, %v12506_v32 }
 0x583   :  { %9198 = vmatmul.mubr.msk.f32.gmra.mrb[32].mxu1 %vm3362_vm14, %v13685_v7  ;;  %v4988_v1 = vcombine.high %v4965_v41, %v4979_v36  ;;  %v4987_v57 = vcombine.low %v4965_v41, %v4979_v36 }
 0x585   :  { %5814 = vmatprep.mubr.f32.mxu0 %v4988_v1 }
 0x586   :  { %5815 = vmatmul.mubr.f32.gmra.mrb[48].mxu0 %v4987_v57 }
 0x587   :  { %5819 = vmatprep.mubr.f32.mxu0 %v5023_v5 }
 0x58a   :  { %5820 = vmatmul.mubr.f32.gmra.mrb[50].mxu0 %v5022_v16 }
 0x5cd   :  { %v5976_v10 = vpop.f32.mrb[34].mxu1 }
 0x5ce   :  { %v9127_v28 = vpop.f32.mrb[35].mxu1 }
 0x5d6   :  { %v14087_v29 = vpop.f32.mrb[36].mxu1 }
 0x5d7   :  { %v9130_v53 = vpop.f32.mrb[37].mxu1 }
 0x5e2   :  { %v14089_v55 = vpop.f32.mrb[38].mxu1 }
 0x5e3   :  { %v9133_v7 = vpop.f32.mrb[39].mxu1 }
 0x5e6   :  { %v14091_v27 = vpop.f32.mrb[40].mxu1 }
 0x5e7   :  { %v9136_v43 = vpop.f32.mrb[41].mxu1 }
 0x5fa   :  { %v14093_v3 = vpop.f32.mrb[42].mxu1 }
 0x5fb   :  { %v9139_v49 = vpop.f32.mrb[43].mxu1 }
 0x5fe   :  { %v14095_v52 = vpop.f32.mrb[44].mxu1 }
 0x5ff   :  { %16430 = vst [vmem:[#allocation5_spill] sm:$0xff] %v14095_v52  ;;  %v9142_v5 = vpop.f32.mrb[45].mxu1 }
 0x606   :  { %v14097_v40 = vpop.f32.mrb[46].mxu1 }
 0x607   :  { %16431 = vst [vmem:[#allocation22_spill] sm:$0xff] %v14097_v40  ;;  %v9145_v61 = vpop.f32.mrb[47].mxu1 }
 0x612   :  { %v14099_v2 = vpop.f32.mrb[48].mxu1 }
 0x613   :  { %16432 = vst [vmem:[#allocation20_spill] sm:$0xff] %v14099_v2  ;;  %v9148_v16 = vpop.f32.mrb[49].mxu1 }
 0x616   :  { %v6016_v47 = vpop.f32.mrb[0].mxu1 }
 0x617   :  { %v9474_v58 = vadd.f32 %v14104_v12, %v6016_v47  ;;  %v9151_v54 = vpop.f32.mrb[1].mxu1 }
 0x619   :  { %v6108_v38 = vmax.f32 %v9474_v58, 0.0 }
 0x61a   :  { %v6021_v19 = vpop.f32.mrb[2].mxu1 }
 0x61b   :  { %v6286_v56 = vcombine.high %v6108_v38, %v6108_v38  ;;  %v14109_v42 = vrot.slane %v6108_v38, %v12506_v32  ;;  %v9475_v18 = vadd.f32 %v14104_v12, %v6021_v19  ;;  %v9154_v22 = vpop.f32.mrb[3].mxu1 }
 0x61d   :  { %16433 = vst [vmem:[#allocation12_spill] sm:$0xff] %v14109_v42  ;;  %v14114_v6 = vrot.slane %v6286_v56, %v12506_v32  ;;  %v14118_v15 = vcombine.high %v14109_v42, %v14109_v42  ;;  %v16238_v62 = vrot.slane %v14109_v42, 7  ;;  %v6109_v33 = vmax.f32 %v9475_v18, 0.0 }
 0x61e   :  { %v6026_v63 = vpop.f32.mrb[4].mxu1 }
 0x61f   :  { %v6302_v34 = vcombine.high %v14114_v6, %v14114_v6  ;;  %v6767_v4 = vrot.slane %v16238_v62, 2  ;;  %v6768_v11 = vrot.slane %v14118_v15, 7  ;;  %v5786_v44 = vpop.f32.mrb[36].mxu0  ;;  %v9157_v23 = vpop.f32.mrb[5].mxu1  ;;  %v6303_v31 = vcombine.high %v6109_v33, %v6109_v33 }
 0x620   :  { %v14132_v30 = vrot.slane %v6109_v33, %v12506_v32  ;;  %v9476_v59 = vadd.f32 %v14104_v12, %v6026_v63  ;;  %v5787_v13 = vadd.f32 %v14104_v12, %v5786_v44  ;;  %v5788_v26 = vpop.f32.mrb[37].mxu0  ;;  %v6771_v21 = vrot.slane %v14114_v6, 7 }
 0x621   :  { %v6769_v9 = vsel %vm14122_vm8, %v6767_v4, %v6768_v11  ;;  %v8818_v45 = vrot.slane %v6302_v34, 9  ;;  %v14139_v35 = vrot.slane %v6303_v31, %v12506_v32  ;;  %v6770_v20 = vrot.slane %v6768_v11, 2 }
 0x622   :  { %v14143_v50 = vcombine.high %v14132_v30, %v14132_v30  ;;  %v6775_v24 = vrot.slane %v14132_v30, 7  ;;  %v6031_v39 = vpop.f32.mrb[6].mxu1  ;;  %v6110_v60 = vmax.f32 %v9476_v59, 0.0  ;;  %v5977_v48 = vadd.f32 %v5976_v10, %v5787_v13 }
 0x623   :  { %v9160_v37 = vpop.f32.mrb[7].mxu1  ;;  %v7048_v0 = vmax.f32 %v14109_v42, %v6769_v9  ;;  %v14150_v25 = vcombine.high %v14139_v35, %v14139_v35  ;;  %v9477_v36 = vadd.f32 %v14104_v12, %v6031_v39  ;;  %v6781_v1 = vrot.slane %v14139_v35, 7 }
 0x624   :  { %v6776_v17 = vsel %vm14122_vm8, %v8818_v45, %v6775_v24  ;;  %v6777_v14 = vrot.slane %v6775_v24, 2  ;;  %v6778_v46 = vrot.slane %v14143_v50, 7  ;;  %v6320_v57 = vcombine.high %v6110_v60, %v6110_v60 }
 0x625   :  { %v7050_v41 = vmax.f32 %v6302_v34, %v6776_v17  ;;  %v6327_v10 = vrot.slane %v6110_v60, %v12506_v32  ;;  %v14162_v53 = vsel %vm14122_vm8, %v6770_v20, %v6771_v21  ;;  %v14168_v5 = vmax.f32 %v7048_v0, %v14118_v15 }
 0x626   :  { %v14158_v28 = vpop.f32.mrb[8].mxu1  ;;  %v6780_v7 = vrot.slane %v6778_v46, 2  ;;  %v6784_v61 = vrot.slane %v14150_v25, 7  ;;  %v6334_v16 = vrot.slane %v6320_v57, %v12506_v32  ;;  %v6779_v58 = vsel %vm14122_vm8, %v6777_v14, %v6778_v46 }
 0x627   :  { %v14165_v43 = vmax.f32 %v7050_v41, %v14132_v30  ;;  %v9163_v49 = vpop.f32.mrb[9].mxu1  ;;  %16437 = vst [vmem:[#allocation14_spill] sm:$0xff] %v14168_v5  ;;  %v6335_v47 = vcombine.high %v6327_v10, %v6327_v10  ;;  %v6100_v38 = vmax.f32 %v5977_v48, 0.0  ;;  %v6111_v19 = vmax.f32 %v9477_v36, 0.0 }
 0x628   :  { %v6782_v54 = vsel %vm14122_vm8, %v6780_v7, %v6781_v1  ;;  %v6783_v18 = vrot.slane %v6781_v1, 2  ;;  %v14179_v33 = vcombine.high %v6334_v16, %v6334_v16  ;;  %v8819_v63 = vrot.slane %v6327_v10, 9 }
 0x629   :  { %16436 = vst [vmem:[#allocation13_spill] sm:$0xff] %v14165_v43  ;;  %v14176_v56 = vpop.f32.mrb[38].mxu0  ;;  %v7052_v22 = vmax.f32 %v14143_v50, %v6782_v54  ;;  %v6788_v11 = vrot.slane %v6335_v47, 7  ;;  %v6791_v44 = vrot.slane %v6334_v16, 7  ;;  %v6150_v23 = vcombine.high %v6100_v38, %v6100_v38 }
 0x62a   :  { %v5793_v34 = vpop.f32.mrb[39].mxu0  ;;  %v14181_v4 = vpop.f32.mrb[10].mxu1  ;;  %v14184_v31 = vrot.slane %v6100_v38, %v12506_v32  ;;  %v7051_v13 = vmax.f32 %v14132_v30, %v6779_v58  ;;  %v6794_v9 = vrot.slane %v14179_v33, 7  ;;  %v6337_v45 = vcombine.high %v6111_v19, %v6111_v19 }
 0x62b   :  { %v9166_v59 = vpop.f32.mrb[11].mxu1  ;;  %v14188_v26 = vmax.f32 %v7052_v22, %v14139_v35  ;;  %v6789_v24 = vsel %vm14122_vm8, %v8819_v63, %v6788_v11  ;;  %v6790_v39 = vrot.slane %v6788_v11, 2  ;;  %v6793_v20 = vrot.slane %v6791_v44, 2 }
 0x62c   :  { %v6344_v60 = vrot.slane %v6111_v19, %v12506_v32  ;;  %v6785_v48 = vsel %vm14122_vm8, %v6783_v18, %v6784_v61  ;;  %v7054_v30 = vmax.f32 %v6327_v10, %v6789_v24  ;;  %v14200_v21 = vcombine.high %v14184_v31, %v14184_v31 }
 0x62d   :  { %16438 = vst [vmem:[#allocation49_spill] sm:$0xff] %v14188_v26  ;;  %v7208_v37 = vmax.f32 %v14168_v5, %v14188_v26  ;;  %v6792_v17 = vsel %vm14122_vm8, %v6790_v39, %v6791_v44  ;;  %v6795_v14 = vsel %vm14122_vm8, %v6793_v20, %v6794_v9  ;;  %v14209_v46 = vrot.slane %v6150_v23, %v12506_v32 }
 0x62e   :  { %v14202_v0 = vpop.f32.mrb[12].mxu1  ;;  %v7055_v36 = vmax.f32 %v6335_v47, %v6792_v17  ;;  %v7056_v1 = vmax.f32 %v6334_v16, %v6795_v14  ;;  %v14211_v57 = vmax.f32 %v7054_v30, %v6335_v47  ;;  %v6684_v10 = vrot.slane %v14200_v21, 7 }
 0x62f   :  { %v9169_v41 = vpop.f32.mrb[13].mxu1  ;;  %v7049_v7 = vmax.f32 %v14118_v15, %v14162_v53  ;;  %v7053_v49 = vmax.f32 %v14139_v35, %v6785_v48  ;;  %v14218_v61 = vrot.slane %v6337_v45, %v12506_v32  ;;  %v6352_v58 = vcombine.high %v6344_v60, %v6344_v60 }
 0x630   :  { %16439 = vst [vmem:[#allocation10_spill] sm:$0xff] %v14211_v57  ;;  %v14221_v54 = vmax.f32 %v7051_v13, %v14143_v50  ;;  %v14223_v38 = vmax.f32 %v7055_v36, %v6334_v16  ;;  %v14226_v19 = vmax.f32 %v7056_v1, %v14179_v33  ;;  %v7210_v47 = vmax.f32 %v14165_v43, %v14211_v57 }
 0x631   :  { %v14234_v15 = vcombine.high %v14209_v46, %v14209_v46  ;;  %v8811_v35 = vrot.slane %v14184_v31, 9  ;;  %v6686_v53 = vrot.slane %v6684_v10, 2  ;;  %v14239_v50 = vcombine.high %v14218_v61, %v14218_v61 }
 0x632   :  { %16440 = vst [vmem:[#allocation50_spill] sm:$0xff] %v14221_v54  ;;  %16441 = vst [vmem:[#allocation48_spill] sm:$0xff] %v14223_v38  ;;  %v14230_v18 = vpop.f32.mrb[14].mxu1  ;;  %v14244_v63 = vmax.f32 %v7208_v37, %v14226_v19  ;;  %v6687_v34 = vrot.slane %v14209_v46, 7  ;;  %v6796_v11 = vrot.slane %v6794_v9, 2  ;;  %v14248_v44 = vmax.f32 %v7049_v7, %v14114_v6 }
 0x633   :  { %v9172_v16 = vpop.f32.mrb[15].mxu1  ;;  %v6685_v23 = vsel %vm14122_vm8, %v8811_v35, %v6684_v10  ;;  %v6797_v59 = vrot.slane %v6344_v60, 7  ;;  %v8820_v13 = vrot.slane %v6352_v58, 9  ;;  %v6801_v24 = vrot.slane %v14218_v61, 7 }
 0x634   :  { %16442 = vst [vmem:[#allocation11_spill] sm:$0xff] %v14244_v63  ;;  %16443 = vst [vmem:[#allocation9_spill] sm:$0xff] %v14248_v44  ;;  %v6688_v45 = vsel %vm14122_vm8, %v6686_v53, %v6687_v34  ;;  %v6804_v39 = vrot.slane %v14239_v50, 7  ;;  %v14257_v20 = vmax.f32 %v7053_v49, %v14150_v25  ;;  %v9478_v9 = vadd.f32 %v14104_v12, %v14158_v28 }
 0x635   :  { %v6798_v6 = vsel %vm14122_vm8, %v6796_v11, %v6797_v59  ;;  %v5792_v30 = vadd.f32 %v14104_v12, %v14176_v56  ;;  %v6689_v41 = vrot.slane %v6687_v34, 2  ;;  %v6690_v25 = vrot.slane %v14234_v15, 7 }
 0x636   :  { %16444 = vst [vmem:[#allocation21_spill] sm:$0xff] %v14257_v20  ;;  %v14259_v48 = vpop.f32.mrb[16].mxu1  ;;  %v6802_v36 = vsel %vm14122_vm8, %v8820_v13, %v6801_v24  ;;  %v7057_v1 = vmax.f32 %v14179_v33, %v6798_v6  ;;  %v7022_v28 = vmax.f32 %v14184_v31, %v6685_v23  ;;  %v7209_v49 = vmax.f32 %v14248_v44, %v14257_v20 }
 0x637   :  { %v14269_v17 = vpop.f32.mrb[40].mxu0  ;;  %v9175_v14 = vpop.f32.mrb[17].mxu1  ;;  %v7058_v7 = vmax.f32 %v6352_v58, %v6802_v36  ;;  %v6112_v35 = vmax.f32 %v9478_v9, 0.0  ;;  %v7023_v56 = vmax.f32 %v14200_v21, %v6688_v45  ;;  %v6803_v53 = vrot.slane %v6801_v24, 2 }
 0x638   :  { %v5798_v10 = vpop.f32.mrb[41].mxu0  ;;  %v14279_v16 = vmax.f32 %v7057_v1, %v6344_v60  ;;  %v5982_v34 = vadd.f32 %v14087_v29, %v5792_v30  ;;  %v6806_v31 = vrot.slane %v6804_v39, 2  ;;  %v9479_v29 = vadd.f32 %v14104_v12, %v14181_v4 }
 0x639   :  { %v7138_v59 = vmax.f32 %v7058_v7, %v14218_v61  ;;  %v6354_v33 = vcombine.high %v6112_v35, %v6112_v35  ;;  %v14286_v13 = vrot.slane %v6112_v35, %v12506_v32  ;;  %v14297_v24 = vsel %vm14122_vm8, %v6689_v41, %v6690_v25 }
 0x63a   :  { %16445 = vst [vmem:[#allocation15_spill] sm:$0xff] %v14279_v16  ;;  %v14282_v11 = vpop.f32.mrb[18].mxu1  ;;  %v14291_v45 = vmax.f32 %v7209_v49, %v14279_v16  ;;  %v6101_v60 = vmax.f32 %v5982_v34, 0.0  ;;  %v14300_v6 = vmax.f32 %v7022_v28, %v14200_v21  ;;  %v14306_v14 = vmax.f32 %v7023_v56, %v14209_v46 }
 0x63b   :  { %v9178_v58 = vpop.f32.mrb[19].mxu1  ;;  %v14302_v9 = vmax.f32 %v7210_v47, %v7138_v59  ;;  %v6368_v30 = vrot.slane %v6354_v33, %v12506_v32  ;;  %v14310_v36 = vsel %vm14122_vm8, %v6803_v53, %v6804_v39  ;;  %v6807_v4 = vrot.slane %v14286_v13, 7 }
 0x63c   :  { %16446 = vst [vmem:[#allocation19_spill] sm:$0xff] %v14291_v45  ;;  %v6167_v1 = vcombine.high %v6101_v60, %v6101_v60  ;;  %v14317_v21 = vcombine.high %v14286_v13, %v14286_v13  ;;  %v6174_v41 = vrot.slane %v6101_v60, %v12506_v32  ;;  %v6692_v28 = vrot.slane %v6690_v25, 2 }
 0x63d   :  { %16447 = vst [vmem:[#allocation28_spill] sm:$0xff] %v14302_v9  ;;  %v14319_v47 = vcombine.high %v6368_v30, %v6368_v30  ;;  %v6808_v49 = vsel %vm14122_vm8, %v6806_v31, %v6807_v4  ;;  %v8821_v39 = vrot.slane %v6368_v30, 9  ;;  %v6113_v56 = vmax.f32 %v9479_v29, 0.0 }
 0x63e   :  { %v14313_v10 = vpop.f32.mrb[20].mxu1  ;;  %v6181_v35 = vrot.slane %v6167_v1, %v12506_v32  ;;  %v7060_v34 = vmax.f32 %v14239_v50, %v6808_v49  ;;  %v6182_v59 = vcombine.high %v6174_v41, %v6174_v41  ;;  %v6693_v33 = vrot.slane %v6174_v41, 7 }
 0x63f   :  { %v9181_v7 = vpop.f32.mrb[21].mxu1  ;;  %v6814_v53 = vrot.slane %v14319_v47, 7  ;;  %v6371_v8 = vcombine.high %v6113_v56, %v6113_v56  ;;  %v14335_v1 = vrot.slane %v6807_v4, 2 }
 0x640   :  { %v14331_v25 = vcombine.high %v6181_v35, %v6181_v35  ;;  %v6697_v7 = vrot.slane %v6181_v35, 7  ;;  %v7140_v62 = vmax.f32 %v7060_v34, %v14286_v13  ;;  %v6694_v60 = vsel %vm14122_vm8, %v6692_v28, %v6693_v33 }
 0x641   :  { %v14327_v58 = vpop.f32.mrb[42].mxu0  ;;  %v6815_v49 = vsel %vm14122_vm8, %v8821_v39, %v6814_v53  ;;  %v8812_v16 = vrot.slane %v6182_v59, 9  ;;  %v6816_v63 = vrot.slane %v6814_v53, 2  ;;  %v7025_v57 = vmax.f32 %v14234_v15, %v6694_v60 }
 0x642   :  { %v5803_v31 = vpop.f32.mrb[43].mxu0  ;;  %v14333_v23 = vpop.f32.mrb[22].mxu1  ;;  %v7062_v37 = vmax.f32 %v6368_v30, %v6815_v49  ;;  %v6699_v20 = vrot.slane %v6697_v7, 2  ;;  %v16246_v29 = vrot.slane %v14331_v25, 7  ;;  %v6378_v28 = vrot.slane %v6113_v56, %v12506_v32 }
 0x643   :  { %v9184_v22 = vpop.f32.mrb[23].mxu1  ;;  %v16448_v31 = vmax.f32 %v14188_v26, %v14226_v19  ;;  %v6698_v30 = vsel %vm14122_vm8, %v8812_v16, %v6697_v7  ;;  %v6385_v53 = vrot.slane %v6371_v8, %v12506_v32  ;;  %v14365_v60 = vmax.f32 %v7025_v57, %v6174_v41 }
 0x644   :  { %v14353_v22 = vmax.f32 %v7062_v37, %v14319_v47  ;;  %v7026_v33 = vmax.f32 %v6182_v59, %v6698_v30  ;;  %v9480_v37 = vadd.f32 %v14104_v12, %v14202_v0  ;;  %v6386_v7 = vcombine.high %v6378_v28, %v6378_v28 }
 0x645   :  { %v14346_v4 = vmax.f32 %v16448_v31, %v7140_v62  ;;  %v14350_v39 = vpop.f32.mrb[44].mxu0  ;;  %v6701_v62 = vsel %vm14122_vm8, %v6699_v20, %v16246_v29  ;;  %v6387_v56 = vcombine.high %v6385_v53, %v6385_v53  ;;  %v6817_v31 = vrot.slane %v6378_v28, 7 }
 0x646   :  { %v5808_v34 = vpop.f32.mrb[45].mxu0  ;;  %v14359_v19 = vpop.f32.mrb[24].mxu1  ;;  %v7027_v16 = vmax.f32 %v6181_v35, %v6701_v62  ;;  %v14369_v8 = vmax.f32 %v7026_v33, %v6181_v35  ;;  %v9481_v26 = vadd.f32 %v14104_v12, %v14230_v18  ;;  %v6820_v0 = vrot.slane %v6386_v7, 7 }
 0x647   :  { %16449 = vst [vmem:[#allocation29_spill] sm:$0xff] %v14346_v4  ;;  %v9187_v49 = vpop.f32.mrb[25].mxu1  ;;  %v6823_v34 = vrot.slane %v6385_v53, 7  ;;  %v6114_v4 = vmax.f32 %v9480_v37, 0.0  ;;  %v6818_v57 = vsel %vm14122_vm8, %v6816_v63, %v6817_v31  ;;  %v6819_v41 = vrot.slane %v6817_v31, 2 }
 0x648   :  { %v14374_v20 = vmax.f32 %v7027_v16, %v14331_v25  ;;  %v8822_v35 = vrot.slane %v6387_v56, 9  ;;  %v7063_v62 = vmax.f32 %v14319_v47, %v6818_v57  ;;  %v6822_v16 = vrot.slane %v6820_v0, 2 }
 0x649   :  { %v6388_v33 = vcombine.high %v6114_v4, %v6114_v4  ;;  %v6821_v49 = vsel %vm14122_vm8, %v6819_v41, %v6820_v0  ;;  %v6395_v63 = vrot.slane %v6114_v4, %v12506_v32  ;;  %v6115_v30 = vmax.f32 %v9481_v26, 0.0 }
 0x64a   :  { %v14378_v59 = vpop.f32.mrb[26].mxu1  ;;  %v7064_v31 = vmax.f32 %v6378_v28, %v6821_v49  ;;  %v14388_v29 = vmax.f32 %v7063_v62, %v6378_v28  ;;  %v6824_v47 = vsel %vm14122_vm8, %v6822_v16, %v6823_v34  ;;  %v9482_v18 = vadd.f32 %v14104_v12, %v14259_v48 }
 0x64b   :  { %v9190_v37 = vpop.f32.mrb[27].mxu1  ;;  %v6402_v43 = vrot.slane %v6388_v33, %v12506_v32  ;;  %v6403_v57 = vcombine.high %v6395_v63, %v6395_v63  ;;  %v7065_v41 = vmax.f32 %v6386_v7, %v6824_v47  ;;  %v6405_v16 = vcombine.high %v6115_v30, %v6115_v30 }
 0x64c   :  { %v6827_v37 = vrot.slane %v6395_v63, 7  ;;  %v14397_v0 = vmax.f32 %v7064_v31, %v6386_v7  ;;  %v6412_v47 = vrot.slane %v6115_v30, %v12506_v32 }
 0x64d   :  { %v6404_v4 = vcombine.high %v6402_v43, %v6402_v43  ;;  %v6833_v49 = vrot.slane %v6402_v43, 7  ;;  %v6830_v34 = vrot.slane %v6403_v57, 7  ;;  %v14403_v42 = vmax.f32 %v7065_v41, %v6385_v53 }
 0x64e   :  { %v14395_v44 = vpop.f32.mrb[28].mxu1  ;;  %v6828_v26 = vsel %vm14122_vm8, %v8822_v35, %v6827_v37  ;;  %v6829_v33 = vrot.slane %v6827_v37, 2  ;;  %v6116_v53 = vmax.f32 %v9482_v18, 0.0  ;;  %v8823_v40 = vrot.slane %v6412_v47, 9 }
 0x64f   :  { %v14399_v28 = vpop.f32.mrb[46].mxu0  ;;  %v9193_v62 = vpop.f32.mrb[29].mxu1  ;;  %v6835_v48 = vrot.slane %v6833_v49, 2  ;;  %v6836_v38 = vrot.slane %v6404_v4, 7  ;;  %v7066_v54 = vmax.f32 %v6387_v56, %v6828_v26  ;;  %v6832_v31 = vrot.slane %v6830_v34, 2 }
 0x650   :  { %v5813_v5 = vpop.f32.mrb[47].mxu0  ;;  %v6831_v7 = vsel %vm14122_vm8, %v6829_v33, %v6830_v34  ;;  %v6419_v62 = vrot.slane %v6405_v16, %v12506_v32  ;;  %v6420_v33 = vcombine.high %v6412_v47, %v6412_v47 }
 0x651   :  { %v6837_v35 = vsel %vm14122_vm8, %v6835_v48, %v6836_v38  ;;  %v7067_v37 = vmax.f32 %v6395_v63, %v6831_v7  ;;  %v14413_v5 = vmax.f32 %v7066_v54, %v6395_v63  ;;  %v6834_v56 = vsel %vm14122_vm8, %v6832_v31, %v6833_v49 }
 0x652   :  { %v14409_v9 = vpop.f32.mrb[30].mxu1  ;;  %v7069_v26 = vmax.f32 %v6402_v43, %v6837_v35  ;;  %v6421_v34 = vcombine.high %v6419_v62, %v6419_v62  ;;  %v7068_v2 = vmax.f32 %v6403_v57, %v6834_v56  ;;  %v6840_v52 = vrot.slane %v6420_v33, 7 }
 0x653   :  { %16450 = vst [vmem:[#allocation18_spill] sm:$0xff] %v14409_v9  ;;  %v9196_v41 = vpop.f32.mrb[31].mxu1  ;;  %v14417_v30 = vmax.f32 %v7067_v37, %v6403_v57  ;;  %v7214_v16 = vmax.f32 %v14353_v22, %v14413_v5  ;;  %v6843_v38 = vrot.slane %v6419_v62, 7  ;;  %v6422_v54 = vcombine.high %v6116_v53, %v6116_v53 }
 0x654   :  { %v6846_v48 = vrot.slane %v6421_v34, 7  ;;  %v14423_v18 = vmax.f32 %v7068_v2, %v6402_v43  ;;  %v6429_v7 = vrot.slane %v6116_v53, %v12506_v32  ;;  %v14428_v31 = vmax.f32 %v7069_v26, %v6404_v4 }
 0x655   :  { %v7215_v49 = vmax.f32 %v14388_v29, %v14417_v30  ;;  %v6841_v22 = vsel %vm14122_vm8, %v8823_v40, %v6840_v52  ;;  %v6842_v35 = vrot.slane %v6840_v52, 2  ;;  %v6845_v37 = vrot.slane %v6843_v38, 2 }
 0x656   :  { %v14421_v63 = vpop.f32.mrb[32].mxu1  ;;  %v6436_v41 = vrot.slane %v6422_v54, %v12506_v32  ;;  %v7216_v56 = vmax.f32 %v14397_v0, %v14423_v18  ;;  %v7070_v2 = vmax.f32 %v6412_v47, %v6841_v22  ;;  %v6437_v43 = vcombine.high %v6429_v7, %v6429_v7 }
 0x657   :  { %16451 = vst [vmem:[#allocation17_spill] sm:$0xff] %v14421_v63  ;;  %v9199_v57 = vpop.f32.mrb[33].mxu1  ;;  %v6848_v63 = vrot.slane %v6846_v48, 2  ;;  %v6844_v29 = vsel %vm14122_vm8, %v6842_v35, %v6843_v38  ;;  %v6847_v4 = vsel %vm14122_vm8, %v6845_v37, %v6846_v48  ;;  %v6849_v52 = vrot.slane %v6429_v7, 7 }
 0x658   :  { %v14441_v53 = vcombine.high %v6436_v41, %v6436_v41  ;;  %v7071_v26 = vmax.f32 %v6420_v33, %v6844_v29  ;;  %v7072_v54 = vmax.f32 %v6419_v62, %v6847_v4  ;;  %v14443_v57 = vmax.f32 %v7070_v2, %v6420_v33 }
 0x659   :  { %v14435_v9 = vpop.f32.mrb[48].mxu0  ;;  %v8824_v0 = vrot.slane %v6437_v43, 9  ;;  %v6850_v47 = vsel %vm14122_vm8, %v6848_v63, %v6849_v52  ;;  %v6853_v22 = vrot.slane %v6436_v41, 7  ;;  %v7217_v38 = vmax.f32 %v14403_v42, %v14428_v31 }
 0x65a   :  { %16452 = vst [vmem:[#allocation16_spill] sm:$0xff] %v14435_v9  ;;  %v5818_v40 = vpop.f32.mrb[49].mxu0  ;;  %v6856_v9 = vrot.slane %v14441_v53, 7  ;;  %v14450_v35 = vmax.f32 %v7071_v26, %v6419_v62  ;;  %v14452_v48 = vmax.f32 %v7072_v54, %v6421_v34  ;;  %v7218_v37 = vmax.f32 %v14413_v5, %v14443_v57 }
 0x65b   :  { %v14457_v33 = vmax.f32 %v7214_v16, %v14443_v57  ;;  %v16454_v63 = vrot.slane %v14317_v21, 7  ;;  %v6854_v42 = vsel %vm14122_vm8, %v8824_v0, %v6853_v22  ;;  %v6855_v62 = vrot.slane %v6853_v22, 2 }
 0x65c   :  { %v7073_v4 = vmax.f32 %v6421_v34, %v6850_v47  ;;  %v7219_v5 = vmax.f32 %v14417_v30, %v14450_v35  ;;  %v14471_v16 = vmax.f32 %v7215_v49, %v14450_v35  ;;  %v14474_v40 = vmax.f32 %v7216_v56, %v14452_v48  ;;  %v16456_v47 = vld [vmem:[#allocation27_spill] sm:$0xff] }
 0x65d   :  { %16453 = vst [vmem:[#allocation32_spill] sm:$0xff] %v14457_v33  ;;  %v14459_v2 = vpop.f32.mrb[50].mxu0  ;;  %v6811_v29 = vsel %vm14122_vm8, %v14335_v1, %v16454_v63  ;;  %v5797_v26 = vadd.f32 %v14104_v12, %v14269_v17  ;;  %v6857_v1 = vsel %vm14122_vm8, %v6855_v62, %v6856_v9  ;;  %v7074_v54 = vmax.f32 %v6437_v43, %v6854_v42 }
 0x65e   :  { %v5823_v52 = vpop.f32.mrb[51].mxu0  ;;  %16455 = vst [vmem:[#allocation24_spill] sm:$0xff] %v14474_v40  ;;  %v14480_v0 = vmax.f32 %v7073_v4, %v6429_v7  ;;  %v7024_v34 = vmax.f32 %v14209_v46, %v14297_v24  ;;  %v14485_v30 = vsub.s32 0, %v16456_v47  ;;  %v14488_v49 = vsub.s32 1, %v16456_v47 }
 0x65f   :  { %v7061_v56 = vmax.f32 %v14286_v13, %v6811_v29  ;;  %v7075_v22 = vmax.f32 %v6436_v41, %v6857_v1  ;;  %v14491_v63 = vmax.f32 %v7074_v54, %v6436_v41  ;;  %v16458_v46 = vmax.f32 %v14218_v61, %v14310_v36 }
 0x660   :  { %v14496_v7 = vmax.f32 %v7217_v38, %v14480_v0  ;;  %v5987_v13 = vadd.f32 %v14089_v55, %v5797_v26  ;;  %v9483_v41 = vadd.f32 %v14104_v12, %v14282_v11  ;;  %v16462_v47 = vrot.slane %v14331_v25, 7 }
 0x661   :  { %v14502_v24 = vmax.f32 %v16458_v46, %v14239_v50  ;;  %v14512_v38 = vmax.f32 %v7075_v22, %v14441_v53  ;;  %v14517_v61 = vmax.f32 %v7218_v37, %v14491_v63  ;;  %v14520_v50 = vmax.f32 %v7061_v56, %v14317_v21 }
 0x662   :  { %16457 = vst [vmem:[#allocation8_spill] sm:$0xff] %v14496_v7  ;;  %v6102_v36 = vmax.f32 %v5987_v13, 0.0  ;;  %v6117_v11 = vmax.f32 %v9483_v41, 0.0  ;;  %v7220_v37 = vmax.f32 %v14423_v18, %v14452_v48  ;;  %v6702_v56 = vrot.slane %v16462_v47, 2 }
 0x663   :  { %16459 = vst [vmem:[#allocation23_spill] sm:$0xff] %v14517_v61  ;;  %16460 = vst [vmem:[#allocation35_spill] sm:$0xff] %v14520_v50  ;;  %v14529_v52 = vmax.f32 %v7219_v5, %v14512_v38  ;;  %v6858_v22 = vrot.slane %v6856_v9, 2  ;;  %v9484_v46 = vadd.f32 %v14104_v12, %v14313_v10 }
 0x664   :  { %v6184_v26 = vcombine.high %v6102_v36, %v6102_v36  ;;  %v6191_v21 = vrot.slane %v6102_v36, %v12506_v32  ;;  %v6439_v1 = vcombine.high %v6117_v11, %v6117_v11  ;;  %v6446_v54 = vrot.slane %v6117_v11, %v12506_v32 }
 0x665   :  { %16461 = vst [vmem:[#allocation34_spill] sm:$0xff] %v14529_v52  ;;  %v14544_v36 = vmax.f32 %v7024_v34, %v14234_v15  ;;  %v6118_v43 = vmax.f32 %v9484_v46, 0.0 }
 0x666   :  { %v6198_v13 = vrot.slane %v6184_v26, %v12506_v32  ;;  %v6199_v41 = vcombine.high %v6191_v21, %v6191_v21  ;;  %v6703_v18 = vrot.slane %v6191_v21, 7  ;;  %v6453_v55 = vrot.slane %v6439_v1, %v12506_v32 }
 0x667   :  { %v6454_v11 = vcombine.high %v6446_v54, %v6446_v54  ;;  %v6859_v29 = vrot.slane %v6446_v54, 7 }
 0x668   :  { %v14546_v47 = vcombine.high %v6198_v13, %v6198_v13  ;;  %v6704_v9 = vsel %vm14122_vm8, %v6702_v56, %v6703_v18  ;;  %v6705_v10 = vrot.slane %v6703_v18, 2  ;;  %v6706_v4 = vrot.slane %v6199_v41, 7 }
 0x669   :  { %v8813_v62 = vrot.slane %v6198_v13, 9  ;;  %v7028_v26 = vmax.f32 %v14331_v25, %v6704_v9  ;;  %v14551_v5 = vcombine.high %v6453_v55, %v6453_v55  ;;  %v6860_v1 = vsel %vm14122_vm8, %v6858_v22, %v6859_v29 }
 0x66a   :  { %v6707_v15 = vsel %vm14122_vm8, %v6705_v10, %v6706_v4  ;;  %v6710_v34 = vrot.slane %v14546_v47, 7  ;;  %v6861_v46 = vrot.slane %v6859_v29, 2  ;;  %v6862_v42 = vrot.slane %v6454_v11, 7 }
 0x66b   :  { %v7029_v17 = vmax.f32 %v6191_v21, %v6707_v15  ;;  %v14558_v45 = vmax.f32 %v7028_v26, %v6191_v21  ;;  %v8825_v56 = vrot.slane %v6453_v55, 9  ;;  %v6866_v18 = vrot.slane %v14551_v5, 7 }
 0x66c   :  { %v6711_v9 = vsel %vm14122_vm8, %v8813_v62, %v6710_v34  ;;  %v6863_v22 = vsel %vm14122_vm8, %v6861_v46, %v6862_v42  ;;  %v7076_v4 = vmax.f32 %v14441_v53, %v6860_v1  ;;  %v5807_v15 = vadd.f32 %v14104_v12, %v14350_v39 }
 0x66d   :  { %v7030_v10 = vmax.f32 %v6198_v13, %v6711_v9  ;;  %v14568_v29 = vmax.f32 %v7029_v17, %v6199_v41  ;;  %v6867_v26 = vsel %vm14122_vm8, %v8825_v56, %v6866_v18  ;;  %v7077_v25 = vmax.f32 %v6446_v54, %v6863_v22 }
 0x66e   :  { %v7078_v50 = vmax.f32 %v6453_v55, %v6867_v26  ;;  %v14576_v62 = vmax.f32 %v7076_v4, %v6446_v54  ;;  %v6456_v17 = vcombine.high %v6118_v43, %v6118_v43  ;;  %v6463_v13 = vrot.slane %v6118_v43, %v12506_v32 }
 0x66f   :  { %v14579_v42 = vmax.f32 %v7030_v10, %v14546_v47  ;;  %v14584_v41 = vmax.f32 %v7077_v25, %v6454_v11  ;;  %v16464_v43 = vmax.f32 %v14300_v6, %v14369_v8  ;;  %v16468_v9 = vmax.f32 %v14443_v57, %v14491_v63 }
 0x670   :  { %v14587_v1 = vmax.f32 %v7078_v50, %v14551_v5  ;;  %v7224_v46 = vmax.f32 %v14452_v48, %v14576_v62  ;;  %v14592_v55 = vmax.f32 %v7220_v37, %v14576_v62  ;;  %v6471_v50 = vcombine.high %v6463_v13, %v6463_v13 }
 0x671   :  { %v14602_v11 = vmax.f32 %v16464_v43, %v14579_v42  ;;  %v16466_v48 = vmax.f32 %v14428_v31, %v14480_v0  ;;  %v5802_v6 = vadd.f32 %v14104_v12, %v14327_v58  ;;  %v6868_v26 = vrot.slane %v6866_v18, 2 }
 0x672   :  { %16463 = vst [vmem:[#allocation36_spill] sm:$0xff] %v14592_v55  ;;  %v14616_v22 = vmax.f32 %v16468_v9, %v14587_v1  ;;  %v6470_v31 = vrot.slane %v6456_v17, %v12506_v32  ;;  %v6712_v9 = vrot.slane %v6710_v34, 2  ;;  %v6869_v10 = vrot.slane %v6463_v13, 7 }
 0x673   :  { %16465 = vst [vmem:[#allocation33_spill] sm:$0xff] %v14602_v11  ;;  %v14610_v37 = vmax.f32 %v16466_v48, %v14584_v41  ;;  %v6872_v18 = vrot.slane %v6471_v50, 7  ;;  %v7225_v17 = vmax.f32 %v14480_v0, %v14584_v41  ;;  %v5992_v43 = vadd.f32 %v14091_v27, %v5802_v6 }
 0x674   :  { %v9485_v54 = vadd.f32 %v14104_v12, %v14333_v23  ;;  %v6870_v58 = vsel %vm14122_vm8, %v6868_v26, %v6869_v10  ;;  %v6871_v34 = vrot.slane %v6869_v10, 2  ;;  %v6875_v57 = vrot.slane %v6470_v31, 7 }
 0x675   :  { %16467 = vst [vmem:[#allocation6_spill] sm:$0xff] %v14610_v37  ;;  %v6874_v48 = vrot.slane %v6872_v18, 2  ;;  %v7079_v4 = vmax.f32 %v14551_v5, %v6870_v58  ;;  %v6103_v56 = vmax.f32 %v5992_v43, 0.0  ;;  %v5997_v0 = vadd.f32 %v14093_v3, %v5807_v15 }
 0x676   :  { %v6119_v25 = vmax.f32 %v9485_v54, 0.0  ;;  %v6873_v39 = vsel %vm14122_vm8, %v6871_v34, %v6872_v18  ;;  %v14654_v10 = vcombine.high %v6470_v31, %v6470_v31  ;;  %v9486_v58 = vadd.f32 %v14104_v12, %v14359_v19 }
 0x677   :  { %v6876_v6 = vsel %vm14122_vm8, %v6874_v48, %v6875_v57  ;;  %v7080_v26 = vmax.f32 %v6463_v13, %v6873_v39  ;;  %v14656_v43 = vmax.f32 %v7079_v4, %v6463_v13  ;;  %v6201_v54 = vcombine.high %v6103_v56, %v6103_v56 }
 0x678   :  { %v7081_v5 = vmax.f32 %v6471_v50, %v6876_v6  ;;  %v6208_v3 = vrot.slane %v6103_v56, %v12506_v32  ;;  %v6473_v15 = vcombine.high %v6119_v25, %v6119_v25  ;;  %v16469_v48 = vmax.f32 %v14450_v35, %v14512_v38 }
 0x679   :  { %v14661_v27 = vmax.f32 %v7080_v26, %v6471_v50  ;;  %v6480_v56 = vrot.slane %v6119_v25, %v12506_v32  ;;  %v6215_v6 = vrot.slane %v6201_v54, %v12506_v32  ;;  %v6104_v19 = vmax.f32 %v5997_v0, 0.0 }
 0x67a   :  { %v14663_v23 = vmax.f32 %v7081_v5, %v6470_v31  ;;  %v14671_v13 = vmax.f32 %v16469_v48, %v14656_v43  ;;  %v6216_v4 = vcombine.high %v6208_v3, %v6208_v3  ;;  %v6713_v18 = vrot.slane %v6208_v3, 7 }
 0x67b   :  { %v6487_v34 = vrot.slane %v6473_v15, %v12506_v32  ;;  %v14680_v31 = vmax.f32 %v7224_v46, %v14661_v27  ;;  %v14697_v15 = vmax.f32 %v9486_v58, 0.0  ;;  %v14701_v25 = vadd.f32 %v14104_v12, %v14378_v59 }
 0x67c   :  { %16470 = vst [vmem:[#allocation25_spill] sm:$0xff] %v14671_v13  ;;  %v14683_v39 = vmax.f32 %v7225_v17, %v14663_v23  ;;  %v6714_v26 = vsel %vm14122_vm8, %v6712_v9, %v6713_v18  ;;  %v8826_v17 = vrot.slane %v14654_v10, 9  ;;  %v6715_v48 = vrot.slane %v6713_v18, 2 }
 0x67d   :  { %16471 = vst [vmem:[#allocation26_spill] sm:$0xff] %v14680_v31  ;;  %v6716_v35 = vrot.slane %v6216_v4, 7  ;;  %v7031_v54 = vmax.f32 %v14546_v47, %v6714_v26  ;;  %v6488_v9 = vcombine.high %v6480_v56, %v6480_v56  ;;  %v6489_v50 = vcombine.high %v6487_v34, %v6487_v34 }
 0x67e   :  { %16472 = vst [vmem:[#allocation40_spill] sm:$0xff] %v14683_v39  ;;  %v6879_v57 = vrot.slane %v6480_v56, 7  ;;  %v6719_v53 = vrot.slane %v6215_v6, 7  ;;  %v6885_v21 = vrot.slane %v6487_v34, 7 }
 0x67f   :  { %v6717_v5 = vsel %vm14122_vm8, %v6715_v48, %v6716_v35  ;;  %v6718_v46 = vrot.slane %v6716_v35, 2  ;;  %v14706_v37 = vmax.f32 %v7031_v54, %v6208_v3  ;;  %v6882_v59 = vrot.slane %v6488_v9, 7 }
 0x680   :  { %v7032_v58 = vmax.f32 %v6208_v3, %v6717_v5  ;;  %v6880_v0 = vsel %vm14122_vm8, %v8826_v17, %v6879_v57  ;;  %v6881_v18 = vrot.slane %v6879_v57, 2  ;;  %v6887_v47 = vrot.slane %v6885_v21, 2 }
 0x681   :  { %v6720_v12 = vsel %vm14122_vm8, %v6718_v46, %v6719_v53  ;;  %v6888_v26 = vrot.slane %v6489_v50, 7  ;;  %v16473_v3 = vmax.f32 %v14306_v14, %v14374_v20  ;;  %v6884_v17 = vrot.slane %v6882_v59, 2 }
 0x682   :  { %v7033_v7 = vmax.f32 %v6216_v4, %v6720_v12  ;;  %v14712_v55 = vmax.f32 %v7032_v58, %v6216_v4  ;;  %v6883_v57 = vsel %vm14122_vm8, %v6881_v18, %v6882_v59  ;;  %v7082_v46 = vmax.f32 %v14654_v10, %v6880_v0 }
 0x683   :  { %v14720_v5 = vmax.f32 %v16473_v3, %v14706_v37  ;;  %v6889_v53 = vsel %vm14122_vm8, %v6887_v47, %v6888_v26  ;;  %v16474_v14 = vmax.f32 %v14544_v36, %v14558_v45  ;;  %v6218_v58 = vcombine.high %v6104_v19, %v6104_v19 }
 0x684   :  { %v14727_v4 = vmax.f32 %v7033_v7, %v6215_v6  ;;  %v6886_v12 = vsel %vm14122_vm8, %v6884_v17, %v6885_v21  ;;  %v7083_v59 = vmax.f32 %v6480_v56, %v6883_v57  ;;  %v7085_v10 = vmax.f32 %v6487_v34, %v6889_v53 }
 0x685   :  { %v14735_v54 = vmax.f32 %v16474_v14, %v14712_v55  ;;  %v6217_v0 = vcombine.high %v6215_v6, %v6215_v6  ;;  %v16476_v36 = vmax.f32 %v14365_v60, %v14568_v29  ;;  %v7084_v3 = vmax.f32 %v6488_v9, %v6886_v12 }
 0x686   :  { %v14751_v14 = vmax.f32 %v7082_v46, %v6480_v56  ;;  %v14753_v18 = vmax.f32 %v7083_v59, %v6488_v9  ;;  %v14755_v21 = vmax.f32 %v7085_v10, %v6489_v50  ;;  %v6225_v17 = vrot.slane %v6104_v19, %v12506_v32 }
 0x687   :  { %16475 = vst [vmem:[#allocation39_spill] sm:$0xff] %v14735_v54  ;;  %v14749_v26 = vmax.f32 %v16476_v36, %v14727_v4  ;;  %v6232_v53 = vrot.slane %v6218_v58, %v12506_v32  ;;  %v14763_v60 = vmax.f32 %v7084_v3, %v6487_v34  ;;  %v16478_v50 = vmax.f32 %v14491_v63, %v14587_v1 }
 0x688   :  { %v16479_v19 = vmax.f32 %v14512_v38, %v14656_v43  ;;  %v16481_v34 = vmax.f32 %v14584_v41, %v14663_v23  ;;  %v6233_v59 = vcombine.high %v6225_v17, %v6225_v17  ;;  %v8814_v63 = vrot.slane %v6217_v0, 9 }
 0x689   :  { %16477 = vst [vmem:[#allocation31_spill] sm:$0xff] %v14749_v26  ;;  %v14773_v46 = vmax.f32 %v16478_v50, %v14751_v14  ;;  %v6234_v10 = vcombine.high %v6232_v53, %v6232_v53  ;;  %v16483_v38 = vmax.f32 %v14576_v62, %v14661_v27  ;;  %v6729_v7 = vrot.slane %v6232_v53, 7  ;;  %v16498_v26 = vld [vmem:[#allocation17_spill] sm:$0xff] }
 0x68a   :  { %v14779_v12 = vmax.f32 %v16479_v19, %v14753_v18  ;;  %v14785_v58 = vmax.f32 %v16481_v34, %v14755_v21  ;;  %v6726_v57 = vrot.slane %v6233_v59, 7  ;;  %v6490_v41 = vcombine.high %v14697_v15, %v14697_v15 }
 0x68b   :  { %v14795_v50 = vmax.f32 %v16483_v38, %v14763_v60  ;;  %v6723_v38 = vrot.slane %v6225_v17, 7  ;;  %v6732_v3 = vrot.slane %v6234_v10, 7  ;;  %v6497_v19 = vrot.slane %v14697_v15, %v12506_v32 }
 0x68c   :  { %16480 = vst [vmem:[#allocation44_spill] sm:$0xff] %v14779_v12  ;;  %16482 = vst [vmem:[#allocation43_spill] sm:$0xff] %v14785_v58  ;;  %v6728_v9 = vrot.slane %v6726_v57, 2  ;;  %v6121_v6 = vmax.f32 %v14701_v25, 0.0  ;;  %v6731_v56 = vrot.slane %v6729_v7, 2  ;;  %v6504_v62 = vrot.slane %v6490_v41, %v12506_v32 }
 0x68d   :  { %16484 = vst [vmem:[#allocation45_spill] sm:$0xff] %v14795_v50  ;;  %v6724_v34 = vsel %vm14122_vm8, %v8814_v63, %v6723_v38  ;;  %v6725_v36 = vrot.slane %v6723_v38, 2  ;;  %v6505_v48 = vcombine.high %v6497_v19, %v6497_v19  ;;  %v8827_v31 = vrot.slane %v6497_v19, 9 }
 0x68e   :  { %v7034_v47 = vmax.f32 %v6217_v0, %v6724_v34  ;;  %v6730_v15 = vsel %vm14122_vm8, %v6728_v9, %v6729_v7  ;;  %v6733_v63 = vsel %vm14122_vm8, %v6731_v56, %v6732_v3  ;;  %v6895_v34 = vrot.slane %v6504_v62, 7 }
 0x68f   :  { %v6727_v39 = vsel %vm14122_vm8, %v6725_v36, %v6726_v57  ;;  %v7036_v25 = vmax.f32 %v6233_v59, %v6730_v15  ;;  %v7037_v0 = vmax.f32 %v6232_v53, %v6733_v63  ;;  %v6892_v41 = vrot.slane %v6505_v48, 7  ;;  %v16495_v57 = vld [vmem:[#allocation18_spill] sm:$0xff] }
 0x690   :  { %v7035_v38 = vmax.f32 %v6225_v17, %v6727_v39  ;;  %v14825_v40 = vmax.f32 %v7034_v47, %v6225_v17  ;;  %v6507_v54 = vcombine.high %v6121_v6, %v6121_v6  ;;  %v16485_v7 = vmax.f32 %v14369_v8, %v14579_v42 }
 0x691   :  { %v14829_v35 = vmax.f32 %v7036_v25, %v6232_v53  ;;  %v14839_v39 = vmax.f32 %v7037_v0, %v6234_v10  ;;  %v6506_v47 = vcombine.high %v6504_v62, %v6504_v62  ;;  %v6893_v17 = vsel %vm14122_vm8, %v8827_v31, %v6892_v41 }
 0x692   :  { %v14827_v13 = vmax.f32 %v7035_v38, %v6233_v59  ;;  %v14837_v56 = vmax.f32 %v16485_v7, %v14825_v40  ;;  %v6894_v9 = vrot.slane %v6892_v41, 2  ;;  %v16486_v36 = vmax.f32 %v14374_v20, %v14706_v37  ;;  %v14892_v7 = vld [vmem:[%s16168_s6 + $0x1] ss:$0 sm:$0xff] }
 0x693   :  { %v16487_v10 = vmax.f32 %v14558_v45, %v14712_v55  ;;  %v16489_v15 = vmax.f32 %v14568_v29, %v14727_v4  ;;  %v6897_v38 = vrot.slane %v6895_v34, 2  ;;  %v7233_v45 = vmax.f32 %v14663_v23, %v14755_v21 }
 0x694   :  { %v14851_v8 = vmax.f32 %v16486_v36, %v14827_v13  ;;  %v6896_v20 = vsel %vm14122_vm8, %v6894_v9, %v6895_v34  ;;  %v6898_v9 = vrot.slane %v6506_v47, 7  ;;  %v7086_v34 = vmax.f32 %v6497_v19, %v6893_v17 }
 0x695   :  { %v14857_v3 = vmax.f32 %v16487_v10, %v14829_v35  ;;  %v14865_v63 = vmax.f32 %v16489_v15, %v14839_v39  ;;  %v7087_v36 = vmax.f32 %v6505_v48, %v6896_v20  ;;  %v6514_v10 = vrot.slane %v6121_v6, %v12506_v32 }
 0x696   :  { %v6521_v15 = vrot.slane %v6507_v54, %v12506_v32  ;;  %v6899_v0 = vsel %vm14122_vm8, %v6897_v38, %v6898_v9  ;;  %v14887_v41 = vmax.f32 %v7086_v34, %v6505_v48  ;;  %v6900_v25 = vrot.slane %v6898_v9, 2 }
 0x697   :  { %16488 = vst [vmem:[#allocation54_spill] sm:$0xff] %v14857_v3  ;;  %16490 = vst [vmem:[#allocation30_spill] sm:$0xff] %v14865_v63  ;;  %v9488_v19 = vadd.f32 %v14892_v7, %v14395_v44  ;;  %v7088_v6 = vmax.f32 %v6504_v62, %v6899_v0  ;;  %v14896_v17 = vmax.f32 %v7087_v36, %v6504_v62  ;;  %v6901_v9 = vrot.slane %v6514_v10, 7 }
 0x698   :  { %v6522_v54 = vcombine.high %v6514_v10, %v6514_v10  ;;  %v6523_v20 = vcombine.high %v6521_v15, %v6521_v15  ;;  %v7234_v23 = vmax.f32 %v14751_v14, %v14887_v41  ;;  %v16491_v48 = vmax.f32 %v14587_v1, %v14751_v14 }
 0x699   :  { %v6905_v34 = vrot.slane %v6521_v15, 7  ;;  %v14906_v29 = vmax.f32 %v7088_v6, %v6506_v47  ;;  %v16492_v62 = vmax.f32 %v14656_v43, %v14753_v18  ;;  %v6902_v14 = vsel %vm14122_vm8, %v6900_v25, %v6901_v9 }
 0x69a   :  { %v14904_v38 = vmax.f32 %v16491_v48, %v14887_v41  ;;  %v8828_v36 = vrot.slane %v6522_v54, 9  ;;  %v16493_v43 = vmax.f32 %v14661_v27, %v14763_v60  ;;  %v6908_v1 = vrot.slane %v6523_v20, 7 }
 0x69b   :  { %v14914_v0 = vmax.f32 %v16492_v62, %v14896_v17  ;;  %v6907_v6 = vrot.slane %v6905_v34, 2  ;;  %v7089_v59 = vmax.f32 %v6506_v47, %v6902_v14  ;;  %v6122_v25 = vmax.f32 %v9488_v19, 0.0  ;;  %v16496_v14 = vld [vmem:[#allocation5_spill] sm:$0xff] }
 0x69c   :  { %v14930_v62 = vmax.f32 %v16493_v43, %v14906_v29  ;;  %v6906_v31 = vsel %vm14122_vm8, %v8828_v36, %v6905_v34  ;;  %v7236_v48 = vmax.f32 %v14763_v60, %v14906_v29  ;;  %v5812_v44 = vadd.f32 %v14892_v7, %v14399_v28 }
 0x69d   :  { %v7090_v53 = vmax.f32 %v6522_v54, %v6906_v31  ;;  %v9489_v27 = vadd.f32 %v14892_v7, %v16495_v57  ;;  %v6909_v43 = vsel %vm14122_vm8, %v6907_v6, %v6908_v1  ;;  %v14944_v34 = vmax.f32 %v7089_v59, %v6514_v10 }
 0x69e   :  { %16494 = vst [vmem:[#allocation41_spill] sm:$0xff] %v14930_v62  ;;  %v6524_v31 = vcombine.high %v6122_v25, %v6122_v25  ;;  %v7091_v19 = vmax.f32 %v6521_v15, %v6909_v43  ;;  %v6531_v54 = vrot.slane %v6122_v25, %v12506_v32  ;;  %v6910_v36 = vrot.slane %v6908_v1, 2 }
 0x69f   :  { %v14946_v47 = vmax.f32 %v7090_v53, %v6521_v15  ;;  %v6002_v60 = vadd.f32 %v16496_v14, %v5812_v44  ;;  %v7237_v28 = vmax.f32 %v14755_v21, %v14944_v34  ;;  %v14953_v9 = vmax.f32 %v7233_v45, %v14944_v34 }
 0x6a0   :  { %v6538_v59 = vrot.slane %v6524_v31, %v12506_v32  ;;  %v14959_v53 = vmax.f32 %v7091_v19, %v6523_v20  ;;  %v6539_v10 = vcombine.high %v6531_v54, %v6531_v54  ;;  %v6911_v15 = vrot.slane %v6531_v54, 7 }
 0x6a1   :  { %16497 = vst [vmem:[#allocation37_spill] sm:$0xff] %v14953_v9  ;;  %v14956_v57 = vmax.f32 %v7234_v23, %v14946_v47  ;;  %v7238_v1 = vmax.f32 %v14887_v41, %v14946_v47  ;;  %v6105_v31 = vmax.f32 %v6002_v60, 0.0  ;;  %v6123_v58 = vmax.f32 %v9489_v27, 0.0  ;;  %v16510_v9 = vld [vmem:[#allocation22_spill] sm:$0xff] }
 0x6a2   :  { %v14967_v45 = vcombine.high %v6538_v59, %v6538_v59  ;;  %v8829_v6 = vrot.slane %v6538_v59, 9  ;;  %v6912_v23 = vsel %vm14122_vm8, %v6910_v36, %v6911_v15  ;;  %v6913_v25 = vrot.slane %v6911_v15, 2 }
 0x6a3   :  { %v6914_v43 = vrot.slane %v6539_v10, 7  ;;  %v7092_v14 = vmax.f32 %v6523_v20, %v6912_v23  ;;  %v6235_v21 = vcombine.high %v6105_v31, %v6105_v31  ;;  %v6242_v63 = vrot.slane %v6105_v31, %v12506_v32 }
 0x6a4   :  { %v6918_v19 = vrot.slane %v14967_v45, 7  ;;  %v9490_v50 = vadd.f32 %v14892_v7, %v16498_v26  ;;  %v6541_v26 = vcombine.high %v6123_v58, %v6123_v58 }
 0x6a5   :  { %v6915_v44 = vsel %vm14122_vm8, %v6913_v25, %v6914_v43  ;;  %v14981_v3 = vmax.f32 %v7092_v14, %v6531_v54  ;;  %v6249_v27 = vrot.slane %v6235_v21, %v12506_v32  ;;  %v6250_v23 = vcombine.high %v6242_v63, %v6242_v63 }
 0x6a6   :  { %v6919_v36 = vsel %vm14122_vm8, %v8829_v6, %v6918_v19  ;;  %v6920_v60 = vrot.slane %v6918_v19, 2  ;;  %v7093_v15 = vmax.f32 %v6531_v54, %v6915_v44  ;;  %v8815_v41 = vrot.slane %v6242_v63, 9 }
 0x6a7   :  { %v7094_v20 = vmax.f32 %v6538_v59, %v6919_v36  ;;  %v7240_v25 = vmax.f32 %v14906_v29, %v14981_v3  ;;  %v14989_v43 = vmax.f32 %v7236_v48, %v14981_v3  ;;  %v14994_v44 = vcombine.high %v6249_v27, %v6249_v27 }
 0x6a8   :  { %v14984_v62 = vmax.f32 %v7093_v15, %v6539_v10  ;;  %v6736_v54 = vrot.slane %v6250_v23, 7  ;;  %v6739_v59 = vrot.slane %v6249_v27, 7  ;;  %v6548_v10 = vrot.slane %v6123_v58, %v12506_v32 }
 0x6a9   :  { %16500 = vst [vmem:[#allocation53_spill] sm:$0xff] %v14989_v43  ;;  %v14992_v6 = vmax.f32 %v7094_v20, %v14967_v45  ;;  %v6555_v31 = vrot.slane %v6541_v26, %v12506_v32  ;;  %v6124_v48 = vmax.f32 %v9490_v50, 0.0 }
 0x6aa   :  { %16499 = vst [vmem:[#allocation38_spill] sm:$0xff] %v14984_v62  ;;  %v14997_v21 = vmax.f32 %v7237_v28, %v14984_v62  ;;  %v7241_v29 = vmax.f32 %v14944_v34, %v14984_v62  ;;  %v6737_v14 = vsel %vm14122_vm8, %v8815_v41, %v6736_v54  ;;  %v6738_v36 = vrot.slane %v6736_v54, 2 }
 0x6ab   :  { %v15006_v19 = vmax.f32 %v7238_v1, %v14992_v6  ;;  %v6741_v15 = vrot.slane %v6739_v59, 2  ;;  %v16295_v28 = vrot.slane %v14994_v44, 7  ;;  %v7038_v20 = vmax.f32 %v6242_v63, %v6737_v14 }
 0x6ac   :  { %16501 = vst [vmem:[#allocation52_spill] sm:$0xff] %v14997_v21  ;;  %v6556_v58 = vcombine.high %v6548_v10, %v6548_v10  ;;  %v6740_v34 = vsel %vm14122_vm8, %v6738_v36, %v6739_v59  ;;  %v6921_v21 = vrot.slane %v6548_v10, 7  ;;  %v6557_v63 = vcombine.high %v6555_v31, %v6555_v31 }
 0x6ad   :  { %v6743_v1 = vsel %vm14122_vm8, %v6741_v15, %v16295_v28  ;;  %v7039_v41 = vmax.f32 %v6250_v23, %v6740_v34  ;;  %v15019_v54 = vmax.f32 %v7038_v20, %v6250_v23  ;;  %v16502_v59 = vmax.f32 %v14579_v42, %v14825_v40 }
 0x6ae   :  { %v6924_v43 = vrot.slane %v6556_v58, 7  ;;  %v7040_v12 = vmax.f32 %v6249_v27, %v6743_v1  ;;  %v6922_v14 = vsel %vm14122_vm8, %v6920_v60, %v6921_v21  ;;  %v6923_v26 = vrot.slane %v6921_v21, 2 }
 0x6af   :  { %v15023_v52 = vmax.f32 %v7039_v41, %v6249_v27  ;;  %v15031_v36 = vmax.f32 %v16502_v59, %v15019_v54  ;;  %v6927_v60 = vrot.slane %v6555_v31, 7  ;;  %v7095_v27 = vmax.f32 %v14967_v45, %v6922_v14 }
 0x6b0   :  { %v6926_v23 = vrot.slane %v6924_v43, 2  ;;  %v15034_v15 = vmax.f32 %v7040_v12, %v14994_v44  ;;  %v6925_v20 = vsel %vm14122_vm8, %v6923_v26, %v6924_v43  ;;  %v16503_v42 = vmax.f32 %v14706_v37, %v14827_v13 }
 0x6b1   :  { %v6558_v12 = vcombine.high %v6124_v48, %v6124_v48  ;;  %v16504_v43 = vmax.f32 %v14712_v55, %v14829_v35  ;;  %v7096_v41 = vmax.f32 %v6548_v10, %v6925_v20  ;;  %v15057_v14 = vmax.f32 %v7095_v27, %v6548_v10  ;;  %v16508_v55 = vld [vmem:[#allocation16_spill] sm:$0xff] }
 0x6b2   :  { %v15047_v1 = vmax.f32 %v16503_v42, %v15023_v52  ;;  %v6928_v45 = vsel %vm14122_vm8, %v6926_v23, %v6927_v60  ;;  %v6565_v21 = vrot.slane %v6124_v48, %v12506_v32  ;;  %v16506_v20 = vmax.f32 %v14896_v17, %v14959_v53 }
 0x6b3   :  { %v15053_v26 = vmax.f32 %v16504_v43, %v15034_v15  ;;  %v7097_v42 = vmax.f32 %v6556_v58, %v6928_v45  ;;  %v8830_v43 = vrot.slane %v6557_v63, 9  ;;  %v15066_v34 = vmax.f32 %v7096_v41, %v6556_v58 }
 0x6b4   :  { %v15076_v60 = vmax.f32 %v16506_v20, %v15057_v14  ;;  %v6572_v27 = vrot.slane %v6558_v12, %v12506_v32  ;;  %v6573_v48 = vcombine.high %v6565_v21, %v6565_v21  ;;  %v6931_v41 = vrot.slane %v6565_v21, 7 }
 0x6b5   :  { %v15070_v10 = vmax.f32 %v7097_v42, %v6555_v31  ;;  %v15082_v58 = vmax.f32 %v7240_v25, %v15066_v34  ;;  %v5817_v31 = vadd.f32 %v14892_v7, %v16508_v55 }
 0x6b6   :  { %v6574_v45 = vcombine.high %v6572_v27, %v6572_v27  ;;  %v6932_v25 = vsel %vm14122_vm8, %v8830_v43, %v6931_v41  ;;  %v6933_v59 = vrot.slane %v6931_v41, 2  ;;  %v6934_v23 = vrot.slane %v6573_v48, 7 }
 0x6b7   :  { %16505 = vst [vmem:[#allocation42_spill] sm:$0xff] %v15070_v10  ;;  %16507 = vst [vmem:[#allocation46_spill] sm:$0xff] %v15082_v58  ;;  %v15093_v37 = vmax.f32 %v7241_v29, %v15070_v10  ;;  %v6937_v50 = vrot.slane %v6572_v27, 7  ;;  %v7098_v20 = vmax.f32 %v6557_v63, %v6932_v25  ;;  %v6007_v10 = vadd.f32 %v16510_v9, %v5817_v31 }
 0x6b8   :  { %v6935_v12 = vsel %vm14122_vm8, %v6933_v59, %v6934_v23  ;;  %v6936_v28 = vrot.slane %v6934_v23, 2  ;;  %v6940_v29 = vrot.slane %v6574_v45, 7  ;;  %v7193_v63 = vmax.f32 %v14727_v4, %v14839_v39 }
 0x6b9   :  { %16509 = vst [vmem:[#allocation47_spill] sm:$0xff] %v15093_v37  ;;  %v6939_v62 = vrot.slane %v6937_v50, 2  ;;  %v7178_v55 = vmax.f32 %v7098_v20, %v6565_v21  ;;  %v6106_v58 = vmax.f32 %v6007_v10, 0.0  ;;  %v5822_v59 = vadd.f32 %v14892_v7, %v14459_v2 }
 0x6ba   :  { %v6938_v42 = vsel %vm14122_vm8, %v6936_v28, %v6937_v50  ;;  %v7099_v23 = vmax.f32 %v6565_v21, %v6935_v12  ;;  %v16511_v25 = vmax.f32 %v14946_v47, %v14992_v6  ;;  %v16513_v50 = vld [vmem:[#allocation20_spill] sm:$0xff]  ;;  %v16514_v21 = vrot.slane %v14994_v44, 7 }
 0x6bb   :  { %v6941_v9 = vsel %vm14122_vm8, %v6939_v62, %v6940_v29  ;;  %v7100_v31 = vmax.f32 %v6573_v48, %v6938_v42  ;;  %v6252_v41 = vcombine.high %v6106_v58, %v6106_v58  ;;  %v6259_v28 = vrot.slane %v6106_v58, %v12506_v32 }
 0x6bc   :  { %v15119_v43 = vmax.f32 %v16511_v25, %v7178_v55  ;;  %v7101_v20 = vmax.f32 %v6572_v27, %v6941_v9  ;;  %v6012_v10 = vadd.f32 %v16513_v50, %v5822_v59  ;;  %v6744_v58 = vrot.slane %v16514_v21, 2 }
 0x6bd   :  { %v6266_v47 = vrot.slane %v6252_v41, %v12506_v32  ;;  %v6267_v6 = vcombine.high %v6259_v28, %v6259_v28  ;;  %v6745_v42 = vrot.slane %v6259_v28, 7  ;;  %v15134_v12 = vmax.f32 %v7099_v23, %v6573_v48  ;;  %v16515_v48 = vld [vmem:[#allocation28_spill] sm:$0xff] }
 0x6be   :  { %16512 = vst [vmem:[#allocation7_spill] sm:$0xff] %v15119_v43  ;;  %v15136_v55 = vmax.f32 %v7100_v31, %v6572_v27  ;;  %v15138_v29 = vmax.f32 %v7101_v20, %v6574_v45  ;;  %v6107_v59 = vmax.f32 %v6012_v10, 0.0  ;;  %v16521_v20 = vrot.slane %v14517_v61, %v14488_v49 }
 0x6bf   :  { %v6268_v9 = vcombine.high %v6266_v47, %v6266_v47  ;;  %v6746_v25 = vsel %vm14122_vm8, %v6744_v58, %v6745_v42  ;;  %v8816_v50 = vrot.slane %v6267_v6, 9  ;;  %v6749_v7 = vrot.slane %v6266_v47, 7 }
 0x6c0   :  { %v7041_v41 = vmax.f32 %v14994_v44, %v6746_v25  ;;  %v6269_v2 = vcombine.high %v6107_v59, %v6107_v59  ;;  %v6276_v21 = vrot.slane %v6107_v59, %v12506_v32  ;;  %v16527_v61 = vrot.slane %v15031_v36, %v14488_v49 }
 0x6c1   :  { %v6750_v27 = vsel %vm14122_vm8, %v8816_v50, %v6749_v7  ;;  %v6751_v45 = vrot.slane %v6749_v7, 2  ;;  %v6752_v31 = vrot.slane %v6268_v9, 7 }
 0x6c2   :  { %v7042_v10 = vmax.f32 %v6267_v6, %v6750_v27  ;;  %v7121_v58 = vmax.f32 %v7041_v41, %v6259_v28  ;;  %v6283_v42 = vrot.slane %v6269_v2, %v12506_v32  ;;  %v6284_v4 = vcombine.high %v6276_v21, %v6276_v21 }
 0x6c3   :  { %v6753_v44 = vsel %vm14122_vm8, %v6751_v45, %v6752_v31  ;;  %v6754_v59 = vrot.slane %v6752_v31, 2  ;;  %v6755_v25 = vrot.slane %v6276_v21, 7  ;;  %v16516_v45 = vmax.f32 %v14825_v40, %v15019_v54 }
 0x6c4   :  { %v7043_v50 = vmax.f32 %v6266_v47, %v6753_v44  ;;  %v7122_v7 = vmax.f32 %v7042_v10, %v6266_v47  ;;  %v7197_v62 = vmax.f32 %v14839_v39, %v7121_v58  ;;  %v15156_v37 = vmax.f32 %v7193_v63, %v7121_v58 }
 0x6c5   :  { %v6285_v6 = vcombine.high %v6283_v42, %v6283_v42  ;;  %v6756_v32 = vsel %vm14122_vm8, %v6754_v59, %v6755_v25  ;;  %v6757_v28 = vrot.slane %v6755_v25, 2  ;;  %v6758_v2 = vrot.slane %v6284_v4, 7 }
 0x6c6   :  { %v7123_v41 = vmax.f32 %v7043_v50, %v6268_v9  ;;  %v7198_v27 = vmax.f32 %v15019_v54, %v7122_v7  ;;  %v15164_v31 = vmax.f32 %v16516_v45, %v7122_v7  ;;  %v7473_v47 = vrot.slane %v15119_v43, %v14488_v49 }
 0x6c7   :  { %v6759_v63 = vsel %vm14122_vm8, %v6757_v28, %v6758_v2  ;;  %v8817_v10 = vrot.slane %v6283_v42, 9  ;;  %v6762_v44 = vrot.slane %v6285_v6, 7  ;;  %v16517_v25 = vmax.f32 %v14827_v13, %v15023_v52 }
 0x6c8   :  { %v7199_v59 = vmax.f32 %v15023_v52, %v7123_v41  ;;  %v7425_v40 = vrot.slane %v15164_v31, %v14488_v49  ;;  %v7044_v2 = vmax.f32 %v6268_v9, %v6756_v32  ;;  %v7045_v39 = vmax.f32 %v6276_v21, %v6759_v63  ;;  %v16522_v9 = vld [vmem:[#allocation50_spill] sm:$0xff] }
 0x6c9   :  { %v15176_v50 = vmax.f32 %v16517_v25, %v7123_v41  ;;  %v6763_v45 = vsel %vm14122_vm8, %v8817_v10, %v6762_v44  ;;  %v6764_v28 = vrot.slane %v6762_v44, 2  ;;  %v16518_v52 = vrot.slane %v14602_v11, %v14488_v49  ;;  %v16525_v44 = vld [vmem:[#allocation12_spill] sm:$0xff] }
 0x6ca   :  { %v7046_v23 = vmax.f32 %v6283_v42, %v6763_v45  ;;  %v16519_v13 = vrot.slane %v14837_v56, %v14488_v49  ;;  %v16520_v54 = vrot.slane %v14457_v33, %v14488_v49  ;;  %v16523_v42 = vld [vmem:[#allocation48_spill] sm:$0xff]  ;;  %v16526_v45 = vrot.slane %v16525_v44, 7 }
 0x6cb   :  { %v16524_v32 = vmax.f32 %v16522_v9, %v16523_v42 }
 0x6cc   :  { %v7474_v25 = vsel %vm7390_vm9, %v16519_v13, %v16518_v52  ;;  %v7481_v10 = vsel %vm7390_vm9, %v16521_v20, %v16520_v54  ;;  %v6766_v43 = vsel %vm14122_vm8, %v6764_v28, %v16526_v45  ;;  %v15208_v52 = vmax.f32 %v7044_v2, %v6276_v21  ;;  %v16529_v21 = vld [vmem:[#allocation14_spill] sm:$0xff]  ;;  %v16530_v28 = vld [vmem:[#allocation9_spill] sm:$0xff] }
 0x6cd   :  { %v15202_v63 = vmax.f32 %v16524_v32, %v14502_v24  ;;  %v15210_v13 = vmax.f32 %v7045_v39, %v6284_v4  ;;  %v7475_v20 = vsel %vm6676_vm3, %v16527_v61, %v7474_v25  ;;  %v7047_v54 = vmax.f32 %v6285_v6, %v6766_v43 }
 0x6ce   :  { %v7126_v33 = vmax.f32 %v7046_v23, %v6285_v6  ;;  %v7476_v11 = vsel %vm7393_vm10, %v7425_v40, %v7475_v20  ;;  %v16528_v24 = vrot.slane %v14616_v22, %v14488_v49  ;;  %v7200_v51 = vmax.f32 %v15034_v15, %v15208_v52  ;;  %v16531_v6 = vld [vmem:[#allocation13_spill] sm:$0xff] }
 0x6cf   :  { %v7201_v4 = vmax.f32 %v7121_v58, %v15210_v13  ;;  %v7204_v39 = vmax.f32 %v15208_v52, %v16529_v21  ;;  %v7127_v43 = vmax.f32 %v7047_v54, %v16525_v44  ;;  %v16532_v2 = vmax.f32 %v14829_v35, %v15034_v15  ;;  %v16533_v15 = vld [vmem:[#allocation10_spill] sm:$0xff] }
 0x6d0   :  { %v7482_v32 = vsel %vm6676_vm3, %v16528_v24, %v7481_v10  ;;  %v7202_v23 = vmax.f32 %v7122_v7, %v7126_v33  ;;  %v7206_v40 = vmax.f32 %v7126_v33, %v16531_v6  ;;  %v15237_v10 = vmax.f32 %v7197_v62, %v15210_v13 }
 0x6d1   :  { %v15234_v25 = vmax.f32 %v16532_v2, %v15208_v52  ;;  %v15239_v58 = vmax.f32 %v7198_v27, %v7126_v33  ;;  %v15242_v45 = vmax.f32 %v7200_v51, %v16529_v21  ;;  %v15245_v20 = vmax.f32 %v7201_v4, %v16530_v28 }
 0x6d2   :  { %v15252_v35 = vmax.f32 %v7202_v23, %v16531_v6  ;;  %v15255_v62 = vmax.f32 %v7206_v40, %v16533_v15  ;;  %v16534_v24 = vrot.slane %v14773_v46, %v14488_v49  ;;  %v16535_v6 = vrot.slane %v14904_v38, %v14488_v49 }
 0x6d3   :  { %v7429_v54 = vrot.slane %v15239_v58, %v14488_v49  ;;  %v7203_v2 = vmax.f32 %v7123_v41, %v7127_v43  ;;  %v16536_v27 = vrot.slane %v14956_v57, %v14488_v49  ;;  %v16537_v44 = vrot.slane %v15006_v19, %v14488_v49 }
 0x6d4   :  { %v7483_v51 = vsel %vm7393_vm10, %v16534_v24, %v7482_v32  ;;  %v7433_v4 = vrot.slane %v15252_v35, %v14488_v49  ;;  %v7437_v23 = vrot.slane %v15255_v62, %v14488_v49  ;;  %v7207_v32 = vmax.f32 %v7127_v43, %v16522_v9 }
 0x6d5   :  { %v7484_v40 = vsel %vm6678_vm5, %v16535_v6, %v7483_v51  ;;  %v7477_v15 = vsel %vm6678_vm5, %v7429_v54, %v7476_v11  ;;  %v7263_v24 = vmax.f32 %v7199_v59, %v7127_v43  ;;  %v7267_v51 = vmax.f32 %v7203_v2, %v16522_v9 }
 0x6d6   :  { %v7485_v33 = vsel %vm7396_vm11, %v16536_v27, %v7484_v40  ;;  %v7478_v61 = vsel %vm7396_vm11, %v7433_v4, %v7477_v15  ;;  %v16538_v11 = vmax.f32 %v14753_v18, %v14896_v17  ;;  %v7271_v59 = vmax.f32 %v7207_v32, %v16523_v42  ;;  %v16544_v40 = vld [vmem:[#allocation34_spill] sm:$0xff] }
 0x6d7   :  { %v7486_v7 = vsel %vm6680_vm7, %v16537_v44, %v7485_v33  ;;  %v7479_v54 = vsel %vm6680_vm7, %v7437_v23, %v7478_v61  ;;  %v16539_v43 = vmax.f32 %v14959_v53, %v15057_v14  ;;  %v16540_v44 = vrot.slane %v16515_v48, %v14488_v49 }
 0x6d8   :  { %v7299_v41 = vmax.f32 %v16538_v11, %v14959_v53  ;;  %v7487_v27 = vsel %vm7399_vm12, %v7473_v47, %v7486_v7  ;;  %v7525_v18 = vrot.slane %v15176_v50, %v14485_v30  ;;  %v7529_v17 = vrot.slane %v7263_v24, %v14485_v30 }
 0x6d9   :  { %v7307_v4 = vmax.f32 %v16539_v43, %v15134_v12  ;;  %v7480_v9 = vsel %vm7399_vm12, %v16540_v44, %v7479_v54  ;;  %v7533_v61 = vrot.slane %v7267_v51, %v14485_v30  ;;  %v7537_v42 = vrot.slane %v7271_v59, %v14485_v30 }
 0x6da   :  { %v9546_v47 = vpack.i.bf16 %v7487_v27, %v7480_v9  ;;  %v7541_v7 = vrot.slane %v15202_v63, %v14485_v30  ;;  %v7565_v53 = vrot.slane %v7299_v41, %v14485_v30  ;;  %v16541_v12 = vrot.slane %v14720_v5, %v14485_v30  ;;  %v16547_v27 = vld [vmem:[#allocation25_spill] sm:$0xff] }
 0x6db   :  { %v7573_v14 = vrot.slane %v7307_v4, %v14485_v30  ;;  %v16542_v33 = vrot.slane %v14851_v8, %v14485_v30  ;;  %v16543_v6 = vrot.slane %v14471_v16, %v14485_v30  ;;  %v16545_v2 = vrot.slane %v16544_v40, %v14485_v30 }
 0x6dc   :  { %v7609_v32 = vrot.slane %v15176_v50, %v14488_v49  ;;  %9547 = vrot.lane.b32.xlu0 %v9546_v47, %s9631_s21  ;;  %v16546_v11 = vrot.slane %v15047_v1, %v14485_v30  ;;  %v16548_v43 = vrot.slane %v16547_v27, %v14485_v30  ;;  %v7613_v9 = vrot.slane %v7263_v24, %v14488_v49 }
 0x6dd   :  { %v7574_v23 = vsel %vm7390_vm9, %v16542_v33, %v16541_v12  ;;  %v7581_v15 = vsel %vm7390_vm9, %v16545_v2, %v16543_v6  ;;  %v7617_v12 = vrot.slane %v7267_v51, %v14488_v49  ;;  %v16549_v6 = vld [vmem:[#allocation44_spill] sm:$0xff]  ;;  %v7621_v2 = vrot.slane %v7271_v59, %v14488_v49 }
 0x6de   :  { %v7575_v54 = vsel %vm6676_vm3, %v16546_v11, %v7574_v23  ;;  %v7582_v44 = vsel %vm6676_vm3, %v16548_v43, %v7581_v15  ;;  %v16550_v50 = vrot.slane %v16549_v6, %v14485_v30  ;;  %v7625_v23 = vrot.slane %v15202_v63, %v14488_v49 }
 0x6df   :  { %v7576_v33 = vsel %vm7393_vm10, %v7525_v18, %v7575_v54  ;;  %v16551_v15 = vrot.slane %v14914_v0, %v14485_v30  ;;  %v7649_v51 = vrot.slane %v7299_v41, %v14488_v49  ;;  %v7657_v18 = vrot.slane %v7307_v4, %v14488_v49 }
 0x6e0   :  { %v7583_v47 = vsel %vm7393_vm10, %v16550_v50, %v7582_v44  ;;  %v7577_v11 = vsel %vm6678_vm5, %v7529_v17, %v7576_v33  ;;  %v16552_v59 = vrot.slane %v14720_v5, %v14488_v49  ;;  %v16553_v63 = vrot.slane %v14851_v8, %v14488_v49 }
 0x6e1   :  { %v7584_v24 = vsel %vm6678_vm5, %v16551_v15, %v7583_v47  ;;  %v7578_v54 = vsel %vm7396_vm11, %v7533_v61, %v7577_v11  ;;  %v16554_v44 = vrot.slane %v14471_v16, %v14488_v49  ;;  %v16555_v41 = vrot.slane %v16544_v40, %v14488_v49 }
 0x6e2   :  { %v7585_v43 = vsel %vm7396_vm11, %v7565_v53, %v7584_v24  ;;  %v7658_v17 = vsel %vm7390_vm9, %v16553_v63, %v16552_v59  ;;  %v7579_v61 = vsel %vm6680_vm7, %v7537_v42, %v7578_v54  ;;  %v16556_v53 = vrot.slane %v15076_v60, %v14485_v30 }
 0x6e3   :  { %v7665_v4 = vsel %vm7390_vm9, %v16555_v41, %v16554_v44  ;;  %v16557_v8 = vrot.slane %v15047_v1, %v14488_v49  ;;  %v16558_v16 = vrot.slane %v16547_v27, %v14488_v49  ;;  %v7580_v40 = vsel %vm7399_vm12, %v7541_v7, %v7579_v61 }
 0x6e4   :  { %v7586_v5 = vsel %vm6680_vm7, %v16556_v53, %v7585_v43  ;;  %v16559_v11 = vrot.slane %v16549_v6, %v14488_v49  ;;  %v16560_v54 = vrot.slane %v14914_v0, %v14488_v49  ;;  %v16561_v43 = vld [vmem:[#allocation49_spill] sm:$0xff]  ;;  %v16562_v6 = vmax.f32 %v14981_v3, %v15066_v34 }
 0x6e5   :  { %v7659_v33 = vsel %vm6676_vm3, %v16557_v8, %v7658_v17  ;;  %v7666_v50 = vsel %vm6676_vm3, %v16558_v16, %v7665_v4  ;;  %v7587_v47 = vsel %vm7399_vm12, %v7573_v14, %v7586_v5  ;;  %v7268_v7 = vmax.f32 %v7204_v39, %v16561_v43  ;;  %v16566_v17 = vld [vmem:[#allocation41_spill] sm:$0xff]  ;;  %v16568_v4 = vld [vmem:[#allocation46_spill] sm:$0xff]  ;;  %v16569_v5 = vld [vmem:[#allocation39_spill] sm:$0xff] }
 0x6e6   :  { %v7660_v42 = vsel %vm7393_vm10, %v7609_v32, %v7659_v33  ;;  %v7667_v15 = vsel %vm7393_vm10, %v16559_v11, %v7666_v50  ;;  %v9551_v24 = vpack.i.bf16 %v7587_v47, %v7580_v40  ;;  %v7308_v59 = vmax.f32 %v16562_v6, %v15136_v55  ;;  %v16565_v55 = vld [vmem:[#allocation29_spill] sm:$0xff]  ;;  %v16571_v8 = vld [vmem:[#allocation54_spill] sm:$0xff]  ;;  %v16573_v16 = vld [vmem:[#allocation24_spill] sm:$0xff] }
 0x6e7   :  { %v7661_v1 = vsel %vm6678_vm5, %v7613_v9, %v7660_v42  ;;  %v7668_v27 = vsel %vm6678_vm5, %v16560_v54, %v7667_v15  ;;  %v7713_v9 = vrot.slane %v15242_v45, %v14485_v30  ;;  %v16563_v52 = vrot.slane %v15076_v60, %v14488_v49  ;;  %v16567_v60 = vld [vmem:[#allocation53_spill] sm:$0xff]  ;;  %v16575_v40 = vld [vmem:[#allocation36_spill] sm:$0xff]  ;;  %v16578_v54 = vld [vmem:[#allocation26_spill] sm:$0xff] }
 0x6e8   :  { %v7662_v14 = vsel %vm7396_vm11, %v7617_v12, %v7661_v1  ;;  %v7669_v32 = vsel %vm7396_vm11, %v7649_v51, %v7668_v27  ;;  %9552 = vrot.lane.b32.xlu1 %v9551_v24, %s9625_s25  ;;  %v7717_v39 = vrot.slane %v7268_v7, %v14485_v30  ;;  %v16564_v12 = vld [vmem:[#allocation11_spill] sm:$0xff]  ;;  %v7725_v63 = vrot.slane %v16565_v55, %v14485_v30  ;;  %s9632_s25 = smov 48   ;;  %v16581_v6 = vld [vmem:[#allocation45_spill] sm:$0xff] }
 0x6e9   :  { %v7663_v0 = vsel %vm6680_vm7, %v7621_v2, %v7662_v14  ;;  %v7670_v21 = vsel %vm6680_vm7, %v16563_v52, %v7669_v32  ;;  %v7721_v51 = vrot.slane %v16564_v12, %v14485_v30  ;;  %v7745_v2 = vrot.slane %v16566_v17, %v14485_v30 }
 0x6ea   :  { %v7664_v3 = vsel %vm7399_vm12, %v7625_v23, %v7663_v0  ;;  %v7671_v34 = vsel %vm7399_vm12, %v7657_v18, %v7670_v21  ;;  %v7749_v41 = vrot.slane %v16567_v60, %v14485_v30  ;;  %v7753_v61 = vrot.slane %v16568_v4, %v14485_v30 }
 0x6eb   :  { %v9556_v44 = vpack.i.bf16 %v7671_v34, %v7664_v3  ;;  %v7757_v53 = vrot.slane %v7308_v59, %v14485_v30  ;;  %v16570_v23 = vrot.slane %v16569_v5, %v14485_v30  ;;  %v16572_v18 = vrot.slane %v16571_v8, %v14485_v30 }
 0x6ec   :  { %v16574_v50 = vrot.slane %v16573_v16, %v14485_v30  ;;  %v16576_v47 = vrot.slane %v16575_v40, %v14485_v30  ;;  %v7797_v11 = vrot.slane %v15242_v45, %v14488_v49  ;;  %v7801_v15 = vrot.slane %v7268_v7, %v14488_v49 }
 0x6ed   :  { %v7758_v33 = vsel %vm7390_vm9, %v16572_v18, %v16570_v23  ;;  %9557 = vrot.lane.b32.xlu0 %v9556_v44, %s9632_s25  ;;  %v16577_v24 = vrot.slane %v15053_v26, %v14485_v30  ;;  %v16579_v27 = vrot.slane %v16578_v54, %v14485_v30  ;;  %v7805_v14 = vrot.slane %v16564_v12, %v14488_v49 }
 0x6ee   :  { %v7765_v42 = vsel %vm7390_vm9, %v16576_v47, %v16574_v50  ;;  %v7809_v45 = vrot.slane %v16565_v55, %v14488_v49  ;;  %v16580_v7 = vrot.slane %v15234_v25, %v14485_v30  ;;  %v16582_v0 = vrot.slane %v16581_v6, %v14485_v30 }
 0x6ef   :  { %v7759_v1 = vsel %vm6676_vm3, %v16577_v24, %v7758_v33  ;;  %v7766_v43 = vsel %vm6676_vm3, %v16579_v27, %v7765_v42  ;;  %v7829_v21 = vrot.slane %v16566_v17, %v14488_v49  ;;  %v7833_v3 = vrot.slane %v16567_v60, %v14488_v49 }
 0x6f0   :  { %v7760_v32 = vsel %vm7393_vm10, %v16580_v7, %v7759_v1  ;;  %v7767_v52 = vsel %vm7393_vm10, %v16582_v0, %v7766_v43  ;;  %v7837_v55 = vrot.slane %v16568_v4, %v14488_v49  ;;  %v7841_v44 = vrot.slane %v7308_v59, %v14488_v49  ;;  %v16593_v43 = vld [vmem:[#allocation35_spill] sm:$0xff]  ;;  %v16596_v0 = vld [vmem:[#allocation38_spill] sm:$0xff] }
 0x6f1   :  { %v7761_v12 = vsel %vm6678_vm5, %v7713_v9, %v7760_v32  ;;  %v7768_v34 = vsel %vm6678_vm5, %v7745_v2, %v7767_v52  ;;  %v16583_v33 = vrot.slane %v16569_v5, %v14488_v49  ;;  %v16584_v17 = vrot.slane %v16571_v8, %v14488_v49  ;;  %v16594_v7 = vld [vmem:[#allocation15_spill] sm:$0xff] }
 0x6f2   :  { %v7762_v23 = vsel %vm7396_vm11, %v7717_v39, %v7761_v12  ;;  %v7769_v18 = vsel %vm7396_vm11, %v7749_v41, %v7768_v34  ;;  %v16585_v9 = vrot.slane %v16573_v16, %v14488_v49  ;;  %v16586_v2 = vrot.slane %v16575_v40, %v14488_v49 }
 0x6f3   :  { %v7842_v60 = vsel %vm7390_vm9, %v16584_v17, %v16583_v33  ;;  %v7763_v39 = vsel %vm6680_vm7, %v7721_v51, %v7762_v23  ;;  %v7770_v41 = vsel %vm6680_vm7, %v7753_v61, %v7769_v18  ;;  %v16587_v4 = vrot.slane %v15053_v26, %v14488_v49 }
 0x6f4   :  { %v7849_v59 = vsel %vm7390_vm9, %v16586_v2, %v16585_v9  ;;  %v16588_v8 = vrot.slane %v16578_v54, %v14488_v49  ;;  %v7764_v16 = vsel %vm7399_vm12, %v7725_v63, %v7763_v39  ;;  %v7771_v40 = vsel %vm7399_vm12, %v7757_v53, %v7770_v41  ;;  %v16591_v54 = vld [vmem:[#allocation21_spill] sm:$0xff]  ;;  %v16604_v2 = vld [vmem:[#allocation8_spill] sm:$0xff] }
 0x6f5   :  { %v7843_v5 = vsel %vm6676_vm3, %v16587_v4, %v7842_v60  ;;  %v16589_v47 = vrot.slane %v15234_v25, %v14488_v49  ;;  %v16590_v61 = vrot.slane %v16581_v6, %v14488_v49  ;;  %v9561_v42 = vpack.i.bf16 %v7771_v40, %v7764_v16  ;;  %v16602_v60 = vld [vmem:[#allocation30_spill] sm:$0xff] }
 0x6f6   :  { %v7850_v50 = vsel %vm6676_vm3, %v16588_v8, %v7849_v59  ;;  %v16592_v63 = vmax.f32 %v15210_v13, %v16530_v28  ;;  %v16595_v32 = vmax.f32 %v16591_v54, %v16594_v7  ;;  %v16603_v9 = vrot.slane %v16602_v60, %v14485_v30  ;;  %v16606_v59 = vld [vmem:[#allocation6_spill] sm:$0xff]  ;;  %v16609_v8 = vld [vmem:[#allocation40_spill] sm:$0xff] }
 0x6f7   :  { %v7844_v51 = vsel %vm7393_vm10, %v16589_v47, %v7843_v5  ;;  %v7851_v26 = vsel %vm7393_vm10, %v16590_v61, %v7850_v50  ;;  %9562 = vrot.lane.b32.xlu1 %v9561_v42, %s9626_s8  ;;  %v16607_v39 = vrot.slane %v16606_v59, %v14485_v30  ;;  %v16608_v4 = vrot.slane %v15156_v37, %v14485_v30  ;;  %s9633_s8 = smov 80  }
 0x6f8   :  { %v7845_v24 = vsel %vm6678_vm5, %v7797_v11, %v7844_v51  ;;  %v7852_v1 = vsel %vm6678_vm5, %v7829_v21, %v7851_v26  ;;  %v7269_v53 = vmax.f32 %v16592_v63, %v16591_v54  ;;  %v15519_v6 = vmax.f32 %v16595_v32, %v16593_v43  ;;  %v16597_v11 = vld [vmem:[#allocation42_spill] sm:$0xff]  ;;  %v16612_v26 = vld [vmem:[#allocation43_spill] sm:$0xff]  ;;  %v16614_v63 = vld [vmem:[#allocation37_spill] sm:$0xff] }
 0x6f9   :  { %v7846_v27 = vsel %vm7396_vm11, %v7801_v15, %v7845_v24  ;;  %v7853_v25 = vsel %vm7396_vm11, %v7833_v3, %v7852_v1  ;;  %v16598_v52 = vmax.f32 %v16596_v0, %v16597_v11  ;;  %v7897_v15 = vrot.slane %v15245_v20, %v14485_v30 }
 0x6fa   :  { %v7847_v13 = vsel %vm6680_vm7, %v7805_v14, %v7846_v27  ;;  %v7854_v28 = vsel %vm6680_vm7, %v7837_v55, %v7853_v25  ;;  %v7901_v3 = vrot.slane %v7269_v53, %v14485_v30  ;;  %v7909_v23 = vrot.slane %v15519_v6, %v14485_v30  ;;  %v16600_v55 = vld [vmem:[#allocation31_spill] sm:$0xff] }
 0x6fb   :  { %v15525_v21 = vmax.f32 %v16598_v52, %v15138_v29  ;;  %v7848_v12 = vsel %vm7399_vm12, %v7809_v45, %v7847_v13  ;;  %v7855_v34 = vsel %vm7399_vm12, %v7841_v44, %v7854_v28  ;;  %v16599_v29 = vld [vmem:[#allocation52_spill] sm:$0xff]  ;;  %v16601_v17 = vrot.slane %v16600_v55, %v14485_v30 }
 0x6fc   :  { %v7933_v18 = vrot.slane %v16599_v29, %v14485_v30  ;;  %v9566_v33 = vpack.i.bf16 %v7855_v34, %v7848_v12  ;;  %v16605_v44 = vrot.slane %v16604_v2, %v14485_v30  ;;  %v16610_v50 = vrot.slane %v16609_v8, %v14485_v30  ;;  %v16621_v12 = vld [vmem:[#allocation19_spill] sm:$0xff] }
 0x6fd   :  { %v7941_v14 = vrot.slane %v15525_v21, %v14485_v30  ;;  %v7942_v45 = vsel %vm7390_vm9, %v16603_v9, %v16601_v17  ;;  %v7981_v40 = vrot.slane %v15245_v20, %v14488_v49  ;;  %v7985_v47 = vrot.slane %v7269_v53, %v14488_v49 }
 0x6fe   :  { %v7949_v41 = vsel %vm7390_vm9, %v16607_v39, %v16605_v44  ;;  %v7943_v5 = vsel %vm6676_vm3, %v16608_v4, %v7942_v45  ;;  %9567 = vrot.lane.b32.xlu0 %v9566_v33, %s9633_s8  ;;  %v16611_v51 = vrot.slane %v15237_v10, %v14485_v30  ;;  %v16613_v42 = vrot.slane %v16612_v26, %v14485_v30  ;;  %v8114_v44 = vld [vmem:[%s16165_s3 + $0x90] sm:$0xff] }
 0x6ff   :  { %v7950_v16 = vsel %vm6676_vm3, %v16610_v50, %v7949_v41  ;;  %v7993_v1 = vrot.slane %v15519_v6, %v14488_v49  ;;  %v8017_v20 = vrot.slane %v16599_v29, %v14488_v49  ;;  %v16615_v53 = vrot.slane %v16614_v63, %v14485_v30 }
 0x700   :  { %v7944_v61 = vsel %vm7393_vm10, %v16611_v51, %v7943_v5  ;;  %v7951_v24 = vsel %vm7393_vm10, %v16613_v42, %v7950_v16  ;;  %v8025_v25 = vrot.slane %v15525_v21, %v14488_v49  ;;  %v16616_v43 = vrot.slane %v16600_v55, %v14488_v49 }
 0x701   :  { %v7945_v54 = vsel %vm6678_vm5, %v7897_v15, %v7944_v61  ;;  %v7952_v27 = vsel %vm6678_vm5, %v16615_v53, %v7951_v24  ;;  %v16617_v7 = vrot.slane %v16602_v60, %v14488_v49  ;;  %v16618_v11 = vrot.slane %v15156_v37, %v14488_v49  ;;  %v8112_v15 = vld [vmem:[%s16165_s3 + $0x80] sm:$0xff] }
 0x702   :  { %v7946_v6 = vsel %vm7396_vm11, %v7901_v3, %v7945_v54  ;;  %v7953_v0 = vsel %vm7396_vm11, %v7933_v18, %v7952_v27  ;;  %v16619_v21 = vrot.slane %v16604_v2, %v14488_v49  ;;  %v16620_v13 = vrot.slane %v16606_v59, %v14488_v49  ;;  %v8113_v3 = vld [vmem:[%s16165_s3 + $0x88] sm:$0xff]  ;;  %v8096_v37 = vld [vmem:[%s16165_s3] sm:$0xff]  ;;  %v16623_v18 = vld [vmem:[#allocation47_spill] sm:$0xff] }
 0x703   :  { %v8026_v32 = vsel %vm7390_vm9, %v16617_v7, %v16616_v43  ;;  %v16622_v34 = vrot.slane %v16621_v12, %v14485_v30  ;;  %v16624_v33 = vrot.slane %v16623_v18, %v14485_v30  ;;  %v16625_v17 = vrot.slane %v15237_v10, %v14488_v49  ;;  %v8097_v2 = vld [vmem:[%s16165_s3 + $0x8] sm:$0xff]  ;;  %v8115_v59 = vld [vmem:[%s16165_s3 + $0x98] sm:$0xff]  ;;  %v8116_v54 = vld [vmem:[%s16165_s3 + $0xa0] sm:$0xff] }
 0x704   :  { %v8027_v52 = vsel %vm6676_vm3, %v16618_v11, %v8026_v32  ;;  %v8033_v28 = vsel %vm7390_vm9, %v16620_v13, %v16619_v21  ;;  %v16626_v9 = vrot.slane %v16609_v8, %v14488_v49  ;;  %v16627_v4 = vrot.slane %v16612_v26, %v14488_v49  ;;  %v8100_v7 = vld [vmem:[%s16165_s3 + $0x20] sm:$0xff]  ;;  %v8101_v32 = vld [vmem:[%s16165_s3 + $0x28] sm:$0xff] }
 0x705   :  { %v7947_v29 = vsel %vm6680_vm7, %v16622_v34, %v7946_v6  ;;  %v7954_v55 = vsel %vm6680_vm7, %v16624_v33, %v7953_v0  ;;  %v8028_v60 = vsel %vm7393_vm10, %v16625_v17, %v8027_v52  ;;  %v16628_v16 = vrot.slane %v16614_v63, %v14488_v49  ;;  %v8117_v63 = vld [vmem:[%s16165_s3 + $0xa8] sm:$0xff] }
 0x706   :  { %v8034_v45 = vsel %vm6676_vm3, %v16626_v9, %v8033_v28  ;;  %v7948_v10 = vsel %vm7399_vm12, %v7909_v23, %v7947_v29  ;;  %v7955_v39 = vsel %vm7399_vm12, %v7941_v14, %v7954_v55  ;;  %v8029_v41 = vsel %vm6678_vm5, %v7981_v40, %v8028_v60  ;;  %v8098_v23 = vld [vmem:[%s16165_s3 + $0x10] sm:$0xff]  ;;  %v8099_v14 = vld [vmem:[%s16165_s3 + $0x18] sm:$0xff]  ;;  %v16631_v28 = vld [vmem:[#allocation33_spill] sm:$0xff] }
 0x707   :  { %v8035_v5 = vsel %vm7393_vm10, %v16627_v4, %v8034_v45  ;;  %v9571_v8 = vpack.i.bf16 %v7955_v39, %v7948_v10  ;;  %v8030_v50 = vsel %vm7396_vm11, %v7985_v47, %v8029_v41  ;;  %v9286_v61 = vpack.c.bf16 %v8113_v3, %v8112_v15  ;;  %v16633_v3 = vld [vmem:[#allocation32_spill] sm:$0xff]  ;;  %v8102_v60 = vld [vmem:[%s16165_s3 + $0x30] sm:$0xff]  ;;  %v8121_v10 = vld [vmem:[%s16165_s3 + $0xc8] sm:$0xff] }
 0x708   :  { %v8036_v51 = vsel %vm6678_vm5, %v16628_v16, %v8035_v5  ;;  %v16629_v40 = vrot.slane %v16621_v12, %v14488_v49  ;;  %v9288_v42 = vpack.c.bf16 %v8097_v2, %v8096_v37  ;;  %v9290_v24 = vpack.c.bf16 %v8115_v59, %v8114_v44  ;;  %v16635_v12 = vld [vmem:[#allocation23_spill] sm:$0xff]  ;;  %v8120_v59 = vld [vmem:[%s16165_s3 + $0xc0] sm:$0xff] }
 0x709   :  { %v8037_v47 = vsel %vm7396_vm11, %v8017_v20, %v8036_v51  ;;  %v7333_v53 = vrot.slane %v14837_v56, %v14485_v30  ;;  %9572 = vrot.lane.b32.xlu1 %v9571_v8, %s9627_s14  ;;  %v16630_v20 = vrot.slane %v16623_v18, %v14488_v49  ;;  %9287 = vmatprep.subr.bf16.mxu0 %v9286_v61  ;;  %v16637_v9 = vld [vmem:[#allocation7_spill] sm:$0xff] }
 0x70a   :  { %v8031_v26 = vsel %vm6680_vm7, %v16629_v40, %v8030_v50  ;;  %v7369_v56 = vrot.slane %v14616_v22, %v14485_v30  ;;  %9289 = vmatpush3.bf16.msra.mxu0 %v9288_v42  ;;  %v9292_v49 = vpack.c.bf16 %v8099_v14, %v8098_v23  ;;  %v7373_v0 = vrot.slane %v14773_v46, %v14485_v30  ;;  %v8122_v23 = vld [vmem:[%s16165_s3 + $0xd0] sm:$0xff]  ;;  %v8123_v14 = vld [vmem:[%s16165_s3 + $0xd8] sm:$0xff] }
 0x70b   :  { %v8032_v27 = vsel %vm7399_vm12, %v7993_v1, %v8031_v26  ;;  %v8038_v43 = vsel %vm6680_vm7, %v16630_v20, %v8037_v47  ;;  %v7337_v1 = vrot.slane %v15031_v36, %v14485_v30  ;;  %v7341_v11 = vrot.slane %v15164_v31, %v14485_v30  ;;  %9291 = vmatprep.subr.bf16.mxu0 %v9290_v24  ;;  %v8118_v36 = vld [vmem:[%s16165_s3 + $0xb0] sm:$0xff]  ;;  %v8107_v42 = vld [vmem:[%s16165_s3 + $0x58] sm:$0xff]  ;;  %v8124_v24 = vld [vmem:[%s16165_s3 + $0xe0] sm:$0xff] }
 0x70c   :  { %v8039_v6 = vsel %vm7399_vm12, %v8025_v25, %v8038_v43  ;;  %v9294_v21 = vpack.c.bf16 %v8117_v63, %v8116_v54  ;;  %v7377_v13 = vrot.slane %v14904_v38, %v14485_v30  ;;  %v9296_v22 = vpack.c.bf16 %v8101_v32, %v8100_v7  ;;  %v8119_v25 = vld [vmem:[%s16165_s3 + $0xb8] sm:$0xff]  ;;  %v8106_v47 = vld [vmem:[%s16165_s3 + $0x50] sm:$0xff]  ;;  %v8125_v54 = vld [vmem:[%s16165_s3 + $0xe8] sm:$0xff] }
 0x70d   :  { %v9576_v52 = vpack.i.bf16 %v8039_v6, %v8032_v27  ;;  %v7349_v46 = vrot.slane %v15252_v35, %v14485_v30  ;;  %v7381_v31 = vrot.slane %v14956_v57, %v14485_v30  ;;  %v16632_v38 = vrot.slane %v16631_v28, %v14485_v30  ;;  %v8108_v27 = vld [vmem:[%s16165_s3 + $0x60] sm:$0xff]  ;;  %v8109_v20 = vld [vmem:[%s16165_s3 + $0x68] sm:$0xff]  ;;  %v8126_v43 = vld [vmem:[%s16165_s3 + $0xf0] sm:$0xff] }
 0x70e   :  { %v16634_v37 = vrot.slane %v16633_v3, %v14485_v30  ;;  %v16636_v34 = vrot.slane %v16635_v12, %v14485_v30  ;;  %v7345_v35 = vrot.slane %v15239_v58, %v14485_v30  ;;  %9293 = vmatpush3.bf16.msra.mxu0 %v9292_v49  ;;  %v7353_v57 = vrot.slane %v15255_v62, %v14485_v30  ;;  %v8103_v58 = vld [vmem:[%s16165_s3 + $0x38] sm:$0xff]  ;;  %v8144_v49 = vld [vmem:[%s16165_s3 + $0x180] sm:$0xff] }
 0x70f   :  { %9577 = vrot.lane.b32.xlu0 %v9576_v52, %s9634_s24  ;;  %v7391_v15 = vsel %vm7390_vm9, %v7333_v53, %v16632_v38  ;;  %v7385_v18 = vrot.slane %v15006_v19, %v14485_v30  ;;  %9295 = vmatprep.subr.bf16.mxu0 %v9294_v21  ;;  %v9298_v17 = vpack.c.bf16 %v8119_v25, %v8118_v36  ;;  %v8127_v7 = vld [vmem:[%s16165_s3 + $0xf8] sm:$0xff] }
 0x710   :  { %v7401_v29 = vsel %vm7390_vm9, %v16636_v34, %v16634_v37  ;;  %v7392_v33 = vsel %vm6676_vm3, %v7337_v1, %v7391_v15  ;;  %v7389_v62 = vrot.slane %v16637_v9, %v14485_v30  ;;  %v7357_v39 = vrot.slane %v16515_v48, %v14485_v30  ;;  %v8104_v30 = vld [vmem:[%s16165_s3 + $0x40] sm:$0xff]  ;;  %v8105_v48 = vld [vmem:[%s16165_s3 + $0x48] sm:$0xff]  ;;  %v8110_v1 = vld [vmem:[%s16165_s3 + $0x70] sm:$0xff] }
 0x711   :  { %v7402_v55 = vsel %vm6676_vm3, %v7369_v56, %v7401_v29  ;;  %v7394_v45 = vsel %vm7393_vm10, %v7341_v11, %v7392_v33  ;;  %v9300_v5 = vpack.c.bf16 %v8103_v58, %v8102_v60  ;;  %v9302_v61 = vpack.c.bf16 %v8121_v10, %v8120_v59  ;;  %v8111_v6 = vld [vmem:[%s16165_s3 + $0x78] sm:$0xff] }
 0x712   :  { %v7403_v19 = vsel %vm7393_vm10, %v7373_v0, %v7402_v55  ;;  %v7395_v44 = vsel %vm6678_vm5, %v7345_v35, %v7394_v45  ;;  %9297 = vmatpush3.bf16.msra.mxu0 %v9296_v22  ;;  %v9304_v40 = vpack.c.bf16 %v8105_v48, %v8104_v30  ;;  %v9306_v26 = vpack.c.bf16 %v8123_v14, %v8122_v23  ;;  %v8145_v0 = vld [vmem:[%s16165_s3 + $0x188] sm:$0xff] }
 0x713   :  { %v7404_v2 = vsel %vm6678_vm5, %v7377_v13, %v7403_v19  ;;  %v7397_v4 = vsel %vm7396_vm11, %v7349_v46, %v7395_v44  ;;  %9299 = vmatprep.subr.bf16.mxu0 %v9298_v17  ;;  %v9308_v63 = vpack.c.bf16 %v8107_v42, %v8106_v47  ;;  %v9310_v53 = vpack.c.bf16 %v8125_v54, %v8124_v24  ;;  %v8128_v44 = vld [vmem:[%s16165_s3 + $0x100] sm:$0xff] }
 0x714   :  { %v7405_v41 = vsel %vm7396_vm11, %v7381_v31, %v7404_v2  ;;  %v7398_v50 = vsel %vm6680_vm7, %v7353_v57, %v7397_v4  ;;  %v9312_v32 = vpack.c.bf16 %v8109_v20, %v8108_v27  ;;  %v9314_v56 = vpack.c.bf16 %v8127_v7, %v8126_v43  ;;  %v8146_v4 = vld [vmem:[%s16165_s3 + $0x190] sm:$0xff]  ;;  %v8131_v20 = vld [vmem:[%s16165_s3 + $0x118] sm:$0xff]  ;;  %v8148_v7 = vld [vmem:[%s16165_s3 + $0x1a0] sm:$0xff] }
 0x715   :  { %v7406_v8 = vsel %vm6680_vm7, %v7385_v18, %v7405_v41  ;;  %v7400_v51 = vsel %vm7399_vm12, %v7357_v39, %v7398_v50  ;;  %v9316_v11 = vpack.c.bf16 %v8111_v6, %v8110_v1  ;;  %v9318_v52 = vpack.c.bf16 %v8145_v0, %v8144_v49  ;;  %v8129_v41 = vld [vmem:[%s16165_s3 + $0x108] sm:$0xff]  ;;  %v8130_v27 = vld [vmem:[%s16165_s3 + $0x110] sm:$0xff] }
 0x716   :  { %v7407_v16 = vsel %vm7399_vm12, %v7389_v62, %v7406_v8  ;;  %9301 = vmatpush3.bf16.msra.mxu0 %v9300_v5  ;;  %vm8056_vm3 = vcmask 654336   ;;  %v8147_v5 = vld [vmem:[%s16165_s3 + $0x198] sm:$0xff] }
 0x717   :  { %9303 = vmatprep.subr.bf16.mxu0 %v9302_v61  ;;  %v9320_v61 = vpack.c.bf16 %v8129_v41, %v8128_v44  ;;  %v9322_v30 = vpack.c.bf16 %v8147_v5, %v8146_v4  ;;  %v8159_v41 = vld [vmem:[%s16165_s3 + $0x1f8] sm:$0xff] }
 0x71a   :  { %9305 = vmatpush3.bf16.msra.mxu0 %v9304_v40 }
 0x71b   :  { %9307 = vmatprep.subr.bf16.mxu0 %v9306_v26 }
 0x71e   :  { %9309 = vmatpush3.bf16.msra.mxu0 %v9308_v63 }
 0x71f   :  { %9311 = vmatprep.subr.bf16.mxu0 %v9310_v53 }
 0x722   :  { %9313 = vmatpush3.bf16.msra.mxu0 %v9312_v32  ;;  %v8149_v32 = vld [vmem:[%s16165_s3 + $0x1a8] sm:$0xff] }
 0x723   :  { %9315 = vmatprep.subr.bf16.mxu0 %v9314_v56 }
 0x726   :  { %9317 = vmatpush3.bf16.msra.mxu0 %v9316_v11 }
 0x727   :  { %9319 = vmatprep.subr.bf16.mxu0 %v9318_v52 }
 0x74e   :  { %v9548_v21 = vpop.permute.xlu0 %9547 }
 0x74f   :  { %v9550_v13 = vunpack.i.h.bf16 %v9548_v21  ;;  %v9549_v22 = vunpack.i.l.bf16 %v9548_v21  ;;  %v9324_v21 = vpack.c.bf16 %v8131_v20, %v8130_v27  ;;  %v8164_v20 = vld [vmem:[%s16165_s3 + $0x220] sm:$0xff] }
 0x751   :  { %v8048_v28 = vsel %vm8046_vm13, %v7407_v16, %v9550_v13  ;;  %v8047_v38 = vsel %vm8046_vm13, %v7400_v51, %v9549_v22  ;;  %v9326_v22 = vpack.c.bf16 %v8149_v32, %v8148_v7  ;;  %v8182_v7 = vld [vmem:[%s16165_s3 + $0x2b0] sm:$0xff]  ;;  %v8183_v32 = vld [vmem:[%s16165_s3 + $0x2b8] sm:$0xff] }
 0x75a   :  { %v9553_v36 = vpop.permute.xlu1 %9552 }
 0x75b   :  { %v9555_v25 = vunpack.i.h.bf16 %v9553_v36  ;;  %v9554_v46 = vunpack.i.l.bf16 %v9553_v36  ;;  %v8132_v36 = vld [vmem:[%s16165_s3 + $0x120] sm:$0xff] }
 0x75d   :  { %v8050_v12 = vsel %vm3362_vm14, %v8048_v28, %v9555_v25  ;;  %v8049_v34 = vsel %vm3362_vm14, %v8047_v38, %v9554_v46  ;;  %v8133_v25 = vld [vmem:[%s16165_s3 + $0x128] sm:$0xff]  ;;  %v8150_v28 = vld [vmem:[%s16165_s3 + $0x1b0] sm:$0xff]  ;;  %v8151_v38 = vld [vmem:[%s16165_s3 + $0x1b8] sm:$0xff] }
 0x75f   :  { %v9558_v31 = vpop.permute.xlu0 %9557 }
 0x760   :  { %v9560_v15 = vunpack.i.h.bf16 %v9558_v31  ;;  %v9559_v3 = vunpack.i.l.bf16 %v9558_v31 }
 0x762   :  { %v8052_v18 = vsel %vm8051_vm1, %v8049_v34, %v9559_v3  ;;  %v8053_v33 = vsel %vm8051_vm1, %v8050_v12, %v9560_v15  ;;  %v9328_v15 = vpack.c.bf16 %v8133_v25, %v8132_v36  ;;  %v9330_v3 = vpack.c.bf16 %v8151_v38, %v8150_v28  ;;  %v8135_v12 = vld [vmem:[%s16165_s3 + $0x138] sm:$0xff]  ;;  %v8152_v34 = vld [vmem:[%s16165_s3 + $0x1c0] sm:$0xff]  ;;  %v8169_v36 = vld [vmem:[%s16165_s3 + $0x248] sm:$0xff] }
 0x763   :  { %v8186_v25 = vld [vmem:[%s16165_s3 + $0x2d0] sm:$0xff]  ;;  %v8187_v28 = vld [vmem:[%s16165_s3 + $0x2d8] sm:$0xff] }
 0x769   :  { %v9563_v37 = vpop.permute.xlu1 %9562 }
 0x76a   :  { %v9565_v29 = vunpack.i.h.bf16 %v9563_v37  ;;  %v9564_v35 = vunpack.i.l.bf16 %v9563_v37  ;;  %v8134_v37 = vld [vmem:[%s16165_s3 + $0x130] sm:$0xff] }
 0x76c   :  { %v8054_v60 = vsel %vm3403_vm15, %v8052_v18, %v9564_v35  ;;  %v8055_v58 = vsel %vm3403_vm15, %v8053_v33, %v9565_v29  ;;  %v8153_v29 = vld [vmem:[%s16165_s3 + $0x1c8] sm:$0xff]  ;;  %v9332_v35 = vpack.c.bf16 %v8135_v12, %v8134_v37  ;;  %v8136_v18 = vld [vmem:[%s16165_s3 + $0x140] sm:$0xff]  ;;  %v8171_v37 = vld [vmem:[%s16165_s3 + $0x258] sm:$0xff] }
 0x76d   :  { %v8137_v33 = vld [vmem:[%s16165_s3 + $0x148] sm:$0xff]  ;;  %v8188_v12 = vld [vmem:[%s16165_s3 + $0x2e0] sm:$0xff] }
 0x770   :  { %v9568_v57 = vpop.permute.xlu0 %9567 }
 0x771   :  { %v9570_v55 = vunpack.i.h.bf16 %v9568_v57  ;;  %v9569_v17 = vunpack.i.l.bf16 %v9568_v57  ;;  %v9334_v57 = vpack.c.bf16 %v8153_v29, %v8152_v34  ;;  %v8189_v34 = vld [vmem:[%s16165_s3 + $0x2e8] sm:$0xff] }
 0x773   :  { %v8057_v62 = vsel %vm8056_vm3, %v8054_v60, %v9569_v17  ;;  %v8058_v45 = vsel %vm8056_vm3, %v8055_v58, %v9570_v55  ;;  %v8154_v55 = vld [vmem:[%s16165_s3 + $0x1d0] sm:$0xff]  ;;  %v8155_v17 = vld [vmem:[%s16165_s3 + $0x1d8] sm:$0xff]  ;;  %v9336_v60 = vpack.c.bf16 %v8137_v33, %v8136_v18  ;;  %v8173_v18 = vld [vmem:[%s16165_s3 + $0x268] sm:$0xff] }
 0x774   :  { %v9338_v58 = vpack.c.bf16 %v8155_v17, %v8154_v55  ;;  %v8190_v33 = vld [vmem:[%s16165_s3 + $0x2f0] sm:$0xff]  ;;  %v8191_v55 = vld [vmem:[%s16165_s3 + $0x2f8] sm:$0xff] }
 0x77b   :  { %v9573_v9 = vpop.permute.xlu1 %9572 }
 0x77c   :  { %v9575_v19 = vunpack.i.h.bf16 %v9573_v9  ;;  %v9574_v2 = vunpack.i.l.bf16 %v9573_v9  ;;  %v8138_v9 = vld [vmem:[%s16165_s3 + $0x150] sm:$0xff] }
 0x77e   :  { %v8059_v59 = vsel %vm3444_vm2, %v8057_v62, %v9574_v2  ;;  %v8060_v10 = vsel %vm3444_vm2, %v8058_v45, %v9575_v19  ;;  %v8139_v62 = vld [vmem:[%s16165_s3 + $0x158] sm:$0xff]  ;;  %v8156_v45 = vld [vmem:[%s16165_s3 + $0x1e0] sm:$0xff]  ;;  %v8157_v19 = vld [vmem:[%s16165_s3 + $0x1e8] sm:$0xff] }
 0x77f   :  { %v9340_v2 = vpack.c.bf16 %v8139_v62, %v8138_v9  ;;  %v9342_v44 = vpack.c.bf16 %v8157_v19, %v8156_v45  ;;  %v8175_v9 = vld [vmem:[%s16165_s3 + $0x278] sm:$0xff]  ;;  %v8208_v62 = vld [vmem:[%s16165_s3 + $0x380] sm:$0xff]  ;;  %v8209_v45 = vld [vmem:[%s16165_s3 + $0x388] sm:$0xff] }
 0x781   :  { %v9578_v39 = vpop.permute.xlu0 %9577 }
 0x782   :  { %v9580_v8 = vunpack.i.h.bf16 %v9578_v39  ;;  %v9579_v50 = vunpack.i.l.bf16 %v9578_v39  ;;  %v8158_v39 = vld [vmem:[%s16165_s3 + $0x1f0] sm:$0xff] }
 0x783   :  { %v9346_v5 = vpack.c.bf16 %v8159_v41, %v8158_v39  ;;  %v8211_v39 = vld [vmem:[%s16165_s3 + $0x398] sm:$0xff] }
 0x784   :  { %v8062_v16 = vsel %vm8061_vm4, %v8059_v59, %v9579_v50  ;;  %v8063_v51 = vsel %vm8061_vm4, %v8060_v10, %v9580_v8  ;;  %v8140_v59 = vld [vmem:[%s16165_s3 + $0x160] sm:$0xff]  ;;  %v8141_v10 = vld [vmem:[%s16165_s3 + $0x168] sm:$0xff]  ;;  %v8142_v8 = vld [vmem:[%s16165_s3 + $0x170] sm:$0xff] }
 0x785   :  { %v8069_v48 = vrot.slane %v8062_v16, 1  ;;  %v8066_v23 = vrot.slane %v8063_v51, 7  ;;  %v8076_v14 = vrot.slane %v8062_v16, 3  ;;  %v8077_v40 = vrot.slane %v8063_v51, 2  ;;  %v8143_v50 = vld [vmem:[%s16165_s3 + $0x178] sm:$0xff] }
 0x786   :  { %v8072_v26 = vrot.slane %v8062_v16, 2  ;;  %v8073_v47 = vrot.slane %v8063_v51, 1  ;;  %v8084_v42 = vrot.slane %v8062_v16, 5  ;;  %v8085_v24 = vrot.slane %v8063_v51, 4 }
 0x787   :  { %v8070_v54 = vsel %vm7390_vm9, %v8063_v51, %v8069_v48  ;;  %v8067_v63 = vsel %vm7390_vm9, %v8066_v23, %v8062_v16  ;;  %v8078_v53 = vsel %vm7390_vm9, %v8077_v40, %v8076_v14  ;;  %v8080_v43 = vrot.slane %v8062_v16, 4  ;;  %v8160_v48 = vld [vmem:[%s16165_s3 + $0x200] sm:$0xff]  ;;  %v8161_v23 = vld [vmem:[%s16165_s3 + $0x208] sm:$0xff]  ;;  %v8178_v14 = vld [vmem:[%s16165_s3 + $0x290] sm:$0xff] }
 0x788   :  { %8292 = vmatprep.mubr.f32.mxu0 %v8070_v54  ;;  %v15830_v56 = vsel %vm7390_vm9, %v8073_v47, %v8072_v26  ;;  %v15833_v1 = vsel %vm7390_vm9, %v8085_v24, %v8084_v42  ;;  %v8081_v6 = vrot.slane %v8063_v51, 3  ;;  %v8092_v49 = vrot.slane %v8062_v16, 7  ;;  %v8179_v40 = vld [vmem:[%s16165_s3 + $0x298] sm:$0xff]  ;;  %v8162_v42 = vld [vmem:[%s16165_s3 + $0x210] sm:$0xff]  ;;  %v8180_v54 = vld [vmem:[%s16165_s3 + $0x2a0] sm:$0xff] }
 0x789   :  { %8293 = vmatmul.mubr.f32.vlgmr.msra.gmra.mrb[52].mxu0 %v8067_v63  ;;  %v8093_v0 = vrot.slane %v8063_v51, 6  ;;  %v8088_v11 = vrot.slane %v8062_v16, 6  ;;  %v8089_v52 = vrot.slane %v8063_v51, 5  ;;  %v9344_v4 = vpack.c.bf16 %v8141_v10, %v8140_v59  ;;  %v8176_v16 = vld [vmem:[%s16165_s3 + $0x280] sm:$0xff]  ;;  %v8177_v51 = vld [vmem:[%s16165_s3 + $0x288] sm:$0xff]  ;;  %v8163_v24 = vld [vmem:[%s16165_s3 + $0x218] sm:$0xff] }
 0x78a   :  { %9321 = vmatpush3.bf16.msra.mxu0 %v9320_v61  ;;  %8362 = vmatprep.mubr.f32.mxu0 %v8078_v53  ;;  %v15836_v13 = vsel %vm7390_vm9, %v8081_v6, %v8080_v43  ;;  %v9348_v61 = vpack.c.bf16 %v8143_v50, %v8142_v8  ;;  %v9352_v26 = vpack.c.bf16 %v8161_v23, %v8160_v48  ;;  %v8181_v63 = vld [vmem:[%s16165_s3 + $0x2a8] sm:$0xff]  ;;  %v8166_v6 = vld [vmem:[%s16165_s3 + $0x230] sm:$0xff]  ;;  %v8195_v8 = vld [vmem:[%s16165_s3 + $0x318] sm:$0xff] }
 0x78b   :  { %9323 = vmatprep.subr.bf16.mxu0 %v9322_v30  ;;  %v15845_v46 = vsel %vm7390_vm9, %v8093_v0, %v8092_v49  ;;  %v15848_v31 = vsel %vm7390_vm9, %v8089_v52, %v8088_v11  ;;  %v9350_v30 = vpack.c.bf16 %v8177_v51, %v8176_v16  ;;  %v9354_v47 = vpack.c.bf16 %v8179_v40, %v8178_v14  ;;  %v8165_v43 = vld [vmem:[%s16165_s3 + $0x228] sm:$0xff]  ;;  %v8167_v49 = vld [vmem:[%s16165_s3 + $0x238] sm:$0xff]  ;;  %v8184_v0 = vld [vmem:[%s16165_s3 + $0x2c0] sm:$0xff] }
 0x78c   :  { %v9356_v53 = vpack.c.bf16 %v8163_v24, %v8162_v42  ;;  %v9358_v27 = vpack.c.bf16 %v8181_v63, %v8180_v54  ;;  %v8185_v11 = vld [vmem:[%s16165_s3 + $0x2c8] sm:$0xff]  ;;  %v9364_v52 = vpack.c.bf16 %v8167_v49, %v8166_v6  ;;  %v8210_v10 = vld [vmem:[%s16165_s3 + $0x390] sm:$0xff]  ;;  %v8212_v50 = vld [vmem:[%s16165_s3 + $0x3a0] sm:$0xff] }
 0x78d   :  { %v8193_v59 = vld [vmem:[%s16165_s3 + $0x308] sm:$0xff]  ;;  %v8214_v23 = vld [vmem:[%s16165_s3 + $0x3b0] sm:$0xff]  ;;  %v8200_v63 = vld [vmem:[%s16165_s3 + $0x340] sm:$0xff] }
 0x78e   :  { %9325 = vmatpush3.bf16.msra.mxu0 %v9324_v21  ;;  %v9366_v21 = vpack.c.bf16 %v8185_v11, %v8184_v0  ;;  %v8213_v16 = vld [vmem:[%s16165_s3 + $0x3a8] sm:$0xff]  ;;  %v8198_v40 = vld [vmem:[%s16165_s3 + $0x330] sm:$0xff]  ;;  %v8204_v11 = vld [vmem:[%s16165_s3 + $0x360] sm:$0xff] }
 0x78f   :  { %9327 = vmatprep.subr.bf16.mxu0 %v9326_v22  ;;  %v8168_v22 = vld [vmem:[%s16165_s3 + $0x240] sm:$0xff]  ;;  %v8197_v48 = vld [vmem:[%s16165_s3 + $0x328] sm:$0xff] }
 0x790   :  { %v9368_v38 = vpack.c.bf16 %v8169_v36, %v8168_v22  ;;  %v8217_v42 = vld [vmem:[%s16165_s3 + $0x3c8] sm:$0xff]  ;;  %v8223_v22 = vld [vmem:[%s16165_s3 + $0x3f8] sm:$0xff] }
 0x791   :  { %v8221_v6 = vld [vmem:[%s16165_s3 + $0x3e8] sm:$0xff] }
 0x792   :  { %9329 = vmatpush3.bf16.msra.mxu0 %v9328_v15  ;;  %v9370_v15 = vpack.c.bf16 %v8187_v28, %v8186_v25  ;;  %v8206_v28 = vld [vmem:[%s16165_s3 + $0x370] sm:$0xff] }
 0x793   :  { %9331 = vmatprep.subr.bf16.mxu0 %v9330_v3  ;;  %v8170_v3 = vld [vmem:[%s16165_s3 + $0x250] sm:$0xff] }
 0x794   :  { %v9372_v29 = vpack.c.bf16 %v8171_v37, %v8170_v3  ;;  %v16638_v3 = vmov 0.0|0.0   ;;  %v16639_v37 = vmov 0.0  }
 0x796   :  { %9333 = vmatpush3.bf16.msra.mxu0 %v9332_v35  ;;  %v9374_v35 = vpack.c.bf16 %v8189_v34, %v8188_v12  ;;  %v8509_v12 = vld [vmem:[%s16166_s4] sm:$0xff]  ;;  %v8510_v34 = vld [vmem:[%s16166_s4 + $0x8] sm:$0xff] }
 0x797   :  { %9335 = vmatprep.subr.bf16.mxu0 %v9334_v57  ;;  %v8172_v57 = vld [vmem:[%s16165_s3 + $0x260] sm:$0xff] }
 0x798   :  { %v9376_v17 = vpack.c.bf16 %v8173_v18, %v8172_v57 }
 0x79a   :  { %9337 = vmatpush3.bf16.msra.mxu0 %v9336_v60  ;;  %v9378_v60 = vpack.c.bf16 %v8191_v55, %v8190_v33 }
 0x79b   :  { %9339 = vmatprep.subr.bf16.mxu0 %v9338_v58  ;;  %v8174_v58 = vld [vmem:[%s16165_s3 + $0x270] sm:$0xff] }
 0x79c   :  { %v9380_v19 = vpack.c.bf16 %v8175_v9, %v8174_v58 }
 0x79e   :  { %9341 = vmatpush3.bf16.msra.mxu0 %v9340_v2  ;;  %v9382_v2 = vpack.c.bf16 %v8209_v45, %v8208_v62 }
 0x79f   :  { %9343 = vmatprep.subr.bf16.mxu0 %v9342_v44  ;;  %v8192_v44 = vld [vmem:[%s16165_s3 + $0x300] sm:$0xff] }
 0x7a0   :  { %v9384_v41 = vpack.c.bf16 %v8193_v59, %v8192_v44 }
 0x7a2   :  { %9345 = vmatpush3.bf16.msra.mxu0 %v9344_v4  ;;  %v9386_v4 = vpack.c.bf16 %v8211_v39, %v8210_v10 }
 0x7a3   :  { %9347 = vmatprep.subr.bf16.mxu0 %v9346_v5  ;;  %v8194_v5 = vld [vmem:[%s16165_s3 + $0x310] sm:$0xff] }
 0x7a4   :  { %v9388_v51 = vpack.c.bf16 %v8195_v8, %v8194_v5  ;;  %v8592_v5 = vld [vmem:[%s16167_s5 + $0x8] sm:$0xff] }
 0x7a6   :  { %9349 = vmatpush3.bf16.msra.mxu0 %v9348_v61  ;;  %v9390_v61 = vpack.c.bf16 %v8213_v16, %v8212_v50 }
 0x7a7   :  { %9351 = vmatprep.subr.bf16.mxu0 %v9350_v30  ;;  %v8196_v30 = vld [vmem:[%s16165_s3 + $0x320] sm:$0xff] }
 0x7a9   :  { %8363 = vmatmul.mubr.f32.vlgmr.msra.gmra.mrb[54].mxu0 %v15830_v56  ;;  %v9360_v56 = vpack.c.bf16 %v8165_v43, %v8164_v20  ;;  %v8219_v20 = vld [vmem:[%s16165_s3 + $0x3d8] sm:$0xff] }
 0x7aa   :  { %9353 = vmatpush3.bf16.msra.mxu0 %v9352_v26  ;;  %8432 = vmatprep.mubr.f32.mxu0 %v15833_v1  ;;  %v9362_v1 = vpack.c.bf16 %v8183_v32, %v8182_v7  ;;  %v8199_v26 = vld [vmem:[%s16165_s3 + $0x338] sm:$0xff]  ;;  %v8202_v32 = vld [vmem:[%s16165_s3 + $0x350] sm:$0xff] }
 0x7ab   :  { %9355 = vmatprep.subr.bf16.mxu0 %v9354_v47  ;;  %v8216_v47 = vld [vmem:[%s16165_s3 + $0x3c0] sm:$0xff]  ;;  %v9396_v24 = vpack.c.bf16 %v8199_v26, %v8198_v40 }
 0x7ac   :  { %v9398_v54 = vpack.c.bf16 %v8217_v42, %v8216_v47  ;;  %v8834_v40 = vld [vmem:[%s16168_s6 + $0x4] ss:$0 sm:$0xff] }
 0x7ae   :  { %9357 = vmatpush3.bf16.msra.mxu0 %v9356_v53  ;;  %v8201_v53 = vld [vmem:[%s16165_s3 + $0x348] sm:$0xff] }
 0x7af   :  { %9359 = vmatprep.subr.bf16.mxu0 %v9358_v27  ;;  %v8218_v27 = vld [vmem:[%s16165_s3 + $0x3d0] sm:$0xff]  ;;  %v9400_v43 = vpack.c.bf16 %v8201_v53, %v8200_v63 }
 0x7b0   :  { %v9402_v7 = vpack.c.bf16 %v8219_v20, %v8218_v27 }
 0x7b2   :  { %9361 = vmatpush3.bf16.msra.mxu0 %v9360_v56  ;;  %v8203_v56 = vld [vmem:[%s16165_s3 + $0x358] sm:$0xff] }
 0x7b3   :  { %9363 = vmatprep.subr.bf16.mxu0 %v9362_v1  ;;  %v8220_v1 = vld [vmem:[%s16165_s3 + $0x3e0] sm:$0xff]  ;;  %v9404_v49 = vpack.c.bf16 %v8203_v56, %v8202_v32 }
 0x7b4   :  { %v9406_v0 = vpack.c.bf16 %v8221_v6, %v8220_v1 }
 0x7b6   :  { %9365 = vmatpush3.bf16.msra.mxu0 %v9364_v52  ;;  %v8205_v52 = vld [vmem:[%s16165_s3 + $0x368] sm:$0xff] }
 0x7b7   :  { %9367 = vmatprep.subr.bf16.mxu0 %v9366_v21  ;;  %v8222_v21 = vld [vmem:[%s16165_s3 + $0x3f0] sm:$0xff]  ;;  %v9408_v36 = vpack.c.bf16 %v8205_v52, %v8204_v11 }
 0x7b8   :  { %v9410_v25 = vpack.c.bf16 %v8223_v22, %v8222_v21 }
 0x7ba   :  { %9369 = vmatpush3.bf16.msra.mxu0 %v9368_v38  ;;  %v8207_v38 = vld [vmem:[%s16165_s3 + $0x378] sm:$0xff] }
 0x7bb   :  { %9371 = vmatprep.subr.bf16.mxu0 %v9370_v15  ;;  %v9412_v15 = vpack.c.bf16 %v8207_v38, %v8206_v28 }
 0x7be   :  { %9373 = vmatpush3.bf16.msra.mxu0 %v9372_v29  ;;  %v8511_v29 = vld [vmem:[%s16166_s4 + $0x10] sm:$0xff] }
 0x7bf   :  { %9375 = vmatprep.subr.bf16.mxu0 %v9374_v35  ;;  %v9415_v35 = vpack.c.bf16 %v8510_v34, %v8509_v12 }
 0x7c2   :  { %9377 = vmatpush3.bf16.msra.mxu0 %v9376_v17  ;;  %v8831_v17 = vld [vmem:[%s16168_s6 + $0x2] ss:$0 sm:$0xff] }
 0x7c3   :  { %9379 = vmatprep.subr.bf16.mxu0 %v9378_v60 }
 0x7c6   :  { %9381 = vmatpush3.bf16.msra.mxu0 %v9380_v19 }
 0x7c7   :  { %9383 = vmatprep.subr.bf16.mxu0 %v9382_v2 }
 0x7c9   :  { %8433 = vmatmul.mubr.f32.vlgmr.msra.gmra.mrb[56].mxu0 %v15836_v13  ;;  %v8215_v13 = vld [vmem:[%s16165_s3 + $0x3b8] sm:$0xff] }
 0x7ca   :  { %9385 = vmatpush3.bf16.msra.mxu0 %v9384_v41  ;;  %8502 = vmatprep.mubr.f32.mxu0 %v15845_v46  ;;  %v9392_v46 = vpack.c.bf16 %v8197_v48, %v8196_v30  ;;  %v9394_v14 = vpack.c.bf16 %v8215_v13, %v8214_v23  ;;  %v8832_v48 = vld [vmem:[%s16168_s6 + $0x3] ss:$0 sm:$0xff] }
 0x7cb   :  { %9387 = vmatprep.subr.bf16.mxu0 %v9386_v4  ;;  %v8591_v4 = vld [vmem:[%s16167_s5] sm:$0xff] }
 0x7cc   :  { %v9421_v50 = vpack.c.bf16 %v8592_v5, %v8591_v4 }
 0x7ce   :  { %9389 = vmatpush3.bf16.msra.mxu0 %v9388_v51  ;;  %v8593_v51 = vld [vmem:[%s16167_s5 + $0x10] sm:$0xff] }
 0x7cf   :  { %9391 = vmatprep.subr.bf16.mxu0 %v9390_v61  ;;  %v8594_v61 = vld [vmem:[%s16167_s5 + $0x18] sm:$0xff]  ;;  %s9591_s5 = scalar_lea.vmem %s8680_s2, 32 }
 0x7d0   :  { %v9424_v30 = vpack.c.bf16 %v8594_v61, %v8593_v51  ;;  %p9592_p0 = scmp.ne.s32.totalorder %s8680_s2, %s9591_s5  ;;  %p9597_p2 = scmp.lt.s32.totalorder %s9591_s5, %s9591_s5 }
 0x7d2   :  { %9393 = vmatpush3.bf16.msra.mxu0 %v9392_v46  ;;  %p9598_p3 = por %p9597_p2, %p9596_p1 }
 0x7d3   :  { %9395 = vmatprep.subr.bf16.mxu0 %v9394_v14 }
 0x7d4   :  { %p9599_p4 = pnand %p9598_p3, %p9592_p0 }
 0x7d6   :  { %9397 = vmatpush3.bf16.msra.mxu0 %v9396_v24 }
 0x7d7   :  { %9399 = vmatprep.subr.bf16.mxu0 %v9398_v54 }
 0x7da   :  { %9401 = vmatpush3.bf16.msra.mxu0 %v9400_v43 }
 0x7db   :  { %9403 = vmatprep.subr.bf16.mxu0 %v9402_v7 }
 0x7de   :  { %9405 = vmatpush3.bf16.msra.mxu0 %v9404_v49 }
 0x7df   :  { %9407 = vmatprep.subr.bf16.mxu0 %v9406_v0 }
 0x7e2   :  { %9409 = vmatpush3.bf16.msra.mxu0 %v9408_v36 }
 0x7e3   :  { %9411 = vmatprep.subr.bf16.mxu0 %v9410_v25 }
 0x7e6   :  { %9413 = vmatpush3.bf16.msra.mxu0 %v9412_v15 }
 0x7e7   :  { %9414 = vmatprep.subr.bf16.mxu0 %v16638_v3 }
 0x7e9   :  { %8503 = vmatmul.mubr.f32.vlgmr.msra.gmra.mrb[58].mxu0 %v15848_v31  ;;  %v8512_v31 = vld [vmem:[%s16166_s4 + $0x18] sm:$0xff] }
 0x7ea   :  { %9208 = vmatprep.mubr.msk.f32.mxu0 %vm9629_vm0, %v16639_v37  ;;  %9416 = vmatpush3.bf16.msra.mxu0 %v9415_v35  ;;  %v9418_v57 = vpack.c.bf16 %v8512_v31, %v8511_v29 }
 0x7eb   :  { %9417 = vmatprep.subr.bf16.mxu0 %v16638_v3 }
 0x7ee   :  { %9419 = vmatpush3.bf16.msra.mxu0 %v9418_v57 }
 0x7ef   :  { %9420 = vmatprep.subr.bf16.mxu0 %v16638_v3 }
 0x85c   :  { %v8937_v18 = vpop.f32.mrb[52].mxu0 }
 0x85d   :  { %v8938_v33 = vpop.f32.mrb[53].mxu0 }
 0x85e   :  { %v8939_v55 = vadd.f32 %v8938_v33, %v8937_v18 }
 0x860   :  { %v8295_v9 = vadd.f32 %v8939_v55, %v8831_v17 }
 0x87c   :  { %v8972_v60 = vpop.f32.mrb[54].mxu0 }
 0x87d   :  { %v8973_v58 = vpop.f32.mrb[55].mxu0 }
 0x87e   :  { %v8974_v62 = vadd.f32 %v8973_v58, %v8972_v60 }
 0x880   :  { %v8365_v45 = vadd.f32 %v8974_v62, %v8295_v9 }
 0x89c   :  { %v9007_v19 = vpop.f32.mrb[56].mxu0 }
 0x89d   :  { %v9008_v2 = vpop.f32.mrb[57].mxu0 }
 0x89e   :  { %v9009_v44 = vadd.f32 %v9008_v2, %v9007_v19 }
 0x8a0   :  { %v8435_v59 = vadd.f32 %v9009_v44, %v8365_v45 }
 0x8bc   :  { %v9042_v10 = vpop.f32.mrb[58].mxu0 }
 0x8bd   :  { %v9043_v39 = vpop.f32.mrb[59].mxu0 }
 0x8be   :  { %v9044_v41 = vadd.f32 %v9043_v39, %v9042_v10 }
 0x8c0   :  { %v8505_v8 = vadd.f32 %v9044_v41, %v8435_v59 }
 0x8c2   :  { %v8508_v16 = vmax.f32 %v8505_v8, 0.0 }
 0x8c4   :  { %9209 = vmatmul.mubr.msk.f32.vlgmr.msra.gmra.mrb[60].mxu0 %vm3362_vm14, %v8508_v16 }
 0x8c5   :  { %9422 = vmatpush3.bf16.msra.mxu0 %v9421_v50  ;;  %9219 = vmatprep.mubr.msk.f32.mxu0 %vm9629_vm0, %v16639_v37 }
 0x8c6   :  { %9423 = vmatprep.subr.bf16.mxu0 %v16638_v3 }
 0x8c9   :  { %9425 = vmatpush3.bf16.msra.mxu0 %v9424_v30 }
 0x997   :  { %v8586_v23 = vpop.f32.mrb[60].mxu0 }
 0x998   :  { %v8587_v13 = vadd.f32 %v8832_v48, %v8586_v23  ;;  %v9210_v46 = vpop.f32.mrb[61].mxu0 }
 0x99a   :  { %v8590_v14 = vmax.f32 %v8587_v13, 0.0 }
 0x99c   :  { %9220 = vmatmul.mubr.msk.f32.vlgmr.msra.gmra.mrb[62].mxu0 %vm3362_vm14, %v8590_v14 }
 0xa6f   :  { %v8668_v26 = vpop.f32.mrb[62].mxu0 }
 0xa70   :  { %v8669_v47 = vadd.f32 %v8834_v40, %v8668_v26  ;;  %v9221_v42 = vpop.f32.mrb[63].mxu0 }
 0xa72   :  { %8672 = vst [vmem:[#allocation2] sm:$0x3] %v8669_v47 }
 0xa73   :  { %9602 = shalt.err (!%p9599_p4)
}
 0xa74   :  { %s9603_s20 = scalar_lea.hbm %s16169_s7, 32 }
 0xa75   :  { %p9604_p5 = scmp.ne.s32.totalorder %s16169_s7, %s9603_s20  ;;  %p9607_p6 = scmp.lt.u32.totalorder %s9603_s20, %s16169_s7 }
 0xa77   :  { %p9609_p7 = pnand %p9607_p6, %p9604_p5 }
 0xa79   :  { %9612 = shalt.err (!%p9609_p7)
}
 0xa7a   :  { %8682 = dma.vmem_to_hbm [thread:$0]  %s8680_s2, 32, %s16169_s7, [#allocation3]  }
 0xa7b   :  { %9613 = dma.done.wait [#allocation3], 32  }
 0xa7c   :  { %9614 = vsyncadd [#allocation3], 4294967264 }
 0xa7d   :  { %8686 = vsyncpa [#allocation3], 1 }

</bundles_post_ra>
